<compile_context>
chip_gen: v7x
topology: tpu7x:2x2x1
jax: 0.10.0
libtpu: 0.0.40
codegen_flags: <defaults>
</compile_context>

<pallas_src>
import jax
import jax.numpy as jnp
from jax import lax
from jax.experimental import pallas as pl
from jax.experimental.pallas import tpu as pltpu

ALPHA = 0.1          # LeakyReLU negative slope
SCALE = 2            # nearest-neighbour upsample factor
BN_EPS = 1e-5


def _uppredict_kernel(x_ref, w_ref, b_ref, post_ref, shift_ref, o_ref,
                      xpad_ref, patch_ref):
    """One batch block (NB images) per grid step.

    x_ref:     (NB, H, W, Cin)               bf16 NHWC input (original res)
    w_ref:     (4*Cout, 4*Cin)               bf16 merged subpixel weights
    b_ref:     (4*Cout, 1)                   f32  conv bias (BN-folded)
    post_ref:  (4*Cout, 1)                   f32  post-activation BN scale
    shift_ref: (4*Cout, 1)                   f32  BN shift
    o_ref:     (1, 4*Cout, NB*(H+1)*Wpad)    f32  lane-dense phase-packed slab
    xpad_ref:  VMEM (NB*(H+1)+1, Wpad+1, Cin) bf16 padded, batch-stacked tile
    patch_ref: VMEM (NB*(H+1)*Wpad, 4*Cin)    bf16 im2col operand
    """
    nb, h, w, cin = x_ref.shape
    hp1 = h + 1
    rows = nb * hp1                       # window rows across the batch block
    wpad = xpad_ref.shape[1] - 1          # window columns (>= W+1, 16-aligned)
    m = rows * wpad

    # Re-zero only the padding strips that kept windows read (separator rows,
    # left pad column, right pad column).  The interior is fully overwritten
    # below; the extra alignment columns only feed discarded outputs.
    zrow = jnp.zeros((1, wpad + 1, cin), xpad_ref.dtype)
    for b in range(nb + 1):
        xpad_ref[b * hp1:b * hp1 + 1, :, :] = zrow
    zcol = jnp.zeros((rows + 1, 1, cin), xpad_ref.dtype)
    xpad_ref[:, 0:1, :] = zcol
    xpad_ref[:, w + 1:w + 2, :] = zcol

    # Fused zero padding: image b occupies padded rows [b*(H+1)+1, b*(H+1)+H];
    # consecutive images share one zero separator row.
    for b in range(nb):
        xpad_ref[b * hp1 + 1:b * hp1 + 1 + h, 1:w + 1, :] = x_ref[b]

    # im2col of every 2x2 window, batch folded into M: because images are
    # stacked along the row axis, one contiguous slice covers them all.
    for k, (u, v) in enumerate(((0, 0), (0, 1), (1, 0), (1, 1))):
        win = xpad_ref[u:u + rows, v:v + wpad, :]          # (rows, wpad, Cin)
        patch_ref[:, k * cin:(k + 1) * cin] = win.reshape(m, cin)

    # Single MXU matmul in NT orientation (W @ patch^T): bf16 operands, f32
    # accumulation, result (4*Cout, M) so the output store is lane-dense.
    acc = lax.dot_general(
        w_ref[...], patch_ref[...],
        dimension_numbers=(((1,), (1,)), ((), ())),
        preferred_element_type=jnp.float32)                # (4*Cout, M)

    acc = acc + b_ref[...]                       # conv bias (BN scale folded)
    act = jnp.where(acc > 0, acc, ALPHA * acc)   # LeakyReLU(0.1)
    y = act * post_ref[...] + shift_ref[...]     # remaining BN affine (eval)
    o_ref[...] = y.reshape(o_ref.shape).astype(o_ref.dtype)


def _pick_batch_block(n, h, w, cin, cout, wpad, budget_bytes=6 << 20):
    """Largest divisor of n whose per-step VMEM footprint fits the budget."""
    hp1 = h + 1
    per_img = (hp1 * wpad * 4 * cin * 2            # bf16 im2col patch
               + hp1 * wpad * 4 * cout * 4 * 3     # f32 acc + 2x out block
               + (hp1 + 1) * (wpad + 1) * cin * 2  # bf16 padded tile
               + h * w * cin * 2 * 2)              # bf16 double-buffered input
    nb = 1
    for cand in range(1, n + 1):
        if n % cand == 0 and cand * per_img <= budget_bytes:
            nb = cand
    return nb


@jax.jit
def up_predict(x, conv_w, conv_b, bn_gamma, bn_beta, bn_mean, bn_var):
    """UpPredict forward. x: (N, Cin, H, W) f32 -> (N, Cout, 2H, 2W) f32."""
    n, cin, h, w = x.shape
    cout = conv_w.shape[0]
    hp1 = h + 1
    wpad = ((w + 1 + 15) // 16) * 16     # bf16 sublane-aligned window columns
    nb = _pick_batch_block(n, h, w, cin, cout, wpad)
    g = n // nb
    rows = nb * hp1
    m = rows * wpad

    # --- subpixel (depth-to-space) reformulation of Upsample(x2)+Conv3x3 -----
    # mix[a, u, dy]: which 3x3 kernel rows dy feed window-row u of phase a
    # (same matrix for columns b, v, dx).
    mix = jnp.array([[[1., 0., 0.], [0., 1., 1.]],
                     [[1., 1., 0.], [0., 0., 1.]]], jnp.float32)
    # w_eff[a,b,u,v,i,o] = sum_{dy in rows(a,u), dx in cols(b,v)} w[o,i,dy,dx]
    w_eff = jnp.einsum('aud,bve,oide->abuvio', mix, mix,
                       conv_w.astype(jnp.float32))
    # rows = (a, b, o) phases x out-channels; cols = (u, v, i) taps x in-chan.
    w_t = w_eff.transpose(0, 1, 5, 2, 3, 4).reshape(4 * cout, 4 * cin)

    # --- eval-mode BatchNorm folded into the conv (exact, sign-guarded) ------
    s = bn_gamma * lax.rsqrt(bn_var + BN_EPS)
    t = bn_beta - bn_mean * s
    s_fold = jnp.where(s > 0, s, 1.0)    # folded into weights & bias
    s_post = jnp.where(s > 0, 1.0, s)    # left as a post-activation scale

    w_t = (w_t * jnp.tile(s_fold, 4)[:, None]).astype(jnp.bfloat16)
    b_all = jnp.tile(conv_b * s_fold, 4)[:, None].astype(jnp.float32)
    post = jnp.tile(s_post, 4)[:, None].astype(jnp.float32)
    shift = jnp.tile(t, 4)[:, None].astype(jnp.float32)

    # bf16 NHWC input at ORIGINAL resolution (halves input DMA bytes).
    x_nhwc = jnp.transpose(x, (0, 2, 3, 1)).astype(jnp.bfloat16)

    res = pl.pallas_call(
        _uppredict_kernel,
        out_shape=jax.ShapeDtypeStruct((g, 4 * cout, m), jnp.float32),
        grid_spec=pltpu.PrefetchScalarGridSpec(
            num_scalar_prefetch=0,
            grid=(g,),
            in_specs=[
                pl.BlockSpec((nb, h, w, cin), lambda i: (i, 0, 0, 0)),
                pl.BlockSpec((4 * cout, 4 * cin), lambda i: (0, 0)),
                pl.BlockSpec((4 * cout, 1), lambda i: (0, 0)),
                pl.BlockSpec((4 * cout, 1), lambda i: (0, 0)),
                pl.BlockSpec((4 * cout, 1), lambda i: (0, 0)),
            ],
            out_specs=pl.BlockSpec((1, 4 * cout, m), lambda i: (i, 0, 0)),
            scratch_shapes=[
                pltpu.VMEM((rows + 1, wpad + 1, cin), jnp.bfloat16),  # padded
                pltpu.VMEM((m, 4 * cin), jnp.bfloat16),               # im2col
            ],
        ),
        compiler_params=pltpu.CompilerParams(
            dimension_semantics=("parallel",)),
    )(x_nhwc, w_t, b_all, post, shift)

    # --- depth-to-space back to NCHW (layout plumbing, fused by XLA) ---------
    # res[g, (a*2+b)*Cout+o, (bl*(H+1)+r)*Wpad+c] is the phase-(a,b) result of
    # the 2x2 window starting at padded (r, c) of image g*NB+bl; the output
    # pixel y[2i+a, 2j+b] uses the window starting at (i+a, j+b).
    r7 = res.reshape(g, 2, 2, cout, nb, hp1, wpad)
    r7 = jnp.transpose(r7, (0, 4, 3, 1, 5, 2, 6))   # (g, nb, Cout, a, H+1, b, Wpad)
    r7 = r7.reshape(n, cout, 2, hp1, 2, wpad)
    y00 = r7[:, :, 0, 0:h,     0, 0:w]
    y01 = r7[:, :, 0, 0:h,     1, 1:w + 1]
    y10 = r7[:, :, 1, 1:h + 1, 0, 0:w]
    y11 = r7[:, :, 1, 1:h + 1, 1, 1:w + 1]
    ya0 = jnp.stack([y00, y01], axis=-1)            # (N, Cout, H, W, 2)
    ya1 = jnp.stack([y10, y11], axis=-1)
    y = jnp.stack([ya0, ya1], axis=3)               # (N, Cout, H, 2, W, 2)
    return y.reshape(n, cout, SCALE * h, SCALE * w)


def _reference(x, conv_w, conv_b, gamma, beta, mean, var):
    """Plain-JAX f32 reference of the same forward (module semantics)."""
    x_up = jnp.repeat(jnp.repeat(x, SCALE, axis=2), SCALE, axis=3)
    y = lax.conv_general_dilated(
        x_up, conv_w, window_strides=(1, 1), padding=((1, 1), (1, 1)),
        dimension_numbers=("NCHW", "OIHW", "NCHW"))
    y = y + conv_b[None, :, None, None]
    y = jnp.where(y > 0, y, ALPHA * y)
    s = gamma / jnp.sqrt(var + BN_EPS)
    t = beta - mean * s
    return y * s[None, :, None, None] + t[None, :, None, None]


if __name__ == "__main__":
    N, CIN, COUT, H, W = 2, 4, 8, 16, 16      # output: (2, 8, 32, 32)

    key = jax.random.PRNGKey(0)
    kx, kw, kb = jax.random.split(key, 3)

    x = jax.random.normal(kx, (N, CIN, H, W), dtype=jnp.float32)
    conv_w = 0.1 * jax.random.normal(kw, (COUT, CIN, 3, 3), dtype=jnp.float32)
    conv_b = 0.1 * jax.random.normal(kb, (COUT,), dtype=jnp.float32)

    # Eval-mode BatchNorm2d affine / running stats (deterministic; includes
    # negative gammas to exercise the sign-guarded BN fold).
    bn_gamma = jnp.array([1.0, 0.8, -0.6, 1.2, 0.9, 1.1, -1.0, 0.7], jnp.float32)
    bn_beta = jnp.linspace(-0.3, 0.4, COUT).astype(jnp.float32)
    bn_mean = jnp.linspace(-0.2, 0.3, COUT).astype(jnp.float32)
    bn_var = jnp.linspace(0.5, 1.5, COUT).astype(jnp.float32)

    out = jax.block_until_ready(
        up_predict(x, conv_w, conv_b, bn_gamma, bn_beta, bn_mean, bn_var))
    ref = jax.block_until_ready(
        _reference(x, conv_w, conv_b, bn_gamma, bn_beta, bn_mean, bn_var))

    assert out.shape == (N, COUT, SCALE * H, SCALE * W), out.shape
    # Tolerance sized for bf16 MXU operands (f32 accumulation) vs f32 reference.
    assert jnp.allclose(out, ref, atol=3e-2, rtol=3e-2), \
        float(jnp.max(jnp.abs(out - ref)))

    print("KERNEL_OK")
</pallas_src>

<mosaic_0001>
module attributes {stable_mosaic.version = 11 : i64} {
  func.func @_uppredict_kernel(%arg0: i32, %arg1: memref<2x16x16x4xbf16, #tpu.memory_space<vmem>>, %arg2: memref<32x16xbf16, #tpu.memory_space<vmem>>, %arg3: memref<32x1xf32, #tpu.memory_space<vmem>>, %arg4: memref<32x1xf32, #tpu.memory_space<vmem>>, %arg5: memref<32x1xf32, #tpu.memory_space<vmem>>, %arg6: memref<1x32x1088xf32, #tpu.memory_space<vmem>>, %arg7: memref<35x33x4xbf16, #tpu.memory_space<vmem>>, %arg8: memref<1088x16xbf16, #tpu.memory_space<vmem>>) attributes {dimension_semantics = [#tpu.dimension_semantics<parallel>], iteration_bounds = array<i64: 1>, scalar_prefetch = 0 : i64, scratch_operands = 2 : i64, tpu.core_type = #tpu.core_type<tc>, window_params = [{transform_indices = @transform_0, window_bounds = array<i64: 2, 16, 16, 4>}, {pipeline_mode = #tpu.pipeline_mode<synchronous>, transform_indices = @transform_1, window_bounds = array<i64: 32, 16>}, {pipeline_mode = #tpu.pipeline_mode<synchronous>, transform_indices = @transform_2, window_bounds = array<i64: 32, 1>}, {pipeline_mode = #tpu.pipeline_mode<synchronous>, transform_indices = @transform_3, window_bounds = array<i64: 32, 1>}, {pipeline_mode = #tpu.pipeline_mode<synchronous>, transform_indices = @transform_4, window_bounds = array<i64: 32, 1>}, {transform_indices = @transform_5, window_bounds = array<i64: 1, 32, 1088>}]} {
    %cst = arith.constant 0.000000e+00 : bf16
    %0 = vector.broadcast %cst : bf16 to vector<1x33x4xbf16>
    %c0 = arith.constant 0 : index
    %c0_0 = arith.constant 0 : index
    %c0_1 = arith.constant 0 : index
    %1 = vector.load %arg7[%c0, %c0_0, %c0_1] : memref<35x33x4xbf16, #tpu.memory_space<vmem>>, vector<1x33x4xbf16>
    tpu.vector_store %arg7[%c0, %c0_0, %c0_1], %0 {strides = array<i32>} : memref<35x33x4xbf16, #tpu.memory_space<vmem>>, vector<1x33x4xbf16>,
    %c17 = arith.constant 17 : index
    %c0_2 = arith.constant 0 : index
    %c0_3 = arith.constant 0 : index
    %2 = vector.load %arg7[%c17, %c0_2, %c0_3] : memref<35x33x4xbf16, #tpu.memory_space<vmem>>, vector<1x33x4xbf16>
    tpu.vector_store %arg7[%c17, %c0_2, %c0_3], %0 {strides = array<i32>} : memref<35x33x4xbf16, #tpu.memory_space<vmem>>, vector<1x33x4xbf16>,
    %c34 = arith.constant 34 : index
    %c0_4 = arith.constant 0 : index
    %c0_5 = arith.constant 0 : index
    %3 = vector.load %arg7[%c34, %c0_4, %c0_5] : memref<35x33x4xbf16, #tpu.memory_space<vmem>>, vector<1x33x4xbf16>
    tpu.vector_store %arg7[%c34, %c0_4, %c0_5], %0 {strides = array<i32>} : memref<35x33x4xbf16, #tpu.memory_space<vmem>>, vector<1x33x4xbf16>,
    %cst_6 = arith.constant 0.000000e+00 : bf16
    %4 = vector.broadcast %cst_6 : bf16 to vector<35x1x4xbf16>
    %c0_7 = arith.constant 0 : index
    %c0_8 = arith.constant 0 : index
    %c0_9 = arith.constant 0 : index
    %5 = vector.load %arg7[%c0_7, %c0_8, %c0_9] : memref<35x33x4xbf16, #tpu.memory_space<vmem>>, vector<35x1x4xbf16>
    tpu.vector_store %arg7[%c0_7, %c0_8, %c0_9], %4 {strides = array<i32>} : memref<35x33x4xbf16, #tpu.memory_space<vmem>>, vector<35x1x4xbf16>,
    %c0_10 = arith.constant 0 : index
    %c17_11 = arith.constant 17 : index
    %c0_12 = arith.constant 0 : index
    %6 = vector.load %arg7[%c0_10, %c17_11, %c0_12] : memref<35x33x4xbf16, #tpu.memory_space<vmem>>, vector<35x1x4xbf16>
    tpu.vector_store %arg7[%c0_10, %c17_11, %c0_12], %4 {strides = array<i32>} : memref<35x33x4xbf16, #tpu.memory_space<vmem>>, vector<35x1x4xbf16>,
    %c0_13 = arith.constant 0 : index
    %c0_14 = arith.constant 0 : index
    %c0_15 = arith.constant 0 : index
    %c0_16 = arith.constant 0 : index
    %7 = vector.load %arg1[%c0_13, %c0_14, %c0_15, %c0_16] : memref<2x16x16x4xbf16, #tpu.memory_space<vmem>>, vector<1x16x16x4xbf16>
    %8 = vector.shape_cast %7 : vector<1x16x16x4xbf16> to vector<16x16x4xbf16>
    %c1 = arith.constant 1 : index
    %c1_17 = arith.constant 1 : index
    %c0_18 = arith.constant 0 : index
    %9 = vector.load %arg7[%c1, %c1_17, %c0_18] : memref<35x33x4xbf16, #tpu.memory_space<vmem>>, vector<16x16x4xbf16>
    tpu.vector_store %arg7[%c1, %c1_17, %c0_18], %8 {strides = array<i32>} : memref<35x33x4xbf16, #tpu.memory_space<vmem>>, vector<16x16x4xbf16>,
    %c1_19 = arith.constant 1 : index
    %c0_20 = arith.constant 0 : index
    %c0_21 = arith.constant 0 : index
    %c0_22 = arith.constant 0 : index
    %10 = vector.load %arg1[%c1_19, %c0_20, %c0_21, %c0_22] : memref<2x16x16x4xbf16, #tpu.memory_space<vmem>>, vector<1x16x16x4xbf16>
    %11 = vector.shape_cast %10 : vector<1x16x16x4xbf16> to vector<16x16x4xbf16>
    %c18 = arith.constant 18 : index
    %c1_23 = arith.constant 1 : index
    %c0_24 = arith.constant 0 : index
    %12 = vector.load %arg7[%c18, %c1_23, %c0_24] : memref<35x33x4xbf16, #tpu.memory_space<vmem>>, vector<16x16x4xbf16>
    tpu.vector_store %arg7[%c18, %c1_23, %c0_24], %11 {strides = array<i32>} : memref<35x33x4xbf16, #tpu.memory_space<vmem>>, vector<16x16x4xbf16>,
    %c0_25 = arith.constant 0 : index
    %c0_26 = arith.constant 0 : index
    %c0_27 = arith.constant 0 : index
    %13 = vector.load %arg7[%c0_25, %c0_26, %c0_27] : memref<35x33x4xbf16, #tpu.memory_space<vmem>>, vector<34x32x4xbf16>
    %14 = vector.shape_cast %13 : vector<34x32x4xbf16> to vector<1088x4xbf16>
    %c0_28 = arith.constant 0 : index
    %c0_29 = arith.constant 0 : index
    %15 = vector.load %arg8[%c0_28, %c0_29] : memref<1088x16xbf16, #tpu.memory_space<vmem>>, vector<1088x4xbf16>
    tpu.vector_store %arg8[%c0_28, %c0_29], %14 {strides = array<i32>} : memref<1088x16xbf16, #tpu.memory_space<vmem>>, vector<1088x4xbf16>,
    %c0_30 = arith.constant 0 : index
    %c1_31 = arith.constant 1 : index
    %c0_32 = arith.constant 0 : index
    %16 = vector.load %arg7[%c0_30, %c1_31, %c0_32] : memref<35x33x4xbf16, #tpu.memory_space<vmem>>, vector<34x32x4xbf16>
    %17 = vector.shape_cast %16 : vector<34x32x4xbf16> to vector<1088x4xbf16>
    %c0_33 = arith.constant 0 : index
    %c4 = arith.constant 4 : index
    %18 = vector.load %arg8[%c0_33, %c4] : memref<1088x16xbf16, #tpu.memory_space<vmem>>, vector<1088x4xbf16>
    tpu.vector_store %arg8[%c0_33, %c4], %17 {strides = array<i32>} : memref<1088x16xbf16, #tpu.memory_space<vmem>>, vector<1088x4xbf16>,
    %c1_34 = arith.constant 1 : index
    %c0_35 = arith.constant 0 : index
    %c0_36 = arith.constant 0 : index
    %19 = vector.load %arg7[%c1_34, %c0_35, %c0_36] : memref<35x33x4xbf16, #tpu.memory_space<vmem>>, vector<34x32x4xbf16>
    %20 = vector.shape_cast %19 : vector<34x32x4xbf16> to vector<1088x4xbf16>
    %c0_37 = arith.constant 0 : index
    %c8 = arith.constant 8 : index
    %21 = vector.load %arg8[%c0_37, %c8] : memref<1088x16xbf16, #tpu.memory_space<vmem>>, vector<1088x4xbf16>
    tpu.vector_store %arg8[%c0_37, %c8], %20 {strides = array<i32>} : memref<1088x16xbf16, #tpu.memory_space<vmem>>, vector<1088x4xbf16>,
    %c1_38 = arith.constant 1 : index
    %c1_39 = arith.constant 1 : index
    %c0_40 = arith.constant 0 : index
    %22 = vector.load %arg7[%c1_38, %c1_39, %c0_40] : memref<35x33x4xbf16, #tpu.memory_space<vmem>>, vector<34x32x4xbf16>
    %23 = vector.shape_cast %22 : vector<34x32x4xbf16> to vector<1088x4xbf16>
    %c0_41 = arith.constant 0 : index
    %c12 = arith.constant 12 : index
    %24 = vector.load %arg8[%c0_41, %c12] : memref<1088x16xbf16, #tpu.memory_space<vmem>>, vector<1088x4xbf16>
    tpu.vector_store %arg8[%c0_41, %c12], %23 {strides = array<i32>} : memref<1088x16xbf16, #tpu.memory_space<vmem>>, vector<1088x4xbf16>,
    %c0_42 = arith.constant 0 : index
    %c0_43 = arith.constant 0 : index
    %25 = vector.load %arg2[%c0_42, %c0_43] : memref<32x16xbf16, #tpu.memory_space<vmem>>, vector<32x16xbf16>
    %c0_44 = arith.constant 0 : index
    %c0_45 = arith.constant 0 : index
    %26 = vector.load %arg8[%c0_44, %c0_45] : memref<1088x16xbf16, #tpu.memory_space<vmem>>, vector<1088x16xbf16>
    %cst_46 = arith.constant dense<0.000000e+00> : vector<32x1088xf32>
    %27 = tpu.matmul %25, %26, %cst_46 {dimension_numbers = #tpu.dot_dimension_numbers<[1], [1], [0], [0], [0, 0, 1, 0], [], []>} : vector<32x16xbf16>, vector<1088x16xbf16>, vector<32x1088xf32> -> vector<32x1088xf32>
    %c0_47 = arith.constant 0 : index
    %c0_48 = arith.constant 0 : index
    %28 = vector.load %arg3[%c0_47, %c0_48] : memref<32x1xf32, #tpu.memory_space<vmem>>, vector<32x1xf32>
    %29 = vector.broadcast %28 : vector<32x1xf32> to vector<32x1088xf32>
    %30 = arith.addf %27, %29 : vector<32x1088xf32>
    %cst_49 = arith.constant 0.000000e+00 : f32
    %31 = vector.broadcast %cst_49 : f32 to vector<32x1088xf32>
    %32 = arith.cmpf ogt, %30, %31 : vector<32x1088xf32>
    %cst_50 = arith.constant 1.000000e-01 : f32
    %33 = vector.broadcast %cst_50 : f32 to vector<32x1088xf32>
    %34 = arith.mulf %33, %30 : vector<32x1088xf32>
    %35 = arith.select %32, %30, %34 : vector<32x1088xi1>, vector<32x1088xf32>
    %c0_51 = arith.constant 0 : index
    %c0_52 = arith.constant 0 : index
    %36 = vector.load %arg4[%c0_51, %c0_52] : memref<32x1xf32, #tpu.memory_space<vmem>>, vector<32x1xf32>
    %37 = vector.broadcast %36 : vector<32x1xf32> to vector<32x1088xf32>
    %38 = arith.mulf %35, %37 : vector<32x1088xf32>
    %c0_53 = arith.constant 0 : index
    %c0_54 = arith.constant 0 : index
    %39 = vector.load %arg5[%c0_53, %c0_54] : memref<32x1xf32, #tpu.memory_space<vmem>>, vector<32x1xf32>
    %40 = vector.broadcast %39 : vector<32x1xf32> to vector<32x1088xf32>
    %41 = arith.addf %38, %40 : vector<32x1088xf32>
    %42 = vector.shape_cast %41 : vector<32x1088xf32> to vector<1x32x1088xf32>
    %c0_55 = arith.constant 0 : index
    %c0_56 = arith.constant 0 : index
    %c0_57 = arith.constant 0 : index
    %43 = vector.load %arg6[%c0_55, %c0_56, %c0_57] : memref<1x32x1088xf32, #tpu.memory_space<vmem>>, vector<1x32x1088xf32>
    tpu.vector_store %arg6[%c0_55, %c0_56, %c0_57], %42 {strides = array<i32>} : memref<1x32x1088xf32, #tpu.memory_space<vmem>>, vector<1x32x1088xf32>,
    return
  }
  func.func @transform_0(%arg0: i32) -> (i32, i32, i32, i32) {
    %c0_i32 = arith.constant 0 : i32
    %c0_i32_0 = arith.constant 0 : i32
    %c0_i32_1 = arith.constant 0 : i32
    %c0_i32_2 = arith.constant 0 : i32
    return %arg0, %c0_i32, %c0_i32_0, %c0_i32_1 : i32, i32, i32, i32
  }
  func.func @transform_1(%arg0: i32) -> (i32, i32) {
    %c0_i32 = arith.constant 0 : i32
    %c0_i32_0 = arith.constant 0 : i32
    %c0_i32_1 = arith.constant 0 : i32
    return %c0_i32, %c0_i32_0 : i32, i32
  }
  func.func @transform_2(%arg0: i32) -> (i32, i32) {
    %c0_i32 = arith.constant 0 : i32
    %c0_i32_0 = arith.constant 0 : i32
    %c0_i32_1 = arith.constant 0 : i32
    return %c0_i32, %c0_i32_0 : i32, i32
  }
  func.func @transform_3(%arg0: i32) -> (i32, i32) {
    %c0_i32 = arith.constant 0 : i32
    %c0_i32_0 = arith.constant 0 : i32
    %c0_i32_1 = arith.constant 0 : i32
    return %c0_i32, %c0_i32_0 : i32, i32
  }
  func.func @transform_4(%arg0: i32) -> (i32, i32) {
    %c0_i32 = arith.constant 0 : i32
    %c0_i32_0 = arith.constant 0 : i32
    %c0_i32_1 = arith.constant 0 : i32
    return %c0_i32, %c0_i32_0 : i32, i32
  }
  func.func @transform_5(%arg0: i32) -> (i32, i32, i32) {
    %c0_i32 = arith.constant 0 : i32
    %c0_i32_0 = arith.constant 0 : i32
    %c0_i32_1 = arith.constant 0 : i32
    return %arg0, %c0_i32, %c0_i32_0 : i32, i32, i32
  }
}

</mosaic_0001>

<bundles_post_ra>
// kernel: tile.38
= control target key start
LH: loop header
LB: loop body
LE: loop exit
PB: predicated region body
PF: predicated region fallthrough
CT: control target
= control target key end

     0   :  { %s22_s0 = inlined_call_operand.vmem [shape: f32[8], index: 0, kind: input, shape index: {}]   ;;  %s23_s1 = inlined_call_operand.vmem [shape: f32[4,8], index: 1, kind: output, shape index: {}]  }
   0x1   :  { %v4_v0 = vld [vmem:[%s22_s0] ss:$0 sm:$0xff] }
   0x2   :  { %5 = vst [vmem:[%s23_s1] sm:$0xf] %v4_v0 }

// kernel: mul.10
= control target key start
LH: loop header
LB: loop body
LE: loop exit
PB: predicated region body
PF: predicated region fallthrough
CT: control target
= control target key end

     0   :  { %vm7_vm0 = vcmask 64512   ;;  %s37_s8 = smov 8   ;;  %s38_s9 = smov 16   ;;  %vm13_vm1 = vcmask 261312   ;;  %vm19_vm2 = vcmask 195712   ;;  %vm25_vm3 = vcmask 130112   ;;  %s55_s0 = inlined_call_operand.vmem [shape: f32[4,8], index: 0, kind: input, shape index: {}]   ;;  %s56_s1 = inlined_call_operand.vmem [shape: f32[32], index: 1, kind: output, shape index: {}]  }
   0x1   :  { %v4_v0 = vld [vmem:[%s55_s0] sm:$0xf]  ;;  %s36_s0 = smov 24  }
   0x2   :  { %5 = vst [vmem:[#allocation1] sm:$0xf] %v4_v0 }
   0x9   :  { %v10_v1 = vld [vmem:[#allocation1 + $0x3] sm:$0x1]   ;;  %v22_v2 = vld [vmem:[#allocation1 + $0x1] sm:$0x1]   ;;  %v6_v3 = vld [vmem:[#allocation1] sm:$0x1]  }
   0xa   :  { %11 = vrot.lane.b32.xlu0 %v10_v1, %s36_s0  ;;  %23 = vrot.lane.b32.xlu1 %v22_v2, %s37_s8  ;;  %v16_v4 = vld [vmem:[#allocation1 + $0x2] sm:$0x1]   ;;  %8 = vst.msk [vmem:[#allocation0] sm:$0x1] %vm7_vm0, %v6_v3  }
   0xe   :  { %17 = vrot.lane.b32.xlu0 %v16_v4, %s38_s9 }
  0x7c   :  { %v12_v5 = vpop.permute.xlu0 %11   ;;  %v24_v6 = vpop.permute.xlu1 %23  }
  0x7d   :  { %14 = vst.msk [vmem:[#allocation0] sm:$0x1] %vm13_vm1, %v12_v5  }
  0x80   :  { %v18_v7 = vpop.permute.xlu0 %17  }
  0x81   :  { %20 = vst.msk [vmem:[#allocation0] sm:$0x1] %vm19_vm2, %v18_v7  }
  0x82   :  { %26 = vst.msk [vmem:[#allocation0] sm:$0x1] %vm25_vm3, %v24_v6  }
  0x89   :  { %v30_v8 = vld [vmem:[#allocation0] sm:$0x1] }
  0x8a   :  { %32 = vst [vmem:[%s56_s1] sm:$0x1] %v30_v8 }

// kernel: tile.0
= control target key start
LH: loop header
LB: loop body
LE: loop exit
PB: predicated region body
PF: predicated region fallthrough
CT: control target
= control target key end

     0   :  { %s66_s8 = smov 125   ;;  %vm7_vm0 = vcmask 7168   ;;  %s67_s11 = smov 126   ;;  %s117_s0 = inlined_call_operand.vmem [shape: f32[4,8], index: 0, kind: input, shape index: {}]   ;;  %s118_s1 = inlined_call_operand.vmem [shape: f32[32,1], index: 1, kind: output, shape index: {}]  }
   0x1   :  { %v4_v0 = vld [vmem:[%s117_s0] sm:$0xf]  ;;  %s65_s0 = smov 127   ;;  %s68_s12 = smov 124  }
   0x2   :  { %5 = vst [vmem:[#allocation0] sm:$0xf] %v4_v0  ;;  %s69_s13 = smov 123   ;;  %s70_s14 = smov 122  }
   0x3   :  { %s71_s15 = smov 121  }
   0x9   :  { %v9_v1 = vld [vmem:[#allocation0] sm:$0xf]  }
   0xa   :  { %v21_v2 = vld [vmem:[#allocation0] sm:$0xf]   ;;  %10 = vrot.lane.b32.xlu0 %v9_v1, %s65_s0 }
   0xb   :  { %22 = vrot.lane.b32.xlu1 %v21_v2, %s66_s8  ;;  %v15_v3 = vld [vmem:[#allocation0] sm:$0xf]  }
   0xc   :  { %v27_v4 = vld [vmem:[#allocation0] sm:$0xf]  }
   0xd   :  { %v6_v5 = vld [vmem:[#allocation0] sm:$0xf]  }
   0xe   :  { %8 = vst.msk [vmem:[%s118_s1] ss:$8 sm:$0xf] %vm7_vm0, %v6_v5   ;;  %16 = vrot.lane.b32.xlu0 %v15_v3, %s67_s11  ;;  %v33_v6 = vld [vmem:[#allocation0] sm:$0xf]  }
   0xf   :  { %28 = vrot.lane.b32.xlu1 %v27_v4, %s68_s12  ;;  %v39_v7 = vld [vmem:[#allocation0] sm:$0xf]  }
  0x10   :  { %v45_v8 = vld [vmem:[#allocation0] sm:$0xf]  }
  0x12   :  { %34 = vrot.lane.b32.xlu0 %v33_v6, %s69_s13 }
  0x13   :  { %40 = vrot.lane.b32.xlu1 %v39_v7, %s70_s14 }
  0x16   :  { %46 = vrot.lane.b32.xlu0 %v45_v8, %s71_s15 }
  0x7c   :  { %v11_v9 = vpop.permute.xlu0 %10  }
  0x7d   :  { %v23_v10 = vpop.permute.xlu1 %22   ;;  %51 = vst.msk [vmem:[%s118_s1 + $0x1] ss:$8 sm:$0xf] %vm7_vm0, %v11_v9  }
  0x7e   :  { %53 = vst.msk [vmem:[%s118_s1 + $0x3] ss:$8 sm:$0xf] %vm7_vm0, %v23_v10  }
  0x80   :  { %v17_v11 = vpop.permute.xlu0 %16  }
  0x81   :  { %v29_v12 = vpop.permute.xlu1 %28   ;;  %52 = vst.msk [vmem:[%s118_s1 + $0x2] ss:$8 sm:$0xf] %vm7_vm0, %v17_v11  }
  0x82   :  { %54 = vst.msk [vmem:[%s118_s1 + $0x4] ss:$8 sm:$0xf] %vm7_vm0, %v29_v12  }
  0x84   :  { %v35_v13 = vpop.permute.xlu0 %34  }
  0x85   :  { %v41_v14 = vpop.permute.xlu1 %40   ;;  %55 = vst.msk [vmem:[%s118_s1 + $0x5] ss:$8 sm:$0xf] %vm7_vm0, %v35_v13  }
  0x86   :  { %56 = vst.msk [vmem:[%s118_s1 + $0x6] ss:$8 sm:$0xf] %vm7_vm0, %v41_v14  }
  0x88   :  { %v47_v15 = vpop.permute.xlu0 %46  }
  0x89   :  { %57 = vst.msk [vmem:[%s118_s1 + $0x7] ss:$8 sm:$0xf] %vm7_vm0, %v47_v15  }

// kernel: up_predict.1
= control target key start
LH: loop header
LB: loop body
LE: loop exit
PB: predicated region body
PF: predicated region fallthrough
CT: control target
= control target key end

     0   :  { %vm21_vm0 = vcmask 27648   ;;  %vm26_vm1 = vcmask 24576   ;;  %vm27_vm2 = vsmask.f32 256  ;;  %v63_v0 = vld [vmem:[#allocation2 + $0x64] sm:$0x1]  ;;  %s11544_s0 = inlined_call_operand.vmem [shape: bf16[2,16,16,4], index: 0, kind: input, shape index: {}]   ;;  %s11545_s1 = inlined_call_operand.vmem [shape: bf16[32,16], index: 1, kind: input, shape index: {}]   ;;  %s11546_s2 = inlined_call_operand.vmem [shape: f32[32,1], index: 2, kind: input, shape index: {}]   ;;  %s11547_s3 = inlined_call_operand.vmem [shape: f32[32,1], index: 3, kind: input, shape index: {}]   ;;  %s11548_s4 = inlined_call_operand.vmem [shape: f32[32,1], index: 4, kind: input, shape index: {}]   ;;  %s11549_s5 = inlined_call_operand.vmem [shape: f32[1,32,1088], index: 5, kind: output, shape index: {}]  }
   0x1   :  { %vm8324_vm3 = vmand %vm26_vm1, %vm27_vm2  ;;  %v11562_v1 = vmov 0  ;;  %vm153_vm4 = vsmask.f32 7938  ;;  %v268_v2 = vld [vmem:[%s11544_s0 + $0x20] sm:$0xf]  ;;  %v11565_v7 = vmov 0 }
   0x2   :  { %v11563_v1 = vsel %vm8324_vm3, 4294967295, %v11562_v1  ;;  %v269_v3 = vld [vmem:[%s11544_s0 + $0x24] sm:$0xf]  ;;  %v64_v4 = vsel %vm8324_vm3, 0, %v63_v0  ;;  %vm292_vm5 = vsmask.f32 4368  ;;  %vm8337_vm6 = vmand %vm26_vm1, %vm153_vm4 }
   0x3   :  { %11564 = vst [vmem:[#allocation4_spill] sm:$0xff] %v11563_v1  ;;  %v363_v5 = vshrl.u32 %v268_v2, 16  ;;  %v366_v6 = vshll.u32 %v268_v2, 16  ;;  %65 = vst [vmem:[#allocation2 + $0x64] sm:$0x1] %v64_v4  ;;  %v11566_v7 = vsel %vm8337_vm6, 4294967295, %v11565_v7 }
   0x4   :  { %11567 = vst [vmem:[#allocation5_spill] sm:$0xff] %v11566_v7  ;;  %v371_v8 = vshrl.u32 %v269_v3, 16  ;;  %v374_v9 = vshll.u32 %v269_v3, 16  ;;  %v51_v10 = vld [vmem:[#allocation2 + $0x14] sm:$0x1]  ;;  %vm8353_vm7 = vmor %vm27_vm2, %vm292_vm5  ;;  %v11568_v21 = vmov 0 }
   0x5   :  { %v260_v11 = vld [vmem:[%s11544_s0] sm:$0xf]  ;;  %v365_v12 = vrot.slane %v363_v5, 7  ;;  %v52_v13 = vsel %vm8324_vm3, 0, %v51_v10  ;;  %v261_v14 = vld [vmem:[%s11544_s0 + $0x4] sm:$0xf]  ;;  %vm8375_vm8 = vmand %vm21_vm0, %vm153_vm4 }
   0x6   :  { %v295_v15 = vshrl.u32 %v260_v11, 16  ;;  %v298_v16 = vshll.u32 %v260_v11, 16  ;;  %v8349_v17 = vrot.slane %v371_v8, 7  ;;  %53 = vst [vmem:[#allocation2 + $0x14] sm:$0x1] %v52_v13  ;;  %v303_v18 = vshrl.u32 %v261_v14, 16 }
   0x7   :  { %v306_v19 = vshll.u32 %v261_v14, 16  ;;  %v158_v20 = vld [vmem:[#allocation2 + $0x1c] sm:$0x1]  ;;  %v11569_v21 = vsel %vm8353_vm7, 4294967295, %v11568_v21  ;;  %v369_v22 = vrot.slane %v365_v12, 4  ;;  %v8289_v25 = vmov 0  }
   0x8   :  { %11570 = vst [vmem:[#allocation6_spill] sm:$0xff] %v11569_v21  ;;  %v297_v23 = vrot.slane %v295_v15, 7  ;;  %v159_v24 = vsel %vm8337_vm6, 0, %v158_v20  ;;  %22 = vst.msk [vmem:[#allocation2] sm:$0xf] %vm21_vm0, %v8289_v25  ;;  %8148 = vset.pattern.permute.xlu1 %v8289_v25  ;;  %8147 = vset.pattern.permute.xlu0 %v8289_v25  ;;  %v368_v26 = vor.u32 %v366_v6, %v365_v12  ;;  %v378_v28 = vrot.slane %v8349_v17, 4 }
   0x9   :  { %23 = vst.msk [vmem:[#allocation2 + $0x4] sm:$0xf] %vm21_vm0, %v8289_v25  ;;  %24 = vst.msk [vmem:[#allocation2 + $0x8] sm:$0xf] %vm21_vm0, %v8289_v25  ;;  %v376_v27 = vor.u32 %v374_v9, %v8349_v17  ;;  %v305_v29 = vrot.slane %v303_v18, 7  ;;  %v11571_v31 = vmov 0 }
   0xa   :  { %25 = vst.msk [vmem:[#allocation2 + $0xc] sm:$0xf] %vm21_vm0, %v8289_v25  ;;  %33 = vst.msk [vmem:[#allocation2 + $0x154] sm:$0xf] %vm21_vm0, %v8289_v25  ;;  %v170_v30 = vld [vmem:[#allocation2 + $0x6c] sm:$0x1]  ;;  %v300_v37 = vor.u32 %v298_v16, %v297_v23 }
   0xb   :  { %34 = vst.msk [vmem:[#allocation2 + $0x158] sm:$0xf] %vm21_vm0, %v8289_v25  ;;  %35 = vst.msk [vmem:[#allocation2 + $0x15c] sm:$0xf] %vm21_vm0, %v8289_v25  ;;  %v11572_v31 = vsel %vm8375_vm8, 4294967295, %v11571_v31  ;;  %v301_v32 = vrot.slane %v297_v23, 4  ;;  %v377_v36 = vsel %vm8353_vm7, %v369_v22, %v376_v27  ;;  %v308_v38 = vor.u32 %v306_v19, %v305_v29 }
   0xc   :  { %36 = vst.msk [vmem:[#allocation2 + $0x160] sm:$0xf] %vm21_vm0, %v8289_v25  ;;  %41 = vst.msk [vmem:[#allocation2 + $0x2a8] sm:$0xf] %vm21_vm0, %v8289_v25  ;;  %v171_v33 = vsel %vm8337_vm6, 0, %v170_v30  ;;  %v310_v49 = vrot.slane %v305_v29, 4 }
   0xd   :  { %42 = vst.msk [vmem:[#allocation2 + $0x2ac] sm:$0xf] %vm21_vm0, %v8289_v25  ;;  %43 = vst.msk [vmem:[#allocation2 + $0x2b0] sm:$0xf] %vm21_vm0, %v8289_v25  ;;  %v54_v34 = vld [vmem:[#allocation2 + $0x28] sm:$0x1]  ;;  %v309_v48 = vsel %vm8353_vm7, %v301_v32, %v308_v38 }
   0xe   :  { %44 = vst.msk [vmem:[#allocation2 + $0x2b4] sm:$0xf] %vm21_vm0, %v8289_v25  ;;  %160 = vst [vmem:[#allocation2 + $0x1c] sm:$0x1] %v159_v24  ;;  %v262_v35 = vld [vmem:[%s11544_s0 + $0x8] sm:$0xf] }
   0xf   :  { %11573 = vst [vmem:[#allocation7_spill] sm:$0xff] %v11572_v31  ;;  %172 = vst [vmem:[#allocation2 + $0x6c] sm:$0x1] %v171_v33  ;;  %v55_v39 = vsel %vm8324_vm3, 0, %v54_v34  ;;  %v263_v40 = vld [vmem:[%s11544_s0 + $0xc] sm:$0xf] }
  0x10   :  { %v66_v41 = vld [vmem:[#allocation2 + $0x78] sm:$0x1]  ;;  %v645_v42 = vld [vmem:[#allocation2 + $0x64] sm:$0xf]  ;;  %648 = vst.msk [vmem:[#allocation2 + $0x68] sm:$0xf] %vm21_vm0, %v377_v36 }
  0x11   :  { %56 = vst [vmem:[#allocation2 + $0x28] sm:$0x1] %v55_v39  ;;  %v312_v43 = vshrl.u32 %v262_v35, 16  ;;  %v315_v44 = vshll.u32 %v262_v35, 16  ;;  %v320_v45 = vshrl.u32 %v263_v40, 16  ;;  %v323_v46 = vshll.u32 %v263_v40, 16 }
  0x12   :  { %v646_v47 = vsel %vm8375_vm8, %v368_v26, %v645_v42  ;;  %v67_v50 = vsel %vm8324_vm3, 0, %v66_v41  ;;  %v270_v51 = vld [vmem:[%s11544_s0 + $0x28] sm:$0xf]  ;;  %v271_v52 = vld [vmem:[%s11544_s0 + $0x2c] sm:$0xf]  ;;  %s8290_s11 = smov 8  }
  0x13   :  { %647 = vst [vmem:[#allocation2 + $0x64] sm:$0xf] %v646_v47  ;;  %v617_v53 = vld [vmem:[#allocation2 + $0x14] sm:$0xf]  ;;  %620 = vst.msk [vmem:[#allocation2 + $0x18] sm:$0xf] %vm21_vm0, %v309_v48 }
  0x14   :  { %v314_v54 = vrot.slane %v312_v43, 7  ;;  %v8405_v55 = vrot.slane %v320_v45, 7  ;;  %68 = vst [vmem:[#allocation2 + $0x78] sm:$0x1] %v67_v50  ;;  %v380_v56 = vshrl.u32 %v270_v51, 16  ;;  %v383_v57 = vshll.u32 %v270_v51, 16 }
  0x15   :  { %v618_v58 = vsel %vm8375_vm8, %v300_v37, %v617_v53  ;;  %v388_v59 = vshrl.u32 %v271_v52, 16  ;;  %v391_v60 = vshll.u32 %v271_v52, 16  ;;  %v48_v61 = vld [vmem:[#allocation2] sm:$0x1]  ;;  %v155_v62 = vld [vmem:[#allocation2 + $0x8] sm:$0x1] }
  0x16   :  { %619 = vst [vmem:[#allocation2 + $0x14] sm:$0xf] %v618_v58  ;;  %v621_v63 = vld [vmem:[#allocation2 + $0x1c] sm:$0x1]  ;;  %v317_v0 = vor.u32 %v315_v44, %v314_v54  ;;  %v318_v2 = vrot.slane %v314_v54, 4  ;;  %v325_v3 = vor.u32 %v323_v46, %v8405_v55  ;;  %v382_v6 = vrot.slane %v380_v56, 7 }
  0x17   :  { %v1809_v4 = vld [vmem:[#allocation2 + $0x4] sm:$0xf]  ;;  %v622_v5 = vsel %vm8324_vm3, %v310_v49, %v621_v63  ;;  %v8412_v8 = vrot.slane %v388_v59, 7  ;;  %v49_v9 = vsel %vm8324_vm3, 0, %v48_v61  ;;  %v60_v10 = vld [vmem:[#allocation2 + $0x50] sm:$0x1] }
  0x18   :  { %623 = vst [vmem:[#allocation2 + $0x1c] sm:$0x1] %v622_v5  ;;  %v649_v11 = vld [vmem:[#allocation2 + $0x6c] sm:$0x1]  ;;  %v326_v12 = vsel %vm8353_vm7, %v318_v2, %v325_v3  ;;  %50 = vst [vmem:[#allocation2] sm:$0x1] %v49_v9  ;;  %v385_v17 = vor.u32 %v383_v57, %v382_v6 }
  0x19   :  { %v156_v13 = vsel %vm8337_vm6, 0, %v155_v62  ;;  %vm1978_vm9 = vsmask.f32 3328  ;;  %v1991_v14 = vshll.u32 %v1809_v4, 16  ;;  %v650_v15 = vsel %vm8324_vm3, %v378_v28, %v649_v11  ;;  %v624_v16 = vld [vmem:[#allocation2 + $0x28] sm:$0xf] }
  0x1a   :  { %627 = vst.msk [vmem:[#allocation2 + $0x2c] sm:$0xf] %vm21_vm0, %v326_v12  ;;  %v386_v18 = vrot.slane %v382_v6, 4  ;;  %v393_v19 = vor.u32 %v391_v60, %v8412_v8  ;;  %157 = vst [vmem:[#allocation2 + $0x8] sm:$0x1] %v156_v13  ;;  %v625_v20 = vsel %vm8375_vm8, %v317_v0, %v624_v16  ;;  %v8149_v24 = vld [vmem:[#allocation2 + $0x64] sm:$0xff]  }
  0x1b   :  { %651 = vst [vmem:[#allocation2 + $0x6c] sm:$0x1] %v650_v15  ;;  %vm1979_vm10 = vsmask.f32 7440  ;;  %v8426_v22 = vrot.slane %v1991_v14, 5  ;;  %v1995_v26 = vshrl.u32 %v1809_v4, 16  ;;  %4446 = vrot.lane.b32.xlu0 %v8149_v24, %s8290_s11 }
  0x1c   :  { %v167_v23 = vld [vmem:[#allocation2 + $0x58] sm:$0x1]  ;;  %626 = vst [vmem:[#allocation2 + $0x28] sm:$0xf] %v625_v20  ;;  %v394_v25 = vsel %vm8353_vm7, %v386_v18, %v393_v19  ;;  %v61_v28 = vsel %vm8324_vm3, 0, %v60_v10  ;;  %vm8451_vm11 = vmor %vm1978_vm9, %vm1979_vm10  ;;  %s8291_s14 = smov 4  }
  0x1d   :  { %v652_v27 = vld [vmem:[#allocation2 + $0x78] sm:$0xf]  ;;  %655 = vst.msk [vmem:[#allocation2 + $0x7c] sm:$0xf] %vm21_vm0, %v394_v25  ;;  %v168_v29 = vsel %vm8337_vm6, 0, %v167_v23  ;;  %v1997_v34 = vrot.slane %v1995_v26, 4 }
  0x1e   :  { %v266_v30 = vld [vmem:[%s11544_s0 + $0x18] sm:$0xf]  ;;  %v653_v33 = vsel %vm8375_vm8, %v385_v17, %v652_v27  ;;  %62 = vst [vmem:[#allocation2 + $0x50] sm:$0x1] %v61_v28  ;;  %169 = vst [vmem:[#allocation2 + $0x58] sm:$0x1] %v168_v29 }
  0x1f   :  { %v8150_v32 = vld [vmem:[#allocation2 + $0x14] sm:$0xff]   ;;  %v267_v35 = vld [vmem:[%s11544_s0 + $0x1c] sm:$0xf]  ;;  %654 = vst [vmem:[#allocation2 + $0x78] sm:$0xf] %v653_v33  ;;  %v346_v36 = vshrl.u32 %v266_v30, 16  ;;  %v1998_v43 = vor.u32 %v1997_v34, %v8426_v22 }
  0x20   :  { %v349_v37 = vshll.u32 %v266_v30, 16  ;;  %v354_v38 = vshrl.u32 %v267_v35, 16  ;;  %v357_v39 = vshll.u32 %v267_v35, 16  ;;  %v29_v40 = vld [vmem:[#allocation2 + $0x10] sm:$0x1]  ;;  %4430 = vrot.lane.b32.xlu1 %v8150_v32, %s8290_s11  ;;  %v8151_v41 = vld [vmem:[#allocation2 + $0x1c] sm:$0xff]  }
  0x21   :  { %v1808_v42 = vld [vmem:[#allocation2] sm:$0xf]  ;;  %v30_v44 = vsel %vm8324_vm3, 0, %v29_v40  ;;  %v1810_v45 = vld [vmem:[#allocation2 + $0x8] sm:$0xf]  ;;  %4432 = vrot.lane.b32.xlu0 %v8151_v41, %s8290_s11  ;;  %v1999_v49 = vrot.slane %v1998_v43, 4 }
  0x22   :  { %v1982_v46 = vshrl.u32 %v1808_v42, 16  ;;  %v1985_v47 = vshll.u32 %v1808_v42, 16  ;;  %31 = vst [vmem:[#allocation2 + $0x10] sm:$0x1] %v30_v44  ;;  %v8152_v48 = vld [vmem:[#allocation2 + $0x6c] sm:$0xff]   ;;  %v2001_v50 = vshll.u32 %v1810_v45, 16 }
  0x23   :  { %v2005_v51 = vshrl.u32 %v1810_v45, 16  ;;  %v8153_v52 = vld [vmem:[#allocation2 + $0x28] sm:$0xff]   ;;  %v348_v57 = vrot.slane %v346_v36, 7  ;;  %v356_v59 = vrot.slane %v354_v38, 7  ;;  %v4703_v15 = vld [vmem:[#allocation2 + $0x14] sm:$0xf] }
  0x24   :  { %v1984_v54 = vrot.slane %v1982_v46, 4  ;;  %v1987_v56 = vrot.slane %v1985_v47, 5  ;;  %4448 = vrot.lane.b32.xlu1 %v8152_v48, %s8290_s11  ;;  %v2003_v58 = vrot.slane %v2001_v50, 5  ;;  %v1811_v60 = vld [vmem:[#allocation2 + $0xc] sm:$0xf]  ;;  %v4874_v23 = vshrl.u32 %v4703_v15, 16 }
  0x25   :  { %v351_v62 = vor.u32 %v349_v37, %v348_v57  ;;  %v352_v63 = vrot.slane %v348_v57, 4  ;;  %v638_v0 = vld [vmem:[#allocation2 + $0x50] sm:$0xf]  ;;  %v642_v2 = vld [vmem:[#allocation2 + $0x58] sm:$0x1]  ;;  %v2007_v3 = vrot.slane %v2005_v51, 4  ;;  %4434 = vrot.lane.b32.xlu0 %v8153_v52, %s8290_s11  ;;  %v359_v6 = vor.u32 %v357_v39, %v356_v59 }
  0x26   :  { %v1988_v61 = vor.u32 %v1987_v56, %v1984_v54  ;;  %v8154_v4 = vld [vmem:[#allocation2 + $0x78] sm:$0xff]   ;;  %v2004_v5 = vsel %vm8451_vm11, %v1999_v49, %v2003_v58  ;;  %v361_v9 = vrot.slane %v356_v59, 4  ;;  %v2011_v10 = vshll.u32 %v1811_v60, 16  ;;  %v4723_v34 = vld [vmem:[#allocation2 + $0x64] sm:$0xf]  ;;  %s8292_s15 = smov 12  }
  0x27   :  { %v639_v12 = vsel %vm8375_vm8, %v351_v62, %v638_v0  ;;  %v2008_v13 = vor.u32 %v2007_v3, %v2003_v58  ;;  %v2015_v14 = vshrl.u32 %v1811_v60, 16  ;;  %v4704_v16 = vld [vmem:[#allocation2 + $0x18] sm:$0xf]  ;;  %v360_v17 = vsel %vm8353_vm7, %v352_v63, %v359_v6  ;;  %v8470_v28 = vld [vmem:[#allocation2 + $0x1c] sm:$0xf]  ;;  %v8190_v31 = vld [vmem:[#allocation2 + $0x28] sm:$0xff]  }
  0x28   :  { %v1989_v11 = vrot.slane %v1988_v61, 4  ;;  %4450 = vrot.lane.b32.xlu1 %v8154_v4, %s8290_s11  ;;  %640 = vst [vmem:[#allocation2 + $0x50] sm:$0xf] %v639_v12  ;;  %v643_v18 = vsel %vm8324_vm3, %v361_v9, %v642_v2  ;;  %v2013_v20 = vrot.slane %v2011_v10, 5  ;;  %641 = vst.msk [vmem:[#allocation2 + $0x54] sm:$0xf] %vm21_vm0, %v360_v17 }
  0x29   :  { %v1812_v19 = vld [vmem:[#allocation2 + $0x10] sm:$0x1]  ;;  %644 = vst [vmem:[#allocation2 + $0x58] sm:$0x1] %v643_v18  ;;  %v2009_v25 = vrot.slane %v2008_v13, 4  ;;  %v2017_v26 = vrot.slane %v2015_v14, 4 }
  0x2a   :  { %v1994_v24 = vsel %vm8451_vm11, %v1989_v11, %v8426_v22  ;;  %v2021_v27 = vshll.u32 %v1812_v19, 16  ;;  %v4876_v30 = vrot.slane %v4874_v23, 4  ;;  %v4877_v32 = vshll.u32 %v4703_v15, 16  ;;  %v4724_v22 = vld [vmem:[#allocation2 + $0x68] sm:$0xf]  ;;  %v8189_v7 = vld [vmem:[#allocation2 + $0x78] sm:$0xff]  }
  0x2b   :  { %v7793_v29 = vcombine.low %v1994_v24, %v2004_v5  ;;  %v4883_v33 = vshll.u32 %v4704_v16, 16  ;;  %v2014_v35 = vsel %vm8451_vm11, %v2009_v25, %v2013_v20  ;;  %v2018_v36 = vor.u32 %v2017_v26, %v2013_v20  ;;  %v4725_v13 = vld [vmem:[#allocation2 + $0x6c] sm:$0xf]  ;;  %v1831_v19 = vld [vmem:[#allocation2 + $0x5c] sm:$0xf] }
  0x2c   :  { %v2023_v37 = vrot.slane %v2021_v27, 5  ;;  %v4887_v38 = vshrl.u32 %v4704_v16, 16  ;;  %v4879_v39 = vrot.slane %v4877_v32, 5  ;;  %v4893_v41 = vshll.u32 %v8470_v28, 16  ;;  %v6919_v53 = vld [vmem:[%s11546_s2 + $0x8] sm:$0xff] }
  0x2d   :  { %3681 = vrot.lane.b32.xlu0 %v7793_v29, %s8291_s14  ;;  %v4885_v40 = vrot.slane %v4883_v33, 5  ;;  %v4897_v42 = vshrl.u32 %v8470_v28, 16  ;;  %v2019_v43 = vrot.slane %v2018_v36, 4  ;;  %v5050_v45 = vshrl.u32 %v4723_v34, 16 }
  0x2e   :  { %v4889_v44 = vrot.slane %v4887_v38, 4  ;;  %v5053_v46 = vshll.u32 %v4723_v34, 16  ;;  %v4880_v47 = vor.u32 %v4879_v39, %v4876_v30  ;;  %v8477_v48 = vrot.slane %v4893_v41, 5  ;;  %v1832_v30 = vld [vmem:[#allocation2 + $0x60] sm:$0x1] }
  0x2f   :  { %v5059_v49 = vshll.u32 %v4724_v22, 16  ;;  %v5063_v50 = vshrl.u32 %v4724_v22, 16  ;;  %v1828_v51 = vld [vmem:[#allocation2 + $0x50] sm:$0xf]  ;;  %v2024_v52 = vsel %vm8451_vm11, %v2019_v43, %v2023_v37  ;;  %v5052_v56 = vrot.slane %v5050_v45, 4 }
  0x30   :  { %v4890_v54 = vor.u32 %v4889_v44, %v4885_v40  ;;  %v5055_v57 = vrot.slane %v5053_v46, 5  ;;  %v1829_v58 = vld [vmem:[#allocation2 + $0x54] sm:$0xf]  ;;  %v1830_v59 = vld [vmem:[#allocation2 + $0x58] sm:$0xf]  ;;  %v2158_v60 = vshrl.u32 %v1828_v51, 16  ;;  %v7794_v62 = vcombine.low %v2014_v35, %v2024_v52 }
  0x31   :  { %v2161_v61 = vshll.u32 %v1828_v51, 16  ;;  %v2167_v63 = vshll.u32 %v1829_v58, 16  ;;  %v2171_v0 = vshrl.u32 %v1829_v58, 16  ;;  %v2177_v2 = vshll.u32 %v1830_v59, 16  ;;  %v4726_v58 = vld [vmem:[#allocation2 + $0x70] sm:$0xf] }
  0x32   :  { %v2181_v3 = vshrl.u32 %v1830_v59, 16  ;;  %v2160_v4 = vrot.slane %v2158_v60, 4  ;;  %3683 = vrot.lane.b32.xlu0 %v7794_v62, %s8291_s14  ;;  %v4881_v6 = vrot.slane %v4880_v47, 4  ;;  %v4891_v9 = vrot.slane %v4890_v54, 4 }
  0x33   :  { %v2163_v5 = vrot.slane %v2161_v61, 5  ;;  %v2169_v10 = vrot.slane %v2167_v63, 5  ;;  %v2173_v11 = vrot.slane %v2171_v0, 4  ;;  %v2179_v12 = vrot.slane %v2177_v2, 5  ;;  %v4727_v63 = vld [vmem:[#allocation2 + $0x74] sm:$0x1] }
  0x34   :  { %v5056_v14 = vor.u32 %v5055_v57, %v5052_v56  ;;  %v4886_v16 = vsel %vm8451_vm11, %v4881_v6, %v4885_v40  ;;  %v4896_v17 = vsel %vm8451_vm11, %v4891_v9, %v8477_v48  ;;  %v5061_v18 = vrot.slane %v5059_v49, 5  ;;  %v4706_v40 = vld [vmem:[#allocation2 + $0x20] sm:$0xf] }
  0x35   :  { %v2164_v15 = vor.u32 %v2163_v5, %v2160_v4  ;;  %v2174_v20 = vor.u32 %v2173_v11, %v2169_v10  ;;  %v7929_v23 = vcombine.low %v4886_v16, %v4896_v17  ;;  %v5065_v25 = vrot.slane %v5063_v50, 4  ;;  %v4707_v50 = vld [vmem:[#allocation2 + $0x24] sm:$0x1] }
  0x36   :  { %v5057_v24 = vrot.slane %v5056_v14, 4  ;;  %v5069_v27 = vshll.u32 %v4725_v13, 16  ;;  %v5073_v29 = vshrl.u32 %v4725_v13, 16  ;;  %v2183_v32 = vrot.slane %v2181_v3, 4  ;;  %v1833_v13 = vld [vmem:[#allocation2 + $0x64] sm:$0xf] }
  0x37   :  { %v2165_v26 = vrot.slane %v2164_v15, 4  ;;  %v2175_v33 = vrot.slane %v2174_v20, 4  ;;  %v5066_v35 = vor.u32 %v5065_v25, %v5061_v18  ;;  %v2187_v36 = vshll.u32 %v1831_v19, 16  ;;  %v1834_v14 = vld [vmem:[#allocation2 + $0x68] sm:$0xf] }
  0x38   :  { %v5062_v34 = vsel %vm8451_vm11, %v5057_v24, %v5061_v18  ;;  %v5071_v38 = vrot.slane %v5069_v27, 5  ;;  %v2184_v22 = vor.u32 %v2183_v32, %v2179_v12  ;;  %v2191_v39 = vshrl.u32 %v1831_v19, 16  ;;  %v8507_v18 = vld [vmem:[#allocation2 + $0x6c] sm:$0xf] }
  0x39   :  { %v2170_v37 = vsel %vm8451_vm11, %v2165_v26, %v2169_v10  ;;  %v2180_v41 = vsel %vm8451_vm11, %v2175_v33, %v2179_v12  ;;  %v5067_v43 = vrot.slane %v5066_v35, 4  ;;  %v2189_v44 = vrot.slane %v2187_v36, 5  ;;  %v1813_v35 = vld [vmem:[#allocation2 + $0x14] sm:$0xf] }
  0x3a   :  { %v2197_v45 = vshll.u32 %v1832_v30, 16  ;;  %v7801_v46 = vcombine.low %v2170_v37, %v2180_v41  ;;  %v2185_v47 = vrot.slane %v2184_v22, 4  ;;  %v2193_v49 = vrot.slane %v2191_v39, 4  ;;  %v1814_v39 = vld [vmem:[#allocation2 + $0x18] sm:$0xf] }
  0x3b   :  { %v4899_v51 = vrot.slane %v4897_v42, 4  ;;  %v5072_v52 = vsel %vm8451_vm11, %v5067_v43, %v5071_v38  ;;  %v4903_v56 = vshll.u32 %v4706_v40, 16  ;;  %v4907_v57 = vshrl.u32 %v4706_v40, 16 }
  0x3c   :  { %v2199_v54 = vrot.slane %v2197_v45, 5  ;;  %3697 = vrot.lane.b32.xlu1 %v7801_v46, %s8291_s14  ;;  %v7937_v59 = vcombine.low %v5062_v34, %v5072_v52  ;;  %v2190_v60 = vsel %vm8451_vm11, %v2185_v47, %v2189_v44  ;;  %v2194_v61 = vor.u32 %v2193_v49, %v2189_v44  ;;  %v8518_v45 = vld [vmem:[#allocation2 + $0x1c] sm:$0xf] }
  0x3d   :  { %v4900_v62 = vor.u32 %v4899_v51, %v8477_v48  ;;  %v4905_v0 = vrot.slane %v4903_v56, 5  ;;  %v4909_v28 = vrot.slane %v4907_v57, 4  ;;  %v4913_v42 = vshll.u32 %v4707_v50, 16  ;;  %v173_v57 = vld [vmem:[#allocation2 + $0x80] sm:$0x1] }
  0x3e   :  { %v5075_v2 = vrot.slane %v5073_v29, 4  ;;  %6589 = vrot.lane.b32.xlu0 %v7937_v59, %s8292_s15  ;;  %v2195_v3 = vrot.slane %v2194_v61, 4  ;;  %v5079_v5 = vshll.u32 %v4726_v58, 16  ;;  %v5083_v6 = vshrl.u32 %v4726_v58, 16 }
  0x3f   :  { %v4901_v4 = vrot.slane %v4900_v62, 4  ;;  %v4910_v9 = vor.u32 %v4909_v28, %v4905_v0  ;;  %v4915_v10 = vrot.slane %v4913_v42, 5  ;;  %v5089_v12 = vshll.u32 %v4727_v63, 16  ;;  %v4728_v62 = vld [vmem:[#allocation2 + $0x78] sm:$0xf] }
  0x40   :  { %v5076_v11 = vor.u32 %v5075_v2, %v5071_v38  ;;  %6573 = vrot.lane.b32.xlu1 %v7929_v23, %s8292_s15  ;;  %v2200_v48 = vsel %vm8451_vm11, %v2195_v3, %v2199_v54  ;;  %v5081_v16 = vrot.slane %v5079_v5, 5  ;;  %v5085_v17 = vrot.slane %v5083_v6, 4  ;;  %v4729_v2 = vld [vmem:[#allocation2 + $0x7c] sm:$0xf] }
  0x41   :  { %v4906_v15 = vsel %vm8451_vm11, %v4901_v4, %v4905_v0  ;;  %v7802_v19 = vcombine.low %v2190_v60, %v2200_v48  ;;  %v4911_v20 = vrot.slane %v4910_v9, 4  ;;  %v5091_v25 = vrot.slane %v5089_v12, 5  ;;  %v161_v9 = vld [vmem:[#allocation2 + $0x30] sm:$0x1] }
  0x42   :  { %v5077_v24 = vrot.slane %v5076_v11, 4  ;;  %v5086_v26 = vor.u32 %v5085_v17, %v5081_v16  ;;  %v2202_v27 = vshrl.u32 %v1833_v13, 16  ;;  %v2205_v29 = vshll.u32 %v1833_v13, 16 }
  0x43   :  { %v2211_v30 = vshll.u32 %v1834_v14, 16  ;;  %v4916_v23 = vsel %vm8451_vm11, %v4911_v20, %v4915_v10  ;;  %v2215_v33 = vshrl.u32 %v1834_v14, 16  ;;  %v2221_v34 = vshll.u32 %v8507_v18, 16  ;;  %v4708_v14 = vld [vmem:[#allocation2 + $0x28] sm:$0xf] }
  0x44   :  { %v5082_v32 = vsel %vm8451_vm11, %v5077_v24, %v5081_v16  ;;  %3699 = vrot.lane.b32.xlu1 %v7802_v19, %s8291_s14  ;;  %v7930_v36 = vcombine.low %v4906_v15, %v4916_v23  ;;  %v5087_v37 = vrot.slane %v5086_v26, 4  ;;  %v2204_v38 = vrot.slane %v2202_v27, 4 }
  0x45   :  { %v2207_v22 = vrot.slane %v2205_v29, 5  ;;  %v395_v40 = vrot.slane %v8412_v8, 4  ;;  %v2213_v41 = vrot.slane %v2211_v30, 5  ;;  %v2217_v43 = vrot.slane %v2215_v33, 4 }
  0x46   :  { %v8516_v44 = vrot.slane %v2221_v34, 5  ;;  %6575 = vrot.lane.b32.xlu0 %v7930_v36, %s8292_s15  ;;  %v5092_v46 = vsel %vm8451_vm11, %v5087_v37, %v5091_v25  ;;  %v2026_v49 = vshrl.u32 %v1813_v35, 16  ;;  %v2029_v50 = vshll.u32 %v1813_v35, 16  ;;  %v1836_v35 = vld [vmem:[#allocation2 + $0x70] sm:$0xf] }
  0x47   :  { %v2208_v47 = vor.u32 %v2207_v22, %v2204_v38  ;;  %v7938_v51 = vcombine.low %v5082_v32, %v5092_v46  ;;  %v2218_v52 = vor.u32 %v2217_v43, %v2213_v41  ;;  %v2035_v54 = vshll.u32 %v1814_v39, 16 }
  0x48   :  { %v2039_v56 = vshrl.u32 %v1814_v39, 16  ;;  %v2028_v59 = vrot.slane %v2026_v49, 4  ;;  %v2031_v60 = vrot.slane %v2029_v50, 5  ;;  %v2045_v61 = vshll.u32 %v8518_v45, 16  ;;  %v1837_v39 = vld [vmem:[#allocation2 + $0x74] sm:$0x1] }
  0x49   :  { %v2209_v58 = vrot.slane %v2208_v47, 4  ;;  %6591 = vrot.lane.b32.xlu1 %v7938_v51, %s8292_s15  ;;  %v2219_v63 = vrot.slane %v2218_v52, 4  ;;  %v2225_v0 = vshrl.u32 %v8507_v18, 16  ;;  %v2037_v28 = vrot.slane %v2035_v54, 5  ;;  %v4709_v18 = vld [vmem:[#allocation2 + $0x2c] sm:$0xf] }
  0x4a   :  { %v2041_v42 = vrot.slane %v2039_v56, 4  ;;  %v2032_v4 = vor.u32 %v2031_v60, %v2028_v59  ;;  %v8528_v5 = vrot.slane %v2045_v61, 5  ;;  %v174_v6 = vsel %vm8337_vm6, 0, %v173_v57  ;;  %v1816_v49 = vld [vmem:[#allocation2 + $0x20] sm:$0xf] }
  0x4b   :  { %v2214_v3 = vsel %vm8451_vm11, %v2209_v58, %v2213_v41  ;;  %v2224_v10 = vsel %vm8451_vm11, %v2219_v63, %v8516_v44  ;;  %175 = vst [vmem:[#allocation2 + $0x80] sm:$0x1] %v174_v6  ;;  %v5094_v12 = vshrl.u32 %v4728_v62, 16  ;;  %v5097_v13 = vshll.u32 %v4728_v62, 16  ;;  %v1817_v60 = vld [vmem:[#allocation2 + $0x24] sm:$0x1] }
  0x4c   :  { %v2042_v11 = vor.u32 %v2041_v42, %v2037_v28  ;;  %v7803_v48 = vcombine.low %v2214_v3, %v2224_v10  ;;  %v2033_v15 = vrot.slane %v2032_v4, 4  ;;  %v5103_v16 = vshll.u32 %v4729_v2, 16  ;;  %v84_v61 = vld [vmem:[#allocation2 + $0xf0] sm:$0x1]  ;;  %v282_v10 = vld [vmem:[%s11544_s0 + $0x58] sm:$0xf] }
  0x4d   :  { %v5107_v17 = vshrl.u32 %v4729_v2, 16  ;;  %v5096_v20 = vrot.slane %v5094_v12, 4  ;;  %v5099_v24 = vrot.slane %v5097_v13, 5  ;;  %v162_v25 = vsel %vm8337_vm6, 0, %v161_v9 }
  0x4e   :  { %v2043_v19 = vrot.slane %v2042_v11, 4  ;;  %3701 = vrot.lane.b32.xlu1 %v7803_v48, %s8291_s14  ;;  %v2038_v26 = vsel %vm8451_vm11, %v2033_v15, %v2037_v28  ;;  %v8540_v27 = vrot.slane %v5103_v16, 5  ;;  %163 = vst [vmem:[#allocation2 + $0x30] sm:$0x1] %v162_v25  ;;  %v4918_v30 = vshrl.u32 %v4708_v14, 16 }
  0x4f   :  { %v5109_v29 = vrot.slane %v5107_v17, 4  ;;  %v5100_v32 = vor.u32 %v5099_v24, %v5096_v20  ;;  %v4921_v33 = vshll.u32 %v4708_v14, 16  ;;  %v4927_v34 = vshll.u32 %v4709_v18, 16  ;;  %v191_v28 = vld [vmem:[#allocation2 + $0xf8] sm:$0x1] }
  0x50   :  { %v2048_v23 = vsel %vm8451_vm11, %v2043_v19, %v8528_v5  ;;  %v2049_v36 = vshrl.u32 %v8518_v45, 16  ;;  %v4920_v38 = vrot.slane %v4918_v30, 4  ;;  %v4931_v22 = vshrl.u32 %v4709_v18, 16  ;;  %v283_v48 = vld [vmem:[%s11544_s0 + $0x5c] sm:$0xf] }
  0x51   :  { %v7795_v37 = vcombine.low %v2038_v26, %v2048_v23  ;;  %v5110_v41 = vor.u32 %v5109_v29, %v8540_v27  ;;  %v4923_v43 = vrot.slane %v4921_v33, 5  ;;  %v8547_v46 = vrot.slane %v4927_v34, 5  ;;  %v72_v25 = vld [vmem:[#allocation2 + $0xa0] sm:$0x1] }
  0x52   :  { %v2227_v47 = vrot.slane %v2225_v0, 4  ;;  %v327_v50 = vrot.slane %v8405_v55, 4  ;;  %v656_v51 = vld [vmem:[#allocation2 + $0x80] sm:$0x1]  ;;  %v4933_v52 = vrot.slane %v4931_v22, 4  ;;  %v2231_v54 = vshll.u32 %v1836_v35, 16 }
  0x53   :  { %3685 = vrot.lane.b32.xlu0 %v7795_v37, %s8291_s14  ;;  %v2235_v56 = vshrl.u32 %v1836_v35, 16  ;;  %v657_v45 = vsel %vm8324_vm3, %v395_v40, %v656_v51  ;;  %v8555_v57 = vrot.slane %v5100_v32, 4  ;;  %v4924_v58 = vor.u32 %v4923_v43, %v4920_v38  ;;  %v179_v32 = vld [vmem:[#allocation2 + $0xa8] sm:$0x1]  ;;  %v274_v43 = vld [vmem:[%s11544_s0 + $0x38] sm:$0xf] }
  0x54   :  { %v2228_v59 = vor.u32 %v2227_v47, %v8516_v44  ;;  %658 = vst [vmem:[#allocation2 + $0x80] sm:$0x1] %v657_v45  ;;  %v4934_v55 = vor.u32 %v4933_v52, %v8547_v46  ;;  %v2233_v62 = vrot.slane %v2231_v54, 5  ;;  %v2241_v0 = vshll.u32 %v1837_v39, 16 }
  0x55   :  { %v2237_v63 = vrot.slane %v2235_v56, 4  ;;  %v8559_v42 = vrot.slane %v5110_v41, 4  ;;  %v628_v8 = vld [vmem:[#allocation2 + $0x30] sm:$0x1]  ;;  %v2051_v3 = vrot.slane %v2049_v36, 4  ;;  %v2055_v40 = vshll.u32 %v1816_v49, 16 }
  0x56   :  { %v2229_v2 = vrot.slane %v2228_v59, 4  ;;  %v629_v4 = vsel %vm8324_vm3, %v327_v50, %v628_v8  ;;  %v8563_v6 = vrot.slane %v4924_v58, 4  ;;  %v2243_v9 = vrot.slane %v2241_v0, 5  ;;  %v275_v50 = vld [vmem:[%s11544_s0 + $0x3c] sm:$0xf] }
  0x57   :  { %v2238_v44 = vor.u32 %v2237_v63, %v2233_v62  ;;  %630 = vst [vmem:[#allocation2 + $0x30] sm:$0x1] %v629_v4  ;;  %v8568_v11 = vrot.slane %v4934_v55, 4  ;;  %v2052_v13 = vor.u32 %v2051_v3, %v8528_v5  ;;  %v8573_v14 = vrot.slane %v2055_v40, 5  ;;  %v284_v8 = vld [vmem:[%s11544_s0 + $0x60] sm:$0xf] }
  0x58   :  { %v2234_v12 = vsel %vm8451_vm11, %v2229_v2, %v2233_v62  ;;  %v2059_v16 = vshrl.u32 %v1816_v49, 16  ;;  %v2065_v17 = vshll.u32 %v1817_v60, 16  ;;  %v85_v18 = vsel %vm8324_vm3, 0, %v84_v61 }
  0x59   :  { %v2239_v15 = vrot.slane %v2238_v44, 4  ;;  %v8580_v19 = vrot.slane %v2052_v13, 4  ;;  %86 = vst [vmem:[#allocation2 + $0xf0] sm:$0x1] %v85_v18  ;;  %v192_v20 = vsel %vm8337_vm6, 0, %v191_v28  ;;  %v482_v24 = vshrl.u32 %v282_v10, 16 }
  0x5a   :  { %v485_v5 = vshll.u32 %v282_v10, 16  ;;  %v2061_v29 = vrot.slane %v2059_v16, 4  ;;  %v8586_v30 = vrot.slane %v2065_v17, 5  ;;  %193 = vst [vmem:[#allocation2 + $0xf8] sm:$0x1] %v192_v20  ;;  %v490_v23 = vshrl.u32 %v283_v48, 16 }
  0x5b   :  { %v2244_v26 = vsel %vm8451_vm11, %v2239_v15, %v2243_v9  ;;  %v8588_v33 = vld [vmem:[#allocation2 + $0x80] sm:$0xf]  ;;  %v5106_v34 = vsel %vm8451_vm11, %v8555_v57, %v8540_v27  ;;  %v4930_v35 = vsel %vm8451_vm11, %v8563_v6, %v8547_v46  ;;  %v484_v36 = vrot.slane %v482_v24, 7  ;;  %v87_v57 = vld [vmem:[#allocation2 + $0x104] sm:$0x1] }
  0x5c   :  { %v493_v37 = vshll.u32 %v283_v48, 16  ;;  %v5113_v38 = vshll.u32 %v8588_v33, 16  ;;  %v8599_v22 = vcombine.low %v2234_v12, %v2244_v26  ;;  %v2062_v39 = vor.u32 %v2061_v29, %v8573_v14  ;;  %v285_v12 = vld [vmem:[%s11544_s0 + $0x64] sm:$0xf]  ;;  %v75_v16 = vld [vmem:[#allocation2 + $0xb4] sm:$0x1] }
  0x5d   :  { %v492_v41 = vrot.slane %v490_v23, 7  ;;  %v487_v47 = vor.u32 %v485_v5, %v484_v36  ;;  %v488_v27 = vrot.slane %v484_v36, 4  ;;  %v73_v49 = vsel %vm8324_vm3, 0, %v72_v25  ;;  %v8654_v24 = vld [vmem:[%s11544_s0 + $0x40] sm:$0xf] }
  0x5e   :  { %v180_v46 = vsel %vm8337_vm6, 0, %v179_v32  ;;  %v8612_v51 = vrot.slane %v5113_v38, 5  ;;  %v8614_v52 = vld [vmem:[#allocation2 + $0x30] sm:$0xf]  ;;  %v2063_v54 = vrot.slane %v2062_v39, 4  ;;  %v5117_v58 = vshrl.u32 %v8588_v33, 16 }
  0x5f   :  { %v495_v56 = vor.u32 %v493_v37, %v492_v41  ;;  %v497_v45 = vrot.slane %v492_v41, 4  ;;  %74 = vst [vmem:[#allocation2 + $0xa0] sm:$0x1] %v73_v49  ;;  %181 = vst [vmem:[#allocation2 + $0xa8] sm:$0x1] %v180_v46  ;;  %v4937_v59 = vshll.u32 %v8614_v52, 16  ;;  %v2058_v60 = vsel %vm8451_vm11, %v8580_v19, %v8573_v14 }
  0x60   :  { %v414_v61 = vshrl.u32 %v274_v43, 16  ;;  %v5116_v55 = vsel %vm8451_vm11, %v8559_v42, %v8612_v51  ;;  %v694_v63 = vld [vmem:[#allocation2 + $0xf0] sm:$0xf]  ;;  %v417_v0 = vshll.u32 %v274_v43, 16  ;;  %v422_v28 = vshrl.u32 %v275_v50, 16 }
  0x61   :  { %v496_v62 = vsel %vm8353_vm7, %v488_v27, %v495_v56  ;;  %v7939_v2 = vcombine.low %v5106_v34, %v5116_v55  ;;  %v8631_v3 = vrot.slane %v4937_v59, 5  ;;  %v2068_v40 = vsel %vm8451_vm11, %v2063_v54, %v8586_v30  ;;  %v698_v4 = vld [vmem:[#allocation2 + $0xf8] sm:$0x1] }
  0x62   :  { %v695_v42 = vsel %vm8375_vm8, %v487_v47, %v694_v63  ;;  %697 = vst.msk [vmem:[#allocation2 + $0xf4] sm:$0xf] %vm21_vm0, %v496_v62  ;;  %v699_v6 = vsel %vm8324_vm3, %v497_v45, %v698_v4  ;;  %v416_v44 = vrot.slane %v414_v61, 7  ;;  %v424_v9 = vrot.slane %v422_v28, 7 }
  0x63   :  { %696 = vst [vmem:[#allocation2 + $0xf0] sm:$0xf] %v695_v42  ;;  %v425_v10 = vshll.u32 %v275_v50, 16  ;;  %6593 = vrot.lane.b32.xlu1 %v7939_v2, %s8292_s15  ;;  %v4940_v13 = vsel %vm8451_vm11, %v8568_v11, %v8631_v3  ;;  %700 = vst [vmem:[#allocation2 + $0xf8] sm:$0x1] %v699_v6  ;;  %v88_v14 = vsel %vm8324_vm3, 0, %v87_v57  ;;  %v7796_v5 = vcombine.low %v2058_v60, %v2068_v40 }
  0x64   :  { %v499_v48 = vshrl.u32 %v284_v8, 16  ;;  %v502_v15 = vshll.u32 %v284_v8, 16  ;;  %v7931_v17 = vcombine.low %v4930_v35, %v4940_v13  ;;  %v419_v18 = vor.u32 %v417_v0, %v416_v44  ;;  %89 = vst [vmem:[#allocation2 + $0x104] sm:$0x1] %v88_v14  ;;  %v8659_v11 = vld [vmem:[%s11544_s0 + $0x44] sm:$0xf] }
  0x65   :  { %v420_v19 = vrot.slane %v416_v44, 4  ;;  %v427_v20 = vor.u32 %v425_v10, %v424_v9  ;;  %v429_v25 = vrot.slane %v424_v9, 4  ;;  %v507_v34 = vshrl.u32 %v285_v12, 16  ;;  %v4731_v6 = vld [vmem:[#allocation2 + $0x84] sm:$0xf] }
  0x66   :  { %v666_v26 = vld [vmem:[#allocation2 + $0xa0] sm:$0xf]  ;;  %v670_v29 = vld [vmem:[#allocation2 + $0xa8] sm:$0x1]  ;;  %v501_v30 = vrot.slane %v499_v48, 7  ;;  %6577 = vrot.lane.b32.xlu0 %v7931_v17, %s8292_s15  ;;  %v510_v35 = vshll.u32 %v285_v12, 16 }
  0x67   :  { %v428_v23 = vsel %vm8353_vm7, %v420_v19, %v427_v20  ;;  %v667_v32 = vsel %vm8375_vm8, %v419_v18, %v666_v26  ;;  %v4941_v36 = vshrl.u32 %v8614_v52, 16  ;;  %3703 = vrot.lane.b32.xlu1 %v8599_v22, %s8291_s14  ;;  %v671_v37 = vsel %vm8324_vm3, %v429_v25, %v670_v29 }
  0x68   :  { %668 = vst [vmem:[#allocation2 + $0xa0] sm:$0xf] %v667_v32  ;;  %669 = vst.msk [vmem:[#allocation2 + $0xa4] sm:$0xf] %vm21_vm0, %v428_v23  ;;  %v76_v38 = vsel %vm8324_vm3, 0, %v75_v16  ;;  %v504_v41 = vor.u32 %v502_v15, %v501_v30  ;;  %v505_v43 = vrot.slane %v501_v30, 4 }
  0x69   :  { %v1869_v39 = vld [vmem:[#allocation2 + $0xf4] sm:$0xf]  ;;  %672 = vst [vmem:[#allocation2 + $0xa8] sm:$0x1] %v671_v37  ;;  %v8674_v47 = vrot.slane %v507_v34, 7  ;;  %v431_v27 = vshrl.u32 %v8654_v24, 16 }
  0x6a   :  { %77 = vst [vmem:[#allocation2 + $0xb4] sm:$0x1] %v76_v38  ;;  %v1868_v49 = vld [vmem:[#allocation2 + $0xf0] sm:$0xf]  ;;  %v2519_v22 = vshll.u32 %v1869_v39, 16  ;;  %v2523_v46 = vshrl.u32 %v1869_v39, 16  ;;  %3687 = vrot.lane.b32.xlu0 %v7796_v5, %s8291_s14 }
  0x6b   :  { %v434_v50 = vshll.u32 %v8654_v24, 16  ;;  %v439_v54 = vshrl.u32 %v8659_v11, 16  ;;  %v8680_v56 = vld [vmem:[#allocation2 + $0xf8] sm:$0xf]  ;;  %v2510_v45 = vshrl.u32 %v1868_v49, 16  ;;  %v2513_v57 = vshll.u32 %v1868_v49, 16 }
  0x6c   :  { %v512_v59 = vor.u32 %v510_v35, %v8674_v47  ;;  %v5119_v60 = vrot.slane %v5117_v58, 4  ;;  %v2521_v61 = vrot.slane %v2519_v22, 5  ;;  %v2525_v55 = vrot.slane %v2523_v46, 4  ;;  %v701_v63 = vld [vmem:[#allocation2 + $0x104] sm:$0xf]  ;;  %v8191_v21 = vld [vmem:[#allocation2 + $0xf8] sm:$0xff]  }
  0x6d   :  { %v2529_v62 = vshll.u32 %v8680_v56, 16  ;;  %v442_v0 = vshll.u32 %v8659_v11, 16  ;;  %v2512_v28 = vrot.slane %v2510_v45, 4  ;;  %v2515_v8 = vrot.slane %v2513_v57, 5 }
  0x6e   :  { %v513_v2 = vsel %vm8353_vm7, %v505_v43, %v512_v59  ;;  %v702_v40 = vsel %vm8375_vm8, %v504_v41, %v701_v63  ;;  %v2526_v42 = vor.u32 %v2525_v55, %v2521_v61  ;;  %v2533_v33 = vshrl.u32 %v8680_v56, 16  ;;  %v4732_v41 = vld [vmem:[#allocation2 + $0x88] sm:$0x1]  ;;  %v4711_v43 = vld [vmem:[#allocation2 + $0x34] sm:$0xf] }
  0x6f   :  { %v8691_v4 = vrot.slane %v2529_v62, 5  ;;  %v514_v58 = vrot.slane %v8674_v47, 4  ;;  %703 = vst [vmem:[#allocation2 + $0x104] sm:$0xf] %v702_v40  ;;  %704 = vst.msk [vmem:[#allocation2 + $0x108] sm:$0xf] %vm21_vm0, %v513_v2  ;;  %v2516_v44 = vor.u32 %v2515_v8, %v2512_v28  ;;  %v5120_v14 = vor.u32 %v5119_v60, %v8612_v51 }
  0x70   :  { %v1848_v9 = vld [vmem:[#allocation2 + $0xa0] sm:$0xf]  ;;  %v1849_v10 = vld [vmem:[#allocation2 + $0xa4] sm:$0xf]  ;;  %v433_v12 = vrot.slane %v431_v27, 7  ;;  %v8696_v13 = vrot.slane %v439_v54, 7 }
  0x71   :  { %v2527_v48 = vrot.slane %v2526_v42, 4  ;;  %v8699_v15 = vld [vmem:[#allocation2 + $0xa8] sm:$0xf]  ;;  %v2334_v16 = vshrl.u32 %v1848_v9, 16  ;;  %v2337_v17 = vshll.u32 %v1848_v9, 16  ;;  %v2343_v18 = vshll.u32 %v1849_v10, 16 }
  0x72   :  { %v2517_v19 = vrot.slane %v2516_v44, 4  ;;  %v2347_v20 = vshrl.u32 %v1849_v10, 16  ;;  %v2353_v24 = vshll.u32 %v8699_v15, 16  ;;  %v5123_v11 = vshll.u32 %v4731_v6, 16  ;;  %v673_v30 = vld [vmem:[#allocation2 + $0xb4] sm:$0xf] }
  0x73   :  { %v2532_v5 = vsel %vm8451_vm11, %v2527_v48, %v8691_v4  ;;  %v2336_v25 = vrot.slane %v2334_v16, 4  ;;  %v2339_v26 = vrot.slane %v2337_v17, 5  ;;  %v2345_v29 = vrot.slane %v2343_v18, 5  ;;  %v4712_v62 = vld [vmem:[#allocation2 + $0x38] sm:$0x1]  ;;  %v8192_v1 = vld [vmem:[#allocation2 + $0xa8] sm:$0xff]  }
  0x74   :  { %v2522_v51 = vsel %vm8451_vm11, %v2517_v19, %v2521_v61  ;;  %v2349_v23 = vrot.slane %v2347_v20, 4  ;;  %v436_v32 = vor.u32 %v434_v50, %v433_v12  ;;  %v5127_v34 = vshrl.u32 %v4731_v6, 16  ;;  %v8155_v50 = vld [vmem:[#allocation2 + $0x80] sm:$0xff]   ;;  %v194_v40 = vld [vmem:[#allocation2 + $0x10c] sm:$0x1] }
  0x75   :  { %v7817_v35 = vcombine.low %v2522_v51, %v2532_v5  ;;  %v2340_v37 = vor.u32 %v2339_v26, %v2336_v25  ;;  %v437_v38 = vrot.slane %v433_v12, 4  ;;  %v444_v39 = vor.u32 %v442_v0, %v8696_v13  ;;  %v182_v26 = vld [vmem:[#allocation2 + $0xbc] sm:$0x1] }
  0x76   :  { %v2350_v27 = vor.u32 %v2349_v23, %v2345_v29  ;;  %v8708_v49 = vrot.slane %v2353_v24, 5  ;;  %v2357_v22 = vshrl.u32 %v8699_v15, 16  ;;  %v674_v46 = vsel %vm8375_vm8, %v436_v32, %v673_v30  ;;  %v4763_v42 = vld [vmem:[#allocation2 + $0x104] sm:$0xf]  ;;  %v4764_v52 = vld [vmem:[#allocation2 + $0x108] sm:$0xf] }
  0x77   :  { %3729 = vrot.lane.b32.xlu1 %v7817_v35, %s8291_s14  ;;  %v2341_v54 = vrot.slane %v2340_v37, 4  ;;  %v445_v45 = vsel %vm8353_vm7, %v437_v38, %v444_v39  ;;  %675 = vst [vmem:[#allocation2 + $0xb4] sm:$0xf] %v674_v46  ;;  %v5121_v57 = vrot.slane %v5120_v14, 4  ;;  %v5125_v59 = vrot.slane %v5123_v11, 5  ;;  %v8157_v12 = vld [vmem:[#allocation2 + $0x104] sm:$0xff]  }
  0x78   :  { %v2351_v60 = vrot.slane %v2350_v27, 4  ;;  %676 = vst.msk [vmem:[#allocation2 + $0xb8] sm:$0xf] %vm21_vm0, %v445_v45  ;;  %v5129_v61 = vrot.slane %v5127_v34, 4  ;;  %v5133_v55 = vshll.u32 %v4732_v41, 16  ;;  %v4943_v63 = vrot.slane %v4941_v36, 4 }
  0x79   :  { %v2346_v0 = vsel %vm8451_vm11, %v2341_v54, %v2345_v29  ;;  %v5126_v28 = vsel %vm8451_vm11, %v5121_v57, %v5125_v59  ;;  %v4947_v8 = vshll.u32 %v4711_v43, 16  ;;  %v4951_v2 = vshrl.u32 %v4711_v43, 16  ;;  %v8156_v24 = vld [vmem:[#allocation2 + $0x30] sm:$0xff]   ;;  %v1838_v34 = vld [vmem:[#allocation2 + $0x78] sm:$0xf] }
  0x7a   :  { %v2356_v6 = vsel %vm8451_vm11, %v2351_v60, %v8708_v49  ;;  %v5130_v44 = vor.u32 %v5129_v61, %v5125_v59  ;;  %v5135_v9 = vrot.slane %v5133_v55, 5  ;;  %v4944_v10 = vor.u32 %v4943_v63, %v8631_v3  ;;  %v1839_v61 = vld [vmem:[#allocation2 + $0x7c] sm:$0xf] }
  0x7b   :  { %v7809_v36 = vcombine.low %v2346_v0, %v2356_v6  ;;  %4452 = vrot.lane.b32.xlu1 %v8155_v50, %s8290_s11  ;;  %v4949_v14 = vrot.slane %v4947_v8, 5  ;;  %v4953_v48 = vrot.slane %v4951_v2, 4  ;;  %v4957_v16 = vshll.u32 %v4712_v62, 16 }
  0x7c   :  { %v5131_v17 = vrot.slane %v5130_v44, 4  ;;  %v4945_v18 = vrot.slane %v4944_v10, 4  ;;  %v195_v19 = vsel %vm8337_vm6, 0, %v194_v40  ;;  %v5402_v20 = vshrl.u32 %v4763_v42, 16  ;;  %v8750_v10 = vld [vmem:[#allocation2 + $0x80] sm:$0xf] }
  0x7d   :  { %3713 = vrot.lane.b32.xlu0 %v7809_v36, %s8291_s14  ;;  %v4954_v11 = vor.u32 %v4953_v48, %v4949_v14  ;;  %v4959_v5 = vrot.slane %v4957_v16, 5  ;;  %196 = vst [vmem:[#allocation2 + $0x10c] sm:$0x1] %v195_v19  ;;  %v5405_v3 = vshll.u32 %v4763_v42, 16  ;;  %v5411_v25 = vshll.u32 %v4764_v52, 16 }
  0x7e   :  { %v5136_v29 = vsel %vm8451_vm11, %v5131_v17, %v5135_v9  ;;  %v4950_v30 = vsel %vm8451_vm11, %v4945_v18, %v4949_v14  ;;  %v5404_v51 = vrot.slane %v5402_v20, 4  ;;  %v5415_v23 = vshrl.u32 %v4764_v52, 16  ;;  %v4743_v32 = vld [vmem:[#allocation2 + $0xb4] sm:$0xf]  ;;  %v1819_v36 = vld [vmem:[#allocation2 + $0x2c] sm:$0xf] }
  0x7f   :  { %4478 = vrot.lane.b32.xlu1 %v8157_v12, %s8290_s11  ;;  %v7940_v35 = vcombine.low %v5126_v28, %v5136_v29  ;;  %v4955_v37 = vrot.slane %v4954_v11, 4  ;;  %v5407_v38 = vrot.slane %v5405_v3, 5  ;;  %v8736_v39 = vrot.slane %v5411_v25, 5  ;;  %v4744_v27 = vld [vmem:[#allocation2 + $0xb8] sm:$0xf] }
  0x80   :  { %v5417_v41 = vrot.slane %v5415_v23, 4  ;;  %v183_v43 = vsel %vm8337_vm6, 0, %v182_v26  ;;  %v5226_v46 = vshrl.u32 %v4743_v32, 16  ;;  %v5229_v54 = vshll.u32 %v4743_v32, 16  ;;  %v8158_v50 = vld [vmem:[#allocation2 + $0xb4] sm:$0xff]  }
  0x81   :  { %4436 = vrot.lane.b32.xlu0 %v8156_v24, %s8290_s11  ;;  %v4960_v45 = vsel %vm8451_vm11, %v4955_v37, %v4959_v5  ;;  %v5408_v57 = vor.u32 %v5407_v38, %v5404_v51  ;;  %184 = vst [vmem:[#allocation2 + $0xbc] sm:$0x1] %v183_v43  ;;  %v5235_v59 = vshll.u32 %v4744_v27, 16  ;;  %v5239_v60 = vshrl.u32 %v4744_v27, 16  ;;  %v1818_v28 = vld [vmem:[#allocation2 + $0x28] sm:$0xf] }
  0x82   :  { %v446_v55 = vrot.slane %v8696_v13, 4  ;;  %v5418_v62 = vor.u32 %v5417_v41, %v8736_v39  ;;  %v5228_v63 = vrot.slane %v5226_v46, 4  ;;  %v5231_v0 = vrot.slane %v5229_v54, 5  ;;  %v8764_v24 = vld [vmem:[#allocation2 + $0x30] sm:$0xf] }
  0x83   :  { %6595 = vrot.lane.b32.xlu1 %v7940_v35, %s8292_s15  ;;  %v8746_v8 = vrot.slane %v5408_v57, 4  ;;  %v8748_v2 = vrot.slane %v5235_v59, 5  ;;  %v5241_v40 = vrot.slane %v5239_v60, 4  ;;  %v2246_v42 = vshrl.u32 %v1838_v34, 16  ;;  %v1871_v43 = vld [vmem:[#allocation2 + $0xfc] sm:$0xf] }
  0x84   :  { %v7932_v6 = vcombine.low %v4950_v30, %v4960_v45  ;;  %v705_v44 = vld [vmem:[#allocation2 + $0x10c] sm:$0x1]  ;;  %v5232_v9 = vor.u32 %v5231_v0, %v5228_v63  ;;  %v2249_v52 = vshll.u32 %v1838_v34, 16  ;;  %v2255_v13 = vshll.u32 %v1839_v61, 16 }
  0x85   :  { %4462 = vrot.lane.b32.xlu0 %v8158_v50, %s8290_s11  ;;  %v706_v12 = vsel %vm8324_vm3, %v514_v58, %v705_v44  ;;  %v8757_v14 = vrot.slane %v5418_v62, 4  ;;  %v5242_v48 = vor.u32 %v5241_v40, %v8748_v2  ;;  %v2248_v16 = vrot.slane %v2246_v42, 4 }
  0x86   :  { %707 = vst [vmem:[#allocation2 + $0x10c] sm:$0x1] %v706_v12  ;;  %v5414_v17 = vsel %vm8451_vm11, %v8746_v8, %v8736_v39  ;;  %v2251_v18 = vrot.slane %v2249_v52, 5  ;;  %v2257_v19 = vrot.slane %v2255_v13, 5  ;;  %v2259_v20 = vshrl.u32 %v1839_v61, 16 }
  0x87   :  { %v8766_v47 = vrot.slane %v5232_v9, 4  ;;  %v8768_v11 = vrot.slane %v5242_v48, 4  ;;  %v2265_v58 = vshll.u32 %v8750_v10, 16  ;;  %v2070_v5 = vshrl.u32 %v1818_v28, 16  ;;  %v1872_v61 = vld [vmem:[#allocation2 + $0x100] sm:$0x1] }
  0x88   :  { %v677_v3 = vld [vmem:[#allocation2 + $0xbc] sm:$0x1]  ;;  %v2252_v25 = vor.u32 %v2251_v18, %v2248_v16  ;;  %v2261_v26 = vrot.slane %v2259_v20, 4  ;;  %v2269_v29 = vshrl.u32 %v8750_v10, 16  ;;  %v2073_v30 = vshll.u32 %v1818_v28, 16 }
  0x89   :  { %6579 = vrot.lane.b32.xlu0 %v7932_v6, %s8292_s15  ;;  %v678_v51 = vsel %vm8324_vm3, %v446_v55, %v677_v3  ;;  %v8775_v23 = vrot.slane %v2265_v58, 5  ;;  %v2072_v32 = vrot.slane %v2070_v5, 4  ;;  %v2079_v34 = vshll.u32 %v1819_v36, 16  ;;  %v1851_v55 = vld [vmem:[#allocation2 + $0xac] sm:$0xf] }
  0x8a   :  { %679 = vst [vmem:[#allocation2 + $0xbc] sm:$0x1] %v678_v51  ;;  %v2253_v35 = vrot.slane %v2252_v25, 4  ;;  %v2262_v37 = vor.u32 %v2261_v26, %v2257_v19  ;;  %v2075_v38 = vrot.slane %v2073_v30, 5  ;;  %v2083_v41 = vshrl.u32 %v1819_v36, 16 }
  0x8b   :  { %v5238_v27 = vsel %vm8451_vm11, %v8766_v47, %v8748_v2  ;;  %v2081_v46 = vrot.slane %v2079_v34, 5  ;;  %v2089_v54 = vshll.u32 %v8764_v24, 16  ;;  %v2535_v50 = vrot.slane %v2533_v33, 4  ;;  %v1852_v48 = vld [vmem:[#allocation2 + $0xb0] sm:$0x1] }
  0x8c   :  { %v2258_v45 = vsel %vm8451_vm11, %v2253_v35, %v2257_v19  ;;  %v2263_v57 = vrot.slane %v2262_v37, 4  ;;  %v2076_v59 = vor.u32 %v2075_v38, %v2072_v32  ;;  %v2085_v60 = vrot.slane %v2083_v41, 4  ;;  %v69_v16 = vld [vmem:[#allocation2 + $0x8c] sm:$0x1]  ;;  %v272_v30 = vld [vmem:[%s11544_s0 + $0x30] sm:$0xf] }
  0x8d   :  { %v8786_v62 = vld [vmem:[#allocation2 + $0x10c] sm:$0xf]  ;;  %v8788_v63 = vrot.slane %v2089_v54, 5  ;;  %v2536_v0 = vor.u32 %v2535_v50, %v8691_v4  ;;  %v2539_v28 = vshll.u32 %v1871_v43, 16  ;;  %v2543_v2 = vshrl.u32 %v1871_v43, 16 }
  0x8e   :  { %v5421_v40 = vshll.u32 %v8786_v62, 16  ;;  %v5425_v56 = vshrl.u32 %v8786_v62, 16  ;;  %v2268_v33 = vsel %vm8451_vm11, %v2263_v57, %v8775_v23  ;;  %v2077_v42 = vrot.slane %v2076_v59, 4  ;;  %v273_v38 = vld [vmem:[%s11544_s0 + $0x34] sm:$0xf] }
  0x8f   :  { %v7805_v6 = vcombine.low %v2258_v45, %v2268_v33  ;;  %v2086_v44 = vor.u32 %v2085_v60, %v2081_v46  ;;  %v2537_v9 = vrot.slane %v2536_v0, 4  ;;  %v2541_v52 = vrot.slane %v2539_v28, 5  ;;  %v57_v43 = vld [vmem:[#allocation2 + $0x3c] sm:$0x1]  ;;  %v264_v45 = vld [vmem:[%s11544_s0 + $0x10] sm:$0xf] }
  0x90   :  { %v8796_v13 = vrot.slane %v5421_v40, 5  ;;  %v2082_v4 = vsel %vm8451_vm11, %v2077_v42, %v2081_v46  ;;  %v2545_v36 = vrot.slane %v2543_v2, 4  ;;  %v2549_v12 = vshll.u32 %v1872_v61, 16  ;;  %v265_v57 = vld [vmem:[%s11544_s0 + $0x14] sm:$0xf] }
  0x91   :  { %v8800_v18 = vld [vmem:[#allocation2 + $0xbc] sm:$0xf]  ;;  %v2087_v19 = vrot.slane %v2086_v44, 4  ;;  %v2542_v20 = vsel %vm8451_vm11, %v2537_v9, %v2541_v52  ;;  %v2359_v47 = vrot.slane %v2357_v22, 4  ;;  %v2363_v58 = vshll.u32 %v1851_v55, 16 }
  0x92   :  { %v5424_v5 = vsel %vm8451_vm11, %v8757_v14, %v8796_v13  ;;  %v5245_v3 = vshll.u32 %v8800_v18, 16  ;;  %v5249_v25 = vshrl.u32 %v8800_v18, 16  ;;  %v2546_v26 = vor.u32 %v2545_v36, %v2541_v52  ;;  %v176_v40 = vld [vmem:[#allocation2 + $0x94] sm:$0x1]  ;;  %v164_v9 = vld [vmem:[#allocation2 + $0x44] sm:$0x1] }
  0x93   :  { %v7953_v15 = vcombine.low %v5414_v17, %v5424_v5  ;;  %v2092_v22 = vsel %vm8451_vm11, %v2087_v19, %v8788_v63  ;;  %v2551_v14 = vrot.slane %v2549_v12, 5  ;;  %v2360_v51 = vor.u32 %v2359_v47, %v8708_v49 }
  0x94   :  { %v8824_v32 = vrot.slane %v5245_v3, 5  ;;  %v7797_v34 = vcombine.low %v2082_v4, %v2092_v22  ;;  %v2547_v35 = vrot.slane %v2546_v26, 4  ;;  %v2365_v37 = vrot.slane %v2363_v58, 5  ;;  %v4746_v58 = vld [vmem:[#allocation2 + $0xc0] sm:$0xf] }
  0x95   :  { %6621 = vrot.lane.b32.xlu1 %v7953_v15, %s8292_s15  ;;  %v2361_v39 = vrot.slane %v2360_v51, 4  ;;  %v2367_v8 = vshrl.u32 %v1851_v55, 16  ;;  %v2373_v17 = vshll.u32 %v1852_v48, 16  ;;  %v70_v41 = vsel %vm8324_vm3, 0, %v69_v16  ;;  %v4766_v48 = vld [vmem:[#allocation2 + $0x110] sm:$0xf] }
  0x96   :  { %v5248_v49 = vsel %vm8451_vm11, %v8768_v11, %v8824_v32  ;;  %v2552_v46 = vsel %vm8451_vm11, %v2547_v35, %v2551_v14  ;;  %71 = vst [vmem:[#allocation2 + $0x8c] sm:$0x1] %v70_v41  ;;  %v397_v54 = vshrl.u32 %v272_v30, 16  ;;  %v400_v50 = vshll.u32 %v272_v30, 16 }
  0x97   :  { %v7945_v59 = vcombine.low %v5238_v27, %v5248_v49  ;;  %v7818_v60 = vcombine.low %v2542_v20, %v2552_v46  ;;  %v2366_v61 = vsel %vm8451_vm11, %v2361_v39, %v2365_v37  ;;  %v2369_v11 = vrot.slane %v2367_v8, 4  ;;  %v4747_v8 = vld [vmem:[#allocation2 + $0xc4] sm:$0x1] }
  0x98   :  { %v2375_v55 = vrot.slane %v2373_v17, 5  ;;  %v399_v0 = vrot.slane %v397_v54, 7  ;;  %v405_v28 = vshrl.u32 %v273_v38, 16  ;;  %v408_v2 = vshll.u32 %v273_v38, 16  ;;  %v1841_v46 = vld [vmem:[#allocation2 + $0x84] sm:$0xf] }
  0x99   :  { %6605 = vrot.lane.b32.xlu0 %v7945_v59, %s8292_s15  ;;  %3705 = vrot.lane.b32.xlu1 %v7805_v6, %s8291_s14  ;;  %v2370_v33 = vor.u32 %v2369_v11, %v2365_v37  ;;  %v58_v42 = vsel %vm8324_vm3, 0, %v57_v43  ;;  %v329_v44 = vshrl.u32 %v264_v45, 16  ;;  %v332_v27 = vshll.u32 %v264_v45, 16  ;;  %v4767_v6 = vld [vmem:[#allocation2 + $0x114] sm:$0x1] }
  0x9a   :  { %v402_v52 = vor.u32 %v400_v50, %v399_v0  ;;  %v403_v4 = vrot.slane %v399_v0, 4  ;;  %v407_v36 = vrot.slane %v405_v28, 7  ;;  %59 = vst [vmem:[#allocation2 + $0x3c] sm:$0x1] %v58_v42  ;;  %v337_v12 = vshrl.u32 %v265_v57, 16 }
  0x9b   :  { %v2371_v16 = vrot.slane %v2370_v33, 4  ;;  %v331_v19 = vrot.slane %v329_v44, 7  ;;  %v340_v20 = vshll.u32 %v265_v57, 16  ;;  %v177_v47 = vsel %vm8337_vm6, 0, %v176_v40 }
  0x9c   :  { %v410_v5 = vor.u32 %v408_v2, %v407_v36  ;;  %v412_v3 = vrot.slane %v407_v36, 4  ;;  %v339_v26 = vrot.slane %v337_v12, 7  ;;  %178 = vst [vmem:[#allocation2 + $0x94] sm:$0x1] %v177_v47  ;;  %v165_v30 = vsel %vm8337_vm6, 0, %v164_v9  ;;  %v8161_v12 = vld [vmem:[#allocation2 + $0x10c] sm:$0xff]  }
  0x9d   :  { %3689 = vrot.lane.b32.xlu0 %v7797_v34, %s8291_s14  ;;  %3731 = vrot.lane.b32.xlu1 %v7818_v60, %s8291_s14  ;;  %v2376_v15 = vsel %vm8451_vm11, %v2371_v16, %v2375_v55  ;;  %v659_v22 = vld [vmem:[#allocation2 + $0x8c] sm:$0xf]  ;;  %v334_v14 = vor.u32 %v332_v27, %v331_v19  ;;  %v335_v51 = vrot.slane %v331_v19, 4  ;;  %166 = vst [vmem:[#allocation2 + $0x44] sm:$0x1] %v165_v30  ;;  %v5427_v35 = vrot.slane %v5425_v56, 4 }
  0x9e   :  { %v7810_v37 = vcombine.low %v2366_v61, %v2376_v15  ;;  %v411_v38 = vsel %vm8353_vm7, %v403_v4, %v410_v5  ;;  %v660_v39 = vsel %vm8375_vm8, %v402_v52, %v659_v22  ;;  %v342_v34 = vor.u32 %v340_v20, %v339_v26 }
  0x9f   :  { %661 = vst [vmem:[#allocation2 + $0x8c] sm:$0xf] %v660_v39  ;;  %662 = vst.msk [vmem:[#allocation2 + $0x90] sm:$0xf] %vm21_vm0, %v411_v38  ;;  %v344_v17 = vrot.slane %v339_v26, 4  ;;  %v5428_v41 = vor.u32 %v5427_v35, %v8796_v13  ;;  %v5431_v43 = vshll.u32 %v4766_v48, 16 }
  0xa0   :  { %v5435_v49 = vshrl.u32 %v4766_v48, 16  ;;  %v343_v62 = vsel %vm8353_vm7, %v335_v51, %v342_v34  ;;  %v5441_v56 = vshll.u32 %v4767_v6, 16  ;;  %v5251_v54 = vrot.slane %v5249_v25, 4 }
  0xa1   :  { %v5255_v50 = vshll.u32 %v4746_v58, 16  ;;  %3715 = vrot.lane.b32.xlu0 %v7810_v37, %s8291_s14  ;;  %v631_v45 = vld [vmem:[#allocation2 + $0x3c] sm:$0xf]  ;;  %634 = vst.msk [vmem:[#allocation2 + $0x40] sm:$0xf] %vm21_vm0, %v343_v62  ;;  %v5429_v57 = vrot.slane %v5428_v41, 4 }
  0xa2   :  { %v5433_v59 = vrot.slane %v5431_v43, 5  ;;  %v5437_v60 = vrot.slane %v5435_v49, 4  ;;  %v5259_v13 = vshrl.u32 %v4746_v58, 16  ;;  %v632_v61 = vsel %vm8375_vm8, %v334_v14, %v631_v45 }
  0xa3   :  { %v5443_v11 = vrot.slane %v5441_v56, 5  ;;  %v5252_v55 = vor.u32 %v5251_v54, %v8824_v32  ;;  %v5257_v0 = vrot.slane %v5255_v50, 5  ;;  %633 = vst [vmem:[#allocation2 + $0x3c] sm:$0xf] %v632_v61  ;;  %v663_v18 = vld [vmem:[#allocation2 + $0x94] sm:$0x1] }
  0xa4   :  { %v5438_v25 = vor.u32 %v5437_v60, %v5433_v59  ;;  %v5261_v28 = vrot.slane %v5259_v13, 4  ;;  %v5265_v2 = vshll.u32 %v4747_v8, 16  ;;  %v664_v40 = vsel %vm8324_vm3, %v412_v3, %v663_v18  ;;  %v635_v33 = vld [vmem:[#allocation2 + $0x44] sm:$0x1]  ;;  %v8162_v8 = vld [vmem:[#allocation2 + $0xbc] sm:$0xff]  }
  0xa5   :  { %v5253_v42 = vrot.slane %v5252_v55, 4  ;;  %v2271_v44 = vrot.slane %v2269_v29, 4  ;;  %v2275_v27 = vshll.u32 %v1841_v46, 16  ;;  %665 = vst [vmem:[#allocation2 + $0x94] sm:$0x1] %v664_v40  ;;  %v636_v9 = vsel %vm8324_vm3, %v344_v17, %v635_v33 }
  0xa6   :  { %v5439_v32 = vrot.slane %v5438_v25, 4  ;;  %v5262_v52 = vor.u32 %v5261_v28, %v5257_v0  ;;  %v5267_v4 = vrot.slane %v5265_v2, 5  ;;  %v8159_v36 = vld [vmem:[#allocation2 + $0x8c] sm:$0xff]   ;;  %637 = vst [vmem:[#allocation2 + $0x44] sm:$0x1] %v636_v9  ;;  %v5434_v48 = vsel %vm8451_vm11, %v5429_v57, %v5433_v59 }
  0xa7   :  { %v2272_v16 = vor.u32 %v2271_v44, %v8775_v23  ;;  %v8884_v19 = vrot.slane %v2275_v27, 5  ;;  %v4733_v10 = vld [vmem:[#allocation2 + $0x8c] sm:$0xf]  ;;  %v4734_v29 = vld [vmem:[#allocation2 + $0x90] sm:$0xf]  ;;  %v5258_v47 = vsel %vm8451_vm11, %v5253_v42, %v5257_v0  ;;  %v2279_v58 = vshrl.u32 %v1841_v46, 16  ;;  %4454 = vrot.lane.b32.xlu1 %v8159_v36, %s8290_s11 }
  0xa8   :  { %v5444_v20 = vsel %vm8451_vm11, %v5439_v32, %v5443_v11  ;;  %v5263_v6 = vrot.slane %v5262_v52, 4  ;;  %v5138_v5 = vshrl.u32 %v4733_v10, 16  ;;  %v5141_v3 = vshll.u32 %v4733_v10, 16  ;;  %v4714_v15 = vld [vmem:[#allocation2 + $0x40] sm:$0xf]  ;;  %v8912_v11 = vpop.permute.xlu1 %4430 }
  0xa9   :  { %v5147_v26 = vshll.u32 %v4734_v29, 16  ;;  %v5151_v30 = vshrl.u32 %v4734_v29, 16  ;;  %v2093_v23 = vshrl.u32 %v8764_v24, 16  ;;  %v8894_v14 = vrot.slane %v2272_v16, 4  ;;  %v1842_v13 = vld [vmem:[#allocation2 + $0x88] sm:$0x1] }
  0xaa   :  { %v5268_v22 = vsel %vm8451_vm11, %v5263_v6, %v5267_v4  ;;  %v2281_v51 = vrot.slane %v2279_v58, 4  ;;  %v8160_v35 = vld [vmem:[#allocation2 + $0x3c] sm:$0xff]   ;;  %v5140_v37 = vrot.slane %v5138_v5, 4  ;;  %v5143_v38 = vrot.slane %v5141_v3, 5  ;;  %v1821_v42 = vld [vmem:[#allocation2 + $0x34] sm:$0xf]  ;;  %v8927_v3 = vpop.permute.xlu0 %4446 }
  0xab   :  { %v5149_v39 = vrot.slane %v5147_v26, 5  ;;  %v8896_v34 = vcombine.low %v5434_v48, %v5444_v20  ;;  %v5153_v17 = vrot.slane %v5151_v30, 4  ;;  %v4713_v41 = vld [vmem:[#allocation2 + $0x3c] sm:$0xf]  ;;  %v4971_v43 = vshll.u32 %v4714_v15, 16  ;;  %4438 = vrot.lane.b32.xlu0 %v8160_v35, %s8290_s11  ;;  %4480 = vrot.lane.b32.xlu1 %v8161_v12, %s8290_s11 }
  0xac   :  { %v4975_v49 = vshrl.u32 %v4714_v15, 16  ;;  %v8898_v46 = vcombine.low %v5258_v47, %v5268_v22  ;;  %v8902_v24 = vld [vmem:[#allocation2 + $0x94] sm:$0xf]  ;;  %v5144_v62 = vor.u32 %v5143_v38, %v5140_v37  ;;  %v4962_v56 = vshrl.u32 %v4713_v41, 16  ;;  %v1822_v52 = vld [vmem:[#allocation2 + $0x38] sm:$0x1]  ;;  %v8929_v26 = vpop.permute.xlu1 %4448 }
  0xad   :  { %v4965_v54 = vshll.u32 %v4713_v41, 16  ;;  %v2282_v50 = vor.u32 %v2281_v51, %v8884_v19  ;;  %v5154_v45 = vor.u32 %v5153_v17, %v5149_v39  ;;  %v5157_v57 = vshll.u32 %v8902_v24, 16  ;;  %v8906_v59 = vld [vmem:[#allocation2 + $0x44] sm:$0xf]  ;;  %v1874_v22 = vld [vmem:[#allocation2 + $0x108] sm:$0xf] }
  0xae   :  { %v4973_v60 = vrot.slane %v4971_v43, 5  ;;  %v2278_v61 = vsel %vm8451_vm11, %v8894_v14, %v8884_v19  ;;  %v5145_v55 = vrot.slane %v5144_v62, 4  ;;  %v4964_v0 = vrot.slane %v4962_v56, 4  ;;  %v1873_v16 = vld [vmem:[#allocation2 + $0x104] sm:$0xf] }
  0xaf   :  { %v4967_v18 = vrot.slane %v4965_v54, 5  ;;  %v4977_v25 = vrot.slane %v4975_v49, 4  ;;  %v5155_v28 = vrot.slane %v5154_v45, 4  ;;  %v8914_v2 = vrot.slane %v5157_v57, 5  ;;  %4464 = vrot.lane.b32.xlu0 %v8162_v8, %s8290_s11  ;;  %v8939_v38 = vld [vmem:[#allocation2 + $0x10c] sm:$0xf] }
  0xb0   :  { %v5161_v40 = vshrl.u32 %v8902_v24, 16  ;;  %v4981_v33 = vshll.u32 %v8906_v59, 16  ;;  %v5150_v44 = vsel %vm8451_vm11, %v5145_v55, %v5149_v39  ;;  %v2283_v32 = vrot.slane %v2282_v50, 4  ;;  %v1853_v39 = vld [vmem:[#allocation2 + $0xb4] sm:$0xf] }
  0xb1   :  { %v4968_v27 = vor.u32 %v4967_v18, %v4964_v0  ;;  %v4978_v9 = vor.u32 %v4977_v25, %v4973_v60  ;;  %v5160_v4 = vsel %vm8451_vm11, %v5155_v28, %v8914_v2  ;;  %v2285_v12 = vshll.u32 %v1842_v13, 16  ;;  %v1854_v50 = vld [vmem:[#allocation2 + $0xb8] sm:$0xf]  ;;  %v8948_v13 = vld [vmem:[#allocation2 + $0xbc] sm:$0xf] }
  0xb2   :  { %v8924_v36 = vrot.slane %v4981_v33, 5  ;;  %v2095_v48 = vrot.slane %v2093_v23, 4  ;;  %v7941_v19 = vcombine.low %v5150_v44, %v5160_v4  ;;  %v2099_v20 = vshll.u32 %v1821_v42, 16  ;;  %v90_v28 = vld [vmem:[#allocation2 + $0x118] sm:$0x1] }
  0xb3   :  { %v4969_v10 = vrot.slane %v4968_v27, 4  ;;  %v4979_v29 = vrot.slane %v4978_v9, 4  ;;  %v2287_v47 = vrot.slane %v2285_v12, 5  ;;  %v2103_v58 = vshrl.u32 %v1821_v42, 16  ;;  %v286_v33 = vld [vmem:[%s11544_s0 + $0x68] sm:$0xf]  ;;  %v8953_v42 = vpop.permute.xlu0 %4432 }
  0xb4   :  { %v2096_v6 = vor.u32 %v2095_v48, %v8788_v63  ;;  %v2109_v5 = vshll.u32 %v1822_v52, 16  ;;  %6597 = vrot.lane.b32.xlu1 %v7941_v19, %s8292_s15  ;;  %v2101_v15 = vrot.slane %v2099_v20, 5  ;;  %v2554_v14 = vshrl.u32 %v1873_v16, 16 }
  0xb5   :  { %v4974_v30 = vsel %vm8451_vm11, %v4969_v10, %v4973_v60  ;;  %v4984_v23 = vsel %vm8451_vm11, %v4979_v29, %v8924_v36  ;;  %v2288_v63 = vsel %vm8451_vm11, %v2283_v32, %v2287_v47  ;;  %v2105_v37 = vrot.slane %v2103_v58, 4  ;;  %v78_v47 = vld [vmem:[#allocation2 + $0xc8] sm:$0x1] }
  0xb6   :  { %v7933_v51 = vcombine.low %v4974_v30, %v4984_v23  ;;  %v2097_v35 = vrot.slane %v2096_v6, 4  ;;  %v4985_v8 = vshrl.u32 %v8906_v59, 16  ;;  %v7806_v17 = vcombine.low %v2278_v61, %v2288_v63  ;;  %v278_v30 = vld [vmem:[%s11544_s0 + $0x48] sm:$0xf] }
  0xb7   :  { %v2556_v41 = vrot.slane %v2554_v14, 4  ;;  %v2557_v43 = vshll.u32 %v1873_v16, 16  ;;  %v2106_v49 = vor.u32 %v2105_v37, %v2101_v15  ;;  %v2111_v62 = vrot.slane %v2109_v5, 5  ;;  %v287_v16 = vld [vmem:[%s11544_s0 + $0x6c] sm:$0xf] }
  0xb8   :  { %6581 = vrot.lane.b32.xlu0 %v7933_v51, %s8292_s15  ;;  %v2563_v56 = vshll.u32 %v1874_v22, 16  ;;  %v2567_v54 = vshrl.u32 %v1874_v22, 16  ;;  %6623 = vrot.lane.b32.xlu1 %v8896_v34, %s8292_s15  ;;  %v2102_v45 = vsel %vm8451_vm11, %v2097_v35, %v2101_v15  ;;  %v2573_v60 = vshll.u32 %v8939_v38, 16  ;;  %v8955_v34 = vpop.permute.xlu1 %4450  ;;  %v279_v51 = vld [vmem:[%s11544_s0 + $0x4c] sm:$0xf] }
  0xb9   :  { %v2559_v57 = vrot.slane %v2557_v43, 5  ;;  %v2378_v61 = vshrl.u32 %v1853_v39, 16  ;;  %v2107_v55 = vrot.slane %v2106_v49, 4  ;;  %v2381_v25 = vshll.u32 %v1853_v39, 16 }
  0xba   :  { %v2565_v0 = vrot.slane %v2563_v56, 5  ;;  %v2569_v18 = vrot.slane %v2567_v54, 4  ;;  %v8957_v27 = vrot.slane %v2573_v60, 5  ;;  %v2387_v32 = vshll.u32 %v1854_v50, 16  ;;  %v8163_v60 = vld [vmem:[#allocation2 + $0x94] sm:$0xff]  }
  0xbb   :  { %v2560_v44 = vor.u32 %v2559_v57, %v2556_v41  ;;  %v2380_v9 = vrot.slane %v2378_v61, 4  ;;  %v2112_v52 = vsel %vm8451_vm11, %v2107_v55, %v2111_v62  ;;  %v2383_v12 = vrot.slane %v2381_v25, 5  ;;  %v4736_v25 = vld [vmem:[#allocation2 + $0x98] sm:$0xf] }
  0xbc   :  { %6607 = vrot.lane.b32.xlu0 %v8898_v46, %s8292_s15  ;;  %v2570_v4 = vor.u32 %v2569_v18, %v2565_v0  ;;  %v2391_v48 = vshrl.u32 %v1854_v50, 16  ;;  %3707 = vrot.lane.b32.xlu1 %v7806_v17, %s8291_s14  ;;  %v7798_v19 = vcombine.low %v2102_v45, %v2112_v52  ;;  %v2389_v29 = vrot.slane %v2387_v32, 5  ;;  %v8985_v17 = vpop.permute.xlu0 %4434  ;;  %v8987_v41 = vpop.permute.xlu1 %3697  ;;  %v4737_v32 = vld [vmem:[#allocation2 + $0x9c] sm:$0x1] }
  0xbd   :  { %v2561_v10 = vrot.slane %v2560_v44, 4  ;;  %v2397_v20 = vshll.u32 %v8948_v13, 16  ;;  %v2577_v46 = vshrl.u32 %v8939_v38, 16  ;;  %v2384_v58 = vor.u32 %v2383_v12, %v2380_v9 }
  0xbe   :  { %v2571_v6 = vrot.slane %v2570_v4, 4  ;;  %v2393_v5 = vrot.slane %v2391_v48, 4  ;;  %v91_v22 = vsel %vm8324_vm3, 0, %v90_v28  ;;  %v516_v14 = vshrl.u32 %v286_v33, 16 }
  0xbf   :  { %v2566_v23 = vsel %vm8451_vm11, %v2561_v10, %v2565_v0  ;;  %v8974_v15 = vrot.slane %v2397_v20, 5  ;;  %v2385_v35 = vrot.slane %v2384_v58, 4  ;;  %92 = vst [vmem:[#allocation2 + $0x118] sm:$0x1] %v91_v22  ;;  %v519_v39 = vshll.u32 %v286_v33, 16 }
  0xc0   :  { %3691 = vrot.lane.b32.xlu0 %v7798_v19, %s8291_s14  ;;  %v2576_v63 = vsel %vm8451_vm11, %v2571_v6, %v8957_v27  ;;  %v2394_v37 = vor.u32 %v2393_v5, %v2389_v29  ;;  %v518_v49 = vrot.slane %v516_v14, 7  ;;  %v524_v62 = vshrl.u32 %v287_v16, 16  ;;  %v9005_v6 = vpop.permute.xlu0 %3681  ;;  %v9007_v58 = vpop.permute.xlu1 %6573  ;;  %v8164_v5 = vld [vmem:[#allocation2 + $0x44] sm:$0xff]   ;;  %v197_v14 = vld [vmem:[#allocation2 + $0x120] sm:$0x1] }
  0xc1   :  { %v7819_v43 = vcombine.low %v2566_v23, %v2576_v63  ;;  %v527_v56 = vshll.u32 %v287_v16, 16  ;;  %v2390_v54 = vsel %vm8451_vm11, %v2385_v35, %v2389_v29  ;;  %v79_v45 = vsel %vm8324_vm3, 0, %v78_v47  ;;  %v4716_v16 = vld [vmem:[#allocation2 + $0x48] sm:$0xf]  ;;  %v4717_v47 = vld [vmem:[#allocation2 + $0x4c] sm:$0x1] }
  0xc2   :  { %v2395_v50 = vrot.slane %v2394_v37, 4  ;;  %v448_v57 = vshrl.u32 %v278_v30, 16  ;;  %v521_v61 = vor.u32 %v519_v39, %v518_v49  ;;  %v522_v55 = vrot.slane %v518_v49, 4  ;;  %80 = vst [vmem:[#allocation2 + $0xc8] sm:$0x1] %v79_v45 }
  0xc3   :  { %3733 = vrot.lane.b32.xlu1 %v7819_v43, %s8291_s14  ;;  %v8994_v0 = vrot.slane %v524_v62, 7  ;;  %v451_v18 = vshll.u32 %v278_v30, 16  ;;  %v456_v44 = vshrl.u32 %v279_v51, 16  ;;  %v459_v9 = vshll.u32 %v279_v51, 16  ;;  %v185_v39 = vld [vmem:[#allocation2 + $0xd0] sm:$0x1] }
  0xc4   :  { %v2400_v28 = vsel %vm8451_vm11, %v2395_v50, %v8974_v15  ;;  %v450_v33 = vrot.slane %v448_v57, 7  ;;  %v2401_v52 = vshrl.u32 %v8948_v13, 16  ;;  %v5163_v48 = vrot.slane %v5161_v40, 4  ;;  %v1843_v43 = vld [vmem:[#allocation2 + $0x8c] sm:$0xf] }
  0xc5   :  { %v7811_v4 = vcombine.low %v2390_v54, %v2400_v28  ;;  %v529_v12 = vor.u32 %v527_v56, %v8994_v0  ;;  %v9003_v29 = vrot.slane %v456_v44, 7  ;;  %v5167_v20 = vshll.u32 %v4736_v25, 16  ;;  %v9022_v54 = vld [vmem:[#allocation2 + $0x90] sm:$0xf] }
  0xc6   :  { %v453_v19 = vor.u32 %v451_v18, %v450_v33  ;;  %v454_v10 = vrot.slane %v450_v33, 4  ;;  %v708_v40 = vld [vmem:[#allocation2 + $0x118] sm:$0xf]  ;;  %v5164_v30 = vor.u32 %v5163_v48, %v8914_v2  ;;  %v5171_v23 = vshrl.u32 %v4736_v25, 16 }
  0xc7   :  { %3717 = vrot.lane.b32.xlu0 %v7811_v4, %s8291_s14  ;;  %4456 = vrot.lane.b32.xlu1 %v8163_v60, %s8290_s11  ;;  %v530_v24 = vsel %vm8353_vm7, %v522_v55, %v529_v12  ;;  %v5177_v22 = vshll.u32 %v4737_v32, 16  ;;  %v531_v51 = vrot.slane %v8994_v0, 4  ;;  %v709_v63 = vsel %vm8375_vm8, %v521_v61, %v708_v40  ;;  %v9035_v32 = vpop.permute.xlu0 %3683  ;;  %v9037_v4 = vpop.permute.xlu1 %3699 }
  0xc8   :  { %711 = vst.msk [vmem:[#allocation2 + $0x11c] sm:$0xf] %vm21_vm0, %v530_v24  ;;  %v461_v35 = vor.u32 %v459_v9, %v9003_v29  ;;  %v5169_v37 = vrot.slane %v5167_v20, 5  ;;  %710 = vst [vmem:[#allocation2 + $0x118] sm:$0xf] %v709_v63  ;;  %v463_v49 = vrot.slane %v9003_v29, 4 }
  0xc9   :  { %v5165_v62 = vrot.slane %v5164_v30, 4  ;;  %v5173_v2 = vrot.slane %v5171_v23, 4  ;;  %v4987_v56 = vrot.slane %v4985_v8, 4  ;;  %v680_v45 = vld [vmem:[#allocation2 + $0xc8] sm:$0xf]  ;;  %v4991_v57 = vshll.u32 %v4716_v16, 16 }
  0xca   :  { %v462_v50 = vsel %vm8353_vm7, %v454_v10, %v461_v35  ;;  %v4995_v60 = vshrl.u32 %v4716_v16, 16  ;;  %v5001_v61 = vshll.u32 %v4717_v47, 16  ;;  %v681_v55 = vsel %vm8375_vm8, %v453_v19, %v680_v45  ;;  %v9031_v8 = vld [vmem:[#allocation2 + $0x94] sm:$0xf]  ;;  %v9078_v29 = vld [vmem:[#allocation2 + $0x44] sm:$0xf] }
  0xcb   :  { %4440 = vrot.lane.b32.xlu0 %v8164_v5, %s8290_s11  ;;  %683 = vst.msk [vmem:[#allocation2 + $0xcc] sm:$0xf] %vm21_vm0, %v462_v50  ;;  %v5174_v18 = vor.u32 %v5173_v2, %v5169_v37  ;;  %v5179_v25 = vrot.slane %v5177_v22, 5  ;;  %v4988_v59 = vor.u32 %v4987_v56, %v8924_v36  ;;  %682 = vst [vmem:[#allocation2 + $0xc8] sm:$0xf] %v681_v55  ;;  %v4993_v28 = vrot.slane %v4991_v57, 5  ;;  %v9055_v57 = vpop.permute.xlu0 %6589 }
  0xcc   :  { %v4997_v33 = vrot.slane %v4995_v60, 4  ;;  %v5003_v44 = vrot.slane %v5001_v61, 5  ;;  %v198_v9 = vsel %vm8337_vm6, 0, %v197_v14  ;;  %v186_v16 = vsel %vm8337_vm6, 0, %v185_v39  ;;  %v9057_v60 = vpop.permute.xlu1 %6591  ;;  %11577 = vst [vmem:[#allocation9_spill] sm:$0xff] %v9078_v29 }
  0xcd   :  { %v5175_v12 = vrot.slane %v5174_v18, 4  ;;  %v4989_v48 = vrot.slane %v4988_v59, 4  ;;  %199 = vst [vmem:[#allocation2 + $0x120] sm:$0x1] %v198_v9  ;;  %v2290_v36 = vshrl.u32 %v1843_v43, 16  ;;  %v2293_v10 = vshll.u32 %v1843_v43, 16 }
  0xce   :  { %v4998_v19 = vor.u32 %v4997_v33, %v4993_v28  ;;  %187 = vst [vmem:[#allocation2 + $0xd0] sm:$0x1] %v186_v16  ;;  %v2299_v20 = vshll.u32 %v9022_v54, 16  ;;  %v2303_v47 = vshrl.u32 %v9022_v54, 16  ;;  %v5170_v5 = vsel %vm8451_vm11, %v5165_v62, %v5169_v37 }
  0xcf   :  { %v5180_v24 = vsel %vm8451_vm11, %v5175_v12, %v5179_v25  ;;  %v4769_v40 = vld [vmem:[#allocation2 + $0x11c] sm:$0xf]  ;;  %v2292_v30 = vrot.slane %v2290_v36, 4  ;;  %v2309_v23 = vshll.u32 %v9031_v8, 16  ;;  %v4994_v14 = vsel %vm8451_vm11, %v4989_v48, %v4993_v28  ;;  %v4768_v35 = vld [vmem:[#allocation2 + $0x118] sm:$0xf] }
  0xd0   :  { %v8165_v22 = vld [vmem:[#allocation2 + $0x118] sm:$0xff]   ;;  %v4999_v63 = vrot.slane %v4998_v19, 4  ;;  %v5446_v39 = vshrl.u32 %v4768_v35, 16  ;;  %v5449_v43 = vshll.u32 %v4768_v35, 16  ;;  %v5455_v2 = vshll.u32 %v4769_v40, 16 }
  0xd1   :  { %v5459_v56 = vshrl.u32 %v4769_v40, 16  ;;  %4482 = vrot.lane.b32.xlu1 %v8165_v22, %s8290_s11  ;;  %v7942_v37 = vcombine.low %v5170_v5, %v5180_v24  ;;  %v2295_v50 = vrot.slane %v2293_v10, 5  ;;  %v9053_v45 = vrot.slane %v2299_v20, 5  ;;  %v1823_v40 = vld [vmem:[#allocation2 + $0x3c] sm:$0xf] }
  0xd2   :  { %v5004_v62 = vsel %vm8451_vm11, %v4999_v63, %v5003_v44  ;;  %v4749_v54 = vld [vmem:[#allocation2 + $0xcc] sm:$0xf]  ;;  %v5448_v55 = vrot.slane %v5446_v39, 4  ;;  %v5451_v18 = vrot.slane %v5449_v43, 5  ;;  %v9059_v25 = vrot.slane %v5455_v2, 5 }
  0xd3   :  { %v8166_v61 = vld [vmem:[#allocation2 + $0xc8] sm:$0xff]   ;;  %v7934_v59 = vcombine.low %v4994_v14, %v5004_v62  ;;  %v5461_v33 = vrot.slane %v5459_v56, 4  ;;  %v5279_v12 = vshll.u32 %v4749_v54, 16  ;;  %v2296_v48 = vor.u32 %v2295_v50, %v2292_v30  ;;  %v1824_v63 = vld [vmem:[#allocation2 + $0x40] sm:$0xf]  ;;  %v9080_v56 = vpop.permute.xlu0 %6575 }
  0xd4   :  { %v712_v28 = vld [vmem:[#allocation2 + $0x120] sm:$0x1]  ;;  %v4748_v9 = vld [vmem:[#allocation2 + $0xc8] sm:$0xf]  ;;  %4466 = vrot.lane.b32.xlu0 %v8166_v61, %s8290_s11  ;;  %v5452_v16 = vor.u32 %v5451_v18, %v5448_v55  ;;  %v5283_v0 = vshrl.u32 %v4749_v54, 16  ;;  %v2305_v43 = vrot.slane %v2303_v47, 4 }
  0xd5   :  { %v713_v44 = vsel %vm8324_vm3, %v531_v51, %v712_v28  ;;  %v684_v36 = vld [vmem:[#allocation2 + $0xd0] sm:$0x1]  ;;  %v5270_v19 = vshrl.u32 %v4748_v9, 16  ;;  %v5273_v10 = vshll.u32 %v4748_v9, 16  ;;  %6599 = vrot.lane.b32.xlu1 %v7942_v37, %s8292_s15  ;;  %v5462_v20 = vor.u32 %v5461_v33, %v9059_v25 }
  0xd6   :  { %714 = vst [vmem:[#allocation2 + $0x120] sm:$0x1] %v713_v44  ;;  %v685_v5 = vsel %vm8324_vm3, %v463_v49, %v684_v36  ;;  %v9072_v24 = vrot.slane %v5279_v12, 5  ;;  %v9074_v30 = vrot.slane %v5452_v16, 4  ;;  %v2297_v14 = vrot.slane %v2296_v48, 4  ;;  %v9082_v49 = vpop.permute.xlu1 %3701 }
  0xd7   :  { %686 = vst [vmem:[#allocation2 + $0xd0] sm:$0x1] %v685_v5  ;;  %v5272_v51 = vrot.slane %v5270_v19, 4  ;;  %v5275_v22 = vrot.slane %v5273_v10, 5  ;;  %v5463_v35 = vrot.slane %v5462_v20, 4  ;;  %v5285_v39 = vrot.slane %v5283_v0, 4 }
  0xd8   :  { %v9076_v2 = vrot.slane %v2309_v23, 5  ;;  %6583 = vrot.lane.b32.xlu0 %v7934_v59, %s8292_s15  ;;  %v5458_v37 = vsel %vm8451_vm11, %v9074_v30, %v9059_v25  ;;  %v2302_v47 = vsel %vm8451_vm11, %v2297_v14, %v9053_v45  ;;  %v2306_v50 = vor.u32 %v2305_v43, %v9053_v45  ;;  %v1876_v44 = vld [vmem:[#allocation2 + $0x110] sm:$0xf]  ;;  %v1877_v43 = vld [vmem:[#allocation2 + $0x114] sm:$0x1]  ;;  %v8184_v5 = vld [vmem:[#allocation2 + $0xa0] sm:$0xff]  }
  0xd9   :  { %v5276_v62 = vor.u32 %v5275_v22, %v5272_v51  ;;  %v5286_v54 = vor.u32 %v5285_v39, %v9072_v24  ;;  %v2114_v61 = vshrl.u32 %v1823_v40, 16  ;;  %v2117_v55 = vshll.u32 %v1823_v40, 16  ;;  %v9110_v51 = vpop.permute.xlu0 %3685 }
  0xda   :  { %11576 = vst [vmem:[#allocation8_spill] sm:$0xff] %v9076_v2  ;;  %v2123_v59 = vshll.u32 %v1824_v63, 16  ;;  %v2127_v28 = vshrl.u32 %v1824_v63, 16  ;;  %v2133_v33 = vshll.u32 %v9078_v29, 16  ;;  %v2307_v25 = vrot.slane %v2306_v50, 4  ;;  %v9112_v22 = vpop.permute.xlu1 %6593 }
  0xdb   :  { %v5277_v18 = vrot.slane %v5276_v62, 4  ;;  %v5287_v9 = vrot.slane %v5286_v54, 4  ;;  %v2116_v12 = vrot.slane %v2114_v61, 4  ;;  %v2119_v48 = vrot.slane %v2117_v55, 5  ;;  %11579 = vst [vmem:[#allocation11_spill] sm:$0xff] %v9112_v22 }
  0xdc   :  { %v2125_v19 = vrot.slane %v2123_v59, 5  ;;  %v2129_v45 = vrot.slane %v2127_v28, 4  ;;  %v9101_v10 = vrot.slane %v2133_v33, 5  ;;  %v2312_v40 = vsel %vm8451_vm11, %v2307_v25, %v9076_v2  ;;  %v1856_v55 = vld [vmem:[#allocation2 + $0xc0] sm:$0xf] }
  0xdd   :  { %v9096_v16 = vld [vmem:[#allocation2 + $0x120] sm:$0xf]  ;;  %v5282_v36 = vsel %vm8451_vm11, %v5277_v18, %v9072_v24  ;;  %v2120_v30 = vor.u32 %v2119_v48, %v2116_v12  ;;  %v7807_v63 = vcombine.low %v2302_v47, %v2312_v40  ;;  %v2579_v61 = vrot.slane %v2577_v46, 4  ;;  %v1857_v25 = vld [vmem:[#allocation2 + $0xc4] sm:$0x1] }
  0xde   :  { %11578 = vst [vmem:[#allocation10_spill] sm:$0xff] %v9101_v10  ;;  %v5465_v20 = vshll.u32 %v9096_v16, 16  ;;  %v9105_v0 = vld [vmem:[#allocation2 + $0xd0] sm:$0xf]  ;;  %v2130_v39 = vor.u32 %v2129_v45, %v2125_v19  ;;  %v2583_v28 = vshll.u32 %v1876_v44, 16  ;;  %v2587_v33 = vshrl.u32 %v1876_v44, 16 }
  0xdf   :  { %v5289_v24 = vshll.u32 %v9105_v0, 16  ;;  %v2121_v54 = vrot.slane %v2120_v30, 4  ;;  %v2580_v48 = vor.u32 %v2579_v61, %v8957_v27  ;;  %v2593_v45 = vshll.u32 %v1877_v43, 16  ;;  %v4738_v40 = vld [vmem:[#allocation2 + $0xa0] sm:$0xf]  ;;  %v9137_v27 = vpop.permute.xlu1 %3703 }
  0xe0   :  { %v9116_v62 = vrot.slane %v5465_v20, 5  ;;  %v2131_v59 = vrot.slane %v2130_v39, 4  ;;  %v2585_v44 = vrot.slane %v2583_v28, 5  ;;  %v2589_v39 = vrot.slane %v2587_v33, 4  ;;  %v4739_v50 = vld [vmem:[#allocation2 + $0xa4] sm:$0xf] }
  0xe1   :  { %v9121_v18 = vrot.slane %v5289_v24, 5  ;;  %v2126_v12 = vsel %vm8451_vm11, %v2121_v54, %v2125_v19  ;;  %v9135_v19 = vpop.permute.xlu0 %6577  ;;  %v2407_v43 = vshll.u32 %v1856_v55, 16  ;;  %v2411_v54 = vshrl.u32 %v1856_v55, 16  ;;  %v9142_v61 = vld [vmem:[#allocation2 + $0xa8] sm:$0xf] }
  0xe2   :  { %v5468_v47 = vsel %vm8451_vm11, %v5463_v35, %v9116_v62  ;;  %v2136_v46 = vsel %vm8451_vm11, %v2131_v59, %v9101_v10  ;;  %v2581_v35 = vrot.slane %v2580_v48, 4  ;;  %11580 = vst [vmem:[#allocation12_spill] sm:$0xff] %v9135_v19  ;;  %11581 = vst [vmem:[#allocation13_spill] sm:$0xff] %v9142_v61  ;;  %v2590_v59 = vor.u32 %v2589_v39, %v2585_v44  ;;  %v4718_v55 = vld [vmem:[#allocation2 + $0x50] sm:$0xf] }
  0xe3   :  { %v7955_v20 = vcombine.low %v5458_v37, %v5468_v47  ;;  %v5292_v38 = vsel %vm8451_vm11, %v5287_v9, %v9121_v18  ;;  %v7799_v24 = vcombine.low %v2126_v12, %v2136_v46  ;;  %v2595_v37 = vrot.slane %v2593_v45, 5  ;;  %v9156_v39 = vld [vmem:[#allocation2 + $0x58] sm:$0xf]  ;;  %v4771_v22 = vld [vmem:[#allocation2 + $0x124] sm:$0xf] }
  0xe4   :  { %v7947_v30 = vcombine.low %v5282_v36, %v5292_v38  ;;  %v2403_v9 = vrot.slane %v2401_v52, 4  ;;  %v2586_v36 = vsel %vm8451_vm11, %v2581_v35, %v2585_v44  ;;  %v2417_v28 = vshll.u32 %v1857_v25, 16  ;;  %v4719_v35 = vld [vmem:[#allocation2 + $0x54] sm:$0xf] }
  0xe5   :  { %6625 = vrot.lane.b32.xlu1 %v7955_v20, %s8292_s15  ;;  %v5182_v33 = vshrl.u32 %v4738_v40, 16  ;;  %v2409_v12 = vrot.slane %v2407_v43, 5  ;;  %v2413_v48 = vrot.slane %v2411_v54, 4  ;;  %v5185_v45 = vshll.u32 %v4738_v40, 16  ;;  %v8167_v54 = vld [vmem:[#allocation2 + $0xa0] sm:$0xff]   ;;  %v8183_v40 = vld [vmem:[#allocation2 + $0xf0] sm:$0xff]  }
  0xe6   :  { %6609 = vrot.lane.b32.xlu0 %v7947_v30, %s8292_s15  ;;  %v2404_v47 = vor.u32 %v2403_v9, %v8974_v15  ;;  %v2591_v20 = vrot.slane %v2590_v59, 4  ;;  %v2419_v13 = vrot.slane %v2417_v28, 5  ;;  %v5191_v38 = vshll.u32 %v4739_v50, 16  ;;  %v9158_v9 = vpop.permute.xlu0 %3687  ;;  %v8172_v28 = vld [vmem:[#allocation2 + $0x50] sm:$0xff]  }
  0xe7   :  { %v5184_v52 = vrot.slane %v5182_v33, 4  ;;  %v2414_v30 = vor.u32 %v2413_v48, %v2409_v12  ;;  %v5187_v23 = vrot.slane %v5185_v45, 5  ;;  %v5195_v14 = vshrl.u32 %v4739_v50, 16  ;;  %v8173_v33 = vld [vmem:[#allocation2 + $0x8] sm:$0xff]   ;;  %v8178_v45 = vld [vmem:[#allocation2 + $0x14] sm:$0xff]  }
  0xe8   :  { %v2405_v46 = vrot.slane %v2404_v47, 4  ;;  %v2596_v15 = vsel %vm8451_vm11, %v2591_v20, %v2595_v37  ;;  %v9152_v25 = vrot.slane %v5191_v38, 5  ;;  %v5201_v44 = vshll.u32 %v9142_v61, 16  ;;  %v8171_v37 = vld [vmem:[#allocation2] sm:$0xff]   ;;  %v8174_v47 = vld [vmem:[#allocation2 + $0x58] sm:$0xff]   ;;  %v8181_v20 = vld [vmem:[#allocation2 + $0x6c] sm:$0xff]  }
  0xe9   :  { %3709 = vrot.lane.b32.xlu1 %v7807_v63, %s8291_s14  ;;  %v9160_v63 = vpop.permute.xlu1 %3729  ;;  %v7820_v43 = vcombine.low %v2586_v36, %v2596_v15  ;;  %v5188_v59 = vor.u32 %v5187_v23, %v5184_v52  ;;  %v8177_v48 = vld [vmem:[#allocation2 + $0x64] sm:$0xff]   ;;  %v8182_v38 = vld [vmem:[#allocation2 + $0x1c] sm:$0xff]   ;;  %v5197_v36 = vrot.slane %v5195_v14, 4  ;;  %v5019_v61 = vshrl.u32 %v4719_v35, 16 }
  0xea   :  { %3693 = vrot.lane.b32.xlu0 %v7799_v24, %s8291_s14  ;;  %v2410_v50 = vsel %vm8451_vm11, %v2405_v46, %v2409_v12  ;;  %v2415_v24 = vrot.slane %v2414_v30, 4  ;;  %v9164_v15 = vrot.slane %v5201_v44, 5  ;;  %v5006_v12 = vshrl.u32 %v4718_v55, 16 }
  0xeb   :  { %v5009_v46 = vshll.u32 %v4718_v55, 16  ;;  %v5189_v52 = vrot.slane %v5188_v59, 4  ;;  %v5015_v30 = vshll.u32 %v4719_v35, 16  ;;  %v5198_v29 = vor.u32 %v5197_v36, %v9152_v25  ;;  %v8168_v35 = vld [vmem:[#allocation2 + $0x50] sm:$0xff]  }
  0xec   :  { %v2420_v23 = vsel %vm8451_vm11, %v2415_v24, %v2419_v13  ;;  %v5008_v2 = vrot.slane %v5006_v12, 4  ;;  %v5025_v13 = vshll.u32 %v9156_v39, 16  ;;  %v4772_v24 = vld [vmem:[#allocation2 + $0x128] sm:$0x1]  ;;  %v5029_v36 = vshrl.u32 %v9156_v39, 16 }
  0xed   :  { %3735 = vrot.lane.b32.xlu1 %v7820_v43, %s8291_s14  ;;  %v7812_v10 = vcombine.low %v2410_v50, %v2420_v23  ;;  %v5011_v19 = vrot.slane %v5009_v46, 5  ;;  %v9170_v14 = vpop.permute.xlu1 %4452  ;;  %v5194_v55 = vsel %vm8451_vm11, %v5189_v52, %v9152_v25  ;;  %v9175_v44 = vrot.slane %v5015_v30, 5  ;;  %v9180_v12 = vld [vmem:[#allocation2 + $0xd4] sm:$0xf]  ;;  %v8169_v25 = vld [vmem:[#allocation2 + $0x120] sm:$0xff]  }
  0xee   :  { %v5021_v43 = vrot.slane %v5019_v61, 4  ;;  %v5199_v50 = vrot.slane %v5198_v29, 4  ;;  %vm1739_vm12 = vcmask 31744   ;;  %v9184_v61 = vrot.slane %v5025_v13, 5 }
  0xef   :  { %3719 = vrot.lane.b32.xlu0 %v7812_v10, %s8291_s14  ;;  %v5012_v59 = vor.u32 %v5011_v19, %v5008_v2  ;;  %v3714_v46 = vpop.permute.xlu0 %3713  ;;  %1740 = vst.msk [vmem:[#allocation3] sm:$0xff] %vm1739_vm12, %v8171_v37  ;;  %vm3885_vm13 = vcmask 64544   ;;  %1748 = vst.msk [vmem:[#allocation3 + $0x40] sm:$0xff] %vm1739_vm12, %v8172_v28  ;;  %v11582_v2 = vshrl.u32 %v9096_v16, 16  ;;  %v5479_v19 = vshrl.u32 %v4771_v22, 16 }
  0xf0   :  { %v5022_v23 = vor.u32 %v5021_v43, %v9175_v44  ;;  %1741 = vst.msk [vmem:[#allocation3 + $0x8] sm:$0xff] %vm1739_vm12, %v8173_v33  ;;  %1749 = vst.msk [vmem:[#allocation3 + $0x48] sm:$0xff] %vm1739_vm12, %v8174_v47  ;;  %v5204_v16 = vsel %vm8451_vm11, %v5199_v50, %v9164_v15  ;;  %v1846_v37 = vld [vmem:[#allocation2 + $0x98] sm:$0xf]  ;;  %vm4634_vm14 = vcmask 97344   ;;  %vm6777_vm15 = vcmask 130144  }
  0xf1   :  { %4458 = vrot.lane.b32.xlu1 %v8167_v54, %s8290_s11  ;;  %v5471_v29 = vrot.slane %v11582_v2, 4  ;;  %1750 = vst.msk [vmem:[#allocation3 + $0x50] sm:$0xff] %vm1739_vm12, %v8177_v48  ;;  %1742 = vst.msk [vmem:[#allocation3 + $0x10] sm:$0xff] %vm1739_vm12, %v8178_v45  ;;  %v5013_v10 = vrot.slane %v5012_v59, 4  ;;  %v5299_v54 = vshll.u32 %v9180_v12, 16  ;;  %v5303_v48 = vshrl.u32 %v9180_v12, 16 }
  0xf2   :  { %1751 = vst.msk [vmem:[#allocation3 + $0x58] sm:$0xff] %vm1739_vm12, %v8181_v20  ;;  %1743 = vst.msk [vmem:[#allocation3 + $0x18] sm:$0xff] %vm1739_vm12, %v8182_v38  ;;  %v8197_v20 = vld [vmem:[#allocation2 + $0x80] sm:$0xff]   ;;  %v8198_v38 = vld [vmem:[#allocation2 + $0x30] sm:$0xff]   ;;  %vm6952_vm1 = vcmask 130048  }
  0xf3   :  { %1764 = vst.msk [vmem:[#allocation3 + $0xc0] sm:$0xff] %vm1739_vm12, %v8183_v40  ;;  %1756 = vst.msk [vmem:[#allocation3 + $0x80] sm:$0xff] %vm1739_vm12, %v8184_v5  ;;  %v5475_v5 = vshll.u32 %v4771_v22, 16  ;;  %4442 = vrot.lane.b32.xlu0 %v8168_v35, %s8290_s11  ;;  %v11583_v22 = vshrl.u32 %v9105_v0, 16  ;;  %v4437_v40 = vpop.permute.xlu0 %4436  ;;  %v1847_v0 = vld [vmem:[#allocation2 + $0x9c] sm:$0x1] }
  0xf4   :  { %1752 = vst.msk [vmem:[#allocation3 + $0x60] sm:$0xff] %vm1739_vm12, %v8189_v7  ;;  %1744 = vst.msk [vmem:[#allocation3 + $0x20] sm:$0xff] %vm1739_vm12, %v8190_v31  ;;  %v7943_v7 = vcombine.low %v5194_v55, %v5204_v16  ;;  %v5472_v31 = vor.u32 %v5471_v29, %v9116_v62  ;;  %v9240_v30 = vrot.slane %v5299_v54, 5  ;;  %v11586_v35 = vld [vmem:[#allocation12_spill] sm:$0xff]  ;;  %v8200_v2 = vld [vmem:[#allocation2 + $0xb4] sm:$0xff]  }
  0xf5   :  { %1765 = vst.msk [vmem:[#allocation3 + $0xc8] sm:$0xff] %vm1739_vm12, %v8191_v21  ;;  %1757 = vst.msk [vmem:[#allocation3 + $0x88] sm:$0xff] %vm1739_vm12, %v8192_v1  ;;  %v4479_v1 = vpop.permute.xlu1 %4478  ;;  %v5023_v21 = vrot.slane %v5022_v23, 4  ;;  %4484 = vrot.lane.b32.xlu1 %v8169_v25, %s8290_s11  ;;  %v11587_v50 = vld [vmem:[#allocation8_spill] sm:$0xff]  ;;  %v1878_v25 = vld [vmem:[#allocation2 + $0x118] sm:$0xf] }
  0xf6   :  { %3886 = vst.msk [vmem:[#allocation3] sm:$0xff] %vm3885_vm13, %v9005_v6  ;;  %3894 = vst.msk [vmem:[#allocation3 + $0x40] sm:$0xff] %vm3885_vm13, %v8987_v41  ;;  %v5485_v41 = vshll.u32 %v4772_v24, 16  ;;  %v8170_v6 = vld [vmem:[#allocation2 + $0xd0] sm:$0xff]   ;;  %v1827_v24 = vld [vmem:[#allocation2 + $0x4c] sm:$0x1] }
  0xf7   :  { %3887 = vst.msk [vmem:[#allocation3 + $0x8] sm:$0xff] %vm3885_vm13, %v9035_v32  ;;  %3895 = vst.msk [vmem:[#allocation3 + $0x48] sm:$0xff] %vm3885_vm13, %v9037_v4  ;;  %v5018_v32 = vsel %vm8451_vm11, %v5013_v10, %v9175_v44  ;;  %v5477_v4 = vrot.slane %v5475_v5, 5  ;;  %v5028_v62 = vsel %vm8451_vm11, %v5023_v21, %v9184_v61  ;;  %v9242_v44 = vld [vmem:[#allocation2 + $0x48] sm:$0xf]  ;;  %4468 = vrot.lane.b32.xlu0 %v8170_v6, %s8290_s11  ;;  %v2153_v6 = vshll.u32 %v1827_v24, 16 }
  0xf8   :  { %3896 = vst.msk [vmem:[#allocation3 + $0x50] sm:$0xff] %vm3885_vm13, %v9082_v49  ;;  %3888 = vst.msk [vmem:[#allocation3 + $0x10] sm:$0xff] %vm3885_vm13, %v9110_v51  ;;  %v5481_v49 = vrot.slane %v5479_v19, 4  ;;  %v4752_v51 = vld [vmem:[#allocation2 + $0xd8] sm:$0x1]  ;;  %v7935_v28 = vcombine.low %v5018_v32, %v5028_v62  ;;  %v8199_v23 = vld [vmem:[#allocation2 + $0x104] sm:$0xff]  }
  0xf9   :  { %3897 = vst.msk [vmem:[#allocation3 + $0x58] sm:$0xff] %vm3885_vm13, %v9137_v27  ;;  %3889 = vst.msk [vmem:[#allocation3 + $0x18] sm:$0xff] %vm3885_vm13, %v9158_v9  ;;  %v5295_v27 = vrot.slane %v11583_v22, 4  ;;  %v5473_v9 = vrot.slane %v5472_v31, 4  ;;  %v6596_v45 = vpop.permute.xlu1 %6595  ;;  %v5309_v55 = vshll.u32 %v4752_v51, 16  ;;  %6601 = vrot.lane.b32.xlu1 %v7943_v7, %s8292_s15  ;;  %v11588_v10 = vld [vmem:[#allocation9_spill] sm:$0xff] }
  0xfa   :  { %3910 = vst.msk [vmem:[#allocation3 + $0xc0] sm:$0xff] %vm3885_vm13, %v9160_v63  ;;  %3902 = vst.msk [vmem:[#allocation3 + $0x80] sm:$0xff] %vm3885_vm13, %v3714_v46  ;;  %v5487_v63 = vrot.slane %v5485_v41, 5  ;;  %v5482_v33 = vor.u32 %v5481_v49, %v5477_v4  ;;  %v11589_v5 = vshrl.u32 %v11588_v10, 16  ;;  %v2147_v41 = vshrl.u32 %v9242_v44, 16 }
  0xfb   :  { %v5296_v47 = vor.u32 %v5295_v27, %v9121_v18  ;;  %v5478_v52 = vsel %vm8451_vm11, %v5473_v9, %v5477_v4  ;;  %v5305_v18 = vrot.slane %v5303_v48, 4  ;;  %4635 = vst.msk [vmem:[#allocation3] sm:$0xff] %vm4634_vm14, %v8912_v11  ;;  %4636 = vst.msk [vmem:[#allocation3 + $0x8] sm:$0xff] %vm4634_vm14, %v8953_v42  ;;  %v4463_v11 = vpop.permute.xlu0 %4462  ;;  %6585 = vrot.lane.b32.xlu0 %v7935_v28, %s8292_s15  ;;  %v11590_v4 = vld [vmem:[#allocation10_spill] sm:$0xff]  ;;  %v1879_v22 = vld [vmem:[#allocation2 + $0x11c] sm:$0xf] }
  0xfc   :  { %v5483_v43 = vrot.slane %v5482_v33, 4  ;;  %4643 = vst.msk [vmem:[#allocation3 + $0x40] sm:$0xff] %vm4634_vm14, %v8927_v3  ;;  %4644 = vst.msk [vmem:[#allocation3 + $0x48] sm:$0xff] %vm4634_vm14, %v8929_v26  ;;  %v5311_v3 = vrot.slane %v5309_v55, 5  ;;  %v11584_v26 = vshrl.u32 %v9031_v8, 16  ;;  %v2139_v19 = vrot.slane %v11589_v5, 4 }
  0xfd   :  { %v5297_v13 = vrot.slane %v5296_v47, 4  ;;  %4645 = vst.msk [vmem:[#allocation3 + $0x50] sm:$0xff] %vm4634_vm14, %v8955_v34  ;;  %4637 = vst.msk [vmem:[#allocation3 + $0x10] sm:$0xff] %vm4634_vm14, %v8985_v17  ;;  %v2319_v34 = vshll.u32 %v1846_v37, 16  ;;  %v2323_v17 = vshrl.u32 %v1846_v37, 16  ;;  %v2149_v54 = vrot.slane %v2147_v41, 4 }
  0xfe   :  { %4646 = vst.msk [vmem:[#allocation3 + $0x58] sm:$0xff] %vm4634_vm14, %v9170_v14  ;;  %4638 = vst.msk [vmem:[#allocation3 + $0x18] sm:$0xff] %vm4634_vm14, %v4437_v40  ;;  %v2315_v42 = vrot.slane %v11584_v26, 4  ;;  %v11585_v14 = vld [vmem:[#allocation11_spill] sm:$0xff]  ;;  %v2140_v49 = vor.u32 %v2139_v19, %v11590_v4  ;;  %v9299_v27 = vld [vmem:[#allocation2 + $0x120] sm:$0xf] }
  0xff   :  { %4659 = vst.msk [vmem:[#allocation3 + $0xc0] sm:$0xff] %vm4634_vm14, %v4479_v1  ;;  %4651 = vst.msk [vmem:[#allocation3 + $0x80] sm:$0xff] %vm4634_vm14, %v4463_v11  ;;  %v5302_v8 = vsel %vm8451_vm11, %v5297_v13, %v9240_v30  ;;  %v2321_v12 = vrot.slane %v2319_v34, 5  ;;  %v2325_v46 = vrot.slane %v2323_v17, 4  ;;  %v2143_v1 = vshll.u32 %v9242_v44, 16  ;;  %v6580_v7 = vpop.permute.xlu0 %6579 }
 0x100   :  { %1753 = vst.msk [vmem:[#allocation3 + $0x68] sm:$0xff] %vm1739_vm12, %v8197_v20  ;;  %1745 = vst.msk [vmem:[#allocation3 + $0x28] sm:$0xff] %vm1739_vm12, %v8198_v38  ;;  %v2316_v59 = vor.u32 %v2315_v42, %v11587_v50  ;;  %v2598_v40 = vshrl.u32 %v1878_v25, 16  ;;  %v2141_v37 = vrot.slane %v2140_v49, 4  ;;  %v2155_v28 = vrot.slane %v2153_v6, 5 }
 0x101   :  { %6778 = vst.msk [vmem:[#allocation3] sm:$0xff] %vm6777_vm15, %v9007_v58  ;;  %6786 = vst.msk [vmem:[#allocation3 + $0x40] sm:$0xff] %vm6777_vm15, %v9055_v57  ;;  %v5488_v58 = vsel %vm8451_vm11, %v5483_v43, %v5487_v63  ;;  %v5306_v57 = vor.u32 %v5305_v18, %v9240_v30  ;;  %v2326_v31 = vor.u32 %v2325_v46, %v2321_v12  ;;  %v2145_v51 = vrot.slane %v2143_v1, 5  ;;  %v1858_v38 = vld [vmem:[#allocation2 + $0xc8] sm:$0xf] }
 0x102   :  { %6779 = vst.msk [vmem:[#allocation3 + $0x8] sm:$0xff] %vm6777_vm15, %v9080_v56  ;;  %6787 = vst.msk [vmem:[#allocation3 + $0x48] sm:$0xff] %vm6777_vm15, %v9057_v60  ;;  %v2329_v60 = vshll.u32 %v1847_v0, 16  ;;  %v7956_v56 = vcombine.low %v5478_v52, %v5488_v58  ;;  %v2317_v21 = vrot.slane %v2316_v59, 4  ;;  %v2600_v33 = vrot.slane %v2598_v40, 4 }
 0x103   :  { %6788 = vst.msk [vmem:[#allocation3 + $0x50] sm:$0xff] %vm6777_vm15, %v11585_v14  ;;  %6780 = vst.msk [vmem:[#allocation3 + $0x10] sm:$0xff] %vm6777_vm15, %v11586_v35  ;;  %v5307_v29 = vrot.slane %v5306_v57, 4  ;;  %v2327_v63 = vrot.slane %v2326_v31, 4  ;;  %v2601_v47 = vshll.u32 %v1878_v25, 16  ;;  %v2150_v0 = vor.u32 %v2149_v54, %v2145_v51 }
 0x104   :  { %6789 = vst.msk [vmem:[#allocation3 + $0x58] sm:$0xff] %vm6777_vm15, %v6596_v45  ;;  %v2331_v16 = vrot.slane %v2329_v60, 5  ;;  %6627 = vrot.lane.b32.xlu1 %v7956_v56, %s8292_s15  ;;  %6781 = vst.msk [vmem:[#allocation3 + $0x18] sm:$0xff] %vm6777_vm15, %v6580_v7  ;;  %v2322_v9 = vsel %vm8451_vm11, %v2317_v21, %v2321_v12  ;;  %v2607_v45 = vshll.u32 %v1879_v22, 16  ;;  %v2611_v20 = vshrl.u32 %v1879_v22, 16 }
 0x105   :  { %1766 = vst.msk [vmem:[#allocation3 + $0xd0] sm:$0xff] %vm1739_vm12, %v8199_v23  ;;  %1758 = vst.msk [vmem:[#allocation3 + $0x90] sm:$0xff] %vm1739_vm12, %v8200_v2  ;;  %v5312_v32 = vsel %vm8451_vm11, %v5307_v29, %v5311_v3  ;;  %v2146_v30 = vsel %vm8451_vm11, %v2141_v37, %v2145_v51  ;;  %v2603_v55 = vrot.slane %v2601_v47, 5  ;;  %v2617_v44 = vshll.u32 %v9299_v27, 16  ;;  %v1859_v43 = vld [vmem:[#allocation2 + $0xcc] sm:$0xf] }
 0x106   :  { %v7948_v62 = vcombine.low %v5302_v8, %v5312_v32  ;;  %v2332_v48 = vsel %vm8451_vm11, %v2327_v63, %v2331_v16  ;;  %v2151_v13 = vrot.slane %v2150_v0, 4  ;;  %v2609_v18 = vrot.slane %v2607_v45, 5  ;;  %v9313_v42 = vld [vmem:[#allocation2 + $0xd0] sm:$0xf]  ;;  %v93_v57 = vld [vmem:[#allocation2 + $0x12c] sm:$0x1] }
 0x107   :  { %v7808_v52 = vcombine.low %v2322_v9, %v2332_v48  ;;  %v2613_v24 = vrot.slane %v2611_v20, 4  ;;  %v2621_v11 = vshrl.u32 %v9299_v27, 16  ;;  %v2604_v3 = vor.u32 %v2603_v55, %v2600_v33  ;;  %v288_v60 = vld [vmem:[%s11544_s0 + $0x70] sm:$0xf]  ;;  %v289_v25 = vld [vmem:[%s11544_s0 + $0x74] sm:$0xf]  ;;  %v6622_v41 = vpop.permute.xlu1 %6621 }
 0x108   :  { %6611 = vrot.lane.b32.xlu0 %v7948_v62, %s8292_s15  ;;  %v9311_v26 = vrot.slane %v2617_v44, 5  ;;  %v2422_v34 = vshrl.u32 %v1858_v38, 16  ;;  %v2425_v17 = vshll.u32 %v1858_v38, 16  ;;  %v2156_v14 = vsel %vm8451_vm11, %v2151_v13, %v2155_v28  ;;  %v6858_v46 = vld [vmem:[#allocation3 + $0x40] sm:$0xff]  ;;  %v280_v5 = vld [vmem:[%s11544_s0 + $0x50] sm:$0xf] }
 0x109   :  { %3711 = vrot.lane.b32.xlu1 %v7808_v52, %s8291_s14  ;;  %v2614_v35 = vor.u32 %v2613_v24, %v2609_v18  ;;  %v2431_v58 = vshll.u32 %v1859_v43, 16  ;;  %v2435_v8 = vshrl.u32 %v1859_v43, 16  ;;  %v7800_v56 = vcombine.low %v2146_v30, %v2156_v14  ;;  %v81_v10 = vld [vmem:[#allocation2 + $0xdc] sm:$0x1]  ;;  %v281_v31 = vld [vmem:[%s11544_s0 + $0x54] sm:$0xf]  ;;  %8107 = vmatprep.subr.msk.bf16.mxu0 %vm6952_vm1, %v6858_v46 }
 0x10a   :  { %v2605_v50 = vrot.slane %v2604_v3, 4  ;;  %v2424_v59 = vrot.slane %v2422_v34, 4  ;;  %v2427_v12 = vrot.slane %v2425_v17, 5  ;;  %v2441_v16 = vshll.u32 %v9313_v42, 16  ;;  %v6850_v21 = vld [vmem:[#allocation3] sm:$0xff]  ;;  %6802 = vst.msk [vmem:[#allocation3 + $0xc0] sm:$0xff] %vm6777_vm15, %v6622_v41 }
 0x10b   :  { %v2615_v23 = vrot.slane %v2614_v35, 4  ;;  %v2433_v2 = vrot.slane %v2431_v58, 5  ;;  %v2437_v29 = vrot.slane %v2435_v8, 4  ;;  %v2445_v7 = vshrl.u32 %v9313_v42, 16  ;;  %v6859_v63 = vld [vmem:[#allocation3 + $0x48] sm:$0xff]  ;;  %v6606_v52 = vpop.permute.xlu0 %6605  ;;  %v3706_v30 = vpop.permute.xlu1 %3705  ;;  %v8176_v35 = vld [vmem:[#allocation2 + $0x58] sm:$0xff]  }
 0x10c   :  { %3695 = vrot.lane.b32.xlu0 %v7800_v56, %s8291_s14  ;;  %v2610_v19 = vsel %vm8451_vm11, %v2605_v50, %v2609_v18  ;;  %v2428_v1 = vor.u32 %v2427_v12, %v2424_v59  ;;  %v9337_v4 = vrot.slane %v2441_v16, 5  ;;  %v94_v51 = vsel %vm8324_vm3, 0, %v93_v57  ;;  %v8175_v48 = vld [vmem:[#allocation2 + $0xa8] sm:$0xff]   ;;  %6794 = vst.msk [vmem:[#allocation3 + $0x80] sm:$0xff] %vm6777_vm15, %v6606_v52  ;;  %v4742_v17 = vld [vmem:[#allocation2 + $0xb0] sm:$0x1] }
 0x10d   :  { %v2620_v6 = vsel %vm8451_vm11, %v2615_v23, %v9311_v26  ;;  %v2438_v32 = vor.u32 %v2437_v29, %v2433_v2  ;;  %95 = vst [vmem:[#allocation2 + $0x12c] sm:$0x1] %v94_v51  ;;  %v533_v62 = vshrl.u32 %v288_v60, 16  ;;  %v536_v9 = vshll.u32 %v288_v60, 16  ;;  %v4741_v38 = vld [vmem:[#allocation2 + $0xac] sm:$0xf] }
 0x10e   :  { %v7821_v22 = vcombine.low %v2610_v19, %v2620_v6  ;;  %v2429_v40 = vrot.slane %v2428_v1, 4  ;;  %v541_v37 = vshrl.u32 %v289_v25, 16  ;;  %v544_v28 = vshll.u32 %v289_v25, 16  ;;  %3898 = vst.msk [vmem:[#allocation3 + $0x60] sm:$0xff] %vm3885_vm13, %v3706_v30  ;;  %v4721_v14 = vld [vmem:[#allocation2 + $0x5c] sm:$0xf] }
 0x10f   :  { %v2439_v54 = vrot.slane %v2438_v32, 4  ;;  %v6960_v33 = vsel %vm6952_vm1, %v6850_v21, 0  ;;  %v535_v0 = vrot.slane %v533_v62, 7  ;;  %v82_v45 = vsel %vm8324_vm3, 0, %v81_v10  ;;  %v4722_v56 = vld [vmem:[#allocation2 + $0x60] sm:$0x1]  ;;  %v3732_v29 = vpop.permute.xlu1 %3731 }
 0x110   :  { %3737 = vrot.lane.b32.xlu1 %v7821_v22, %s8291_s14  ;;  %v2434_v47 = vsel %vm8451_vm11, %v2429_v40, %v2433_v2  ;;  %8010 = vmatpush3.bf16.xpose.msra.mxu0 %v6960_v33  ;;  %v465_v20 = vshrl.u32 %v280_v5, 16  ;;  %v9352_v44 = vrot.slane %v541_v37, 7  ;;  %83 = vst [vmem:[#allocation2 + $0xdc] sm:$0x1] %v82_v45  ;;  %v468_v43 = vshll.u32 %v280_v5, 16  ;;  %v11592_v12 = vld [vmem:[#allocation13_spill] sm:$0xff]  ;;  %v3690_v2 = vpop.permute.xlu0 %3689 }
 0x111   :  { %v2444_v55 = vsel %vm8451_vm11, %v2439_v54, %v9337_v4  ;;  %v473_v13 = vshrl.u32 %v281_v31, 16  ;;  %8108 = vmatprep.subr.msk.bf16.mxu0 %vm6952_vm1, %v6859_v63  ;;  %v538_v24 = vor.u32 %v536_v9, %v535_v0  ;;  %v539_v3 = vrot.slane %v535_v0, 4  ;;  %v6874_v16 = vld [vmem:[#allocation3 + $0xc0] sm:$0xff]  ;;  %3890 = vst.msk [vmem:[#allocation3 + $0x20] sm:$0xff] %vm3885_vm13, %v3690_v2  ;;  %3911 = vst.msk [vmem:[#allocation3 + $0xc8] sm:$0xff] %vm3885_vm13, %v3732_v29 }
 0x112   :  { %v7813_v18 = vcombine.low %v2434_v47, %v2444_v55  ;;  %v467_v34 = vrot.slane %v465_v20, 7  ;;  %v546_v58 = vor.u32 %v544_v28, %v9352_v44  ;;  %v548_v8 = vrot.slane %v9352_v44, 4  ;;  %8115 = vmatprep.subr.msk.bf16.mxu1 %vm6952_vm1, %v6874_v16  ;;  %v200_v40 = vld [vmem:[#allocation2 + $0x134] sm:$0x1]  ;;  %v188_v62 = vld [vmem:[#allocation2 + $0xe4] sm:$0x1] }
 0x113   :  { %v9359_v57 = vrot.slane %v473_v13, 7  ;;  %v476_v60 = vshll.u32 %v281_v31, 16  ;;  %v11593_v46 = vshrl.u32 %v11592_v12, 16  ;;  %v5211_v23 = vshll.u32 %v4741_v38, 16  ;;  %v6851_v28 = vld [vmem:[#allocation3 + $0x8] sm:$0xff] }
 0x114   :  { %3721 = vrot.lane.b32.xlu0 %v7813_v18, %s8291_s14  ;;  %4460 = vrot.lane.b32.xlu1 %v8175_v48, %s8290_s11  ;;  %v470_v50 = vor.u32 %v468_v43, %v467_v34  ;;  %v471_v59 = vrot.slane %v467_v34, 4  ;;  %v547_v5 = vsel %vm8353_vm7, %v539_v3, %v546_v58  ;;  %v715_v19 = vld [vmem:[#allocation2 + $0x12c] sm:$0xf]  ;;  %v5215_v31 = vshrl.u32 %v4741_v38, 16  ;;  %v1881_v33 = vld [vmem:[#allocation2 + $0x124] sm:$0xf]  ;;  %v3716_v38 = vpop.permute.xlu0 %3715 }
 0x115   :  { %v5207_v25 = vrot.slane %v11593_v46, 4  ;;  %v478_v1 = vor.u32 %v476_v60, %v9359_v57  ;;  %v480_v21 = vrot.slane %v9359_v57, 4  ;;  %v716_v6 = vsel %vm8375_vm8, %v538_v24, %v715_v19  ;;  %718 = vst.msk [vmem:[#allocation2 + $0x130] sm:$0xf] %vm21_vm0, %v547_v5  ;;  %v9382_v20 = vld [vmem:[#allocation2 + $0x128] sm:$0x1] }
 0x116   :  { %v5213_v51 = vrot.slane %v5211_v23, 5  ;;  %v5221_v22 = vshll.u32 %v4742_v17, 16  ;;  %717 = vst [vmem:[#allocation2 + $0x12c] sm:$0xf] %v716_v6  ;;  %v5217_v63 = vrot.slane %v5215_v31, 4  ;;  %v5031_v54 = vrot.slane %v5029_v36, 4 }
 0x117   :  { %v5208_v32 = vor.u32 %v5207_v25, %v9164_v15  ;;  %v479_v9 = vsel %vm8353_vm7, %v471_v59, %v478_v1  ;;  %v5035_v37 = vshll.u32 %v4721_v14, 16  ;;  %v687_v47 = vld [vmem:[#allocation2 + $0xdc] sm:$0xf]  ;;  %v5039_v0 = vshrl.u32 %v4721_v14, 16  ;;  %3903 = vst.msk [vmem:[#allocation3 + $0x88] sm:$0xff] %vm3885_vm13, %v3716_v38  ;;  %v6860_v3 = vld [vmem:[#allocation3 + $0x50] sm:$0xff] }
 0x118   :  { %4444 = vrot.lane.b32.xlu0 %v8176_v35, %s8290_s11  ;;  %690 = vst.msk [vmem:[#allocation2 + $0xe0] sm:$0xf] %vm21_vm0, %v479_v9  ;;  %v5223_v48 = vrot.slane %v5221_v22, 5  ;;  %v5045_v45 = vshll.u32 %v4722_v56, 16  ;;  %v688_v52 = vsel %vm8375_vm8, %v470_v50, %v687_v47  ;;  %v5218_v39 = vor.u32 %v5217_v63, %v5213_v51  ;;  %v8205_v50 = vld [vmem:[#allocation2 + $0x8c] sm:$0xff]   ;;  %v8206_v59 = vld [vmem:[#allocation2 + $0x3c] sm:$0xff]  }
 0x119   :  { %v5209_v15 = vrot.slane %v5208_v32, 4  ;;  %v5032_v36 = vor.u32 %v5031_v54, %v9184_v61  ;;  %v5037_v30 = vrot.slane %v5035_v37, 5  ;;  %689 = vst [vmem:[#allocation2 + $0xdc] sm:$0xf] %v688_v52  ;;  %v5041_v43 = vrot.slane %v5039_v0, 4  ;;  %1754 = vst.msk [vmem:[#allocation3 + $0x70] sm:$0xff] %vm1739_vm12, %v8205_v50  ;;  %v4455_v31 = vpop.permute.xlu1 %4454 }
 0x11a   :  { %v5047_v13 = vrot.slane %v5045_v45, 5  ;;  %v201_v24 = vsel %vm8337_vm6, 0, %v200_v40  ;;  %v5219_v34 = vrot.slane %v5218_v39, 4  ;;  %v6963_v14 = vsel %vm6952_vm1, %v6851_v28, 0  ;;  %1746 = vst.msk [vmem:[#allocation3 + $0x30] sm:$0xff] %vm1739_vm12, %v8206_v59 }
 0x11b   :  { %v5214_v55 = vsel %vm8451_vm11, %v5209_v15, %v5213_v51  ;;  %v5033_v17 = vrot.slane %v5032_v36, 4  ;;  %202 = vst [vmem:[#allocation2 + $0x134] sm:$0x1] %v201_v24  ;;  %v189_v61 = vsel %vm8337_vm6, 0, %v188_v62  ;;  %v5042_v35 = vor.u32 %v5041_v43, %v5037_v30  ;;  %8012 = vmatpush3.bf16.xpose.msra.mxu0 %v6963_v14  ;;  %4647 = vst.msk [vmem:[#allocation3 + $0x60] sm:$0xff] %vm4634_vm14, %v4455_v31 }
 0x11c   :  { %190 = vst [vmem:[#allocation2 + $0xe4] sm:$0x1] %v189_v61  ;;  %v2623_v58 = vrot.slane %v2621_v11, 4  ;;  %v2627_v60 = vshll.u32 %v1881_v33, 16  ;;  %v2631_v56 = vshrl.u32 %v1881_v33, 16  ;;  %v5224_v12 = vsel %vm8451_vm11, %v5219_v34, %v5223_v48  ;;  %8109 = vmatprep.subr.msk.bf16.mxu0 %vm6952_vm1, %v6860_v3 }
 0x11d   :  { %v4774_v46 = vld [vmem:[#allocation2 + $0x130] sm:$0xf]  ;;  %v2637_v25 = vshll.u32 %v9382_v20, 16  ;;  %v9402_v23 = vrot.slane %v2445_v7, 4  ;;  %v7944_v29 = vcombine.low %v5214_v55, %v5224_v12  ;;  %v5038_v27 = vsel %vm8451_vm11, %v5033_v17, %v5037_v30  ;;  %v4773_v16 = vld [vmem:[#allocation2 + $0x12c] sm:$0xf]  ;;  %v4439_v39 = vpop.permute.xlu0 %4438  ;;  %v4481_v36 = vpop.permute.xlu1 %4480 }
 0x11e   :  { %v8179_v2 = vld [vmem:[#allocation2 + $0x12c] sm:$0xff]   ;;  %v5043_v11 = vrot.slane %v5042_v35, 4  ;;  %v2624_v5 = vor.u32 %v2623_v58, %v9311_v26  ;;  %v5490_v19 = vshrl.u32 %v4773_v16, 16  ;;  %v5493_v1 = vshll.u32 %v4773_v16, 16  ;;  %4639 = vst.msk [vmem:[#allocation3 + $0x20] sm:$0xff] %vm4634_vm14, %v4439_v39  ;;  %4660 = vst.msk [vmem:[#allocation3 + $0xc8] sm:$0xff] %vm4634_vm14, %v4481_v36 }
 0x11f   :  { %v5499_v42 = vshll.u32 %v4774_v46, 16  ;;  %v5503_v7 = vshrl.u32 %v4774_v46, 16  ;;  %4486 = vrot.lane.b32.xlu1 %v8179_v2, %s8290_s11  ;;  %v4754_v32 = vld [vmem:[#allocation2 + $0xe0] sm:$0xf]  ;;  %v2629_v22 = vrot.slane %v2627_v60, 5  ;;  %v2633_v40 = vrot.slane %v2631_v56, 4 }
 0x120   :  { %v5048_v6 = vsel %vm8451_vm11, %v5043_v11, %v5047_v13  ;;  %v2625_v51 = vrot.slane %v2624_v5, 4  ;;  %v8180_v26 = vld [vmem:[#allocation2 + $0xdc] sm:$0xff]   ;;  %v5492_v9 = vrot.slane %v5490_v19, 4  ;;  %v5495_v63 = vrot.slane %v5493_v1, 5  ;;  %v1862_v17 = vld [vmem:[#allocation2 + $0xd8] sm:$0x1] }
 0x121   :  { %v7936_v62 = vcombine.low %v5038_v27, %v5048_v6  ;;  %v9414_v54 = vrot.slane %v5499_v42, 5  ;;  %v5505_v28 = vrot.slane %v5503_v7, 4  ;;  %v4753_v33 = vld [vmem:[#allocation2 + $0xdc] sm:$0xf]  ;;  %v5323_v47 = vshll.u32 %v4754_v32, 16  ;;  %4470 = vrot.lane.b32.xlu0 %v8180_v26, %s8290_s11  ;;  %v4465_v12 = vpop.permute.xlu0 %4464  ;;  %v8207_v19 = vld [vmem:[#allocation2 + $0x10c] sm:$0xff]  }
 0x122   :  { %v719_v37 = vld [vmem:[#allocation2 + $0x134] sm:$0x1]  ;;  %v2630_v15 = vsel %vm8451_vm11, %v2625_v51, %v2629_v22  ;;  %v2634_v48 = vor.u32 %v2633_v40, %v2629_v22  ;;  %v5496_v45 = vor.u32 %v5495_v63, %v5492_v9  ;;  %v5314_v38 = vshrl.u32 %v4753_v33, 16  ;;  %v108_v50 = vld [vmem:[#allocation2 + $0x190] sm:$0x1]  ;;  %4652 = vst.msk [vmem:[#allocation3 + $0x88] sm:$0xff] %vm4634_vm14, %v4465_v12 }
 0x123   :  { %v720_v0 = vsel %vm8324_vm3, %v548_v8, %v719_v37  ;;  %v691_v20 = vld [vmem:[#allocation2 + $0xe4] sm:$0x1]  ;;  %v5317_v52 = vshll.u32 %v4753_v33, 16  ;;  %6603 = vrot.lane.b32.xlu1 %v7944_v29, %s8292_s15  ;;  %v5506_v30 = vor.u32 %v5505_v28, %v9414_v54  ;;  %v9429_v44 = vrot.slane %v5323_v47, 5  ;;  %v1861_v8 = vld [vmem:[#allocation2 + $0xd4] sm:$0xf] }
 0x124   :  { %721 = vst [vmem:[#allocation2 + $0x134] sm:$0x1] %v720_v0  ;;  %v692_v55 = vsel %vm8324_vm3, %v480_v21, %v691_v20  ;;  %v5327_v43 = vshrl.u32 %v4754_v32, 16  ;;  %v9433_v13 = vrot.slane %v5496_v45, 4  ;;  %v5316_v24 = vrot.slane %v5314_v38, 4  ;;  %v8208_v1 = vld [vmem:[#allocation2 + $0xbc] sm:$0xff]  }
 0x125   :  { %693 = vst [vmem:[#allocation2 + $0xe4] sm:$0x1] %v692_v55  ;;  %v5319_v3 = vrot.slane %v5317_v52, 5  ;;  %v2635_v34 = vrot.slane %v2634_v48, 4  ;;  %v9435_v14 = vrot.slane %v5506_v30, 4  ;;  %v2639_v61 = vrot.slane %v2637_v25, 5  ;;  %6587 = vrot.lane.b32.xlu0 %v7936_v62, %s8292_s15 }
 0x126   :  { %v5329_v57 = vrot.slane %v5327_v43, 4  ;;  %v2448_v21 = vor.u32 %v9402_v23, %v9337_v4  ;;  %v5502_v35 = vsel %vm8451_vm11, %v9433_v13, %v9414_v54  ;;  %v2451_v60 = vshll.u32 %v1861_v8, 16  ;;  %v215_v59 = vld [vmem:[#allocation2 + $0x198] sm:$0x1]  ;;  %v7697_v23 = vld [vmem:[%s11544_s0 + $0x90] sm:$0xf]  ;;  %v6598_v9 = vpop.permute.xlu1 %6597 }
 0x127   :  { %v5320_v58 = vor.u32 %v5319_v3, %v5316_v24  ;;  %v2455_v56 = vshrl.u32 %v1861_v8, 16  ;;  %v2640_v25 = vsel %vm8451_vm11, %v2635_v34, %v2639_v61  ;;  %v2461_v4 = vshll.u32 %v1862_v17, 16  ;;  %v7698_v29 = vld [vmem:[%s11544_s0 + $0x94] sm:$0xf]  ;;  %v96_v32 = vld [vmem:[#allocation2 + $0x140] sm:$0x1] }
 0x128   :  { %v5330_v46 = vor.u32 %v5329_v57, %v9429_v44  ;;  %v2449_v2 = vrot.slane %v2448_v21, 4  ;;  %v9454_v11 = vcombine.low %v2630_v15, %v2640_v25  ;;  %v2453_v16 = vrot.slane %v2451_v60, 5  ;;  %1767 = vst.msk [vmem:[#allocation3 + $0xd8] sm:$0xff] %vm1739_vm12, %v8207_v19  ;;  %1759 = vst.msk [vmem:[#allocation3 + $0x98] sm:$0xff] %vm1739_vm12, %v8208_v1  ;;  %v203_v15 = vld [vmem:[#allocation2 + $0x148] sm:$0x1] }
 0x129   :  { %v5321_v27 = vrot.slane %v5320_v58, 4  ;;  %v2457_v5 = vrot.slane %v2455_v56, 4  ;;  %v2463_v7 = vrot.slane %v2461_v4, 5  ;;  %v109_v31 = vsel %vm8324_vm3, 0, %v108_v50  ;;  %6790 = vst.msk [vmem:[#allocation3 + $0x60] sm:$0xff] %vm6777_vm15, %v6598_v9  ;;  %v6852_v12 = vld [vmem:[#allocation3 + $0x10] sm:$0xff] }
 0x12a   :  { %v5331_v42 = vrot.slane %v5330_v46, 4  ;;  %v216_v6 = vsel %vm8337_vm6, 0, %v215_v59  ;;  %v2454_v40 = vsel %vm8451_vm11, %v2449_v2, %v2453_v16  ;;  %110 = vst [vmem:[#allocation2 + $0x190] sm:$0x1] %v109_v31  ;;  %v797_v62 = vshrl.u32 %v7697_v23, 16  ;;  %v6582_v55 = vpop.permute.xlu0 %6581  ;;  %v6624_v34 = vpop.permute.xlu1 %6623 }
 0x12b   :  { %v9460_v51 = vld [vmem:[#allocation2 + $0x134] sm:$0xf]  ;;  %v5326_v22 = vsel %vm8451_vm11, %v5321_v27, %v9429_v44  ;;  %v2458_v26 = vor.u32 %v2457_v5, %v2453_v16  ;;  %217 = vst [vmem:[#allocation2 + $0x198] sm:$0x1] %v216_v6  ;;  %v800_v33 = vshll.u32 %v7697_v23, 16  ;;  %v805_v47 = vshrl.u32 %v7698_v29, 16 }
 0x12c   :  { %v5509_v63 = vshll.u32 %v9460_v51, 16  ;;  %v5513_v37 = vshrl.u32 %v9460_v51, 16  ;;  %v9471_v28 = vld [vmem:[#allocation2 + $0xe4] sm:$0xf]  ;;  %v799_v20 = vrot.slane %v797_v62, 7  ;;  %v808_v39 = vshll.u32 %v7698_v29, 16 }
 0x12d   :  { %v5333_v48 = vshll.u32 %v9471_v28, 16  ;;  %v5337_v0 = vshrl.u32 %v9471_v28, 16  ;;  %v2459_v45 = vrot.slane %v2458_v26, 4  ;;  %v807_v52 = vrot.slane %v805_v47, 7  ;;  %v290_v30 = vld [vmem:[%s11544_s0 + $0x78] sm:$0xf] }
 0x12e   :  { %v9476_v38 = vrot.slane %v5509_v63, 5  ;;  %v97_v36 = vsel %vm8324_vm3, 0, %v96_v32  ;;  %v802_v8 = vor.u32 %v800_v33, %v799_v20  ;;  %v803_v24 = vrot.slane %v799_v20, 4  ;;  %v291_v3 = vld [vmem:[%s11544_s0 + $0x7c] sm:$0xf]  ;;  %6782 = vst.msk [vmem:[#allocation3 + $0x20] sm:$0xff] %vm6777_vm15, %v6582_v55  ;;  %v6608_v29 = vpop.permute.xlu0 %6607 }
 0x12f   :  { %v9483_v44 = vrot.slane %v5333_v48, 5  ;;  %v2464_v43 = vsel %vm8451_vm11, %v2459_v45, %v2463_v7  ;;  %98 = vst [vmem:[#allocation2 + $0x140] sm:$0x1] %v97_v36  ;;  %v810_v61 = vor.u32 %v808_v39, %v807_v52  ;;  %v812_v21 = vrot.slane %v807_v52, 4  ;;  %v111_v58 = vld [vmem:[#allocation2 + $0x1a4] sm:$0x1]  ;;  %v3708_v7 = vpop.permute.xlu1 %3707 }
 0x130   :  { %v5512_v17 = vsel %vm8451_vm11, %v9435_v14, %v9476_v38  ;;  %v7814_v57 = vcombine.low %v2454_v40, %v2464_v43  ;;  %v7699_v60 = vld [vmem:[%s11544_s0 + $0x98] sm:$0xf]  ;;  %6803 = vst.msk [vmem:[#allocation3 + $0xc8] sm:$0xff] %vm6777_vm15, %v6624_v34  ;;  %v204_v50 = vsel %vm8337_vm6, 0, %v203_v15  ;;  %v550_v59 = vshrl.u32 %v290_v30, 16  ;;  %6795 = vst.msk [vmem:[#allocation3 + $0x88] sm:$0xff] %vm6777_vm15, %v6608_v29 }
 0x131   :  { %v7957_v56 = vcombine.low %v5502_v35, %v5512_v17  ;;  %v5336_v14 = vsel %vm8451_vm11, %v5331_v42, %v9483_v44  ;;  %v7700_v46 = vld [vmem:[%s11544_s0 + $0x9c] sm:$0xf]  ;;  %v811_v2 = vsel %vm8353_vm7, %v803_v24, %v810_v61  ;;  %v1097_v4 = vld [vmem:[#allocation2 + $0x190] sm:$0xf]  ;;  %205 = vst [vmem:[#allocation2 + $0x148] sm:$0x1] %v204_v50 }
 0x132   :  { %v7949_v25 = vcombine.low %v5326_v22, %v5336_v14  ;;  %v1101_v54 = vld [vmem:[#allocation2 + $0x198] sm:$0x1]  ;;  %v553_v13 = vshll.u32 %v290_v30, 16  ;;  %v558_v35 = vshrl.u32 %v291_v3, 16  ;;  %v99_v23 = vld [vmem:[#allocation2 + $0x154] sm:$0x1]  ;;  %v1098_v27 = vsel %vm8375_vm8, %v802_v8, %v1097_v4  ;;  %v3692_v45 = vpop.permute.xlu0 %3691 }
 0x133   :  { %6629 = vrot.lane.b32.xlu1 %v7957_v56, %s8292_s15  ;;  %1100 = vst.msk [vmem:[#allocation2 + $0x194] sm:$0xf] %vm21_vm0, %v811_v2  ;;  %v1102_v16 = vsel %vm8324_vm3, %v812_v21, %v1101_v54  ;;  %v552_v5 = vrot.slane %v550_v59, 7  ;;  %v561_v19 = vshll.u32 %v291_v3, 16  ;;  %v9520_v1 = vld [vmem:[#allocation2 + $0x138] sm:$0xf] }
 0x134   :  { %v6861_v42 = vld [vmem:[#allocation3 + $0x58] sm:$0xff]  ;;  %6613 = vrot.lane.b32.xlu0 %v7949_v25, %s8292_s15  ;;  %1099 = vst [vmem:[#allocation2 + $0x190] sm:$0xf] %v1098_v27  ;;  %1103 = vst [vmem:[#allocation2 + $0x198] sm:$0x1] %v1102_v16  ;;  %v560_v31 = vrot.slane %v558_v35, 7 }
 0x135   :  { %v6966_v6 = vsel %vm6952_vm1, %v6852_v12, 0  ;;  %v112_v32 = vsel %vm8324_vm3, 0, %v111_v58  ;;  %v814_v22 = vshrl.u32 %v7699_v60, 16  ;;  %3899 = vst.msk [vmem:[#allocation3 + $0x68] sm:$0xff] %vm3885_vm13, %v3708_v7  ;;  %v555_v40 = vor.u32 %v553_v13, %v552_v5  ;;  %v4777_v36 = vld [vmem:[#allocation2 + $0x13c] sm:$0x1]  ;;  %v3734_v17 = vpop.permute.xlu1 %3733 }
 0x136   :  { %v556_v26 = vrot.slane %v552_v5, 4  ;;  %8014 = vmatpush3.bf16.xpose.msra.mxu0 %v6966_v6  ;;  %113 = vst [vmem:[#allocation2 + $0x1a4] sm:$0x1] %v112_v32  ;;  %v817_v62 = vshll.u32 %v7699_v60, 16  ;;  %v822_v9 = vshrl.u32 %v7700_v46, 16  ;;  %v563_v63 = vor.u32 %v561_v19, %v560_v31  ;;  %3891 = vst.msk [vmem:[#allocation3 + $0x28] sm:$0xff] %vm3885_vm13, %v3692_v45 }
 0x137   :  { %v565_v33 = vrot.slane %v560_v31, 4  ;;  %v722_v47 = vld [vmem:[#allocation2 + $0x140] sm:$0xf]  ;;  %v816_v15 = vrot.slane %v814_v22, 7  ;;  %v825_v48 = vshll.u32 %v7700_v46, 16  ;;  %8110 = vmatprep.subr.msk.bf16.mxu0 %vm6952_vm1, %v6861_v42  ;;  %3739 = vrot.lane.b32.xlu1 %v9454_v11, %s8291_s14  ;;  %v100_v39 = vsel %vm8324_vm3, 0, %v99_v23 }
 0x138   :  { %v723_v20 = vsel %vm8375_vm8, %v555_v40, %v722_v47  ;;  %v9533_v52 = vrot.slane %v822_v9, 7  ;;  %v5515_v30 = vrot.slane %v5513_v37, 4  ;;  %3723 = vrot.lane.b32.xlu0 %v7814_v57, %s8291_s14  ;;  %v564_v55 = vsel %vm8353_vm7, %v556_v26, %v563_v63  ;;  %101 = vst [vmem:[#allocation2 + $0x154] sm:$0x1] %v100_v39  ;;  %v726_v24 = vld [vmem:[#allocation2 + $0x148] sm:$0x1] }
 0x139   :  { %724 = vst [vmem:[#allocation2 + $0x140] sm:$0xf] %v723_v20  ;;  %v819_v11 = vor.u32 %v817_v62, %v816_v15  ;;  %v820_v43 = vrot.slane %v816_v15, 4  ;;  %v5519_v8 = vshll.u32 %v9520_v1, 16  ;;  %725 = vst.msk [vmem:[#allocation2 + $0x144] sm:$0xf] %vm21_vm0, %v564_v55  ;;  %v727_v61 = vsel %vm8324_vm3, %v565_v33, %v726_v24  ;;  %v3718_v35 = vpop.permute.xlu0 %3717  ;;  %v4457_v23 = vpop.permute.xlu1 %4456 }
 0x13a   :  { %v827_v3 = vor.u32 %v825_v48, %v9533_v52  ;;  %v829_v51 = vrot.slane %v9533_v52, 4  ;;  %v5516_v37 = vor.u32 %v5515_v30, %v9476_v38  ;;  %v5523_v34 = vshrl.u32 %v9520_v1, 16  ;;  %v1909_v57 = vld [vmem:[#allocation2 + $0x194] sm:$0xf]  ;;  %3912 = vst.msk [vmem:[#allocation3 + $0xd0] sm:$0xff] %vm3885_vm13, %v3734_v17  ;;  %3904 = vst.msk [vmem:[#allocation3 + $0x90] sm:$0xff] %vm3885_vm13, %v3718_v35 }
 0x13b   :  { %v9551_v21 = vrot.slane %v5519_v8, 5  ;;  %v5529_v58 = vshll.u32 %v4777_v36, 16  ;;  %v5339_v60 = vrot.slane %v5337_v0, 4  ;;  %v1908_v56 = vld [vmem:[#allocation2 + $0x190] sm:$0xf]  ;;  %v2871_v50 = vshll.u32 %v1909_v57, 16 }
 0x13c   :  { %v9556_v14 = vld [vmem:[#allocation2 + $0x198] sm:$0xf]  ;;  %v2875_v38 = vshrl.u32 %v1909_v57, 16  ;;  %728 = vst [vmem:[#allocation2 + $0x148] sm:$0x1] %v727_v61  ;;  %v828_v59 = vsel %vm8353_vm7, %v820_v43, %v827_v3  ;;  %v2862_v12 = vshrl.u32 %v1908_v56, 16 }
 0x13d   :  { %v2865_v46 = vshll.u32 %v1908_v56, 16  ;;  %v2881_v25 = vshll.u32 %v9556_v14, 16  ;;  %v2885_v2 = vshrl.u32 %v9556_v14, 16  ;;  %v1104_v4 = vld [vmem:[#allocation2 + $0x1a4] sm:$0xf]  ;;  %v2873_v28 = vrot.slane %v2871_v50, 5  ;;  %v4441_v48 = vpop.permute.xlu0 %4440 }
 0x13e   :  { %1107 = vst.msk [vmem:[#allocation2 + $0x1a8] sm:$0xf] %vm21_vm0, %v828_v59  ;;  %v2877_v0 = vrot.slane %v2875_v38, 4  ;;  %v1105_v54 = vsel %vm8375_vm8, %v819_v11, %v1104_v4  ;;  %v5517_v13 = vrot.slane %v5516_v37, 4  ;;  %v2864_v29 = vrot.slane %v2862_v12, 4 }
 0x13f   :  { %v2867_v27 = vrot.slane %v2865_v46, 5  ;;  %v9565_v16 = vrot.slane %v2881_v25, 5  ;;  %1106 = vst [vmem:[#allocation2 + $0x1a4] sm:$0xf] %v1105_v54  ;;  %v5525_v5 = vrot.slane %v5523_v34, 4  ;;  %4648 = vst.msk [vmem:[#allocation3 + $0x68] sm:$0xff] %vm4634_vm14, %v4457_v23  ;;  %v5340_v31 = vor.u32 %v5339_v60, %v9483_v44 }
 0x140   :  { %v2878_v19 = vor.u32 %v2877_v0, %v2873_v28  ;;  %v1888_v1 = vld [vmem:[#allocation2 + $0x140] sm:$0xf]  ;;  %v5522_v42 = vsel %vm8451_vm11, %v5517_v13, %v9551_v21  ;;  %v5531_v7 = vrot.slane %v5529_v58, 5  ;;  %v1889_v32 = vld [vmem:[#allocation2 + $0x144] sm:$0xf]  ;;  %4640 = vst.msk [vmem:[#allocation3 + $0x28] sm:$0xff] %vm4634_vm14, %v4441_v48 }
 0x141   :  { %v2868_v6 = vor.u32 %v2867_v27, %v2864_v29  ;;  %v2686_v22 = vshrl.u32 %v1888_v1, 16  ;;  %v2689_v40 = vshll.u32 %v1888_v1, 16  ;;  %v5526_v26 = vor.u32 %v5525_v5, %v9551_v21  ;;  %v4756_v33 = vld [vmem:[#allocation2 + $0xe8] sm:$0xf]  ;;  %v4757_v47 = vld [vmem:[#allocation2 + $0xec] sm:$0x1] }
 0x142   :  { %v2879_v62 = vrot.slane %v2878_v19, 4  ;;  %v2695_v9 = vshll.u32 %v1889_v32, 16  ;;  %v2699_v63 = vshrl.u32 %v1889_v32, 16  ;;  %v9574_v15 = vrot.slane %v5340_v31, 4  ;;  %v218_v34 = vld [vmem:[#allocation2 + $0x1ac] sm:$0x1] }
 0x143   :  { %v2869_v45 = vrot.slane %v2868_v6, 4  ;;  %v9576_v20 = vld [vmem:[#allocation2 + $0x148] sm:$0xf]  ;;  %v2688_v39 = vrot.slane %v2686_v22, 4  ;;  %v2691_v36 = vrot.slane %v2689_v40, 5  ;;  %v5527_v44 = vrot.slane %v5526_v26, 4  ;;  %v4483_v27 = vpop.permute.xlu1 %4482 }
 0x144   :  { %v2884_v30 = vsel %vm8451_vm11, %v2879_v62, %v9565_v16  ;;  %v2697_v55 = vrot.slane %v2695_v9, 5  ;;  %v2701_v11 = vrot.slane %v2699_v63, 4  ;;  %v2705_v43 = vshll.u32 %v9576_v20, 16  ;;  %v206_v12 = vld [vmem:[#allocation2 + $0x15c] sm:$0x1]  ;;  %v8185_v25 = vld [vmem:[#allocation2 + $0x134] sm:$0xff]  }
 0x145   :  { %v2874_v8 = vsel %vm8451_vm11, %v2869_v45, %v2873_v28  ;;  %v2692_v24 = vor.u32 %v2691_v36, %v2688_v39  ;;  %v2709_v3 = vshrl.u32 %v9576_v20, 16  ;;  %v5532_v37 = vsel %vm8451_vm11, %v5527_v44, %v5531_v7  ;;  %v4804_v59 = vld [vmem:[#allocation2 + $0x1a8] sm:$0xf]  ;;  %v4783_v29 = vld [vmem:[#allocation2 + $0x154] sm:$0xf]  ;;  %4661 = vst.msk [vmem:[#allocation3 + $0xd0] sm:$0xff] %vm4634_vm14, %v4483_v27 }
 0x146   :  { %v7833_v17 = vcombine.low %v2874_v8, %v2884_v30  ;;  %v2702_v57 = vor.u32 %v2701_v11, %v2697_v55  ;;  %v9588_v61 = vrot.slane %v2705_v43, 5  ;;  %v9590_v21 = vcombine.low %v5522_v42, %v5532_v37  ;;  %v4803_v58 = vld [vmem:[#allocation2 + $0x1a4] sm:$0xf]  ;;  %v4784_v7 = vld [vmem:[#allocation2 + $0x158] sm:$0xf]  ;;  %v4467_v48 = vpop.permute.xlu0 %4466  ;;  %v6862_v30 = vld [vmem:[#allocation3 + $0x60] sm:$0xff] }
 0x147   :  { %v2693_v60 = vrot.slane %v2692_v24, 4  ;;  %v5343_v56 = vshll.u32 %v4756_v33, 16  ;;  %v5347_v50 = vshrl.u32 %v4756_v33, 16  ;;  %v5353_v38 = vshll.u32 %v4757_v47, 16  ;;  %v6853_v40 = vld [vmem:[#allocation3 + $0x18] sm:$0xff]  ;;  %v8187_v62 = vld [vmem:[#allocation2 + $0x1a4] sm:$0xff]  }
 0x148   :  { %3761 = vrot.lane.b32.xlu1 %v7833_v17, %s8291_s14  ;;  %v2703_v46 = vrot.slane %v2702_v57, 4  ;;  %v219_v4 = vsel %vm8337_vm6, 0, %v218_v34  ;;  %v5754_v28 = vshrl.u32 %v4803_v58, 16  ;;  %v5757_v0 = vshll.u32 %v4803_v58, 16  ;;  %v1883_v26 = vld [vmem:[#allocation2 + $0x12c] sm:$0xf] }
 0x149   :  { %v2698_v54 = vsel %vm8451_vm11, %v2693_v60, %v2697_v55  ;;  %v5345_v13 = vrot.slane %v5343_v56, 5  ;;  %v5349_v35 = vrot.slane %v5347_v50, 4  ;;  %v5355_v23 = vrot.slane %v5353_v38, 5  ;;  %220 = vst [vmem:[#allocation2 + $0x1ac] sm:$0x1] %v219_v4  ;;  %v8186_v45 = vld [vmem:[#allocation2 + $0xe4] sm:$0xff]   ;;  %v6600_v55 = vpop.permute.xlu1 %6599 }
 0x14a   :  { %v2708_v5 = vsel %vm8451_vm11, %v2703_v46, %v9588_v61  ;;  %v5756_v19 = vrot.slane %v5754_v28, 4  ;;  %v5759_v1 = vrot.slane %v5757_v0, 5  ;;  %v5763_v42 = vshll.u32 %v4804_v59, 16  ;;  %4653 = vst.msk [vmem:[#allocation3 + $0x90] sm:$0xff] %vm4634_vm14, %v4467_v48  ;;  %v1884_v58 = vld [vmem:[#allocation2 + $0x130] sm:$0xf] }
 0x14b   :  { %v7825_v31 = vcombine.low %v2698_v54, %v2708_v5  ;;  %v5346_v6 = vsel %vm8451_vm11, %v9574_v15, %v5345_v13  ;;  %v5350_v32 = vor.u32 %v5349_v35, %v5345_v13  ;;  %v5767_v22 = vshrl.u32 %v4804_v59, 16  ;;  %6791 = vst.msk [vmem:[#allocation3 + $0x68] sm:$0xff] %vm6777_vm15, %v6600_v55  ;;  %v1863_v60 = vld [vmem:[#allocation2 + $0xdc] sm:$0xf]  ;;  %v8188_v4 = vld [vmem:[#allocation2 + $0x154] sm:$0xff]  }
 0x14c   :  { %4488 = vrot.lane.b32.xlu1 %v8185_v25, %s8290_s11  ;;  %v5760_v9 = vor.u32 %v5759_v1, %v5756_v19  ;;  %v9605_v63 = vrot.slane %v5763_v42, 5  ;;  %v207_v33 = vsel %vm8337_vm6, 0, %v206_v12  ;;  %v5578_v47 = vshrl.u32 %v4783_v29, 16  ;;  %v1885_v12 = vld [vmem:[#allocation2 + $0x134] sm:$0xf]  ;;  %v6584_v25 = vpop.permute.xlu0 %6583 }
 0x14d   :  { %3745 = vrot.lane.b32.xlu0 %v7825_v31, %s8291_s14  ;;  %v5351_v39 = vrot.slane %v5350_v32, 4  ;;  %v5769_v15 = vrot.slane %v5767_v22, 4  ;;  %208 = vst [vmem:[#allocation2 + $0x15c] sm:$0x1] %v207_v33  ;;  %v5581_v36 = vshll.u32 %v4783_v29, 16  ;;  %v5587_v44 = vshll.u32 %v4784_v7, 16 }
 0x14e   :  { %v9611_v11 = vrot.slane %v5760_v9, 4  ;;  %v5580_v43 = vrot.slane %v5578_v47, 4  ;;  %v5591_v8 = vshrl.u32 %v4784_v7, 16  ;;  %v6969_v24 = vsel %vm6952_vm1, %v6853_v40, 0  ;;  %6783 = vst.msk [vmem:[#allocation3 + $0x28] sm:$0xff] %vm6777_vm15, %v6584_v25  ;;  %v8213_v35 = vld [vmem:[#allocation2 + $0x94] sm:$0xff]  }
 0x14f   :  { %v5356_v37 = vsel %vm8451_vm11, %v5351_v39, %v5355_v23  ;;  %v5770_v34 = vor.u32 %v5769_v15, %v9605_v63  ;;  %v5583_v17 = vrot.slane %v5581_v36, 5  ;;  %v9618_v57 = vrot.slane %v5587_v44, 5  ;;  %8016 = vmatpush3.bf16.xpose.msra.mxu0 %v6969_v24  ;;  %v8214_v23 = vld [vmem:[#allocation2 + $0x44] sm:$0xff]   ;;  %1755 = vst.msk [vmem:[#allocation3 + $0x78] sm:$0xff] %vm1739_vm12, %v8213_v35  ;;  %v1864_v33 = vld [vmem:[#allocation2 + $0xe0] sm:$0xf] }
 0x150   :  { %4510 = vrot.lane.b32.xlu1 %v8187_v62, %s8290_s11  ;;  %v7950_v56 = vcombine.low %v5346_v6, %v5356_v37  ;;  %v1108_v50 = vld [vmem:[#allocation2 + $0x1ac] sm:$0x1]  ;;  %v5766_v38 = vsel %vm8451_vm11, %v9611_v11, %v9605_v63  ;;  %v5593_v59 = vrot.slane %v5591_v8, 4  ;;  %v2642_v46 = vshrl.u32 %v1883_v26, 16  ;;  %8111 = vmatprep.subr.msk.bf16.mxu0 %vm6952_vm1, %v6862_v30  ;;  %1747 = vst.msk [vmem:[#allocation3 + $0x38] sm:$0xff] %vm1739_vm12, %v8214_v23 }
 0x151   :  { %4472 = vrot.lane.b32.xlu0 %v8186_v45, %s8290_s11  ;;  %v1109_v28 = vsel %vm8324_vm3, %v829_v51, %v1108_v50  ;;  %v9631_v0 = vrot.slane %v5770_v34, 4  ;;  %v5584_v54 = vor.u32 %v5583_v17, %v5580_v43  ;;  %v2645_v13 = vshll.u32 %v1883_v26, 16 }
 0x152   :  { %1110 = vst [vmem:[#allocation2 + $0x1ac] sm:$0x1] %v1109_v28  ;;  %v5594_v29 = vor.u32 %v5593_v59, %v9618_v57  ;;  %v2644_v27 = vrot.slane %v2642_v46, 4  ;;  %v2651_v5 = vshll.u32 %v1884_v58, 16  ;;  %v2655_v19 = vshrl.u32 %v1884_v58, 16  ;;  %v6866_v46 = vld [vmem:[#allocation3 + $0x80] sm:$0xff] }
 0x153   :  { %v5585_v1 = vrot.slane %v5584_v54, 4  ;;  %v2647_v42 = vrot.slane %v2645_v13, 5  ;;  %v2661_v52 = vshll.u32 %v1885_v12, 16  ;;  %v2665_v7 = vshrl.u32 %v1885_v12, 16  ;;  %v1865_v12 = vld [vmem:[#allocation2 + $0xe4] sm:$0xf] }
 0x154   :  { %6631 = vrot.lane.b32.xlu1 %v9590_v21, %s8292_s15  ;;  %v4785_v51 = vld [vmem:[#allocation2 + $0x15c] sm:$0xf]  ;;  %v5595_v31 = vrot.slane %v5594_v29, 4  ;;  %v2653_v6 = vrot.slane %v2651_v5, 5  ;;  %v2657_v32 = vrot.slane %v2655_v19, 4  ;;  %v2466_v22 = vshrl.u32 %v1863_v60, 16 }
 0x155   :  { %4494 = vrot.lane.b32.xlu0 %v8188_v4, %s8290_s11  ;;  %v5590_v40 = vsel %vm8451_vm11, %v5585_v1, %v9618_v57  ;;  %v5597_v26 = vshll.u32 %v4785_v51, 16  ;;  %v5601_v62 = vshrl.u32 %v4785_v51, 16  ;;  %v2648_v9 = vor.u32 %v2647_v42, %v2644_v27  ;;  %v6875_v54 = vld [vmem:[#allocation3 + $0xc8] sm:$0xff] }
 0x156   :  { %v2658_v47 = vor.u32 %v2657_v32, %v2653_v6  ;;  %v2663_v48 = vrot.slane %v2661_v52, 5  ;;  %v2667_v45 = vrot.slane %v2665_v7, 4  ;;  %v2468_v39 = vrot.slane %v2466_v22, 4  ;;  %v1911_v52 = vld [vmem:[#allocation2 + $0x19c] sm:$0xf] }
 0x157   :  { %v5599_v21 = vrot.slane %v5597_v26, 5  ;;  %v5603_v15 = vrot.slane %v5601_v62, 4  ;;  %v2649_v36 = vrot.slane %v2648_v9, 4  ;;  %v2469_v44 = vshll.u32 %v1863_v60, 16  ;;  %v6626_v27 = vpop.permute.xlu1 %6625  ;;  %v1912_v32 = vld [vmem:[#allocation2 + $0x1a0] sm:$0x1] }
 0x158   :  { %v2659_v30 = vrot.slane %v2658_v47, 4  ;;  %v2668_v55 = vor.u32 %v2667_v45, %v2663_v48  ;;  %v2475_v43 = vshll.u32 %v1864_v33, 16  ;;  %v2479_v8 = vshrl.u32 %v1864_v33, 16  ;;  %6804 = vst.msk [vmem:[#allocation3 + $0xd0] sm:$0xff] %vm6777_vm15, %v6626_v27  ;;  %v6610_v7 = vpop.permute.xlu0 %6609  ;;  %v8216_v26 = vld [vmem:[#allocation2 + $0xc8] sm:$0xff]  }
 0x159   :  { %6615 = vrot.lane.b32.xlu0 %v7950_v56, %s8292_s15  ;;  %v4805_v24 = vld [vmem:[#allocation2 + $0x1ac] sm:$0xf]  ;;  %v5600_v37 = vsel %vm8451_vm11, %v5595_v31, %v5599_v21  ;;  %v5604_v34 = vor.u32 %v5603_v15, %v5599_v21  ;;  %v2654_v17 = vsel %vm8451_vm11, %v2649_v36, %v2653_v6  ;;  %v2471_v57 = vrot.slane %v2469_v44, 5  ;;  %6796 = vst.msk [vmem:[#allocation3 + $0x90] sm:$0xff] %vm6777_vm15, %v6610_v7 }
 0x15a   :  { %v5773_v58 = vshll.u32 %v4805_v24, 16  ;;  %v5777_v50 = vshrl.u32 %v4805_v24, 16  ;;  %v7961_v59 = vcombine.low %v5590_v40, %v5600_v37  ;;  %v2664_v60 = vsel %vm8451_vm11, %v2659_v30, %v2663_v48  ;;  %v8215_v40 = vld [vmem:[#allocation2 + $0x118] sm:$0xff]   ;;  %v1891_v47 = vld [vmem:[#allocation2 + $0x14c] sm:$0xf]  ;;  %1760 = vst.msk [vmem:[#allocation3 + $0xa0] sm:$0xff] %vm1739_vm12, %v8216_v26 }
 0x15b   :  { %v9650_v25 = vrot.slane %v5604_v34, 4  ;;  %v9652_v56 = vrot.slane %v2668_v55, 4  ;;  %v7823_v4 = vcombine.low %v2654_v17, %v2664_v60  ;;  %v2472_v28 = vor.u32 %v2471_v57, %v2468_v39  ;;  %v1892_v39 = vld [vmem:[#allocation2 + $0x150] sm:$0x1]  ;;  %v3710_v21 = vpop.permute.xlu1 %3709  ;;  %1768 = vst.msk [vmem:[#allocation3 + $0xe0] sm:$0xff] %vm1739_vm12, %v8215_v40 }
 0x15c   :  { %v5775_v13 = vrot.slane %v5773_v58, 5  ;;  %v5779_v35 = vrot.slane %v5777_v50, 4  ;;  %v2477_v23 = vrot.slane %v2475_v43, 5  ;;  %v2481_v29 = vrot.slane %v2479_v8, 4  ;;  %3900 = vst.msk [vmem:[#allocation3 + $0x70] sm:$0xff] %vm3885_vm13, %v3710_v21  ;;  %v3694_v36 = vpop.permute.xlu0 %3693 }
 0x15d   :  { %6637 = vrot.lane.b32.xlu0 %v7961_v59, %s8292_s15  ;;  %v2473_v5 = vrot.slane %v2472_v28, 4  ;;  %v2485_v19 = vshll.u32 %v1865_v12, 16  ;;  %v2489_v1 = vshrl.u32 %v1865_v12, 16  ;;  %v7008_v42 = vsel %vm6952_vm1, %v6866_v46, 0  ;;  %v4778_v43 = vld [vmem:[#allocation2 + $0x140] sm:$0xf] }
 0x15e   :  { %v5776_v51 = vsel %vm8451_vm11, %v9631_v0, %v5775_v13  ;;  %v5780_v31 = vor.u32 %v5779_v35, %v5775_v13  ;;  %v2482_v6 = vor.u32 %v2481_v29, %v2477_v23  ;;  %8030 = vmatpush3.bf16.xpose.msra.mxu1 %v7008_v42  ;;  %v2887_v22 = vrot.slane %v2885_v2, 4  ;;  %3892 = vst.msk [vmem:[#allocation3 + $0x30] sm:$0xff] %vm3885_vm13, %v3694_v36  ;;  %v4779_v17 = vld [vmem:[#allocation2 + $0x144] sm:$0xf]  ;;  %v9690_v12 = vld [vmem:[#allocation2 + $0x148] sm:$0xf] }
 0x15f   :  { %v7969_v62 = vcombine.low %v5766_v38, %v5776_v51  ;;  %v2478_v0 = vsel %vm8451_vm11, %v2473_v5, %v2477_v23  ;;  %v2487_v9 = vrot.slane %v2485_v19, 5  ;;  %v2491_v33 = vrot.slane %v2489_v1, 4  ;;  %8116 = vmatprep.subr.msk.bf16.mxu1 %vm6952_vm1, %v6875_v54  ;;  %v3736_v50 = vpop.permute.xlu1 %3735  ;;  %v4758_v54 = vld [vmem:[#allocation2 + $0xf0] sm:$0xf]  ;;  %v4759_v29 = vld [vmem:[#allocation2 + $0xf4] sm:$0xf] }
 0x160   :  { %v9671_v14 = vrot.slane %v5780_v31, 4  ;;  %v2483_v2 = vrot.slane %v2482_v6, 4  ;;  %v2888_v48 = vor.u32 %v2887_v22, %v9565_v16  ;;  %v2891_v45 = vshll.u32 %v1911_v52, 16  ;;  %3913 = vst.msk [vmem:[#allocation3 + $0xd8] sm:$0xff] %vm3885_vm13, %v3736_v50  ;;  %v9699_v40 = vld [vmem:[#allocation2 + $0xf8] sm:$0xf] }
 0x161   :  { %6653 = vrot.lane.b32.xlu1 %v7969_v62, %s8292_s15  ;;  %v2492_v63 = vor.u32 %v2491_v33, %v2487_v9  ;;  %v2895_v11 = vshrl.u32 %v1911_v52, 16  ;;  %v2901_v38 = vshll.u32 %v1912_v32, 16  ;;  %v2711_v15 = vrot.slane %v2709_v3, 4  ;;  %v3720_v1 = vpop.permute.xlu0 %3719  ;;  %v4806_v33 = vld [vmem:[#allocation2 + $0x1b0] sm:$0xf] }
 0x162   :  { %v2488_v16 = vsel %vm8451_vm11, %v2483_v2, %v2487_v9  ;;  %v2889_v44 = vrot.slane %v2888_v48, 4  ;;  %v2893_v30 = vrot.slane %v2891_v45, 5  ;;  %v2715_v55 = vshll.u32 %v1891_v47, 16  ;;  %3905 = vst.msk [vmem:[#allocation3 + $0x98] sm:$0xff] %vm3885_vm13, %v3720_v1  ;;  %v37_v21 = vld [vmem:[#allocation2 + $0x164] sm:$0x1] }
 0x163   :  { %v9683_v8 = vrot.slane %v2492_v63, 4  ;;  %v7815_v24 = vcombine.low %v2478_v0, %v2488_v16  ;;  %v2897_v37 = vrot.slane %v2895_v11, 4  ;;  %v2903_v34 = vrot.slane %v2901_v38, 5  ;;  %v4459_v51 = vpop.permute.xlu1 %4458  ;;  %v8193_v38 = vld [vmem:[#allocation2 + $0x140] sm:$0xff]  }
 0x164   :  { %v2894_v20 = vsel %vm8451_vm11, %v2889_v44, %v2893_v30  ;;  %v2712_v3 = vor.u32 %v2711_v15, %v9588_v61  ;;  %v2717_v57 = vrot.slane %v2715_v55, 5  ;;  %v2719_v58 = vshrl.u32 %v1891_v47, 16  ;;  %4649 = vst.msk [vmem:[#allocation3 + $0x70] sm:$0xff] %vm4634_vm14, %v4459_v51  ;;  %v4786_v44 = vld [vmem:[#allocation2 + $0x160] sm:$0xf] }
 0x165   :  { %3741 = vrot.lane.b32.xlu1 %v7823_v4, %s8291_s14  ;;  %3725 = vrot.lane.b32.xlu0 %v7815_v24, %s8291_s14  ;;  %v2898_v59 = vor.u32 %v2897_v37, %v2893_v30  ;;  %v2725_v60 = vshll.u32 %v1892_v39, 16  ;;  %v5534_v46 = vshrl.u32 %v4778_v43, 16  ;;  %v5537_v28 = vshll.u32 %v4778_v43, 16  ;;  %v4807_v39 = vld [vmem:[#allocation2 + $0x1b4] sm:$0x1]  ;;  %v4443_v63 = vpop.permute.xlu0 %4442 }
 0x166   :  { %v2713_v13 = vrot.slane %v2712_v3, 4  ;;  %v2721_v35 = vrot.slane %v2719_v58, 4  ;;  %v5543_v23 = vshll.u32 %v4779_v17, 16  ;;  %v5547_v61 = vshrl.u32 %v4779_v17, 16  ;;  %4641 = vst.msk [vmem:[#allocation3 + $0x30] sm:$0xff] %vm4634_vm14, %v4443_v63  ;;  %v8194_v43 = vld [vmem:[#allocation2 + $0xf0] sm:$0xff]  }
 0x167   :  { %v2899_v27 = vrot.slane %v2898_v59, 4  ;;  %v2727_v5 = vrot.slane %v2725_v60, 5  ;;  %v5536_v19 = vrot.slane %v5534_v46, 4  ;;  %v5539_v4 = vrot.slane %v5537_v28, 5  ;;  %v4485_v30 = vpop.permute.xlu1 %4484  ;;  %v6854_v58 = vld [vmem:[#allocation3 + $0x20] sm:$0xff] }
 0x168   :  { %v2722_v42 = vor.u32 %v2721_v35, %v2717_v57  ;;  %v5545_v52 = vrot.slane %v5543_v23, 5  ;;  %v5549_v7 = vrot.slane %v5547_v61, 4  ;;  %v2718_v6 = vsel %vm8451_vm11, %v2713_v13, %v2717_v57  ;;  %4662 = vst.msk [vmem:[#allocation3 + $0xd8] sm:$0xff] %vm4634_vm14, %v4485_v30  ;;  %v1886_v28 = vld [vmem:[#allocation2 + $0x138] sm:$0xf]  ;;  %v8195_v35 = vld [vmem:[#allocation2 + $0x1ac] sm:$0xff]  }
 0x169   :  { %v2904_v31 = vsel %vm8451_vm11, %v2899_v27, %v2903_v34  ;;  %v5540_v32 = vor.u32 %v5539_v4, %v5536_v19  ;;  %v5553_v22 = vshll.u32 %v9690_v12, 16  ;;  %v5358_v9 = vshrl.u32 %v4758_v54, 16  ;;  %v4469_v13 = vpop.permute.xlu0 %4468 }
 0x16a   :  { %v7834_v26 = vcombine.low %v2894_v20, %v2904_v31  ;;  %v2723_v62 = vrot.slane %v2722_v42, 4  ;;  %v5550_v0 = vor.u32 %v5549_v7, %v5545_v52  ;;  %v5361_v48 = vshll.u32 %v4758_v54, 16  ;;  %v6863_v54 = vld [vmem:[#allocation3 + $0x68] sm:$0xff]  ;;  %4654 = vst.msk [vmem:[#allocation3 + $0x98] sm:$0xff] %vm4634_vm14, %v4469_v13 }
 0x16b   :  { %v5541_v47 = vrot.slane %v5540_v32, 4  ;;  %v9702_v2 = vrot.slane %v5553_v22, 5  ;;  %v5367_v45 = vshll.u32 %v4759_v29, 16  ;;  %v5360_v36 = vrot.slane %v5358_v9, 4  ;;  %v6602_v19 = vpop.permute.xlu1 %6601  ;;  %v1866_v7 = vld [vmem:[#allocation2 + $0xe8] sm:$0xf] }
 0x16c   :  { %3763 = vrot.lane.b32.xlu1 %v7834_v26, %s8291_s14  ;;  %v2728_v11 = vsel %vm8451_vm11, %v2723_v62, %v2727_v5  ;;  %v5551_v15 = vrot.slane %v5550_v0, 4  ;;  %v5371_v16 = vshrl.u32 %v4759_v29, 16  ;;  %v5363_v37 = vrot.slane %v5361_v48, 5  ;;  %v1887_v5 = vld [vmem:[#allocation2 + $0x13c] sm:$0x1]  ;;  %6792 = vst.msk [vmem:[#allocation3 + $0x70] sm:$0xff] %vm6777_vm15, %v6602_v19 }
 0x16d   :  { %v7826_v55 = vcombine.low %v2718_v6, %v2728_v11  ;;  %v5546_v24 = vsel %vm8451_vm11, %v5541_v47, %v5545_v52  ;;  %v5369_v34 = vrot.slane %v5367_v45, 5  ;;  %v5557_v20 = vshrl.u32 %v9690_v12, 16  ;;  %v1867_v22 = vld [vmem:[#allocation2 + $0xec] sm:$0x1]  ;;  %v8196_v26 = vld [vmem:[#allocation2 + $0x15c] sm:$0xff]   ;;  %v6586_v47 = vpop.permute.xlu0 %6585 }
 0x16e   :  { %v5556_v17 = vsel %vm8451_vm11, %v5551_v15, %v9702_v2  ;;  %v5373_v3 = vrot.slane %v5371_v16, 4  ;;  %v5377_v57 = vshll.u32 %v9699_v40, 16  ;;  %v5364_v59 = vor.u32 %v5363_v37, %v5360_v36  ;;  %6784 = vst.msk [vmem:[#allocation3 + $0x30] sm:$0xff] %vm6777_vm15, %v6586_v47 }
 0x16f   :  { %3747 = vrot.lane.b32.xlu0 %v7826_v55, %s8291_s14  ;;  %v7959_v50 = vcombine.low %v5546_v24, %v5556_v17  ;;  %v5783_v60 = vshll.u32 %v4806_v33, 16  ;;  %v5787_v46 = vshrl.u32 %v4806_v33, 16  ;;  %v5793_v29 = vshll.u32 %v4807_v39, 16  ;;  %v1913_v17 = vld [vmem:[#allocation2 + $0x1a4] sm:$0xf] }
 0x170   :  { %4490 = vrot.lane.b32.xlu1 %v8193_v38, %s8290_s11  ;;  %v5374_v23 = vor.u32 %v5373_v3, %v5369_v34  ;;  %v9718_v61 = vrot.slane %v5377_v57, 5  ;;  %v38_v27 = vsel %vm8324_vm3, 0, %v37_v21  ;;  %v5365_v4 = vrot.slane %v5364_v59, 4 }
 0x171   :  { %v5785_v1 = vrot.slane %v5783_v60, 5  ;;  %v5789_v42 = vrot.slane %v5787_v46, 4  ;;  %39 = vst [vmem:[#allocation2 + $0x164] sm:$0x1] %v38_v27  ;;  %v5607_v52 = vshll.u32 %v4786_v44, 16  ;;  %v5795_v31 = vrot.slane %v5793_v29, 5 }
 0x172   :  { %v5375_v51 = vrot.slane %v5374_v23, 4  ;;  %v5611_v6 = vshrl.u32 %v4786_v44, 16  ;;  %v6972_v32 = vsel %vm6952_vm1, %v6854_v58, 0  ;;  %v5370_v62 = vsel %vm8451_vm11, %v5365_v4, %v5369_v34  ;;  %v6867_v34 = vld [vmem:[#allocation3 + $0x88] sm:$0xff]  ;;  %v6876_v46 = vld [vmem:[#allocation3 + $0xd0] sm:$0xff] }
 0x173   :  { %4474 = vrot.lane.b32.xlu0 %v8194_v43, %s8290_s11  ;;  %v5786_v0 = vsel %vm8451_vm11, %v9671_v14, %v5785_v1  ;;  %v5790_v9 = vor.u32 %v5789_v42, %v5785_v1  ;;  %v9731_v33 = vrot.slane %v5607_v52, 5  ;;  %8018 = vmatpush3.bf16.xpose.msra.mxu0 %v6972_v32  ;;  %v2671_v39 = vshll.u32 %v1886_v28, 16  ;;  %v1914_v60 = vld [vmem:[#allocation2 + $0x1a8] sm:$0xf]  ;;  %v9758_v1 = vld [vmem:[#allocation2 + $0x1ac] sm:$0xf] }
 0x174   :  { %4512 = vrot.lane.b32.xlu1 %v8195_v35, %s8290_s11  ;;  %v5380_v48 = vsel %vm8451_vm11, %v5375_v51, %v9718_v61  ;;  %v5613_v45 = vrot.slane %v5611_v6, 4  ;;  %v2675_v21 = vshrl.u32 %v1886_v28, 16  ;;  %8112 = vmatprep.subr.msk.bf16.mxu0 %vm6952_vm1, %v6863_v54  ;;  %v2681_v15 = vshll.u32 %v1887_v5, 16  ;;  %v1893_v32 = vld [vmem:[#allocation2 + $0x154] sm:$0xf] }
 0x175   :  { %v7951_v14 = vcombine.low %v5370_v62, %v5380_v48  ;;  %v5791_v11 = vrot.slane %v5790_v9, 4  ;;  %v5610_v38 = vsel %vm8451_vm11, %v9650_v25, %v9731_v33  ;;  %v2673_v16 = vrot.slane %v2671_v39, 5  ;;  %v8221_v39 = vld [vmem:[#allocation2 + $0x120] sm:$0xff]  }
 0x176   :  { %v6628_v63 = vpop.permute.xlu1 %6627  ;;  %v5614_v36 = vor.u32 %v5613_v45, %v9731_v33  ;;  %v2677_v44 = vrot.slane %v2675_v21, 4  ;;  %v2495_v30 = vshll.u32 %v1866_v7, 16  ;;  %v2683_v43 = vrot.slane %v2681_v15, 5  ;;  %v114_v45 = vld [vmem:[#allocation2 + $0x1b8] sm:$0x1]  ;;  %v8222_v21 = vld [vmem:[#allocation2 + $0xd0] sm:$0xff]  }
 0x177   :  { %6805 = vst.msk [vmem:[#allocation3 + $0xd8] sm:$0xff] %vm6777_vm15, %v6628_v63  ;;  %4496 = vrot.lane.b32.xlu0 %v8196_v26, %s8290_s11  ;;  %v5796_v55 = vsel %vm8451_vm11, %v5791_v11, %v5795_v31  ;;  %v2499_v24 = vshrl.u32 %v1866_v7, 16  ;;  %v2505_v37 = vshll.u32 %v1867_v22, 16  ;;  %v2674_v58 = vsel %vm8451_vm11, %v9652_v56, %v2673_v16  ;;  %v9771_v11 = vld [vmem:[#allocation2 + $0x15c] sm:$0xf] }
 0x178   :  { %6633 = vrot.lane.b32.xlu1 %v7959_v50, %s8292_s15  ;;  %v7970_v25 = vcombine.low %v5786_v0, %v5796_v55  ;;  %v4787_v3 = vld [vmem:[#allocation2 + $0x164] sm:$0x1]  ;;  %v5615_v57 = vrot.slane %v5614_v36, 4  ;;  %v2678_v59 = vor.u32 %v2677_v44, %v2673_v16  ;;  %v2497_v13 = vrot.slane %v2495_v30, 5  ;;  %v1894_v0 = vld [vmem:[#allocation2 + $0x158] sm:$0xf] }
 0x179   :  { %v5617_v54 = vshll.u32 %v4787_v3, 16  ;;  %v2501_v35 = vrot.slane %v2499_v24, 4  ;;  %v2507_v23 = vrot.slane %v2505_v37, 5  ;;  %v7011_v50 = vsel %vm6952_vm1, %v6867_v34, 0  ;;  %v7702_v24 = vld [vmem:[%s11544_s0 + $0xa4] sm:$0xf] }
 0x17a   :  { %v6612_v28 = vpop.permute.xlu0 %6611  ;;  %v2679_v29 = vrot.slane %v2678_v59, 4  ;;  %v2906_v27 = vshrl.u32 %v1913_v17, 16  ;;  %v2909_v5 = vshll.u32 %v1913_v17, 16  ;;  %v2498_v56 = vsel %vm8451_vm11, %v9683_v8, %v2497_v13  ;;  %8032 = vmatpush3.bf16.xpose.msra.mxu1 %v7011_v50  ;;  %1769 = vst.msk [vmem:[#allocation3 + $0xe8] sm:$0xff] %vm1739_vm12, %v8221_v39  ;;  %1761 = vst.msk [vmem:[#allocation3 + $0xa8] sm:$0xff] %vm1739_vm12, %v8222_v21 }
 0x17b   :  { %6797 = vst.msk [vmem:[#allocation3 + $0x98] sm:$0xff] %vm6777_vm15, %v6612_v28  ;;  %6617 = vrot.lane.b32.xlu0 %v7951_v14, %s8292_s15  ;;  %v5619_v19 = vrot.slane %v5617_v54, 5  ;;  %v2502_v4 = vor.u32 %v2501_v35, %v2497_v13  ;;  %v2915_v42 = vshll.u32 %v1914_v60, 16  ;;  %v3712_v52 = vpop.permute.xlu1 %3711  ;;  %v2919_v6 = vshrl.u32 %v1914_v60, 16  ;;  %8117 = vmatprep.subr.msk.bf16.mxu1 %vm6952_vm1, %v6876_v46  ;;  %v102_v3 = vld [vmem:[#allocation2 + $0x168] sm:$0x1] }
 0x17c   :  { %6655 = vrot.lane.b32.xlu1 %v7970_v25, %s8292_s15  ;;  %v2684_v7 = vsel %vm8451_vm11, %v2679_v29, %v2683_v43  ;;  %v2908_v51 = vrot.slane %v2906_v27, 4  ;;  %v2911_v31 = vrot.slane %v2909_v5, 5  ;;  %3901 = vst.msk [vmem:[#allocation3 + $0x78] sm:$0xff] %vm3885_vm13, %v3712_v52  ;;  %v2925_v48 = vshll.u32 %v9758_v1, 16  ;;  %v7701_v43 = vld [vmem:[%s11544_s0 + $0xa0] sm:$0xf] }
 0x17d   :  { %v5620_v8 = vsel %vm8451_vm11, %v5615_v57, %v5619_v19  ;;  %v7824_v22 = vcombine.low %v2674_v58, %v2684_v7  ;;  %v2503_v26 = vrot.slane %v2502_v4, 4  ;;  %v2917_v62 = vrot.slane %v2915_v42, 5  ;;  %v7693_v57 = vld [vmem:[%s11544_s0 + $0x80] sm:$0xf]  ;;  %v8223_v28 = vld [vmem:[#allocation2 + $0x190] sm:$0xff]  }
 0x17e   :  { %v7962_v9 = vcombine.low %v5610_v38, %v5620_v8  ;;  %v2912_v33 = vor.u32 %v2911_v31, %v2908_v51  ;;  %v2921_v47 = vrot.slane %v2919_v6, 4  ;;  %v5381_v63 = vshrl.u32 %v9699_v40, 16  ;;  %v3696_v16 = vpop.permute.xlu0 %3695  ;;  %v8224_v54 = vld [vmem:[#allocation2 + $0x140] sm:$0xff]   ;;  %1780 = vst.msk [vmem:[#allocation3 + $0x140] sm:$0xff] %vm1739_vm12, %v8223_v28 }
 0x17f   :  { %v2508_v14 = vsel %vm8451_vm11, %v2503_v26, %v2507_v23  ;;  %v2730_v15 = vshrl.u32 %v1893_v32, 16  ;;  %v2733_v36 = vshll.u32 %v1893_v32, 16  ;;  %v9775_v55 = vrot.slane %v2925_v48, 5  ;;  %3893 = vst.msk [vmem:[#allocation3 + $0x38] sm:$0xff] %vm3885_vm13, %v3696_v16  ;;  %v7694_v50 = vld [vmem:[%s11544_s0 + $0x84] sm:$0xf] }
 0x180   :  { %6639 = vrot.lane.b32.xlu0 %v7962_v9, %s8292_s15  ;;  %3743 = vrot.lane.b32.xlu1 %v7824_v22, %s8291_s14  ;;  %v7816_v38 = vcombine.low %v2498_v56, %v2508_v14  ;;  %v2913_v44 = vrot.slane %v2912_v33, 4  ;;  %v2922_v30 = vor.u32 %v2921_v47, %v2917_v62  ;;  %v2739_v17 = vshll.u32 %v1894_v0, 16  ;;  %1772 = vst.msk [vmem:[#allocation3 + $0x100] sm:$0xff] %vm1739_vm12, %v8224_v54  ;;  %v4781_v22 = vld [vmem:[#allocation2 + $0x14c] sm:$0xf]  ;;  %v6855_v40 = vld [vmem:[#allocation3 + $0x28] sm:$0xff] }
 0x181   :  { %v2732_v37 = vrot.slane %v2730_v15, 4  ;;  %v2735_v34 = vrot.slane %v2733_v36, 5  ;;  %v2743_v25 = vshrl.u32 %v1894_v0, 16  ;;  %v2929_v60 = vshrl.u32 %v9758_v1, 16  ;;  %v8201_v0 = vld [vmem:[#allocation2 + $0x148] sm:$0xff]  }
 0x182   :  { %v2918_v58 = vsel %vm8451_vm11, %v2913_v44, %v2917_v62  ;;  %v2923_v59 = vrot.slane %v2922_v30, 4  ;;  %v2749_v46 = vshll.u32 %v9771_v11, 16  ;;  %v2741_v35 = vrot.slane %v2739_v17, 5  ;;  %v3738_v27 = vpop.permute.xlu1 %3737  ;;  %v4782_v47 = vld [vmem:[#allocation2 + $0x150] sm:$0x1]  ;;  %v8202_v17 = vld [vmem:[#allocation2 + $0xf8] sm:$0xff]  }
 0x183   :  { %v2736_v13 = vor.u32 %v2735_v34, %v2732_v37  ;;  %v2745_v23 = vrot.slane %v2743_v25, 4  ;;  %v115_v29 = vsel %vm8324_vm3, 0, %v114_v45  ;;  %v831_v56 = vshrl.u32 %v7701_v43, 16  ;;  %3914 = vst.msk [vmem:[#allocation3 + $0xe0] sm:$0xff] %vm3885_vm13, %v3738_v27  ;;  %v4761_v34 = vld [vmem:[#allocation2 + $0xfc] sm:$0xf] }
 0x184   :  { %3727 = vrot.lane.b32.xlu0 %v7816_v38, %s8291_s14  ;;  %v2928_v5 = vsel %vm8451_vm11, %v2923_v59, %v9775_v55  ;;  %v9802_v19 = vrot.slane %v2749_v46, 5  ;;  %116 = vst [vmem:[#allocation2 + $0x1b8] sm:$0x1] %v115_v29  ;;  %v834_v4 = vshll.u32 %v7701_v43, 16  ;;  %v839_v51 = vshrl.u32 %v7702_v24, 16 }
 0x185   :  { %v7835_v42 = vcombine.low %v2918_v58, %v2928_v5  ;;  %v2737_v52 = vrot.slane %v2736_v13, 4  ;;  %v2746_v7 = vor.u32 %v2745_v23, %v2741_v35  ;;  %v833_v31 = vrot.slane %v831_v56, 7  ;;  %v221_v46 = vld [vmem:[#allocation2 + $0x1c0] sm:$0x1] }
 0x186   :  { %v842_v6 = vshll.u32 %v7702_v24, 16  ;;  %v103_v32 = vsel %vm8324_vm3, 0, %v102_v3  ;;  %v763_v8 = vshrl.u32 %v7693_v57, 16  ;;  %v9812_v9 = vrot.slane %v839_v51, 7  ;;  %v3722_v48 = vpop.permute.xlu0 %3721  ;;  %v4461_v45 = vpop.permute.xlu1 %4460  ;;  %v4762_v29 = vld [vmem:[#allocation2 + $0x100] sm:$0x1] }
 0x187   :  { %3765 = vrot.lane.b32.xlu1 %v7835_v42, %s8291_s14  ;;  %v2742_v26 = vsel %vm8451_vm11, %v2737_v52, %v2741_v35  ;;  %v2747_v62 = vrot.slane %v2746_v7, 4  ;;  %104 = vst [vmem:[#allocation2 + $0x168] sm:$0x1] %v103_v32  ;;  %v766_v33 = vshll.u32 %v7693_v57, 16  ;;  %v836_v39 = vor.u32 %v834_v4, %v833_v31  ;;  %3906 = vst.msk [vmem:[#allocation3 + $0xa0] sm:$0xff] %vm3885_vm13, %v3722_v48  ;;  %v6864_v48 = vld [vmem:[#allocation3 + $0x70] sm:$0xff] }
 0x188   :  { %v837_v21 = vrot.slane %v833_v31, 4  ;;  %v765_v14 = vrot.slane %v763_v8, 7  ;;  %v771_v15 = vshrl.u32 %v7694_v50, 16  ;;  %4650 = vst.msk [vmem:[#allocation3 + $0x78] sm:$0xff] %vm4634_vm14, %v4461_v45  ;;  %v2753_v16 = vshrl.u32 %v9771_v11, 16 }
 0x189   :  { %v2752_v36 = vsel %vm8451_vm11, %v2747_v62, %v9802_v19  ;;  %v844_v38 = vor.u32 %v842_v6, %v9812_v9  ;;  %v774_v44 = vshll.u32 %v7694_v50, 16  ;;  %v5559_v57 = vrot.slane %v5557_v20, 4  ;;  %v209_v50 = vld [vmem:[#allocation2 + $0x170] sm:$0x1] }
 0x18a   :  { %v7827_v30 = vcombine.low %v2742_v26, %v2752_v36  ;;  %v768_v43 = vor.u32 %v766_v33, %v765_v14  ;;  %v769_v24 = vrot.slane %v765_v14, 4  ;;  %v9821_v37 = vrot.slane %v771_v15, 7  ;;  %v4445_v28 = vpop.permute.xlu0 %4444  ;;  %v9840_v51 = vld [vmem:[#allocation2 + $0x1b0] sm:$0xf] }
 0x18b   :  { %4492 = vrot.lane.b32.xlu1 %v8201_v0, %s8290_s11  ;;  %v845_v25 = vsel %vm8353_vm7, %v837_v21, %v844_v38  ;;  %v1111_v3 = vld [vmem:[#allocation2 + $0x1b8] sm:$0xf]  ;;  %v5563_v58 = vshll.u32 %v4781_v22, 16  ;;  %v5567_v59 = vshrl.u32 %v4781_v22, 16  ;;  %v846_v54 = vrot.slane %v9812_v9, 4  ;;  %4642 = vst.msk [vmem:[#allocation3 + $0x38] sm:$0xff] %vm4634_vm14, %v4445_v28 }
 0x18c   :  { %3749 = vrot.lane.b32.xlu0 %v7827_v30, %s8291_s14  ;;  %v1112_v13 = vsel %vm8375_vm8, %v836_v39, %v1111_v3  ;;  %1114 = vst.msk [vmem:[#allocation2 + $0x1bc] sm:$0xf] %vm21_vm0, %v845_v25  ;;  %v776_v35 = vor.u32 %v774_v44, %v9821_v37  ;;  %v5573_v23 = vshll.u32 %v4782_v47, 16  ;;  %v5560_v12 = vor.u32 %v5559_v57, %v9702_v2  ;;  %v1896_v9 = vld [vmem:[#allocation2 + $0x160] sm:$0xf] }
 0x18d   :  { %1113 = vst [vmem:[#allocation2 + $0x1b8] sm:$0xf] %v1112_v13  ;;  %v5565_v20 = vrot.slane %v5563_v58, 5  ;;  %v5569_v27 = vrot.slane %v5567_v59, 4  ;;  %v5383_v5 = vrot.slane %v5381_v63, 4  ;;  %v5387_v52 = vshll.u32 %v4761_v34, 16 }
 0x18e   :  { %v777_v56 = vsel %vm8353_vm7, %v769_v24, %v776_v35  ;;  %v1083_v4 = vld [vmem:[#allocation2 + $0x168] sm:$0xf]  ;;  %v5575_v42 = vrot.slane %v5573_v23, 5  ;;  %v5391_v7 = vshrl.u32 %v4761_v34, 16  ;;  %v5561_v2 = vrot.slane %v5560_v12, 4 }
 0x18f   :  { %v1084_v31 = vsel %vm8375_vm8, %v768_v43, %v1083_v4  ;;  %1086 = vst.msk [vmem:[#allocation2 + $0x16c] sm:$0xf] %vm21_vm0, %v777_v56  ;;  %v5570_v6 = vor.u32 %v5569_v27, %v5565_v20  ;;  %v5384_v32 = vor.u32 %v5383_v5, %v9718_v61  ;;  %v5389_v63 = vrot.slane %v5387_v52, 5 }
 0x190   :  { %4476 = vrot.lane.b32.xlu0 %v8202_v17, %s8290_s11  ;;  %1085 = vst [vmem:[#allocation2 + $0x168] sm:$0xf] %v1084_v31  ;;  %v5393_v8 = vrot.slane %v5391_v7, 4  ;;  %v5397_v22 = vshll.u32 %v4762_v29, 16  ;;  %v222_v26 = vsel %vm8337_vm6, 0, %v221_v46  ;;  %v778_v62 = vrot.slane %v9821_v37, 4 }
 0x191   :  { %v5571_v0 = vrot.slane %v5570_v6, 4  ;;  %v5385_v33 = vrot.slane %v5384_v32, 4  ;;  %223 = vst [vmem:[#allocation2 + $0x1c0] sm:$0x1] %v222_v26  ;;  %v210_v47 = vsel %vm8337_vm6, 0, %v209_v50  ;;  %v6975_v39 = vsel %vm6952_vm1, %v6855_v40, 0  ;;  %v4487_v30 = vpop.permute.xlu1 %4486 }
 0x192   :  { %v5394_v61 = vor.u32 %v5393_v8, %v5389_v63  ;;  %v5399_v45 = vrot.slane %v5397_v22, 5  ;;  %211 = vst [vmem:[#allocation2 + $0x170] sm:$0x1] %v210_v47  ;;  %v2931_v21 = vrot.slane %v2929_v60, 4  ;;  %v5566_v14 = vsel %vm8451_vm11, %v5561_v2, %v5565_v20  ;;  %8020 = vmatpush3.bf16.xpose.msra.mxu0 %v6975_v39  ;;  %4663 = vst.msk [vmem:[#allocation3 + $0xe0] sm:$0xff] %vm4634_vm14, %v4487_v30 }
 0x193   :  { %v5576_v15 = vsel %vm8451_vm11, %v5571_v0, %v5575_v42  ;;  %v4809_v36 = vld [vmem:[#allocation2 + $0x1bc] sm:$0xf]  ;;  %v2935_v38 = vshll.u32 %v9840_v51, 16  ;;  %v2939_v44 = vshrl.u32 %v9840_v51, 16  ;;  %v5390_v24 = vsel %vm8451_vm11, %v5385_v33, %v5389_v63  ;;  %8113 = vmatprep.subr.msk.bf16.mxu0 %vm6952_vm1, %v6864_v48  ;;  %v1917_v31 = vld [vmem:[#allocation2 + $0x1b4] sm:$0x1] }
 0x194   :  { %v8203_v43 = vld [vmem:[#allocation2 + $0x1b8] sm:$0xff]   ;;  %v5395_v37 = vrot.slane %v5394_v61, 4  ;;  %v2932_v60 = vor.u32 %v2931_v21, %v9775_v55  ;;  %v5807_v25 = vshll.u32 %v4809_v36, 16  ;;  %v5811_v3 = vshrl.u32 %v4809_v36, 16  ;;  %v4471_v55 = vpop.permute.xlu0 %4470  ;;  %v1897_v47 = vld [vmem:[#allocation2 + $0x164] sm:$0x1] }
 0x195   :  { %v4808_v1 = vld [vmem:[#allocation2 + $0x1b8] sm:$0xf]  ;;  %4514 = vrot.lane.b32.xlu1 %v8203_v43, %s8290_s11  ;;  %v7960_v57 = vcombine.low %v5566_v14, %v5576_v15  ;;  %v9871_v28 = vrot.slane %v2935_v38, 5  ;;  %4655 = vst.msk [vmem:[#allocation3 + $0xa0] sm:$0xff] %vm4634_vm14, %v4471_v55  ;;  %v6604_v50 = vpop.permute.xlu1 %6603  ;;  %v2941_v26 = vrot.slane %v2939_v44, 4  ;;  %v2755_v48 = vrot.slane %v2753_v16, 4 }
 0x196   :  { %v5798_v34 = vshrl.u32 %v4808_v1, 16  ;;  %v5801_v17 = vshll.u32 %v4808_v1, 16  ;;  %v5400_v58 = vsel %vm8451_vm11, %v5395_v37, %v5399_v45  ;;  %v4789_v59 = vld [vmem:[#allocation2 + $0x16c] sm:$0xf]  ;;  %v9869_v46 = vrot.slane %v2932_v60, 4  ;;  %6793 = vst.msk [vmem:[#allocation3 + $0x78] sm:$0xff] %vm6777_vm15, %v6604_v50 }
 0x197   :  { %v8204_v13 = vld [vmem:[#allocation2 + $0x168] sm:$0xff]   ;;  %v9873_v29 = vrot.slane %v5807_v25, 5  ;;  %v7952_v12 = vcombine.low %v5390_v24, %v5400_v58  ;;  %v5813_v27 = vrot.slane %v5811_v3, 4  ;;  %v5631_v56 = vshll.u32 %v4789_v59, 16  ;;  %v132_v15 = vld [vmem:[#allocation2 + $0x230] sm:$0x1] }
 0x198   :  { %v5800_v35 = vrot.slane %v5798_v34, 4  ;;  %v5803_v23 = vrot.slane %v5801_v17, 5  ;;  %v1115_v20 = vld [vmem:[#allocation2 + $0x1c0] sm:$0x1]  ;;  %v4788_v5 = vld [vmem:[#allocation2 + $0x168] sm:$0xf]  ;;  %4498 = vrot.lane.b32.xlu0 %v8204_v13, %s8290_s11  ;;  %v6588_v63 = vpop.permute.xlu0 %6587  ;;  %v2938_v22 = vsel %vm8451_vm11, %v9869_v46, %v9871_v28  ;;  %v2942_v39 = vor.u32 %v2941_v26, %v9871_v28 }
 0x199   :  { %v1116_v4 = vsel %vm8324_vm3, %v846_v54, %v1115_v20  ;;  %v1087_v52 = vld [vmem:[#allocation2 + $0x170] sm:$0x1]  ;;  %v5622_v7 = vshrl.u32 %v4788_v5, 16  ;;  %v5625_v51 = vshll.u32 %v4788_v5, 16  ;;  %6635 = vrot.lane.b32.xlu1 %v7960_v57, %s8292_s15  ;;  %v5814_v2 = vor.u32 %v5813_v27, %v9873_v29  ;;  %6785 = vst.msk [vmem:[#allocation3 + $0x38] sm:$0xff] %vm6777_vm15, %v6588_v63  ;;  %v6877_v34 = vld [vmem:[#allocation3 + $0xd8] sm:$0xff] }
 0x19a   :  { %v5804_v42 = vor.u32 %v5803_v23, %v5800_v35  ;;  %1117 = vst [vmem:[#allocation2 + $0x1c0] sm:$0x1] %v1116_v4  ;;  %v1088_v6 = vsel %vm8324_vm3, %v778_v62, %v1087_v52  ;;  %v9886_v32 = vrot.slane %v5631_v56, 5  ;;  %v5635_v40 = vshrl.u32 %v4789_v59, 16  ;;  %v6868_v14 = vld [vmem:[#allocation3 + $0x90] sm:$0xff]  ;;  %v8230_v59 = vld [vmem:[#allocation2 + $0xdc] sm:$0xff]  }
 0x19b   :  { %1089 = vst [vmem:[#allocation2 + $0x170] sm:$0x1] %v1088_v6  ;;  %v5624_v54 = vrot.slane %v5622_v7, 4  ;;  %v5627_v8 = vrot.slane %v5625_v51, 5  ;;  %v2945_v62 = vshll.u32 %v1917_v31, 16  ;;  %v9898_v61 = vrot.slane %v5814_v2, 4 }
 0x19c   :  { %v9893_v0 = vrot.slane %v5804_v42, 4  ;;  %v5637_v33 = vrot.slane %v5635_v40, 4  ;;  %6619 = vrot.lane.b32.xlu0 %v7952_v12, %s8292_s15  ;;  %v2759_v21 = vshll.u32 %v1896_v9, 16  ;;  %v2756_v44 = vor.u32 %v2755_v48, %v9802_v19  ;;  %v239_v43 = vld [vmem:[#allocation2 + $0x238] sm:$0x1]  ;;  %v8229_v17 = vld [vmem:[#allocation2 + $0x12c] sm:$0xff]  }
 0x19d   :  { %v5628_v45 = vor.u32 %v5627_v8, %v5624_v54  ;;  %v2947_v38 = vrot.slane %v2945_v62, 5  ;;  %v2763_v30 = vshrl.u32 %v1896_v9, 16  ;;  %v2943_v11 = vrot.slane %v2942_v39, 4  ;;  %v7713_v1 = vld [vmem:[%s11544_s0 + $0xd0] sm:$0xf]  ;;  %1770 = vst.msk [vmem:[#allocation3 + $0xf0] sm:$0xff] %vm1739_vm12, %v8229_v17 }
 0x19e   :  { %v5638_v36 = vor.u32 %v5637_v33, %v9886_v32  ;;  %v2761_v16 = vrot.slane %v2759_v21, 5  ;;  %v2769_v37 = vshll.u32 %v1897_v47, 16  ;;  %v9909_v60 = vld [vmem:[%s11544_s0 + $0xd4] sm:$0xf]  ;;  %v5810_v19 = vsel %vm8451_vm11, %v9893_v0, %v9873_v29  ;;  %v120_v58 = vld [vmem:[#allocation2 + $0x1e0] sm:$0x1] }
 0x19f   :  { %v5629_v24 = vrot.slane %v5628_v45, 4  ;;  %v2757_v25 = vrot.slane %v2756_v44, 4  ;;  %v2765_v3 = vrot.slane %v2763_v30, 4  ;;  %v7014_v57 = vsel %vm6952_vm1, %v6868_v14, 0  ;;  %1762 = vst.msk [vmem:[#allocation3 + $0xb0] sm:$0xff] %vm1739_vm12, %v8230_v59 }
 0x1a0   :  { %v5639_v55 = vrot.slane %v5638_v36, 4  ;;  %v2948_v13 = vsel %vm8451_vm11, %v2943_v11, %v2947_v38  ;;  %8034 = vmatpush3.bf16.xpose.msra.mxu1 %v7014_v57  ;;  %v133_v35 = vsel %vm8324_vm3, 0, %v132_v15  ;;  %v2771_v20 = vrot.slane %v2769_v37, 5  ;;  %v227_v42 = vld [vmem:[#allocation2 + $0x1e8] sm:$0x1] }
 0x1a1   :  { %v9916_v46 = vld [vmem:[#allocation2 + $0x1c0] sm:$0xf]  ;;  %v5634_v28 = vsel %vm8451_vm11, %v5629_v24, %v9886_v32  ;;  %v9930_v12 = vcombine.low %v2938_v22, %v2948_v13  ;;  %134 = vst [vmem:[#allocation2 + $0x230] sm:$0x1] %v133_v35  ;;  %8118 = vmatprep.subr.msk.bf16.mxu1 %vm6952_vm1, %v6877_v34  ;;  %v2762_v5 = vsel %vm8451_vm11, %v2757_v25, %v2761_v16  ;;  %v240_v4 = vsel %vm8337_vm6, 0, %v239_v43 }
 0x1a2   :  { %v5817_v23 = vshll.u32 %v9916_v46, 16  ;;  %v5821_v29 = vshrl.u32 %v9916_v46, 16  ;;  %v9928_v50 = vld [vmem:[#allocation2 + $0x170] sm:$0xf]  ;;  %v2766_v56 = vor.u32 %v2765_v3, %v2761_v16  ;;  %241 = vst [vmem:[#allocation2 + $0x238] sm:$0x1] %v240_v4 }
 0x1a3   :  { %v5641_v27 = vshll.u32 %v9928_v50, 16  ;;  %v933_v7 = vshrl.u32 %v7713_v1, 16  ;;  %v936_v51 = vshll.u32 %v7713_v1, 16  ;;  %v941_v31 = vshrl.u32 %v9909_v60, 16  ;;  %v7705_v2 = vld [vmem:[%s11544_s0 + $0xb0] sm:$0xf] }
 0x1a4   :  { %v9939_v52 = vrot.slane %v5817_v23, 5  ;;  %v2767_v32 = vrot.slane %v2766_v56, 4  ;;  %v944_v40 = vshll.u32 %v9909_v60, 16  ;;  %v121_v9 = vsel %vm8324_vm3, 0, %v120_v58  ;;  %v9953_v63 = vld [vmem:[%s11544_s0 + $0xb4] sm:$0xf] }
 0x1a5   :  { %v9945_v6 = vrot.slane %v5641_v27, 5  ;;  %v135_v54 = vld [vmem:[#allocation2 + $0x244] sm:$0x1]  ;;  %v935_v22 = vrot.slane %v933_v7, 7  ;;  %v943_v26 = vrot.slane %v941_v31, 7  ;;  %v228_v0 = vsel %vm8337_vm6, 0, %v227_v42  ;;  %v6630_v62 = vpop.permute.xlu1 %6629 }
 0x1a6   :  { %v5820_v8 = vsel %vm8451_vm11, %v9898_v61, %v9939_v52  ;;  %122 = vst [vmem:[#allocation2 + $0x1e0] sm:$0x1] %v121_v9  ;;  %v9964_v33 = vld [vmem:[%s11544_s0 + $0xd8] sm:$0xf]  ;;  %v2772_v61 = vsel %vm8451_vm11, %v2767_v32, %v2771_v20  ;;  %229 = vst [vmem:[#allocation2 + $0x1e8] sm:$0x1] %v228_v0  ;;  %v6614_v39 = vpop.permute.xlu0 %6613 }
 0x1a7   :  { %v7971_v47 = vcombine.low %v5810_v19, %v5820_v8  ;;  %v5644_v48 = vsel %vm8451_vm11, %v5639_v55, %v9945_v6  ;;  %v865_v45 = vshrl.u32 %v7705_v2, 16  ;;  %6806 = vst.msk [vmem:[#allocation3 + $0xe0] sm:$0xff] %vm6777_vm15, %v6630_v62  ;;  %v7828_v14 = vcombine.low %v2762_v5, %v2772_v61  ;;  %v7716_v38 = vld [vmem:[%s11544_s0 + $0xdc] sm:$0xf]  ;;  %v123_v44 = vld [vmem:[#allocation2 + $0x1f4] sm:$0x1] }
 0x1a8   :  { %v7963_v21 = vcombine.low %v5634_v28, %v5644_v48  ;;  %v938_v15 = vor.u32 %v936_v51, %v935_v22  ;;  %v939_v36 = vrot.slane %v935_v22, 4  ;;  %6798 = vst.msk [vmem:[#allocation3 + $0xa0] sm:$0xff] %vm6777_vm15, %v6614_v39  ;;  %v946_v30 = vor.u32 %v944_v40, %v943_v26  ;;  %v1153_v24 = vld [vmem:[#allocation2 + $0x230] sm:$0xf]  ;;  %v9987_v17 = vld [vmem:[%s11544_s0 + $0xb8] sm:$0xf] }
 0x1a9   :  { %6657 = vrot.lane.b32.xlu1 %v7971_v47, %s8292_s15  ;;  %v948_v43 = vrot.slane %v943_v26, 4  ;;  %v867_v11 = vrot.slane %v865_v45, 7  ;;  %v868_v16 = vshll.u32 %v7705_v2, 16  ;;  %v873_v1 = vshrl.u32 %v9953_v63, 16  ;;  %v3740_v19 = vpop.permute.xlu1 %3739  ;;  %v1157_v3 = vld [vmem:[#allocation2 + $0x238] sm:$0x1] }
 0x1aa   :  { %6641 = vrot.lane.b32.xlu0 %v7963_v21, %s8292_s15  ;;  %v1154_v37 = vsel %vm8375_vm8, %v938_v15, %v1153_v24  ;;  %v876_v60 = vshll.u32 %v9953_v63, 16  ;;  %v136_v34 = vsel %vm8324_vm3, 0, %v135_v54  ;;  %v947_v25 = vsel %vm8353_vm7, %v939_v36, %v946_v30  ;;  %3915 = vst.msk [vmem:[#allocation3 + $0xe8] sm:$0xff] %vm3885_vm13, %v3740_v19  ;;  %v3724_v28 = vpop.permute.xlu0 %3723  ;;  %v10000_v20 = vld [vmem:[%s11544_s0 + $0xbc] sm:$0xf]  ;;  %v8232_v5 = vld [vmem:[#allocation2 + $0x148] sm:$0xff]  }
 0x1ab   :  { %1155 = vst [vmem:[#allocation2 + $0x230] sm:$0xf] %v1154_v37  ;;  %v870_v57 = vor.u32 %v868_v16, %v867_v11  ;;  %v871_v58 = vrot.slane %v867_v11, 4  ;;  %137 = vst [vmem:[#allocation2 + $0x244] sm:$0x1] %v136_v34  ;;  %v950_v59 = vshrl.u32 %v9964_v33, 16  ;;  %v1158_v55 = vsel %vm8324_vm3, %v948_v43, %v1157_v3 }
 0x1ac   :  { %1156 = vst.msk [vmem:[#allocation2 + $0x234] sm:$0xf] %vm21_vm0, %v947_v25  ;;  %v875_v13 = vrot.slane %v873_v1, 7  ;;  %v953_v35 = vshll.u32 %v9964_v33, 16  ;;  %v958_v23 = vshrl.u32 %v7716_v38, 16  ;;  %v8231_v27 = vld [vmem:[#allocation2 + $0x198] sm:$0xff]  }
 0x1ad   :  { %3907 = vst.msk [vmem:[#allocation3 + $0xa8] sm:$0xff] %vm3885_vm13, %v3724_v28  ;;  %3767 = vrot.lane.b32.xlu1 %v9930_v12, %s8291_s14  ;;  %1159 = vst [vmem:[#allocation2 + $0x238] sm:$0x1] %v1158_v55  ;;  %v1125_v56 = vld [vmem:[#allocation2 + $0x1e0] sm:$0xf]  ;;  %v952_v4 = vrot.slane %v950_v59, 7 }
 0x1ae   :  { %v961_v42 = vshll.u32 %v7716_v38, 16  ;;  %v124_v7 = vsel %vm8324_vm3, 0, %v123_v44  ;;  %v882_v51 = vshrl.u32 %v9987_v17, 16  ;;  %3751 = vrot.lane.b32.xlu0 %v7828_v14, %s8291_s14  ;;  %v878_v31 = vor.u32 %v876_v60, %v875_v13  ;;  %v1129_v40 = vld [vmem:[#allocation2 + $0x1e8] sm:$0x1]  ;;  %1781 = vst.msk [vmem:[#allocation3 + $0x148] sm:$0xff] %vm1739_vm12, %v8231_v27 }
 0x1af   :  { %v880_v2 = vrot.slane %v875_v13, 4  ;;  %v1126_v32 = vsel %vm8375_vm8, %v870_v57, %v1125_v56  ;;  %v10011_v9 = vrot.slane %v958_v23, 7  ;;  %125 = vst [vmem:[#allocation2 + $0x1f4] sm:$0x1] %v124_v7  ;;  %1773 = vst.msk [vmem:[#allocation3 + $0x108] sm:$0xff] %vm1739_vm12, %v8232_v5  ;;  %v10018_v12 = vld [vmem:[%s11545_s1] sm:$0xff]   ;;  %v955_v63 = vor.u32 %v953_v35, %v952_v4 }
 0x1b0   :  { %1127 = vst [vmem:[#allocation2 + $0x1e0] sm:$0xf] %v1126_v32  ;;  %v956_v54 = vrot.slane %v952_v4, 4  ;;  %v884_v8 = vrot.slane %v882_v51, 7  ;;  %v10020_v22 = vld [vmem:[#allocation2 + $0x1c4] sm:$0xf]  ;;  %v879_v26 = vsel %vm8353_vm7, %v871_v58, %v878_v31  ;;  %8025 = vmatprep.mubr.msk.bf16.mxu0 %vm6952_vm1, %v10018_v12  ;;  %8045 = vmatprep.mubr.msk.bf16.mxu1 %vm6952_vm1, %v10018_v12 }
 0x1b1   :  { %v1130_v0 = vsel %vm8324_vm3, %v880_v2, %v1129_v40  ;;  %v963_v33 = vor.u32 %v961_v42, %v10011_v9  ;;  %v885_v62 = vshll.u32 %v9987_v17, 16  ;;  %v5645_v47 = vshrl.u32 %v9928_v50, 16  ;;  %1128 = vst.msk [vmem:[#allocation2 + $0x1e4] sm:$0xf] %vm21_vm0, %v879_v26  ;;  %v4812_v4 = vld [vmem:[#allocation2 + $0x1c8] sm:$0x1] }
 0x1b2   :  { %1131 = vst [vmem:[#allocation2 + $0x1e8] sm:$0x1] %v1130_v0  ;;  %v965_v48 = vrot.slane %v10011_v9, 4  ;;  %v890_v61 = vshrl.u32 %v10000_v20, 16  ;;  %v893_v45 = vshll.u32 %v10000_v20, 16  ;;  %v5823_v15 = vrot.slane %v5821_v29, 4 }
 0x1b3   :  { %v1948_v39 = vld [vmem:[#allocation2 + $0x230] sm:$0xf]  ;;  %v964_v21 = vsel %vm8353_vm7, %v956_v54, %v963_v33  ;;  %v1160_v14 = vld [vmem:[#allocation2 + $0x244] sm:$0xf]  ;;  %v5827_v36 = vshll.u32 %v10020_v22, 16  ;;  %v887_v1 = vor.u32 %v885_v62, %v884_v8  ;;  %v888_v46 = vrot.slane %v884_v8, 4 }
 0x1b4   :  { %v1949_v38 = vld [vmem:[#allocation2 + $0x234] sm:$0xf]  ;;  %v3214_v44 = vshrl.u32 %v1948_v39, 16  ;;  %v3217_v30 = vshll.u32 %v1948_v39, 16  ;;  %v1161_v43 = vsel %vm8375_vm8, %v955_v63, %v1160_v14  ;;  %1163 = vst.msk [vmem:[#allocation2 + $0x248] sm:$0xf] %vm21_vm0, %v964_v21  ;;  %v5824_v19 = vor.u32 %v5823_v15, %v9939_v52 }
 0x1b5   :  { %v10045_v24 = vrot.slane %v890_v61, 7  ;;  %v10047_v11 = vld [vmem:[#allocation2 + $0x238] sm:$0xf]  ;;  %v3223_v16 = vshll.u32 %v1949_v38, 16  ;;  %v3227_v37 = vshrl.u32 %v1949_v38, 16  ;;  %v10052_v59 = vrot.slane %v5827_v36, 5 }
 0x1b6   :  { %1162 = vst [vmem:[#allocation2 + $0x244] sm:$0xf] %v1161_v43  ;;  %v3216_v29 = vrot.slane %v3214_v44, 4  ;;  %v3219_v60 = vrot.slane %v3217_v30, 5  ;;  %v3233_v34 = vshll.u32 %v10047_v11, 16  ;;  %v3237_v55 = vshrl.u32 %v10047_v11, 16 }
 0x1b7   :  { %v1132_v17 = vld [vmem:[#allocation2 + $0x1f4] sm:$0xf]  ;;  %v3225_v25 = vrot.slane %v3223_v16, 5  ;;  %v3229_v3 = vrot.slane %v3227_v37, 4  ;;  %v1928_v57 = vld [vmem:[#allocation2 + $0x1e0] sm:$0xf]  ;;  %v895_v58 = vor.u32 %v893_v45, %v10045_v24 }
 0x1b8   :  { %v3220_v28 = vor.u32 %v3219_v60, %v3216_v29  ;;  %v3038_v13 = vshrl.u32 %v1928_v57, 16  ;;  %v3041_v35 = vshll.u32 %v1928_v57, 16  ;;  %v10055_v20 = vrot.slane %v3233_v34, 5  ;;  %v1929_v27 = vld [vmem:[#allocation2 + $0x1e4] sm:$0xf] }
 0x1b9   :  { %v3230_v23 = vor.u32 %v3229_v3, %v3225_v25  ;;  %v10057_v5 = vld [vmem:[#allocation2 + $0x1e8] sm:$0xf]  ;;  %v896_v52 = vsel %vm8353_vm7, %v888_v46, %v895_v58  ;;  %v1133_v56 = vsel %vm8375_vm8, %v887_v1, %v1132_v17  ;;  %v3047_v31 = vshll.u32 %v1929_v27, 16  ;;  %v4791_v62 = vld [vmem:[#allocation2 + $0x174] sm:$0xf]  ;;  %v8209_v60 = vld [vmem:[#allocation2 + $0x1c0] sm:$0xff]  }
 0x1ba   :  { %v3221_v42 = vrot.slane %v3220_v28, 4  ;;  %v3040_v7 = vrot.slane %v3038_v13, 4  ;;  %v3043_v51 = vrot.slane %v3041_v35, 5  ;;  %1134 = vst [vmem:[#allocation2 + $0x1f4] sm:$0xf] %v1133_v56  ;;  %v3051_v32 = vshrl.u32 %v1929_v27, 16  ;;  %v3762_v54 = vpop.permute.xlu1 %3761 }
 0x1bb   :  { %1135 = vst.msk [vmem:[#allocation2 + $0x1f8] sm:$0xf] %vm21_vm0, %v896_v52  ;;  %v3231_v2 = vrot.slane %v3230_v23, 4  ;;  %v3057_v40 = vshll.u32 %v10057_v5, 16  ;;  %v897_v63 = vrot.slane %v10045_v24, 4  ;;  %v3049_v0 = vrot.slane %v3047_v31, 5 }
 0x1bc   :  { %v3226_v8 = vsel %vm8451_vm11, %v3221_v42, %v3225_v25  ;;  %v3044_v26 = vor.u32 %v3043_v51, %v3040_v7  ;;  %v10068_v33 = vrot.slane %v5824_v19, 4  ;;  %3926 = vst.msk [vmem:[#allocation3 + $0x140] sm:$0xff] %vm3885_vm13, %v3762_v54  ;;  %v3053_v45 = vrot.slane %v3051_v32, 4  ;;  %v4792_v14 = vld [vmem:[#allocation2 + $0x178] sm:$0x1] }
 0x1bd   :  { %v3236_v61 = vsel %vm8451_vm11, %v3231_v2, %v10055_v20  ;;  %v10074_v39 = vrot.slane %v3057_v40, 5  ;;  %v5831_v21 = vshrl.u32 %v10020_v22, 16  ;;  %v5837_v38 = vshll.u32 %v4812_v4, 16  ;;  %v242_v1 = vld [vmem:[#allocation2 + $0x24c] sm:$0x1]  ;;  %v8211_v7 = vld [vmem:[#allocation2 + $0x244] sm:$0xff]  }
 0x1be   :  { %v7849_v15 = vcombine.low %v3226_v8, %v3236_v61  ;;  %v3045_v36 = vrot.slane %v3044_v26, 4  ;;  %v5647_v44 = vrot.slane %v5645_v47, 4  ;;  %v3054_v30 = vor.u32 %v3053_v45, %v3049_v0  ;;  %v4489_v46 = vpop.permute.xlu1 %4488  ;;  %v4843_v47 = vld [vmem:[#allocation2 + $0x244] sm:$0xf]  ;;  %v4844_v23 = vld [vmem:[#allocation2 + $0x248] sm:$0xf] }
 0x1bf   :  { %v5833_v43 = vrot.slane %v5831_v21, 4  ;;  %v5651_v16 = vshll.u32 %v4791_v62, 16  ;;  %v5655_v37 = vshrl.u32 %v4791_v62, 16  ;;  %v3061_v29 = vshrl.u32 %v10057_v5, 16  ;;  %v3746_v17 = vpop.permute.xlu0 %3745  ;;  %4664 = vst.msk [vmem:[#allocation3 + $0xe8] sm:$0xff] %vm4634_vm14, %v4489_v46  ;;  %v8238_v54 = vld [vmem:[#allocation2 + $0x134] sm:$0xff]  }
 0x1c0   :  { %3793 = vrot.lane.b32.xlu1 %v7849_v15, %s8291_s14  ;;  %v5830_v22 = vsel %vm8451_vm11, %v10068_v33, %v10052_v59  ;;  %v5648_v34 = vor.u32 %v5647_v44, %v9945_v6  ;;  %v5661_v50 = vshll.u32 %v4792_v14, 16  ;;  %v3050_v19 = vsel %vm8451_vm11, %v3045_v36, %v3049_v0  ;;  %3918 = vst.msk [vmem:[#allocation3 + $0x100] sm:$0xff] %vm3885_vm13, %v3746_v17  ;;  %v230_v4 = vld [vmem:[#allocation2 + $0x1fc] sm:$0x1]  ;;  %v8239_v61 = vld [vmem:[#allocation2 + $0xe4] sm:$0xff]   ;;  %v8210_v45 = vld [vmem:[#allocation2 + $0x170] sm:$0xff]  }
 0x1c1   :  { %v3055_v25 = vrot.slane %v3054_v30, 4  ;;  %v5834_v3 = vor.u32 %v5833_v43, %v10052_v59  ;;  %v5839_v57 = vrot.slane %v5837_v38, 5  ;;  %v5653_v28 = vrot.slane %v5651_v16, 5  ;;  %v4823_v32 = vld [vmem:[#allocation2 + $0x1f4] sm:$0xf]  ;;  %1771 = vst.msk [vmem:[#allocation3 + $0xf8] sm:$0xff] %vm1739_vm12, %v8238_v54 }
 0x1c2   :  { %v5649_v58 = vrot.slane %v5648_v34, 4  ;;  %v5657_v13 = vrot.slane %v5655_v37, 4  ;;  %v5663_v35 = vrot.slane %v5661_v50, 5  ;;  %v243_v52 = vsel %vm8337_vm6, 0, %v242_v1  ;;  %v4511_v42 = vpop.permute.xlu1 %4510  ;;  %v4824_v62 = vld [vmem:[#allocation2 + $0x1f8] sm:$0xf] }
 0x1c3   :  { %v3060_v6 = vsel %vm8451_vm11, %v3055_v25, %v10074_v39  ;;  %v5835_v27 = vrot.slane %v5834_v3, 4  ;;  %v6106_v56 = vshrl.u32 %v4843_v47, 16  ;;  %244 = vst [vmem:[#allocation2 + $0x24c] sm:$0x1] %v243_v52  ;;  %v6109_v2 = vshll.u32 %v4843_v47, 16  ;;  %v4473_v40 = vpop.permute.xlu0 %4472  ;;  %4675 = vst.msk [vmem:[#allocation3 + $0x140] sm:$0xff] %vm4634_vm14, %v4511_v42 }
 0x1c4   :  { %v7841_v59 = vcombine.low %v3050_v19, %v3060_v6  ;;  %4516 = vrot.lane.b32.xlu1 %v8209_v60, %s8290_s11  ;;  %v5654_v51 = vsel %vm8451_vm11, %v5649_v58, %v5653_v28  ;;  %v5658_v31 = vor.u32 %v5657_v13, %v5653_v28  ;;  %v6115_v0 = vshll.u32 %v4844_v23, 16  ;;  %4656 = vst.msk [vmem:[#allocation3 + $0xa8] sm:$0xff] %vm4634_vm14, %v4473_v40  ;;  %v6856_v16 = vld [vmem:[#allocation3 + $0x30] sm:$0xff]  ;;  %v1918_v34 = vld [vmem:[#allocation2 + $0x1b8] sm:$0xf] }
 0x1c5   :  { %v5840_v8 = vsel %vm8451_vm11, %v5835_v27, %v5839_v57  ;;  %v6108_v26 = vrot.slane %v6106_v56, 4  ;;  %v6119_v33 = vshrl.u32 %v4844_v23, 16  ;;  %v6111_v15 = vrot.slane %v6109_v2, 5  ;;  %1763 = vst.msk [vmem:[#allocation3 + $0xb8] sm:$0xff] %vm1739_vm12, %v8239_v61  ;;  %v1919_v50 = vld [vmem:[#allocation2 + $0x1bc] sm:$0xf] }
 0x1c6   :  { %3777 = vrot.lane.b32.xlu0 %v7841_v59, %s8291_s14  ;;  %v7972_v21 = vcombine.low %v5830_v22, %v5840_v8  ;;  %v5659_v14 = vrot.slane %v5658_v31, 4  ;;  %v231_v36 = vsel %vm8337_vm6, 0, %v230_v4  ;;  %v10107_v38 = vrot.slane %v6115_v0, 5  ;;  %v6632_v37 = vpop.permute.xlu1 %6631  ;;  %v10115_v57 = vld [vmem:[#allocation2 + $0x1c0] sm:$0xf]  ;;  %v6865_v58 = vld [vmem:[#allocation3 + $0x78] sm:$0xff] }
 0x1c7   :  { %v6121_v44 = vrot.slane %v6119_v33, 4  ;;  %232 = vst [vmem:[#allocation2 + $0x1fc] sm:$0x1] %v231_v36  ;;  %v5930_v30 = vshrl.u32 %v4823_v32, 16  ;;  %v5933_v43 = vshll.u32 %v4823_v32, 16  ;;  %v6112_v46 = vor.u32 %v6111_v15, %v6108_v26  ;;  %v4495_v47 = vpop.permute.xlu0 %4494  ;;  %6807 = vst.msk [vmem:[#allocation3 + $0xe8] sm:$0xff] %vm6777_vm15, %v6632_v37 }
 0x1c8   :  { %4542 = vrot.lane.b32.xlu1 %v8211_v7, %s8290_s11  ;;  %v5664_v1 = vsel %vm8451_vm11, %v5659_v14, %v5663_v35  ;;  %v5939_v60 = vshll.u32 %v4824_v62, 16  ;;  %v5943_v22 = vshrl.u32 %v4824_v62, 16  ;;  %4667 = vst.msk [vmem:[#allocation3 + $0x100] sm:$0xff] %vm4634_vm14, %v4495_v47  ;;  %v8212_v28 = vld [vmem:[#allocation2 + $0x1f4] sm:$0xff]   ;;  %v6978_v6 = vsel %vm6952_vm1, %v6856_v16, 0  ;;  %v8240_v59 = vld [vmem:[#allocation2 + $0x1a4] sm:$0xff]  }
 0x1c9   :  { %v7964_v17 = vcombine.low %v5654_v51, %v5664_v1  ;;  %v6122_v19 = vor.u32 %v6121_v44, %v10107_v38  ;;  %v5932_v25 = vrot.slane %v5930_v30, 4  ;;  %v5935_v3 = vrot.slane %v5933_v43, 5  ;;  %8022 = vmatpush3.bf16.xpose.msra.mxu0 %v6978_v6  ;;  %v1898_v32 = vld [vmem:[#allocation2 + $0x168] sm:$0xf]  ;;  %v1899_v40 = vld [vmem:[#allocation2 + $0x16c] sm:$0xf] }
 0x1ca   :  { %4500 = vrot.lane.b32.xlu0 %v8210_v45, %s8290_s11  ;;  %v10119_v13 = vrot.slane %v6112_v46, 4  ;;  %v10121_v35 = vrot.slane %v5939_v60, 5  ;;  %v5945_v23 = vrot.slane %v5943_v22, 4  ;;  %v1164_v27 = vld [vmem:[#allocation2 + $0x24c] sm:$0x1]  ;;  %v2950_v4 = vshrl.u32 %v1918_v34, 16  ;;  %8114 = vmatprep.subr.msk.bf16.mxu0 %vm6952_vm1, %v6865_v58 }
 0x1cb   :  { %v10124_v52 = vrot.slane %v6122_v19, 4  ;;  %v5936_v56 = vor.u32 %v5935_v3, %v5932_v25  ;;  %v2953_v42 = vshll.u32 %v1918_v34, 16  ;;  %v1165_v7 = vsel %vm8324_vm3, %v965_v48, %v1164_v27  ;;  %v6616_v54 = vpop.permute.xlu0 %6615  ;;  %v8241_v8 = vld [vmem:[#allocation2 + $0x154] sm:$0xff]   ;;  %v10139_v33 = vld [vmem:[#allocation2 + $0x170] sm:$0xf]  ;;  %1782 = vst.msk [vmem:[#allocation3 + $0x150] sm:$0xff] %vm1739_vm12, %v8240_v59 }
 0x1cc   :  { %6659 = vrot.lane.b32.xlu1 %v7972_v21, %s8292_s15  ;;  %v6118_v51 = vsel %vm8451_vm11, %v10119_v13, %v10107_v38  ;;  %v5946_v31 = vor.u32 %v5945_v23, %v10121_v35  ;;  %v2959_v2 = vshll.u32 %v1919_v50, 16  ;;  %1166 = vst [vmem:[#allocation2 + $0x24c] sm:$0x1] %v1165_v7  ;;  %v2952_v9 = vrot.slane %v2950_v4, 4  ;;  %6799 = vst.msk [vmem:[#allocation3 + $0xa8] sm:$0xff] %vm6777_vm15, %v6616_v54 }
 0x1cd   :  { %v10137_v26 = vrot.slane %v5936_v56, 4  ;;  %v2955_v0 = vrot.slane %v2953_v42, 5  ;;  %v2963_v48 = vshrl.u32 %v1919_v50, 16  ;;  %v2969_v21 = vshll.u32 %v10115_v57, 16  ;;  %1774 = vst.msk [vmem:[#allocation3 + $0x110] sm:$0xff] %vm1739_vm12, %v8241_v8  ;;  %v6878_v56 = vld [vmem:[#allocation3 + $0xe0] sm:$0xff] }
 0x1ce   :  { %4526 = vrot.lane.b32.xlu0 %v8212_v28, %s8290_s11  ;;  %v1136_v62 = vld [vmem:[#allocation2 + $0x1fc] sm:$0x1]  ;;  %v10144_v61 = vrot.slane %v5946_v31, 4  ;;  %v2961_v45 = vrot.slane %v2959_v2, 5  ;;  %v2973_v14 = vshrl.u32 %v10115_v57, 16  ;;  %v2774_v16 = vshrl.u32 %v1898_v32, 16 }
 0x1cf   :  { %v1137_v15 = vsel %vm8324_vm3, %v897_v63, %v1136_v62  ;;  %v5942_v36 = vsel %vm8451_vm11, %v10137_v26, %v10121_v35  ;;  %v2956_v44 = vor.u32 %v2955_v0, %v2952_v9  ;;  %v2965_v30 = vrot.slane %v2963_v48, 4  ;;  %v6638_v46 = vpop.permute.xlu0 %6637  ;;  %v6869_v63 = vld [vmem:[#allocation3 + $0x98] sm:$0xff]  ;;  %v1951_v50 = vld [vmem:[#allocation2 + $0x23c] sm:$0xf]  ;;  %v1952_v27 = vld [vmem:[#allocation2 + $0x240] sm:$0x1] }
 0x1d0   :  { %1138 = vst [vmem:[#allocation2 + $0x1fc] sm:$0x1] %v1137_v15  ;;  %v10157_v43 = vrot.slane %v2969_v21, 5  ;;  %v2777_v37 = vshll.u32 %v1898_v32, 16  ;;  %v2783_v1 = vshll.u32 %v1899_v40, 16  ;;  %v2787_v24 = vshrl.u32 %v1899_v40, 16 }
 0x1d1   :  { %v2957_v60 = vrot.slane %v2956_v44, 4  ;;  %v2966_v22 = vor.u32 %v2965_v30, %v2961_v45  ;;  %v2793_v34 = vshll.u32 %v10139_v33, 16  ;;  %6810 = vst.msk [vmem:[#allocation3 + $0x100] sm:$0xff] %vm6777_vm15, %v6638_v46  ;;  %v2776_v47 = vrot.slane %v2774_v16, 4  ;;  %v117_v44 = vld [vmem:[#allocation2 + $0x1cc] sm:$0x1] }
 0x1d2   :  { %6643 = vrot.lane.b32.xlu0 %v7964_v17, %s8292_s15  ;;  %v2779_v19 = vrot.slane %v2777_v37, 5  ;;  %v2785_v25 = vrot.slane %v2783_v1, 5  ;;  %v2797_v3 = vshrl.u32 %v10139_v33, 16  ;;  %v2789_v23 = vrot.slane %v2787_v24, 4  ;;  %v7695_v5 = vld [vmem:[%s11544_s0 + $0x88] sm:$0xf] }
 0x1d3   :  { %v2962_v58 = vsel %vm8451_vm11, %v2957_v60, %v2961_v45  ;;  %v2967_v28 = vrot.slane %v2966_v22, 4  ;;  %v10165_v6 = vrot.slane %v2793_v34, 5  ;;  %v10167_v4 = vld [vmem:[#allocation2 + $0x24c] sm:$0xf]  ;;  %v7017_v59 = vsel %vm6952_vm1, %v6869_v63, 0  ;;  %v6654_v31 = vpop.permute.xlu1 %6653 }
 0x1d4   :  { %v2780_v42 = vor.u32 %v2779_v19, %v2776_v47  ;;  %v3239_v17 = vrot.slane %v3237_v55, 4  ;;  %v3243_v7 = vshll.u32 %v1951_v50, 16  ;;  %v6125_v2 = vshll.u32 %v10167_v4, 16  ;;  %8036 = vmatpush3.bf16.xpose.msra.mxu1 %v7017_v59  ;;  %6818 = vst.msk [vmem:[#allocation3 + $0x140] sm:$0xff] %vm6777_vm15, %v6654_v31  ;;  %v1931_v55 = vld [vmem:[#allocation2 + $0x1ec] sm:$0xf] }
 0x1d5   :  { %v6129_v32 = vshrl.u32 %v10167_v4, 16  ;;  %v2972_v40 = vsel %vm8451_vm11, %v2967_v28, %v10157_v43  ;;  %v2790_v54 = vor.u32 %v2789_v23, %v2785_v25  ;;  %8119 = vmatprep.subr.msk.bf16.mxu1 %vm6952_vm1, %v6878_v56  ;;  %v3247_v21 = vshrl.u32 %v1951_v50, 16  ;;  %v1932_v63 = vld [vmem:[#allocation2 + $0x1f0] sm:$0x1]  ;;  %v7703_v50 = vld [vmem:[%s11544_s0 + $0xa8] sm:$0xf] }
 0x1d6   :  { %v7837_v8 = vcombine.low %v2962_v58, %v2972_v40  ;;  %v2781_v9 = vrot.slane %v2780_v42, 4  ;;  %v3240_v0 = vor.u32 %v3239_v17, %v10055_v20  ;;  %v3245_v11 = vrot.slane %v3243_v7, 5  ;;  %v7704_v58 = vld [vmem:[%s11544_s0 + $0xac] sm:$0xf]  ;;  %v105_v59 = vld [vmem:[#allocation2 + $0x17c] sm:$0x1] }
 0x1d7   :  { %v10180_v48 = vrot.slane %v6125_v2, 5  ;;  %v10182_v62 = vld [vmem:[#allocation2 + $0x1fc] sm:$0xf]  ;;  %v2791_v45 = vrot.slane %v2790_v54, 4  ;;  %v3253_v15 = vshll.u32 %v1952_v27, 16  ;;  %v3742_v1 = vpop.permute.xlu1 %3741  ;;  %v3726_v46 = vpop.permute.xlu0 %3725  ;;  %v3249_v24 = vrot.slane %v3247_v21, 4 }
 0x1d8   :  { %v5949_v30 = vshll.u32 %v10182_v62, 16  ;;  %v5953_v16 = vshrl.u32 %v10182_v62, 16  ;;  %v2786_v37 = vsel %vm8451_vm11, %v2781_v9, %v2785_v25  ;;  %v3241_v20 = vrot.slane %v3240_v0, 4  ;;  %3916 = vst.msk [vmem:[#allocation3 + $0xf0] sm:$0xff] %vm3885_vm13, %v3742_v1  ;;  %3908 = vst.msk [vmem:[#allocation3 + $0xb0] sm:$0xff] %vm3885_vm13, %v3726_v46 }
 0x1d9   :  { %v6128_v60 = vsel %vm8451_vm11, %v10124_v52, %v10180_v48  ;;  %v2796_v22 = vsel %vm8451_vm11, %v2791_v45, %v10165_v6  ;;  %v3255_v34 = vrot.slane %v3253_v15, 5  ;;  %v3250_v28 = vor.u32 %v3249_v24, %v3245_v11  ;;  %v7696_v31 = vld [vmem:[%s11544_s0 + $0x8c] sm:$0xf]  ;;  %v224_v15 = vld [vmem:[#allocation2 + $0x1d4] sm:$0x1] }
 0x1da   :  { %v7985_v52 = vcombine.low %v6118_v51, %v6128_v60  ;;  %v10205_v47 = vrot.slane %v5949_v30, 5  ;;  %v7829_v19 = vcombine.low %v2786_v37, %v2796_v22  ;;  %v3246_v25 = vsel %vm8451_vm11, %v3241_v20, %v3245_v11  ;;  %v212_v1 = vld [vmem:[#allocation2 + $0x184] sm:$0x1]  ;;  %v4846_v24 = vld [vmem:[#allocation2 + $0x250] sm:$0xf] }
 0x1db   :  { %v3063_v23 = vrot.slane %v3061_v29, 4  ;;  %v3067_v27 = vshll.u32 %v1931_v55, 16  ;;  %v3071_v56 = vshrl.u32 %v1931_v55, 16  ;;  %v3077_v13 = vshll.u32 %v1932_v63, 16 }
 0x1dc   :  { %6685 = vrot.lane.b32.xlu1 %v7985_v52, %s8292_s15  ;;  %v5952_v38 = vsel %vm8451_vm11, %v10144_v61, %v10205_v47  ;;  %v118_v51 = vsel %vm8324_vm3, 0, %v117_v44  ;;  %v848_v42 = vshrl.u32 %v7703_v50, 16  ;;  %v3251_v17 = vrot.slane %v3250_v28, 4 }
 0x1dd   :  { %v7977_v29 = vcombine.low %v5942_v36, %v5952_v38  ;;  %v3064_v7 = vor.u32 %v3063_v23, %v10074_v39  ;;  %v3069_v61 = vrot.slane %v3067_v27, 5  ;;  %119 = vst [vmem:[#allocation2 + $0x1cc] sm:$0x1] %v118_v51  ;;  %v3073_v2 = vrot.slane %v3071_v56, 4 }
 0x1de   :  { %v3079_v40 = vrot.slane %v3077_v13, 5  ;;  %v850_v54 = vrot.slane %v848_v42, 7  ;;  %v851_v9 = vshll.u32 %v7703_v50, 16  ;;  %v3256_v0 = vsel %vm8451_vm11, %v3251_v17, %v3255_v34  ;;  %v3764_v11 = vpop.permute.xlu1 %3763  ;;  %v4847_v34 = vld [vmem:[#allocation2 + $0x254] sm:$0x1] }
 0x1df   :  { %6669 = vrot.lane.b32.xlu0 %v7977_v29, %s8292_s15  ;;  %v3065_v35 = vrot.slane %v3064_v7, 4  ;;  %v856_v26 = vshrl.u32 %v7704_v58, 16  ;;  %v859_v36 = vshll.u32 %v7704_v58, 16  ;;  %v7850_v39 = vcombine.low %v3246_v25, %v3256_v0  ;;  %3927 = vst.msk [vmem:[#allocation3 + $0x148] sm:$0xff] %vm3885_vm13, %v3764_v11  ;;  %v4827_v29 = vld [vmem:[#allocation2 + $0x204] sm:$0x1] }
 0x1e0   :  { %3769 = vrot.lane.b32.xlu1 %v7837_v8, %s8291_s14  ;;  %v3074_v55 = vor.u32 %v3073_v2, %v3069_v61  ;;  %v853_v45 = vor.u32 %v851_v9, %v850_v54  ;;  %v854_v21 = vrot.slane %v850_v54, 4  ;;  %v106_v37 = vsel %vm8324_vm3, 0, %v105_v59 }
 0x1e1   :  { %v3070_v44 = vsel %vm8451_vm11, %v3065_v35, %v3069_v61  ;;  %v10240_v30 = vrot.slane %v856_v26, 7  ;;  %v780_v20 = vshrl.u32 %v7695_v5, 16  ;;  %107 = vst [vmem:[#allocation2 + $0x17c] sm:$0x1] %v106_v37  ;;  %v783_v8 = vshll.u32 %v7695_v5, 16  ;;  %v3748_v63 = vpop.permute.xlu0 %3747 }
 0x1e2   :  { %v3075_v46 = vrot.slane %v3074_v55, 4  ;;  %v788_v60 = vshrl.u32 %v7696_v31, 16  ;;  %v791_v22 = vshll.u32 %v7696_v31, 16  ;;  %v225_v58 = vsel %vm8337_vm6, 0, %v224_v15  ;;  %3919 = vst.msk [vmem:[#allocation3 + $0x108] sm:$0xff] %vm3885_vm13, %v3748_v63  ;;  %v4491_v28 = vpop.permute.xlu1 %4490 }
 0x1e3   :  { %3753 = vrot.lane.b32.xlu0 %v7829_v19, %s8291_s14  ;;  %v861_v50 = vor.u32 %v859_v36, %v10240_v30  ;;  %v863_v52 = vrot.slane %v10240_v30, 4  ;;  %v782_v25 = vrot.slane %v780_v20, 7  ;;  %226 = vst [vmem:[#allocation2 + $0x1d4] sm:$0x1] %v225_v58  ;;  %v213_v19 = vsel %vm8337_vm6, 0, %v212_v1  ;;  %4665 = vst.msk [vmem:[#allocation3 + $0xf0] sm:$0xff] %vm4634_vm14, %v4491_v28 }
 0x1e4   :  { %3795 = vrot.lane.b32.xlu1 %v7850_v39, %s8291_s14  ;;  %v3080_v23 = vsel %vm8451_vm11, %v3075_v46, %v3079_v40  ;;  %v1118_v27 = vld [vmem:[#allocation2 + $0x1cc] sm:$0xf]  ;;  %v10253_v56 = vrot.slane %v788_v60, 7  ;;  %v6131_v38 = vrot.slane %v6129_v32, 4  ;;  %214 = vst [vmem:[#allocation2 + $0x184] sm:$0x1] %v213_v19 }
 0x1e5   :  { %v7842_v13 = vcombine.low %v3070_v44, %v3080_v23  ;;  %v862_v51 = vsel %vm8353_vm7, %v854_v21, %v861_v50  ;;  %v1119_v42 = vsel %vm8375_vm8, %v853_v45, %v1118_v27  ;;  %v785_v59 = vor.u32 %v783_v8, %v782_v25  ;;  %v4826_v5 = vld [vmem:[#allocation2 + $0x200] sm:$0xf]  ;;  %v4475_v61 = vpop.permute.xlu0 %4474  ;;  %v10283_v45 = vld [vmem:[#allocation2 + $0x1c4] sm:$0xf]  ;;  %v8246_v46 = vld [vmem:[#allocation2 + $0x1ac] sm:$0xff]  }
 0x1e6   :  { %1120 = vst [vmem:[#allocation2 + $0x1cc] sm:$0xf] %v1119_v42  ;;  %1121 = vst.msk [vmem:[#allocation2 + $0x1d0] sm:$0xf] %vm21_vm0, %v862_v51  ;;  %v786_v17 = vrot.slane %v782_v25, 4  ;;  %v793_v4 = vor.u32 %v791_v22, %v10253_v56  ;;  %v795_v32 = vrot.slane %v10253_v56, 4  ;;  %v6132_v7 = vor.u32 %v6131_v38, %v10180_v48  ;;  %v4513_v9 = vpop.permute.xlu1 %4512 }
 0x1e7   :  { %3779 = vrot.lane.b32.xlu0 %v7842_v13, %s8291_s14  ;;  %v6135_v31 = vshll.u32 %v4846_v24, 16  ;;  %v6139_v2 = vshrl.u32 %v4846_v24, 16  ;;  %v6145_v40 = vshll.u32 %v4847_v34, 16  ;;  %v5955_v54 = vrot.slane %v5953_v16, 4  ;;  %4657 = vst.msk [vmem:[#allocation3 + $0xb0] sm:$0xff] %vm4634_vm14, %v4475_v61  ;;  %v6857_v48 = vld [vmem:[#allocation3 + $0x38] sm:$0xff] }
 0x1e8   :  { %v794_v0 = vsel %vm8353_vm7, %v786_v17, %v793_v4  ;;  %v10274_v35 = vrot.slane %v6132_v7, 4  ;;  %v5959_v26 = vshll.u32 %v4826_v5, 16  ;;  %v5963_v36 = vshrl.u32 %v4826_v5, 16  ;;  %4676 = vst.msk [vmem:[#allocation3 + $0x148] sm:$0xff] %vm4634_vm14, %v4513_v9  ;;  %v1090_v11 = vld [vmem:[#allocation2 + $0x17c] sm:$0xf] }
 0x1e9   :  { %1093 = vst.msk [vmem:[#allocation2 + $0x180] sm:$0xf] %vm21_vm0, %v794_v0  ;;  %v10278_v39 = vrot.slane %v6135_v31, 5  ;;  %v6141_v62 = vrot.slane %v6139_v2, 4  ;;  %v10280_v16 = vrot.slane %v6145_v40, 5  ;;  %v5956_v55 = vor.u32 %v5955_v54, %v10205_v47  ;;  %v6890_v20 = vld [vmem:[#allocation3 + $0x140] sm:$0xff]  ;;  %v4497_v1 = vpop.permute.xlu0 %4496 }
 0x1ea   :  { %v1091_v21 = vsel %vm8375_vm8, %v785_v59, %v1090_v11  ;;  %v5961_v15 = vrot.slane %v5959_v26, 5  ;;  %v5965_v44 = vrot.slane %v5963_v36, 4  ;;  %v5969_v37 = vshll.u32 %v4827_v29, 16  ;;  %v8247_v8 = vld [vmem:[#allocation2 + $0x15c] sm:$0xff]   ;;  %v1122_v60 = vld [vmem:[#allocation2 + $0x1d4] sm:$0x1]  ;;  %v6634_v47 = vpop.permute.xlu1 %6633 }
 0x1eb   :  { %1092 = vst [vmem:[#allocation2 + $0x17c] sm:$0xf] %v1091_v21  ;;  %v6142_v22 = vor.u32 %v6141_v62, %v10278_v39  ;;  %v5957_v24 = vrot.slane %v5956_v55, 4  ;;  %v6981_v34 = vsel %vm6952_vm1, %v6857_v48, 0  ;;  %4668 = vst.msk [vmem:[#allocation3 + $0x108] sm:$0xff] %vm4634_vm14, %v4497_v1  ;;  %v1123_v63 = vsel %vm8324_vm3, %v863_v52, %v1122_v60  ;;  %v8219_v42 = vld [vmem:[#allocation2 + $0x24c] sm:$0xff]  }
 0x1ec   :  { %v1094_v50 = vld [vmem:[#allocation2 + $0x184] sm:$0x1]  ;;  %v5966_v25 = vor.u32 %v5965_v44, %v5961_v15  ;;  %v5971_v58 = vrot.slane %v5969_v37, 5  ;;  %8024 = vmatpush3.bf16.xpose.msra.mxu0 %v6981_v34  ;;  %v2975_v28 = vrot.slane %v2973_v14, 4  ;;  %6808 = vst.msk [vmem:[#allocation3 + $0xf0] sm:$0xff] %vm6777_vm15, %v6634_v47  ;;  %v6138_v52 = vsel %vm8451_vm11, %v10274_v35, %v10278_v39  ;;  %v8220_v62 = vld [vmem:[#allocation2 + $0x1fc] sm:$0xff]  }
 0x1ed   :  { %1783 = vst.msk [vmem:[#allocation3 + $0x158] sm:$0xff] %vm1739_vm12, %v8246_v46  ;;  %1775 = vst.msk [vmem:[#allocation3 + $0x118] sm:$0xff] %vm1739_vm12, %v8247_v8  ;;  %v8217_v23 = vld [vmem:[#allocation2 + $0x1cc] sm:$0xff]   ;;  %v1095_v30 = vsel %vm8324_vm3, %v795_v32, %v1094_v50  ;;  %v6143_v27 = vrot.slane %v6142_v22, 4  ;;  %8123 = vmatprep.subr.msk.bf16.mxu0 %vm6952_vm1, %v6890_v20  ;;  %v5962_v56 = vsel %vm8451_vm11, %v5957_v24, %v5961_v15  ;;  %v2979_v13 = vshll.u32 %v10283_v45, 16  ;;  %v6618_v51 = vpop.permute.xlu0 %6617 }
 0x1ee   :  { %1124 = vst [vmem:[#allocation2 + $0x1d4] sm:$0x1] %v1123_v63  ;;  %v4813_v57 = vld [vmem:[#allocation2 + $0x1cc] sm:$0xf]  ;;  %v4814_v14 = vld [vmem:[#allocation2 + $0x1d0] sm:$0xf]  ;;  %v2976_v38 = vor.u32 %v2975_v28, %v10157_v43  ;;  %4518 = vrot.lane.b32.xlu1 %v8217_v23, %s8290_s11  ;;  %v6656_v4 = vpop.permute.xlu1 %6655 }
 0x1ef   :  { %1096 = vst [vmem:[#allocation2 + $0x184] sm:$0x1] %v1095_v30  ;;  %v5967_v19 = vrot.slane %v5966_v25, 4  ;;  %v5842_v59 = vshrl.u32 %v4813_v57, 16  ;;  %v5845_v5 = vshll.u32 %v4813_v57, 16  ;;  %v5851_v29 = vshll.u32 %v4814_v14, 16 }
 0x1f0   :  { %v5855_v17 = vshrl.u32 %v4814_v14, 16  ;;  %6800 = vst.msk [vmem:[#allocation3 + $0xb0] sm:$0xff] %vm6777_vm15, %v6618_v51  ;;  %v4794_v32 = vld [vmem:[#allocation2 + $0x180] sm:$0xf]  ;;  %v6148_v7 = vsel %vm8451_vm11, %v6143_v27, %v10280_v16  ;;  %v10317_v61 = vrot.slane %v2976_v38, 4  ;;  %v10319_v31 = vrot.slane %v2979_v13, 5 }
 0x1f1   :  { %v5972_v43 = vsel %vm8451_vm11, %v5967_v19, %v5971_v58  ;;  %6819 = vst.msk [vmem:[#allocation3 + $0x148] sm:$0xff] %vm6777_vm15, %v6656_v4  ;;  %v5844_v2 = vrot.slane %v5842_v59, 4  ;;  %v5847_v40 = vrot.slane %v5845_v5, 5  ;;  %v5853_v54 = vrot.slane %v5851_v29, 5  ;;  %v1922_v0 = vld [vmem:[#allocation2 + $0x1c8] sm:$0x1] }
 0x1f2   :  { %v5857_v9 = vrot.slane %v5855_v17, 4  ;;  %v8218_v35 = vld [vmem:[#allocation2 + $0x17c] sm:$0xff]   ;;  %v5675_v36 = vshll.u32 %v4794_v32, 16  ;;  %v10322_v48 = vcombine.low %v6138_v52, %v6148_v7  ;;  %v10324_v11 = vcombine.low %v5962_v56, %v5972_v43  ;;  %4544 = vrot.lane.b32.xlu1 %v8219_v42, %s8290_s11  ;;  %v6640_v44 = vpop.permute.xlu0 %6639  ;;  %v3744_v37 = vpop.permute.xlu1 %3743  ;;  %v1901_v22 = vld [vmem:[#allocation2 + $0x174] sm:$0xf] }
 0x1f3   :  { %v4793_v26 = vld [vmem:[#allocation2 + $0x17c] sm:$0xf]  ;;  %v2982_v39 = vsel %vm8451_vm11, %v10317_v61, %v10319_v31  ;;  %v5848_v16 = vor.u32 %v5847_v40, %v5844_v2  ;;  %8026 = vmatmul.mubr.msk.bf16.vlgmr.msra.gmra.mrb[0].mxu0 %vm6952_vm1, %v10018_v12  ;;  %4502 = vrot.lane.b32.xlu0 %v8218_v35, %s8290_s11  ;;  %v5679_v46 = vshrl.u32 %v4794_v32, 16  ;;  %v2983_v8 = vshrl.u32 %v10283_v45, 16  ;;  %6811 = vst.msk [vmem:[#allocation3 + $0x108] sm:$0xff] %vm6777_vm15, %v6640_v44  ;;  %v8248_v43 = vld [vmem:[#allocation2 + $0x230] sm:$0xff]  }
 0x1f4   :  { %v5858_v55 = vor.u32 %v5857_v9, %v5853_v54  ;;  %v5666_v21 = vshrl.u32 %v4793_v26, 16  ;;  %v5669_v15 = vshll.u32 %v4793_v26, 16  ;;  %v5677_v1 = vrot.slane %v5675_v36, 5  ;;  %3917 = vst.msk [vmem:[#allocation3 + $0xf8] sm:$0xff] %vm3885_vm13, %v3744_v37  ;;  %v1902_v38 = vld [vmem:[#allocation2 + $0x178] sm:$0x1] }
 0x1f5   :  { %v10334_v20 = vld [vmem:[#allocation2 + $0x1d4] sm:$0xf]  ;;  %v2989_v60 = vshll.u32 %v1922_v0, 16  ;;  %v5849_v24 = vrot.slane %v5848_v16, 4  ;;  %v5681_v58 = vrot.slane %v5679_v46, 4  ;;  %v2985_v52 = vrot.slane %v2983_v8, 4 }
 0x1f6   :  { %v5859_v34 = vrot.slane %v5858_v55, 4  ;;  %v5861_v12 = vshll.u32 %v10334_v20, 16  ;;  %v5865_v47 = vshrl.u32 %v10334_v20, 16  ;;  %v10341_v63 = vld [vmem:[#allocation2 + $0x184] sm:$0xf]  ;;  %v5668_v50 = vrot.slane %v5666_v21, 4  ;;  %v3728_v27 = vpop.permute.xlu0 %3727 }
 0x1f7   :  { %v5671_v25 = vrot.slane %v5669_v15, 5  ;;  %v5685_v28 = vshll.u32 %v10341_v63, 16  ;;  %v5854_v45 = vsel %vm8451_vm11, %v5849_v24, %v5853_v54  ;;  %v5689_v30 = vshrl.u32 %v10341_v63, 16  ;;  %4528 = vrot.lane.b32.xlu0 %v8220_v62, %s8290_s11  ;;  %3909 = vst.msk [vmem:[#allocation3 + $0xb8] sm:$0xff] %vm3885_vm13, %v3728_v27  ;;  %v6870_v5 = vld [vmem:[#allocation3 + $0xa0] sm:$0xff]  ;;  %v6879_v26 = vld [vmem:[#allocation3 + $0xe8] sm:$0xff] }
 0x1f8   :  { %v10346_v23 = vrot.slane %v5861_v12, 5  ;;  %v5682_v14 = vor.u32 %v5681_v58, %v5677_v1  ;;  %v2991_v19 = vrot.slane %v2989_v60, 5  ;;  %v2986_v51 = vor.u32 %v2985_v52, %v10319_v31  ;;  %v8249_v2 = vld [vmem:[#allocation2 + $0x1e0] sm:$0xff]   ;;  %v1954_v16 = vld [vmem:[#allocation2 + $0x248] sm:$0xf]  ;;  %1796 = vst.msk [vmem:[#allocation3 + $0x1c0] sm:$0xff] %vm1739_vm12, %v8248_v43 }
 0x1f9   :  { %v5672_v57 = vor.u32 %v5671_v25, %v5668_v50  ;;  %v10350_v56 = vrot.slane %v5685_v28, 5  ;;  %v2799_v42 = vrot.slane %v2797_v3, 4  ;;  %v2803_v59 = vshll.u32 %v1901_v22, 16  ;;  %v3766_v7 = vpop.permute.xlu1 %3765  ;;  %v1953_v35 = vld [vmem:[#allocation2 + $0x244] sm:$0xf]  ;;  %1788 = vst.msk [vmem:[#allocation3 + $0x180] sm:$0xff] %vm1739_vm12, %v8249_v2 }
 0x1fa   :  { %v5864_v13 = vsel %vm8451_vm11, %v5859_v34, %v10346_v23  ;;  %v5683_v4 = vrot.slane %v5682_v14, 4  ;;  %v2807_v32 = vshrl.u32 %v1901_v22, 16  ;;  %v2987_v40 = vrot.slane %v2986_v51, 4  ;;  %3928 = vst.msk [vmem:[#allocation3 + $0x150] sm:$0xff] %vm3885_vm13, %v3766_v7  ;;  %v1933_v60 = vld [vmem:[#allocation2 + $0x1f4] sm:$0xf] }
 0x1fb   :  { %v7973_v29 = vcombine.low %v5854_v45, %v5864_v13  ;;  %v5673_v17 = vrot.slane %v5672_v57, 4  ;;  %v2800_v54 = vor.u32 %v2799_v42, %v10165_v6  ;;  %v2805_v9 = vrot.slane %v2803_v59, 5  ;;  %v10368_v6 = vld [vmem:[#allocation2 + $0x24c] sm:$0xf]  ;;  %v1934_v25 = vld [vmem:[#allocation2 + $0x1f8] sm:$0xf] }
 0x1fc   :  { %v2813_v0 = vshll.u32 %v1902_v38, 16  ;;  %v5688_v3 = vsel %vm8451_vm11, %v5683_v4, %v10350_v56  ;;  %v2809_v36 = vrot.slane %v2807_v32, 4  ;;  %v7020_v62 = vsel %vm6952_vm1, %v6870_v5, 0  ;;  %v138_v45 = vld [vmem:[#allocation2 + $0x258] sm:$0x1] }
 0x1fd   :  { %6661 = vrot.lane.b32.xlu1 %v7973_v29, %s8292_s15  ;;  %v5678_v33 = vsel %vm8451_vm11, %v5673_v17, %v5677_v1  ;;  %v2992_v21 = vsel %vm8451_vm11, %v2987_v40, %v2991_v19  ;;  %v2801_v15 = vrot.slane %v2800_v54, 4  ;;  %8038 = vmatpush3.bf16.xpose.msra.mxu1 %v7020_v62  ;;  %v3258_v46 = vshrl.u32 %v1953_v35, 16  ;;  %v4493_v22 = vpop.permute.xlu1 %4492  ;;  %v10391_v14 = vld [vmem:[#allocation2 + $0x1fc] sm:$0xf]  ;;  %v7717_v38 = vld [vmem:[%s11544_s0 + $0xe0] sm:$0xf] }
 0x1fe   :  { %v7965_v55 = vcombine.low %v5678_v33, %v5688_v3  ;;  %v2815_v44 = vrot.slane %v2813_v0, 5  ;;  %v7838_v37 = vcombine.low %v2982_v39, %v2992_v21  ;;  %v2810_v1 = vor.u32 %v2809_v36, %v2805_v9  ;;  %8120 = vmatprep.subr.msk.bf16.mxu1 %vm6952_vm1, %v6879_v26  ;;  %v3750_v58 = vpop.permute.xlu0 %3749  ;;  %4666 = vst.msk [vmem:[#allocation3 + $0xf8] sm:$0xff] %vm4634_vm14, %v4493_v22  ;;  %v7718_v59 = vld [vmem:[%s11544_s0 + $0xe4] sm:$0xf]  ;;  %v126_v54 = vld [vmem:[#allocation2 + $0x208] sm:$0x1] }
 0x1ff   :  { %v3261_v8 = vshll.u32 %v1953_v35, 16  ;;  %v2806_v24 = vsel %vm8451_vm11, %v2801_v15, %v2805_v9  ;;  %v3267_v34 = vshll.u32 %v1954_v16, 16  ;;  %v3271_v12 = vshrl.u32 %v1954_v16, 16  ;;  %3920 = vst.msk [vmem:[#allocation3 + $0x110] sm:$0xff] %vm3885_vm13, %v3750_v58  ;;  %v7709_v9 = vld [vmem:[%s11544_s0 + $0xc0] sm:$0xf] }
 0x200   :  { %6645 = vrot.lane.b32.xlu0 %v7965_v55, %s8292_s15  ;;  %v3277_v50 = vshll.u32 %v10368_v6, 16  ;;  %v2811_v61 = vrot.slane %v2810_v1, 4  ;;  %v3260_v31 = vrot.slane %v3258_v46, 4  ;;  %v3281_v28 = vshrl.u32 %v10368_v6, 16 }
 0x201   :  { %6687 = vrot.lane.b32.xlu1 %v10322_v48, %s8292_s15  ;;  %v3263_v39 = vrot.slane %v3261_v8, 5  ;;  %v3269_v52 = vrot.slane %v3267_v34, 5  ;;  %v3273_v27 = vrot.slane %v3271_v12, 4  ;;  %v3082_v19 = vshrl.u32 %v1933_v60, 16 }
 0x202   :  { %v10389_v57 = vrot.slane %v3277_v50, 5  ;;  %v2816_v48 = vsel %vm8451_vm11, %v2811_v61, %v2815_v44  ;;  %v3085_v51 = vshll.u32 %v1933_v60, 16  ;;  %v3091_v42 = vshll.u32 %v1934_v25, 16  ;;  %v4477_v32 = vpop.permute.xlu0 %4476  ;;  %v7710_v44 = vld [vmem:[%s11544_s0 + $0xc4] sm:$0xf] }
 0x203   :  { %v3264_v13 = vor.u32 %v3263_v39, %v3260_v31  ;;  %v7830_v5 = vcombine.low %v2806_v24, %v2816_v48  ;;  %v3274_v29 = vor.u32 %v3273_v27, %v3269_v52  ;;  %v3084_v17 = vrot.slane %v3082_v19, 4  ;;  %4658 = vst.msk [vmem:[#allocation3 + $0xb8] sm:$0xff] %vm4634_vm14, %v4477_v32  ;;  %v4816_v60 = vld [vmem:[#allocation2 + $0x1d8] sm:$0xf] }
 0x204   :  { %6671 = vrot.lane.b32.xlu0 %v10324_v11, %s8292_s15  ;;  %v3095_v4 = vshrl.u32 %v1934_v25, 16  ;;  %v3087_v43 = vrot.slane %v3085_v51, 5  ;;  %v3093_v2 = vrot.slane %v3091_v42, 5  ;;  %v3101_v40 = vshll.u32 %v10391_v14, 16  ;;  %v8225_v24 = vld [vmem:[#allocation2 + $0x1d4] sm:$0xff]  }
 0x205   :  { %3771 = vrot.lane.b32.xlu1 %v7838_v37, %s8291_s14  ;;  %v3265_v7 = vrot.slane %v3264_v13, 4  ;;  %v3275_v11 = vrot.slane %v3274_v29, 4  ;;  %v3105_v35 = vshrl.u32 %v10391_v14, 16  ;;  %v139_v26 = vsel %vm8324_vm3, 0, %v138_v45  ;;  %v4817_v45 = vld [vmem:[#allocation2 + $0x1dc] sm:$0x1] }
 0x206   :  { %v3097_v0 = vrot.slane %v3095_v4, 4  ;;  %v3088_v3 = vor.u32 %v3087_v43, %v3084_v17  ;;  %v10414_v36 = vrot.slane %v3101_v40, 5  ;;  %140 = vst [vmem:[#allocation2 + $0x258] sm:$0x1] %v139_v26  ;;  %v967_v62 = vshrl.u32 %v7717_v38, 16  ;;  %v8226_v29 = vld [vmem:[#allocation2 + $0x184] sm:$0xff]  }
 0x207   :  { %v3270_v33 = vsel %vm8451_vm11, %v3265_v7, %v3269_v52  ;;  %v3280_v16 = vsel %vm8451_vm11, %v3275_v11, %v10389_v57  ;;  %v970_v21 = vshll.u32 %v7717_v38, 16  ;;  %v975_v15 = vshrl.u32 %v7718_v59, 16  ;;  %v4515_v25 = vpop.permute.xlu1 %4514  ;;  %v245_v11 = vld [vmem:[#allocation2 + $0x260] sm:$0x1] }
 0x208   :  { %3755 = vrot.lane.b32.xlu0 %v7830_v5, %s8291_s14  ;;  %v3098_v55 = vor.u32 %v3097_v0, %v3093_v2  ;;  %v7851_v37 = vcombine.low %v3270_v33, %v3280_v16  ;;  %v3089_v1 = vrot.slane %v3088_v3, 4  ;;  %v969_v46 = vrot.slane %v967_v62, 7  ;;  %4677 = vst.msk [vmem:[#allocation3 + $0x150] sm:$0xff] %vm4634_vm14, %v4515_v25  ;;  %v233_v62 = vld [vmem:[#allocation2 + $0x210] sm:$0x1] }
 0x209   :  { %v978_v8 = vshll.u32 %v7718_v59, 16  ;;  %v10423_v34 = vrot.slane %v975_v15, 7  ;;  %v127_v12 = vsel %vm8324_vm3, 0, %v126_v54  ;;  %v899_v50 = vshrl.u32 %v7709_v9, 16  ;;  %v4796_v59 = vld [vmem:[#allocation2 + $0x188] sm:$0xf] }
 0x20a   :  { %v3099_v22 = vrot.slane %v3098_v55, 4  ;;  %3797 = vrot.lane.b32.xlu1 %v7851_v37, %s8291_s14  ;;  %v3094_v58 = vsel %vm8451_vm11, %v3089_v1, %v3093_v2  ;;  %v972_v61 = vor.u32 %v970_v21, %v969_v46  ;;  %v973_v31 = vrot.slane %v969_v46, 4  ;;  %128 = vst [vmem:[#allocation2 + $0x208] sm:$0x1] %v127_v12  ;;  %v4499_v5 = vpop.permute.xlu0 %4498  ;;  %v1923_v16 = vld [vmem:[#allocation2 + $0x1cc] sm:$0xf] }
 0x20b   :  { %v902_v39 = vshll.u32 %v7709_v9, 16  ;;  %v980_v27 = vor.u32 %v978_v8, %v10423_v34  ;;  %v982_v19 = vrot.slane %v10423_v34, 4  ;;  %v901_v38 = vrot.slane %v899_v50, 7  ;;  %4669 = vst.msk [vmem:[#allocation3 + $0x110] sm:$0xff] %vm4634_vm14, %v4499_v5  ;;  %v6636_v2 = vpop.permute.xlu1 %6635  ;;  %v4797_v9 = vld [vmem:[#allocation2 + $0x18c] sm:$0x1] }
 0x20c   :  { %v3104_v52 = vsel %vm8451_vm11, %v3099_v22, %v10414_v36  ;;  %v907_v13 = vshrl.u32 %v7710_v44, 16  ;;  %v910_v51 = vshll.u32 %v7710_v44, 16  ;;  %v5867_v42 = vrot.slane %v5865_v47, 4  ;;  %6809 = vst.msk [vmem:[#allocation3 + $0xf8] sm:$0xff] %vm6777_vm15, %v6636_v2  ;;  %v6871_v44 = vld [vmem:[#allocation3 + $0xa8] sm:$0xff] }
 0x20d   :  { %v7843_v48 = vcombine.low %v3094_v58, %v3104_v52  ;;  %v981_v17 = vsel %vm8353_vm7, %v973_v31, %v980_v27  ;;  %v1167_v4 = vld [vmem:[#allocation2 + $0x258] sm:$0xf]  ;;  %v904_v32 = vor.u32 %v902_v39, %v901_v38  ;;  %v905_v7 = vrot.slane %v901_v38, 4  ;;  %v10469_v52 = vld [vmem:[#allocation2 + $0x1d0] sm:$0xf] }
 0x20e   :  { %v5871_v43 = vshll.u32 %v4816_v60, 16  ;;  %4520 = vrot.lane.b32.xlu1 %v8225_v24, %s8290_s11  ;;  %v1168_v20 = vsel %vm8375_vm8, %v972_v61, %v1167_v4  ;;  %1170 = vst.msk [vmem:[#allocation2 + $0x25c] sm:$0xf] %vm21_vm0, %v981_v17  ;;  %v10446_v47 = vrot.slane %v907_v13, 7  ;;  %v5868_v40 = vor.u32 %v5867_v42, %v10346_v23  ;;  %v6620_v37 = vpop.permute.xlu0 %6619  ;;  %v6880_v24 = vld [vmem:[#allocation3 + $0xf0] sm:$0xff] }
 0x20f   :  { %3781 = vrot.lane.b32.xlu0 %v7843_v48, %s8291_s14  ;;  %v5875_v54 = vshrl.u32 %v4816_v60, 16  ;;  %1169 = vst [vmem:[#allocation2 + $0x258] sm:$0xf] %v1168_v20  ;;  %v5881_v26 = vshll.u32 %v4817_v45, 16  ;;  %v5691_v33 = vrot.slane %v5689_v30, 4  ;;  %v5695_v3 = vshll.u32 %v4796_v59, 16 }
 0x210   :  { %v5873_v0 = vrot.slane %v5871_v43, 5  ;;  %v912_v55 = vor.u32 %v910_v51, %v10446_v47  ;;  %v914_v21 = vrot.slane %v10446_v47, 4  ;;  %v5869_v15 = vrot.slane %v5868_v40, 4  ;;  %6801 = vst.msk [vmem:[#allocation3 + $0xb8] sm:$0xff] %vm6777_vm15, %v6620_v37 }
 0x211   :  { %v5877_v23 = vrot.slane %v5875_v54, 4  ;;  %v1139_v1 = vld [vmem:[#allocation2 + $0x208] sm:$0xf]  ;;  %v5883_v46 = vrot.slane %v5881_v26, 5  ;;  %v5692_v8 = vor.u32 %v5691_v33, %v10350_v56  ;;  %v5697_v60 = vrot.slane %v5695_v3, 5 }
 0x212   :  { %v5699_v22 = vshrl.u32 %v4796_v59, 16  ;;  %v913_v63 = vsel %vm8353_vm7, %v905_v7, %v912_v55  ;;  %v1140_v30 = vsel %vm8375_vm8, %v904_v32, %v1139_v1  ;;  %v5874_v12 = vsel %vm8451_vm11, %v5869_v15, %v5873_v0 }
 0x213   :  { %4504 = vrot.lane.b32.xlu0 %v8226_v29, %s8290_s11  ;;  %v5878_v50 = vor.u32 %v5877_v23, %v5873_v0  ;;  %1141 = vst [vmem:[#allocation2 + $0x208] sm:$0xf] %v1140_v30  ;;  %1142 = vst.msk [vmem:[#allocation2 + $0x20c] sm:$0xf] %vm21_vm0, %v913_v63  ;;  %v5693_v56 = vrot.slane %v5692_v8, 4  ;;  %v5705_v58 = vshll.u32 %v4797_v9, 16 }
 0x214   :  { %v5701_v25 = vrot.slane %v5699_v22, 4  ;;  %v246_v61 = vsel %vm8337_vm6, 0, %v245_v11  ;;  %v234_v39 = vsel %vm8337_vm6, 0, %v233_v62  ;;  %v7023_v45 = vsel %vm6952_vm1, %v6871_v44, 0  ;;  %v1903_v22 = vld [vmem:[#allocation2 + $0x17c] sm:$0xf] }
 0x215   :  { %v5879_v31 = vrot.slane %v5878_v50, 4  ;;  %247 = vst [vmem:[#allocation2 + $0x260] sm:$0x1] %v246_v61  ;;  %v2994_v27 = vshrl.u32 %v1923_v16, 16  ;;  %v5707_v48 = vrot.slane %v5705_v58, 5  ;;  %8040 = vmatpush3.bf16.xpose.msra.mxu1 %v7023_v45  ;;  %v2997_v51 = vshll.u32 %v1923_v16, 16 }
 0x216   :  { %v5702_v38 = vor.u32 %v5701_v25, %v5697_v60  ;;  %v4849_v13 = vld [vmem:[#allocation2 + $0x25c] sm:$0xf]  ;;  %235 = vst [vmem:[#allocation2 + $0x210] sm:$0x1] %v234_v39  ;;  %v5698_v5 = vsel %vm8451_vm11, %v5693_v56, %v5697_v60  ;;  %v4848_v29 = vld [vmem:[#allocation2 + $0x258] sm:$0xf]  ;;  %8121 = vmatprep.subr.msk.bf16.mxu1 %vm6952_vm1, %v6880_v24 }
 0x217   :  { %v8227_v42 = vld [vmem:[#allocation2 + $0x258] sm:$0xff]   ;;  %v5884_v59 = vsel %vm8451_vm11, %v5879_v31, %v5883_v46  ;;  %v6159_v17 = vshll.u32 %v4849_v13, 16  ;;  %v6150_v7 = vshrl.u32 %v4848_v29, 16  ;;  %v6153_v43 = vshll.u32 %v4848_v29, 16  ;;  %v10495_v50 = vld [vmem:[#allocation2 + $0x1d4] sm:$0xf] }
 0x218   :  { %v7974_v4 = vcombine.low %v5874_v12, %v5884_v59  ;;  %v5703_v32 = vrot.slane %v5702_v38, 4  ;;  %4546 = vrot.lane.b32.xlu1 %v8227_v42, %s8290_s11  ;;  %v6163_v20 = vshrl.u32 %v4849_v13, 16  ;;  %v2996_v40 = vrot.slane %v2994_v27, 4  ;;  %v1904_v31 = vld [vmem:[#allocation2 + $0x180] sm:$0xf]  ;;  %v8253_v42 = vld [vmem:[#allocation2 + $0x1b8] sm:$0xff]  }
 0x219   :  { %v10477_v2 = vrot.slane %v6159_v17, 5  ;;  %v2999_v54 = vrot.slane %v2997_v51, 5  ;;  %v6152_v11 = vrot.slane %v6150_v7, 4  ;;  %v6155_v0 = vrot.slane %v6153_v43, 5  ;;  %v8254_v59 = vld [vmem:[#allocation2 + $0x168] sm:$0xff]   ;;  %1784 = vst.msk [vmem:[#allocation3 + $0x160] sm:$0xff] %vm1739_vm12, %v8253_v42 }
 0x21a   :  { %v5708_v9 = vsel %vm8451_vm11, %v5703_v32, %v5707_v48  ;;  %v3003_v26 = vshll.u32 %v10469_v52, 16  ;;  %v8228_v33 = vld [vmem:[#allocation2 + $0x208] sm:$0xff]   ;;  %v6165_v3 = vrot.slane %v6163_v20, 4  ;;  %v3007_v38 = vshrl.u32 %v10469_v52, 16  ;;  %v10514_v17 = vld [vmem:[#allocation2 + $0x184] sm:$0xf] }
 0x21b   :  { %v3000_v62 = vor.u32 %v2999_v54, %v2996_v40  ;;  %v7966_v16 = vcombine.low %v5698_v5, %v5708_v9  ;;  %v6156_v15 = vor.u32 %v6155_v0, %v6152_v11  ;;  %v4828_v23 = vld [vmem:[#allocation2 + $0x208] sm:$0xf]  ;;  %v4829_v44 = vld [vmem:[#allocation2 + $0x20c] sm:$0xf]  ;;  %4530 = vrot.lane.b32.xlu0 %v8228_v33, %s8290_s11  ;;  %v6658_v24 = vpop.permute.xlu1 %6657  ;;  %v3013_v48 = vshll.u32 %v10495_v50, 16  ;;  %1776 = vst.msk [vmem:[#allocation3 + $0x120] sm:$0xff] %vm1739_vm12, %v8254_v59 }
 0x21c   :  { %v1171_v55 = vld [vmem:[#allocation2 + $0x260] sm:$0x1]  ;;  %6663 = vrot.lane.b32.xlu1 %v7974_v4, %s8292_s15  ;;  %v6166_v1 = vor.u32 %v6165_v3, %v10477_v2  ;;  %v5974_v8 = vshrl.u32 %v4828_v23, 16  ;;  %v5977_v60 = vshll.u32 %v4828_v23, 16  ;;  %v5983_v12 = vshll.u32 %v4829_v44, 16  ;;  %6820 = vst.msk [vmem:[#allocation3 + $0x150] sm:$0xff] %vm6777_vm15, %v6658_v24 }
 0x21d   :  { %v1172_v37 = vsel %vm8324_vm3, %v982_v19, %v1171_v55  ;;  %v1143_v46 = vld [vmem:[#allocation2 + $0x210] sm:$0x1]  ;;  %v10489_v63 = vrot.slane %v6156_v15, 4  ;;  %v5987_v34 = vshrl.u32 %v4829_v44, 16  ;;  %v6642_v19 = vpop.permute.xlu0 %6641  ;;  %v3001_v61 = vrot.slane %v3000_v62, 4  ;;  %v8256_v42 = vld [vmem:[#allocation2 + $0x1e8] sm:$0xff]  }
 0x21e   :  { %1173 = vst [vmem:[#allocation2 + $0x260] sm:$0x1] %v1172_v37  ;;  %v1144_v30 = vsel %vm8324_vm3, %v914_v21, %v1143_v46  ;;  %v10498_v56 = vrot.slane %v6166_v1, 4  ;;  %v5976_v25 = vrot.slane %v5974_v8, 4  ;;  %v5979_v58 = vrot.slane %v5977_v60, 5  ;;  %6812 = vst.msk [vmem:[#allocation3 + $0x110] sm:$0xff] %vm6777_vm15, %v6642_v19 }
 0x21f   :  { %1145 = vst [vmem:[#allocation2 + $0x210] sm:$0x1] %v1144_v30  ;;  %v6162_v47 = vsel %vm8451_vm11, %v10489_v63, %v10477_v2  ;;  %v10505_v21 = vrot.slane %v5983_v12, 5  ;;  %v5989_v39 = vrot.slane %v5987_v34, 4  ;;  %v3005_v45 = vrot.slane %v3003_v26, 5  ;;  %6647 = vrot.lane.b32.xlu0 %v7966_v16, %s8292_s15  ;;  %v3768_v51 = vpop.permute.xlu1 %3767  ;;  %v6882_v1 = vld [vmem:[#allocation3 + $0x100] sm:$0xff] }
 0x220   :  { %v5980_v27 = vor.u32 %v5979_v58, %v5976_v25  ;;  %v3017_v13 = vshrl.u32 %v10495_v50, 16  ;;  %v2818_v4 = vshrl.u32 %v1903_v22, 16  ;;  %v2821_v32 = vshll.u32 %v1903_v22, 16  ;;  %3929 = vst.msk [vmem:[#allocation3 + $0x158] sm:$0xff] %vm3885_vm13, %v3768_v51  ;;  %v1956_v19 = vld [vmem:[#allocation2 + $0x250] sm:$0xf] }
 0x221   :  { %v5990_v5 = vor.u32 %v5989_v39, %v10505_v21  ;;  %v3006_v29 = vsel %vm8451_vm11, %v3001_v61, %v3005_v45  ;;  %v3752_v7 = vpop.permute.xlu0 %3751  ;;  %v3009_v43 = vrot.slane %v3007_v38, 4  ;;  %v10517_v20 = vrot.slane %v3013_v48, 5  ;;  %v6891_v25 = vld [vmem:[#allocation3 + $0x148] sm:$0xff]  ;;  %v8255_v51 = vld [vmem:[#allocation2 + $0x238] sm:$0xff]   ;;  %v4818_v2 = vld [vmem:[#allocation2 + $0x1e0] sm:$0xf] }
 0x222   :  { %v5981_v52 = vrot.slane %v5980_v27, 4  ;;  %v2827_v40 = vshll.u32 %v1904_v31, 16  ;;  %3921 = vst.msk [vmem:[#allocation3 + $0x118] sm:$0xff] %vm3885_vm13, %v3752_v7  ;;  %v2820_v9 = vrot.slane %v2818_v4, 4  ;;  %v2823_v11 = vrot.slane %v2821_v32, 5 }
 0x223   :  { %v5991_v54 = vrot.slane %v5990_v5, 4  ;;  %v2831_v0 = vshrl.u32 %v1904_v31, 16  ;;  %v3010_v3 = vor.u32 %v3009_v43, %v3005_v45  ;;  %v2837_v16 = vshll.u32 %v10514_v17, 16  ;;  %v1936_v5 = vld [vmem:[#allocation2 + $0x200] sm:$0xf]  ;;  %1797 = vst.msk [vmem:[#allocation3 + $0x1c8] sm:$0xff] %vm1739_vm12, %v8255_v51 }
 0x224   :  { %v5986_v33 = vsel %vm8451_vm11, %v5981_v52, %v10505_v21  ;;  %v2829_v62 = vrot.slane %v2827_v40, 5  ;;  %v2824_v44 = vor.u32 %v2823_v11, %v2820_v9  ;;  %v2841_v34 = vshrl.u32 %v10514_v17, 16  ;;  %v1957_v21 = vld [vmem:[#allocation2 + $0x254] sm:$0x1]  ;;  %v1937_v52 = vld [vmem:[#allocation2 + $0x204] sm:$0x1] }
 0x225   :  { %v10522_v26 = vld [vmem:[#allocation2 + $0x260] sm:$0xf]  ;;  %v2833_v37 = vrot.slane %v2831_v0, 4  ;;  %v3011_v60 = vrot.slane %v3010_v3, 4  ;;  %v10534_v22 = vrot.slane %v2837_v16, 5  ;;  %v7056_v31 = vsel %vm6952_vm1, %v6882_v1, 0 }
 0x226   :  { %v6169_v55 = vshll.u32 %v10522_v26, 16  ;;  %v6173_v15 = vshrl.u32 %v10522_v26, 16  ;;  %v10530_v23 = vld [vmem:[#allocation2 + $0x210] sm:$0xf]  ;;  %v2825_v30 = vrot.slane %v2824_v44, 4  ;;  %v3283_v39 = vrot.slane %v3281_v28, 4  ;;  %8050 = vmatpush3.bf16.xpose.msra.mxu0 %v7056_v31 }
 0x227   :  { %v5993_v46 = vshll.u32 %v10530_v23, 16  ;;  %v5997_v8 = vshrl.u32 %v10530_v23, 16  ;;  %v2834_v12 = vor.u32 %v2833_v37, %v2829_v62  ;;  %v3016_v61 = vsel %vm8451_vm11, %v3011_v60, %v10517_v20  ;;  %8124 = vmatprep.subr.msk.bf16.mxu0 %vm6952_vm1, %v6891_v25  ;;  %1789 = vst.msk [vmem:[#allocation3 + $0x188] sm:$0xff] %vm1739_vm12, %v8256_v42  ;;  %v4819_v0 = vld [vmem:[#allocation2 + $0x1e4] sm:$0xf] }
 0x228   :  { %v10536_v24 = vrot.slane %v6169_v55, 5  ;;  %v7839_v27 = vcombine.low %v3006_v29, %v3016_v61  ;;  %v2830_v38 = vsel %vm8451_vm11, %v2825_v30, %v2829_v62  ;;  %v3287_v59 = vshll.u32 %v1956_v19, 16  ;;  %v10575_v16 = vld [vmem:[#allocation2 + $0x1e8] sm:$0xf]  ;;  %v4798_v1 = vld [vmem:[#allocation2 + $0x190] sm:$0xf] }
 0x229   :  { %v10539_v58 = vrot.slane %v5993_v46, 5  ;;  %v2835_v48 = vrot.slane %v2834_v12, 4  ;;  %v3291_v32 = vshrl.u32 %v1956_v19, 16  ;;  %v3297_v7 = vshll.u32 %v1957_v21, 16  ;;  %v4799_v19 = vld [vmem:[#allocation2 + $0x194] sm:$0xf] }
 0x22a   :  { %v6172_v45 = vsel %vm8451_vm11, %v10498_v56, %v10536_v24  ;;  %v3284_v56 = vor.u32 %v3283_v39, %v10389_v57  ;;  %v3107_v43 = vrot.slane %v3105_v35, 4  ;;  %v3111_v9 = vshll.u32 %v1936_v5, 16 }
 0x22b   :  { %v7987_v6 = vcombine.low %v6162_v47, %v6172_v45  ;;  %v5996_v28 = vsel %vm8451_vm11, %v5991_v54, %v10539_v58  ;;  %v2840_v4 = vsel %vm8451_vm11, %v2835_v48, %v10534_v22  ;;  %v3289_v47 = vrot.slane %v3287_v59, 5  ;;  %v10588_v59 = vld [vmem:[#allocation2 + $0x198] sm:$0xf] }
 0x22c   :  { %v7979_v29 = vcombine.low %v5986_v33, %v5996_v28  ;;  %v7831_v57 = vcombine.low %v2830_v38, %v2840_v4  ;;  %v3285_v63 = vrot.slane %v3284_v56, 4  ;;  %v3293_v40 = vrot.slane %v3291_v32, 4 }
 0x22d   :  { %6689 = vrot.lane.b32.xlu1 %v7987_v6, %s8292_s15  ;;  %v3299_v54 = vrot.slane %v3297_v7, 5  ;;  %v3115_v11 = vshrl.u32 %v1936_v5, 16  ;;  %v3108_v3 = vor.u32 %v3107_v43, %v10414_v36  ;;  %v3121_v62 = vshll.u32 %v1937_v52, 16 }
 0x22e   :  { %6673 = vrot.lane.b32.xlu0 %v7979_v29, %s8292_s15  ;;  %v3290_v33 = vsel %vm8451_vm11, %v3285_v63, %v3289_v47  ;;  %v5886_v55 = vshrl.u32 %v4818_v2, 16  ;;  %v3294_v44 = vor.u32 %v3293_v40, %v3289_v47  ;;  %v3113_v37 = vrot.slane %v3111_v9, 5  ;;  %v8234_v63 = vld [vmem:[#allocation2 + $0x1e0] sm:$0xff]  }
 0x22f   :  { %v3117_v14 = vrot.slane %v3115_v11, 4  ;;  %v5889_v35 = vshll.u32 %v4818_v2, 16  ;;  %v3109_v46 = vrot.slane %v3108_v3, 4  ;;  %v3123_v60 = vrot.slane %v3121_v62, 5  ;;  %v4851_v2 = vld [vmem:[#allocation2 + $0x264] sm:$0xf] }
 0x230   :  { %v5888_v30 = vrot.slane %v5886_v55, 4  ;;  %v5895_v12 = vshll.u32 %v4819_v0, 16  ;;  %v3295_v25 = vrot.slane %v3294_v44, 4  ;;  %v5899_v31 = vshrl.u32 %v4819_v0, 16  ;;  %v8235_v62 = vld [vmem:[#allocation2 + $0x190] sm:$0xff]  }
 0x231   :  { %3773 = vrot.lane.b32.xlu1 %v7839_v27, %s8291_s14  ;;  %v3118_v36 = vor.u32 %v3117_v14, %v3113_v37  ;;  %v5891_v61 = vrot.slane %v5889_v35, 5  ;;  %v3114_v21 = vsel %vm8451_vm11, %v3109_v46, %v3113_v37  ;;  %v5905_v45 = vshll.u32 %v10575_v16, 16  ;;  %v8262_v46 = vld [vmem:[#allocation2 + $0x170] sm:$0xff]  }
 0x232   :  { %3757 = vrot.lane.b32.xlu0 %v7831_v57, %s8291_s14  ;;  %v5897_v39 = vrot.slane %v5895_v12, 5  ;;  %v5909_v38 = vshrl.u32 %v10575_v16, 16  ;;  %v3794_v27 = vpop.permute.xlu1 %3793  ;;  %v3300_v48 = vsel %vm8451_vm11, %v3295_v25, %v3299_v54  ;;  %v5901_v6 = vrot.slane %v5899_v31, 4  ;;  %v4852_v54 = vld [vmem:[#allocation2 + $0x268] sm:$0x1]  ;;  %1777 = vst.msk [vmem:[#allocation3 + $0x128] sm:$0xff] %vm1739_vm12, %v8262_v46 }
 0x233   :  { %v3119_v51 = vrot.slane %v3118_v36, 4  ;;  %v5892_v42 = vor.u32 %v5891_v61, %v5888_v30  ;;  %3942 = vst.msk [vmem:[#allocation3 + $0x1c0] sm:$0xff] %vm3885_vm13, %v3794_v27  ;;  %v7852_v28 = vcombine.low %v3290_v33, %v3300_v48  ;;  %v10586_v56 = vrot.slane %v5905_v45, 5  ;;  %v4831_v25 = vld [vmem:[#allocation2 + $0x214] sm:$0xf]  ;;  %v8236_v36 = vld [vmem:[#allocation2 + $0x260] sm:$0xff]  }
 0x234   :  { %v5710_v5 = vshrl.u32 %v4798_v1, 16  ;;  %v5713_v29 = vshll.u32 %v4798_v1, 16  ;;  %v5902_v7 = vor.u32 %v5901_v6, %v5897_v39  ;;  %v5719_v52 = vshll.u32 %v4799_v19, 16  ;;  %v8261_v1 = vld [vmem:[#allocation2 + $0x1c0] sm:$0xff]   ;;  %v4832_v48 = vld [vmem:[#allocation2 + $0x218] sm:$0x1] }
 0x235   :  { %v3124_v4 = vsel %vm8451_vm11, %v3119_v51, %v3123_v60  ;;  %v5893_v32 = vrot.slane %v5892_v42, 4  ;;  %3799 = vrot.lane.b32.xlu1 %v7852_v28, %s8291_s14  ;;  %v5723_v40 = vshrl.u32 %v4799_v19, 16  ;;  %v5729_v3 = vshll.u32 %v10588_v59, 16  ;;  %1785 = vst.msk [vmem:[#allocation3 + $0x168] sm:$0xff] %vm1739_vm12, %v8261_v1  ;;  %v8237_v42 = vld [vmem:[#allocation2 + $0x210] sm:$0xff]  }
 0x236   :  { %v7844_v57 = vcombine.low %v3114_v21, %v3124_v4  ;;  %v5712_v47 = vrot.slane %v5710_v5, 4  ;;  %v5715_v43 = vrot.slane %v5713_v29, 5  ;;  %v4517_v9 = vpop.permute.xlu1 %4516  ;;  %v5903_v0 = vrot.slane %v5902_v7, 4  ;;  %v8265_v4 = vld [vmem:[#allocation2 + $0x244] sm:$0xff]  }
 0x237   :  { %v5898_v11 = vsel %vm8451_vm11, %v5893_v32, %v5897_v39  ;;  %v5721_v33 = vrot.slane %v5719_v52, 5  ;;  %4678 = vst.msk [vmem:[#allocation3 + $0x158] sm:$0xff] %vm4634_vm14, %v4517_v9  ;;  %v5725_v44 = vrot.slane %v5723_v40, 4  ;;  %v5733_v37 = vshrl.u32 %v10588_v59, 16  ;;  %v8266_v32 = vld [vmem:[#allocation2 + $0x1f4] sm:$0xff]  }
 0x238   :  { %3783 = vrot.lane.b32.xlu0 %v7844_v57, %s8291_s14  ;;  %v5716_v55 = vor.u32 %v5715_v43, %v5712_v47  ;;  %v6175_v14 = vrot.slane %v6173_v15, 4  ;;  %v3778_v35 = vpop.permute.xlu0 %3777  ;;  %v5908_v60 = vsel %vm8451_vm11, %v5903_v0, %v10586_v56  ;;  %v10604_v30 = vrot.slane %v5729_v3, 5  ;;  %v1926_v57 = vld [vmem:[#allocation2 + $0x1d8] sm:$0xf]  ;;  %1798 = vst.msk [vmem:[#allocation3 + $0x1d0] sm:$0xff] %vm1739_vm12, %v8265_v4  ;;  %1790 = vst.msk [vmem:[#allocation3 + $0x190] sm:$0xff] %vm1739_vm12, %v8266_v32 }
 0x239   :  { %v6179_v12 = vshll.u32 %v4851_v2, 16  ;;  %v6183_v19 = vshrl.u32 %v4851_v2, 16  ;;  %3934 = vst.msk [vmem:[#allocation3 + $0x180] sm:$0xff] %vm3885_vm13, %v3778_v35  ;;  %4522 = vrot.lane.b32.xlu1 %v8234_v63, %s8290_s11  ;;  %v7975_v61 = vcombine.low %v5898_v11, %v5908_v60  ;;  %v5726_v15 = vor.u32 %v5725_v44, %v5721_v33  ;;  %v6881_v3 = vld [vmem:[#allocation3 + $0xf8] sm:$0xff]  ;;  %v1906_v35 = vld [vmem:[#allocation2 + $0x188] sm:$0xf] }
 0x23a   :  { %v5717_v26 = vrot.slane %v5716_v55, 4  ;;  %v6176_v31 = vor.u32 %v6175_v14, %v10536_v24  ;;  %v4543_v21 = vpop.permute.xlu1 %4542  ;;  %v6189_v27 = vshll.u32 %v4852_v54, 16  ;;  %v5999_v51 = vrot.slane %v5997_v8, 4  ;;  %v6872_v8 = vld [vmem:[#allocation3 + $0xb0] sm:$0xff]  ;;  %v6873_v59 = vld [vmem:[#allocation3 + $0xb8] sm:$0xff] }
 0x23b   :  { %v6181_v39 = vrot.slane %v6179_v12, 5  ;;  %v6185_v45 = vrot.slane %v6183_v19, 4  ;;  %4691 = vst.msk [vmem:[#allocation3 + $0x1c0] sm:$0xff] %vm4634_vm14, %v4543_v21  ;;  %v5727_v6 = vrot.slane %v5726_v15, 4  ;;  %v6003_v5 = vshll.u32 %v4831_v25, 16 }
 0x23c   :  { %4506 = vrot.lane.b32.xlu0 %v8235_v62, %s8290_s11  ;;  %v5722_v24 = vsel %vm8451_vm11, %v5717_v26, %v5721_v33  ;;  %v6177_v28 = vrot.slane %v6176_v31, 4  ;;  %v4501_v29 = vpop.permute.xlu0 %4500  ;;  %v6191_v52 = vrot.slane %v6189_v27, 5  ;;  %v6000_v2 = vor.u32 %v5999_v51, %v10539_v58  ;;  %v1927_v33 = vld [vmem:[#allocation2 + $0x1dc] sm:$0x1] }
 0x23d   :  { %v6186_v7 = vor.u32 %v6185_v45, %v6181_v39  ;;  %v6007_v23 = vshrl.u32 %v4831_v25, 16  ;;  %4670 = vst.msk [vmem:[#allocation3 + $0x118] sm:$0xff] %vm4634_vm14, %v4501_v29  ;;  %4548 = vrot.lane.b32.xlu1 %v8236_v36, %s8290_s11  ;;  %v5732_v63 = vsel %vm8451_vm11, %v5727_v6, %v10604_v30  ;;  %v6005_v43 = vrot.slane %v6003_v5, 5  ;;  %v1907_v25 = vld [vmem:[#allocation2 + $0x18c] sm:$0x1]  ;;  %v6883_v45 = vld [vmem:[#allocation3 + $0x108] sm:$0xff] }
 0x23e   :  { %v6182_v47 = vsel %vm8451_vm11, %v6177_v28, %v6181_v39  ;;  %v6013_v40 = vshll.u32 %v4832_v48, 16  ;;  %v6660_v54 = vpop.permute.xlu1 %6659  ;;  %v7967_v58 = vcombine.low %v5722_v24, %v5732_v63  ;;  %v6001_v11 = vrot.slane %v6000_v2, 4  ;;  %v1959_v29 = vld [vmem:[#allocation2 + $0x25c] sm:$0xf] }
 0x23f   :  { %v6187_v9 = vrot.slane %v6186_v7, 4  ;;  %v6009_v0 = vrot.slane %v6007_v23, 4  ;;  %6821 = vst.msk [vmem:[#allocation3 + $0x158] sm:$0xff] %vm6777_vm15, %v6660_v54  ;;  %v7026_v55 = vsel %vm6952_vm1, %v6872_v8, 0  ;;  %v3019_v44 = vrot.slane %v3017_v13, 4 }
 0x240   :  { %4532 = vrot.lane.b32.xlu0 %v8237_v42, %s8290_s11  ;;  %v6015_v62 = vrot.slane %v6013_v40, 5  ;;  %v3023_v14 = vshll.u32 %v1926_v57, 16  ;;  %v4527_v1 = vpop.permute.xlu0 %4526  ;;  %v6006_v60 = vsel %vm8451_vm11, %v6001_v11, %v6005_v43  ;;  %8042 = vmatpush3.bf16.xpose.msra.mxu1 %v7026_v55  ;;  %v3027_v19 = vshrl.u32 %v1926_v57, 16  ;;  %v1958_v42 = vld [vmem:[#allocation2 + $0x258] sm:$0xf] }
 0x241   :  { %v6192_v46 = vsel %vm8451_vm11, %v6187_v9, %v6191_v52  ;;  %v6010_v12 = vor.u32 %v6009_v0, %v6005_v43  ;;  %4683 = vst.msk [vmem:[#allocation3 + $0x180] sm:$0xff] %vm4634_vm14, %v4527_v1  ;;  %6665 = vrot.lane.b32.xlu1 %v7975_v61, %s8292_s15  ;;  %v3020_v50 = vor.u32 %v3019_v44, %v10517_v20  ;;  %v3033_v26 = vshll.u32 %v1927_v33, 16  ;;  %v10650_v7 = vld [vmem:[#allocation2 + $0x260] sm:$0xf]  ;;  %v6892_v52 = vld [vmem:[#allocation3 + $0x150] sm:$0xff] }
 0x242   :  { %v7988_v36 = vcombine.low %v6182_v47, %v6192_v46  ;;  %v3025_v13 = vrot.slane %v3023_v14, 5  ;;  %8122 = vmatprep.subr.msk.bf16.mxu1 %vm6952_vm1, %v6881_v3  ;;  %v3029_v31 = vrot.slane %v3027_v19, 4  ;;  %v2843_v21 = vrot.slane %v2841_v34, 4  ;;  %v1938_v40 = vld [vmem:[#allocation2 + $0x208] sm:$0xf]  ;;  %v8268_v19 = vld [vmem:[#allocation2 + $0x1cc] sm:$0xff]  }
 0x243   :  { %v6011_v15 = vrot.slane %v6010_v12, 4  ;;  %v2847_v39 = vshll.u32 %v1906_v35, 16  ;;  %v3021_v27 = vrot.slane %v3020_v50, 4  ;;  %v3035_v48 = vrot.slane %v3033_v26, 5  ;;  %v1939_v0 = vld [vmem:[#allocation2 + $0x20c] sm:$0xf] }
 0x244   :  { %6649 = vrot.lane.b32.xlu0 %v7967_v58, %s8292_s15  ;;  %v2851_v51 = vshrl.u32 %v1906_v35, 16  ;;  %v2857_v61 = vshll.u32 %v1907_v25, 16  ;;  %v6644_v24 = vpop.permute.xlu0 %6643  ;;  %v3030_v6 = vor.u32 %v3029_v31, %v3025_v13  ;;  %v2844_v28 = vor.u32 %v2843_v21, %v10534_v22  ;;  %v10660_v44 = vld [vmem:[#allocation2 + $0x210] sm:$0xf]  ;;  %v141_v14 = vld [vmem:[#allocation2 + $0x26c] sm:$0x1] }
 0x245   :  { %v6016_v20 = vsel %vm8451_vm11, %v6011_v15, %v6015_v62  ;;  %v2849_v5 = vrot.slane %v2847_v39, 5  ;;  %6813 = vst.msk [vmem:[#allocation3 + $0x118] sm:$0xff] %vm6777_vm15, %v6644_v24  ;;  %6691 = vrot.lane.b32.xlu1 %v7988_v36, %s8292_s15  ;;  %v3026_v34 = vsel %vm8451_vm11, %v3021_v27, %v3025_v13  ;;  %v7059_v8 = vsel %vm6952_vm1, %v6883_v45, 0  ;;  %v10668_v12 = vld [vmem:[%s11544_s0 + $0xe8] sm:$0xf]  ;;  %v8269_v25 = vld [vmem:[#allocation2 + $0x17c] sm:$0xff]  }
 0x246   :  { %v7980_v17 = vcombine.low %v6006_v60, %v6016_v20  ;;  %v2853_v4 = vrot.slane %v2851_v51, 4  ;;  %v2859_v32 = vrot.slane %v2857_v61, 5  ;;  %v3031_v2 = vrot.slane %v3030_v6, 4  ;;  %8052 = vmatpush3.bf16.xpose.msra.mxu0 %v7059_v8  ;;  %v10676_v15 = vld [vmem:[%s11544_s0 + $0xec] sm:$0xf]  ;;  %v8271_v21 = vld [vmem:[#allocation2 + $0x1fc] sm:$0xff]  }
 0x247   :  { %v2845_v23 = vrot.slane %v2844_v28, 4  ;;  %v3302_v22 = vshrl.u32 %v1958_v42, 16  ;;  %v3305_v63 = vshll.u32 %v1958_v42, 16  ;;  %v3311_v47 = vshll.u32 %v1959_v29, 16  ;;  %8125 = vmatprep.subr.msk.bf16.mxu0 %vm6952_vm1, %v6892_v52  ;;  %v8270_v31 = vld [vmem:[#allocation2 + $0x24c] sm:$0xff]   ;;  %1786 = vst.msk [vmem:[#allocation3 + $0x170] sm:$0xff] %vm1739_vm12, %v8268_v19 }
 0x248   :  { %6675 = vrot.lane.b32.xlu0 %v7980_v17, %s8292_s15  ;;  %v2854_v57 = vor.u32 %v2853_v4, %v2849_v5  ;;  %v3315_v43 = vshrl.u32 %v1959_v29, 16  ;;  %v3036_v54 = vsel %vm8451_vm11, %v3031_v2, %v3035_v48  ;;  %v3321_v11 = vshll.u32 %v10650_v7, 16  ;;  %1778 = vst.msk [vmem:[#allocation3 + $0x130] sm:$0xff] %vm1739_vm12, %v8269_v25  ;;  %v8272_v51 = vld [vmem:[#allocation2 + $0x1d4] sm:$0xff]   ;;  %v8273_v61 = vld [vmem:[#allocation2 + $0x184] sm:$0xff]   ;;  %1799 = vst.msk [vmem:[#allocation3 + $0x1d8] sm:$0xff] %vm1739_vm12, %v8270_v31 }
 0x249   :  { %v2850_v58 = vsel %vm8451_vm11, %v2845_v23, %v2849_v5  ;;  %v3304_v9 = vrot.slane %v3302_v22, 4  ;;  %v7840_v33 = vcombine.low %v3026_v34, %v3036_v54  ;;  %v3307_v62 = vrot.slane %v3305_v63, 5  ;;  %v8274_v42 = vld [vmem:[#allocation2 + $0x258] sm:$0xff]   ;;  %1791 = vst.msk [vmem:[#allocation3 + $0x198] sm:$0xff] %vm1739_vm12, %v8271_v21  ;;  %v8275_v29 = vld [vmem:[#allocation2 + $0x208] sm:$0xff]   ;;  %1787 = vst.msk [vmem:[#allocation3 + $0x178] sm:$0xff] %vm1739_vm12, %v8272_v51 }
 0x24a   :  { %v2855_v3 = vrot.slane %v2854_v57, 4  ;;  %v3313_v55 = vrot.slane %v3311_v47, 5  ;;  %v3317_v35 = vrot.slane %v3315_v43, 4  ;;  %v10662_v1 = vrot.slane %v3321_v11, 5  ;;  %1779 = vst.msk [vmem:[#allocation3 + $0x138] sm:$0xff] %vm1739_vm12, %v8273_v61  ;;  %1800 = vst.msk [vmem:[#allocation3 + $0x1e0] sm:$0xff] %vm1739_vm12, %v8274_v42 }
 0x24b   :  { %v3325_v46 = vshrl.u32 %v10650_v7, 16  ;;  %v3126_v60 = vshrl.u32 %v1938_v40, 16  ;;  %3775 = vrot.lane.b32.xlu1 %v7840_v33, %s8291_s14  ;;  %v3308_v50 = vor.u32 %v3307_v62, %v3304_v9  ;;  %v3129_v13 = vshll.u32 %v1938_v40, 16  ;;  %v129_v22 = vld [vmem:[#allocation2 + $0x21c] sm:$0x1]  ;;  %1792 = vst.msk [vmem:[#allocation3 + $0x1a0] sm:$0xff] %vm1739_vm12, %v8275_v29 }
 0x24c   :  { %v2860_v36 = vsel %vm8451_vm11, %v2855_v3, %v2859_v32  ;;  %v3135_v26 = vshll.u32 %v1939_v0, 16  ;;  %v3318_v45 = vor.u32 %v3317_v35, %v3313_v55  ;;  %v3139_v48 = vshrl.u32 %v1939_v0, 16  ;;  %v7711_v57 = vld [vmem:[%s11544_s0 + $0xc8] sm:$0xf]  ;;  %v4801_v21 = vld [vmem:[#allocation2 + $0x19c] sm:$0xf] }
 0x24d   :  { %v7832_v39 = vcombine.low %v2850_v58, %v2860_v36  ;;  %v3128_v27 = vrot.slane %v3126_v60, 4  ;;  %v3309_v24 = vrot.slane %v3308_v50, 4  ;;  %v3131_v20 = vrot.slane %v3129_v13, 5  ;;  %v4821_v50 = vld [vmem:[#allocation2 + $0x1ec] sm:$0xf]  ;;  %v8243_v29 = vld [vmem:[#allocation2 + $0x198] sm:$0xff]  }
 0x24e   :  { %v3137_v6 = vrot.slane %v3135_v26, 5  ;;  %v3145_v28 = vshll.u32 %v10660_v44, 16  ;;  %v6686_v5 = vpop.permute.xlu1 %6685  ;;  %v3319_v17 = vrot.slane %v3318_v45, 4  ;;  %v3141_v34 = vrot.slane %v3139_v48, 4  ;;  %v4822_v51 = vld [vmem:[#allocation2 + $0x1f0] sm:$0x1] }
 0x24f   :  { %3759 = vrot.lane.b32.xlu0 %v7832_v39, %s8291_s14  ;;  %v3149_v4 = vshrl.u32 %v10660_v44, 16  ;;  %v142_v32 = vsel %vm8324_vm3, 0, %v141_v14  ;;  %6834 = vst.msk [vmem:[#allocation3 + $0x1c0] sm:$0xff] %vm6777_vm15, %v6686_v5  ;;  %v3314_v52 = vsel %vm8451_vm11, %v3309_v24, %v3313_v55  ;;  %v3132_v2 = vor.u32 %v3131_v20, %v3128_v27  ;;  %v7712_v14 = vld [vmem:[%s11544_s0 + $0xcc] sm:$0xf] }
 0x250   :  { %v10693_v23 = vrot.slane %v3145_v28, 5  ;;  %143 = vst [vmem:[#allocation2 + $0x26c] sm:$0x1] %v142_v32  ;;  %v984_v8 = vshrl.u32 %v10668_v12, 16  ;;  %v3324_v63 = vsel %vm8451_vm11, %v3319_v17, %v10662_v1  ;;  %v3142_v47 = vor.u32 %v3141_v34, %v3137_v6  ;;  %v248_v32 = vld [vmem:[#allocation2 + $0x274] sm:$0x1] }
 0x251   :  { %v987_v43 = vshll.u32 %v10668_v12, 16  ;;  %v992_v40 = vshrl.u32 %v10676_v15, 16  ;;  %v6670_v54 = vpop.permute.xlu0 %6669  ;;  %v7853_v58 = vcombine.low %v3314_v52, %v3324_v63  ;;  %v3133_v9 = vrot.slane %v3132_v2, 4  ;;  %v8242_v12 = vld [vmem:[#allocation2 + $0x1e8] sm:$0xff]   ;;  %v7721_v44 = vld [vmem:[%s11544_s0 + $0xf0] sm:$0xf] }
 0x252   :  { %v986_v11 = vrot.slane %v984_v8, 7  ;;  %v995_v0 = vshll.u32 %v10676_v15, 16  ;;  %6826 = vst.msk [vmem:[#allocation3 + $0x180] sm:$0xff] %vm6777_vm15, %v6670_v54  ;;  %v3770_v33 = vpop.permute.xlu1 %3769  ;;  %v3143_v3 = vrot.slane %v3142_v47, 4  ;;  %v130_v55 = vsel %vm8324_vm3, 0, %v129_v22 }
 0x253   :  { %v10707_v62 = vrot.slane %v992_v40, 7  ;;  %v916_v35 = vshrl.u32 %v7711_v57, 16  ;;  %3930 = vst.msk [vmem:[#allocation3 + $0x160] sm:$0xff] %vm3885_vm13, %v3770_v33  ;;  %3801 = vrot.lane.b32.xlu1 %v7853_v58, %s8291_s14  ;;  %v3138_v60 = vsel %vm8451_vm11, %v3133_v9, %v3137_v6  ;;  %131 = vst [vmem:[#allocation2 + $0x21c] sm:$0x1] %v130_v55  ;;  %v919_v36 = vshll.u32 %v7711_v57, 16 }
 0x254   :  { %v989_v19 = vor.u32 %v987_v43, %v986_v11  ;;  %v990_v25 = vrot.slane %v986_v11, 4  ;;  %v3148_v13 = vsel %vm8451_vm11, %v3143_v3, %v10693_v23  ;;  %v924_v27 = vshrl.u32 %v7712_v14, 16  ;;  %v236_v57 = vld [vmem:[#allocation2 + $0x224] sm:$0x1]  ;;  %v4802_v58 = vld [vmem:[#allocation2 + $0x1a0] sm:$0x1] }
 0x255   :  { %v997_v26 = vor.u32 %v995_v0, %v10707_v62  ;;  %v999_v15 = vrot.slane %v10707_v62, 4  ;;  %v918_v31 = vrot.slane %v916_v35, 7  ;;  %v3754_v39 = vpop.permute.xlu0 %3753  ;;  %v7845_v45 = vcombine.low %v3138_v60, %v3148_v13  ;;  %v10750_v35 = vld [vmem:[#allocation2 + $0x264] sm:$0xf] }
 0x256   :  { %v927_v48 = vshll.u32 %v7712_v14, 16  ;;  %v5911_v61 = vrot.slane %v5909_v38, 4  ;;  %3922 = vst.msk [vmem:[#allocation3 + $0x120] sm:$0xff] %vm3885_vm13, %v3754_v39  ;;  %v3796_v42 = vpop.permute.xlu1 %3795  ;;  %v5915_v5 = vshll.u32 %v4821_v50, 16  ;;  %v10734_v38 = vrot.slane %v924_v27, 7 }
 0x257   :  { %v998_v24 = vsel %vm8353_vm7, %v990_v25, %v997_v26  ;;  %v1174_v20 = vld [vmem:[#allocation2 + $0x26c] sm:$0xf]  ;;  %v921_v6 = vor.u32 %v919_v36, %v918_v31  ;;  %v922_v28 = vrot.slane %v918_v31, 4  ;;  %3943 = vst.msk [vmem:[#allocation3 + $0x1c8] sm:$0xff] %vm3885_vm13, %v3796_v42  ;;  %3785 = vrot.lane.b32.xlu0 %v7845_v45, %s8291_s14  ;;  %4524 = vrot.lane.b32.xlu1 %v8242_v12, %s8290_s11  ;;  %v5919_v34 = vshrl.u32 %v4821_v50, 16  ;;  %v6906_v25 = vld [vmem:[#allocation3 + $0x1c0] sm:$0xff] }
 0x258   :  { %v1175_v16 = vsel %vm8375_vm8, %v989_v19, %v1174_v20  ;;  %1177 = vst.msk [vmem:[#allocation2 + $0x270] sm:$0xf] %vm21_vm0, %v998_v24  ;;  %v5912_v17 = vor.u32 %v5911_v61, %v10586_v56  ;;  %v5917_v52 = vrot.slane %v5915_v5, 5  ;;  %v5925_v2 = vshll.u32 %v4822_v51, 16 }
 0x259   :  { %1176 = vst [vmem:[#allocation2 + $0x26c] sm:$0xf] %v1175_v16  ;;  %v5735_v8 = vrot.slane %v5733_v37, 4  ;;  %v5739_v22 = vshll.u32 %v4801_v21, 16  ;;  %v3780_v63 = vpop.permute.xlu0 %3779  ;;  %v929_v47 = vor.u32 %v927_v48, %v10734_v38  ;;  %v931_v43 = vrot.slane %v10734_v38, 4 }
 0x25a   :  { %v5913_v40 = vrot.slane %v5912_v17, 4  ;;  %v5921_v54 = vrot.slane %v5919_v34, 4  ;;  %3935 = vst.msk [vmem:[#allocation3 + $0x188] sm:$0xff] %vm3885_vm13, %v3780_v63  ;;  %v1146_v56 = vld [vmem:[#allocation2 + $0x21c] sm:$0xf]  ;;  %v5927_v9 = vrot.slane %v5925_v2, 5 }
 0x25b   :  { %v5736_v11 = vor.u32 %v5735_v8, %v10604_v30  ;;  %v5741_v0 = vrot.slane %v5739_v22, 5  ;;  %v5743_v33 = vshrl.u32 %v4801_v21, 16  ;;  %4508 = vrot.lane.b32.xlu0 %v8243_v29, %s8290_s11  ;;  %v930_v37 = vsel %vm8353_vm7, %v922_v28, %v929_v47  ;;  %v1962_v22 = vld [vmem:[#allocation2 + $0x268] sm:$0x1] }
 0x25c   :  { %v1147_v3 = vsel %vm8375_vm8, %v921_v6, %v1146_v56  ;;  %v5918_v55 = vsel %vm8451_vm11, %v5913_v40, %v5917_v52  ;;  %v5922_v14 = vor.u32 %v5921_v54, %v5917_v52  ;;  %1149 = vst.msk [vmem:[#allocation2 + $0x220] sm:$0xf] %vm21_vm0, %v930_v37  ;;  %v5749_v12 = vshll.u32 %v4802_v58, 16  ;;  %v1941_v37 = vld [vmem:[#allocation2 + $0x214] sm:$0xf] }
 0x25d   :  { %1148 = vst [vmem:[#allocation2 + $0x21c] sm:$0xf] %v1147_v3  ;;  %v5737_v30 = vrot.slane %v5736_v11, 4  ;;  %v5745_v60 = vrot.slane %v5743_v33, 4  ;;  %v249_v19 = vsel %vm8337_vm6, 0, %v248_v32  ;;  %v237_v50 = vsel %vm8337_vm6, 0, %v236_v57 }
 0x25e   :  { %v5923_v36 = vrot.slane %v5922_v14, 4  ;;  %250 = vst [vmem:[#allocation2 + $0x274] sm:$0x1] %v249_v19  ;;  %v7029_v13 = vsel %vm6952_vm1, %v6873_v59, 0  ;;  %v3327_v26 = vrot.slane %v3325_v46, 4  ;;  %v5751_v21 = vrot.slane %v5749_v12, 5 }
 0x25f   :  { %v5746_v31 = vor.u32 %v5745_v60, %v5741_v0  ;;  %v4854_v39 = vld [vmem:[#allocation2 + $0x270] sm:$0xf]  ;;  %238 = vst [vmem:[#allocation2 + $0x224] sm:$0x1] %v237_v50  ;;  %8044 = vmatpush3.bf16.xpose.msra.mxu1 %v7029_v13  ;;  %v3331_v45 = vshll.u32 %v10750_v35, 16  ;;  %v5742_v51 = vsel %vm8451_vm11, %v5737_v30, %v5741_v0  ;;  %v3335_v52 = vshrl.u32 %v10750_v35, 16 }
 0x260   :  { %v8244_v27 = vld [vmem:[#allocation2 + $0x26c] sm:$0xff]   ;;  %v5928_v48 = vsel %vm8451_vm11, %v5923_v36, %v5927_v9  ;;  %v6203_v42 = vshll.u32 %v4854_v39, 16  ;;  %v3328_v24 = vor.u32 %v3327_v26, %v10662_v1  ;;  %8131 = vmatprep.subr.msk.bf16.mxu1 %vm6952_vm1, %v6906_v25  ;;  %v4519_v28 = vpop.permute.xlu1 %4518  ;;  %v6207_v29 = vshrl.u32 %v4854_v39, 16  ;;  %v10799_v30 = vld [vmem:[%s11545_s1] sm:$0xff]  }
 0x261   :  { %v4853_v61 = vld [vmem:[#allocation2 + $0x26c] sm:$0xf]  ;;  %v7976_v7 = vcombine.low %v5918_v55, %v5928_v48  ;;  %v5747_v46 = vrot.slane %v5746_v31, 4  ;;  %4550 = vrot.lane.b32.xlu1 %v8244_v27, %s8290_s11  ;;  %v10772_v17 = vrot.slane %v3331_v45, 5  ;;  %4679 = vst.msk [vmem:[#allocation3 + $0x160] sm:$0xff] %vm4634_vm14, %v4519_v28  ;;  %v3337_v19 = vrot.slane %v3335_v52, 4 }
 0x262   :  { %v6194_v20 = vshrl.u32 %v4853_v61, 16  ;;  %v6197_v6 = vshll.u32 %v4853_v61, 16  ;;  %v10768_v5 = vrot.slane %v6203_v42, 5  ;;  %v10770_v16 = vrot.slane %v3328_v24, 4  ;;  %v144_v13 = vld [vmem:[#allocation2 + $0x280] sm:$0x1] }
 0x263   :  { %v5752_v1 = vsel %vm8451_vm11, %v5747_v46, %v5751_v21  ;;  %v6209_v8 = vrot.slane %v6207_v29, 4  ;;  %v4834_v54 = vld [vmem:[#allocation2 + $0x220] sm:$0xf]  ;;  %v3341_v50 = vshll.u32 %v1962_v22, 16  ;;  %v3338_v31 = vor.u32 %v3337_v19, %v10772_v17  ;;  %v6884_v45 = vld [vmem:[#allocation3 + $0x110] sm:$0xff] }
 0x264   :  { %v6196_v34 = vrot.slane %v6194_v20, 4  ;;  %v6199_v32 = vrot.slane %v6197_v6, 5  ;;  %v8245_v2 = vld [vmem:[#allocation2 + $0x21c] sm:$0xff]   ;;  %v7968_v57 = vcombine.low %v5742_v51, %v5752_v1  ;;  %v3334_v58 = vsel %vm8451_vm11, %v10770_v16, %v10772_v17  ;;  %v4545_v56 = vpop.permute.xlu1 %4544  ;;  %v7722_v52 = vld [vmem:[%s11544_s0 + $0xf4] sm:$0xf] }
 0x265   :  { %v1178_v63 = vld [vmem:[#allocation2 + $0x274] sm:$0x1]  ;;  %v4833_v40 = vld [vmem:[#allocation2 + $0x21c] sm:$0xf]  ;;  %4534 = vrot.lane.b32.xlu0 %v8245_v2, %s8290_s11  ;;  %6667 = vrot.lane.b32.xlu1 %v7976_v7, %s8292_s15  ;;  %v6210_v11 = vor.u32 %v6209_v8, %v10768_v5  ;;  %v4503_v3 = vpop.permute.xlu0 %4502  ;;  %4692 = vst.msk [vmem:[#allocation3 + $0x1c8] sm:$0xff] %vm4634_vm14, %v4545_v56  ;;  %v6027_v14 = vshll.u32 %v4834_v54, 16 }
 0x266   :  { %v6200_v47 = vor.u32 %v6199_v32, %v6196_v34  ;;  %v1179_v9 = vsel %vm8324_vm3, %v999_v15, %v1178_v63  ;;  %v1150_v0 = vld [vmem:[#allocation2 + $0x224] sm:$0x1]  ;;  %v6018_v33 = vshrl.u32 %v4833_v40, 16  ;;  %v6021_v59 = vshll.u32 %v4833_v40, 16  ;;  %v1942_v15 = vld [vmem:[#allocation2 + $0x218] sm:$0x1]  ;;  %8046 = vmatmul.mubr.msk.bf16.vlgmr.msra.gmra.mrb[0].mxu1 %vm6952_vm1, %v10799_v30 }
 0x267   :  { %1180 = vst [vmem:[#allocation2 + $0x274] sm:$0x1] %v1179_v9  ;;  %v1151_v62 = vsel %vm8324_vm3, %v931_v43, %v1150_v0  ;;  %v6031_v35 = vshrl.u32 %v4834_v54, 16  ;;  %4671 = vst.msk [vmem:[#allocation3 + $0x120] sm:$0xff] %vm4634_vm14, %v4503_v3  ;;  %v10804_v60 = vrot.slane %v6210_v11, 4  ;;  %v10810_v25 = vrot.slane %v6027_v14, 5 }
 0x268   :  { %v10790_v55 = vrot.slane %v6200_v47, 4  ;;  %1152 = vst [vmem:[#allocation2 + $0x224] sm:$0x1] %v1151_v62  ;;  %v6020_v38 = vrot.slane %v6018_v33, 4  ;;  %v6023_v12 = vrot.slane %v6021_v59, 5  ;;  %v3151_v21 = vrot.slane %v3149_v4, 4 }
 0x269   :  { %v6033_v36 = vrot.slane %v6031_v35, 4  ;;  %6651 = vrot.lane.b32.xlu0 %v7968_v57, %s8292_s15  ;;  %v3155_v39 = vshll.u32 %v1941_v37, 16  ;;  %v4529_v27 = vpop.permute.xlu0 %4528  ;;  %v8276_v48 = vld [vmem:[#allocation2 + $0x260] sm:$0xff]   ;;  %v3343_v61 = vrot.slane %v3341_v50, 5  ;;  %v3159_v42 = vshrl.u32 %v1941_v37, 16  ;;  %v6893_v4 = vld [vmem:[#allocation3 + $0x158] sm:$0xff] }
 0x26a   :  { %v6206_v43 = vsel %vm8451_vm11, %v10790_v55, %v10768_v5  ;;  %v6024_v26 = vor.u32 %v6023_v12, %v6020_v38  ;;  %v3165_v24 = vshll.u32 %v1942_v15, 16  ;;  %v251_v7 = vld [vmem:[#allocation2 + $0x288] sm:$0x1]  ;;  %4684 = vst.msk [vmem:[#allocation3 + $0x188] sm:$0xff] %vm4634_vm14, %v4529_v27  ;;  %v3339_v20 = vrot.slane %v3338_v31, 4  ;;  %v8277_v8 = vld [vmem:[#allocation2 + $0x210] sm:$0xff]  }
 0x26b   :  { %v6034_v51 = vor.u32 %v6033_v36, %v10810_v25  ;;  %v3152_v6 = vor.u32 %v3151_v21, %v10693_v23  ;;  %v3157_v28 = vrot.slane %v3155_v39, 5  ;;  %1801 = vst.msk [vmem:[#allocation3 + $0x1e8] sm:$0xff] %vm1739_vm12, %v8276_v48  ;;  %v3161_v1 = vrot.slane %v3159_v42, 4  ;;  %v147_v2 = vld [vmem:[#allocation2 + $0x294] sm:$0x1]  ;;  %1793 = vst.msk [vmem:[#allocation3 + $0x1a8] sm:$0xff] %vm1739_vm12, %v8277_v8 }
 0x26c   :  { %v6025_v46 = vrot.slane %v6024_v26, 4  ;;  %v3167_v34 = vrot.slane %v3165_v24, 5  ;;  %v7062_v32 = vsel %vm6952_vm1, %v6884_v45, 0  ;;  %v3344_v57 = vsel %vm8451_vm11, %v3339_v20, %v3343_v61  ;;  %v7723_v17 = vld [vmem:[%s11544_s0 + $0xf8] sm:$0xf] }
 0x26d   :  { %v6035_v29 = vrot.slane %v6034_v51, 4  ;;  %v3153_v63 = vrot.slane %v3152_v6, 4  ;;  %8054 = vmatpush3.bf16.xpose.msra.mxu0 %v7062_v32  ;;  %v145_v47 = vsel %vm8324_vm3, 0, %v144_v13  ;;  %v10841_v11 = vcombine.low %v3334_v58, %v3344_v57  ;;  %v4856_v42 = vld [vmem:[#allocation2 + $0x278] sm:$0xf] }
 0x26e   :  { %v4855_v23 = vld [vmem:[#allocation2 + $0x274] sm:$0xf]  ;;  %v6030_v22 = vsel %vm8451_vm11, %v6025_v46, %v10810_v25  ;;  %v3162_v0 = vor.u32 %v3161_v1, %v3157_v28  ;;  %146 = vst [vmem:[#allocation2 + $0x280] sm:$0x1] %v145_v47  ;;  %8126 = vmatprep.subr.msk.bf16.mxu0 %vm6952_vm1, %v6893_v4  ;;  %v252_v16 = vsel %vm8337_vm6, 0, %v251_v7  ;;  %v1001_v62 = vshrl.u32 %v7721_v44, 16 }
 0x26f   :  { %v6662_v40 = vpop.permute.xlu1 %6661  ;;  %v6213_v54 = vshll.u32 %v4855_v23, 16  ;;  %v6217_v56 = vshrl.u32 %v4855_v23, 16  ;;  %v10834_v9 = vld [vmem:[#allocation2 + $0x224] sm:$0xf]  ;;  %v3158_v37 = vsel %vm8451_vm11, %v3153_v63, %v3157_v28  ;;  %253 = vst [vmem:[#allocation2 + $0x288] sm:$0x1] %v252_v16 }
 0x270   :  { %6822 = vst.msk [vmem:[#allocation3 + $0x160] sm:$0xff] %vm6777_vm15, %v6662_v40  ;;  %v6037_v33 = vshll.u32 %v10834_v9, 16  ;;  %v6041_v59 = vshrl.u32 %v10834_v9, 16  ;;  %v3163_v3 = vrot.slane %v3162_v0, 4  ;;  %v1004_v14 = vshll.u32 %v7721_v44, 16 }
 0x271   :  { %v10855_v58 = vrot.slane %v6213_v54, 5  ;;  %v1009_v38 = vshrl.u32 %v7722_v52, 16  ;;  %v1012_v12 = vshll.u32 %v7722_v52, 16  ;;  %v148_v19 = vsel %vm8324_vm3, 0, %v147_v2  ;;  %v7724_v25 = vld [vmem:[%s11544_s0 + $0xfc] sm:$0xf] }
 0x272   :  { %v6646_v35 = vpop.permute.xlu0 %6645  ;;  %v10857_v15 = vrot.slane %v6037_v33, 5  ;;  %v3168_v13 = vsel %vm8451_vm11, %v3163_v3, %v3167_v34  ;;  %v1003_v26 = vrot.slane %v1001_v62, 7  ;;  %149 = vst [vmem:[#allocation2 + $0x294] sm:$0x1] %v148_v19  ;;  %v1018_v31 = vshrl.u32 %v7723_v17, 16  ;;  %v8250_v54 = vld [vmem:[#allocation2 + $0x224] sm:$0xff]  }
 0x273   :  { %6814 = vst.msk [vmem:[#allocation3 + $0x120] sm:$0xff] %vm6777_vm15, %v6646_v35  ;;  %v6688_v36 = vpop.permute.xlu1 %6687  ;;  %v6216_v50 = vsel %vm8451_vm11, %v10804_v60, %v10855_v58  ;;  %v7846_v45 = vcombine.low %v3158_v37, %v3168_v13  ;;  %v1011_v60 = vrot.slane %v1009_v38, 7  ;;  %v1021_v6 = vshll.u32 %v7723_v17, 16  ;;  %v4857_v2 = vld [vmem:[#allocation2 + $0x27c] sm:$0x1] }
 0x274   :  { %6835 = vst.msk [vmem:[#allocation3 + $0x1c8] sm:$0xff] %vm6777_vm15, %v6688_v36  ;;  %v7989_v21 = vcombine.low %v6206_v43, %v6216_v50  ;;  %v6040_v39 = vsel %vm8451_vm11, %v6035_v29, %v10857_v15  ;;  %v1006_v48 = vor.u32 %v1004_v14, %v1003_v26  ;;  %v1007_v51 = vrot.slane %v1003_v26, 4  ;;  %v4836_v29 = vld [vmem:[#allocation2 + $0x228] sm:$0xf]  ;;  %v4837_v63 = vld [vmem:[#allocation2 + $0x22c] sm:$0x1] }
 0x275   :  { %v7981_v27 = vcombine.low %v6030_v22, %v6040_v39  ;;  %v1020_v61 = vrot.slane %v1018_v31, 7  ;;  %v1014_v7 = vor.u32 %v1012_v12, %v1011_v60  ;;  %v1016_v46 = vrot.slane %v1011_v60, 4  ;;  %v1181_v20 = vld [vmem:[#allocation2 + $0x280] sm:$0xf]  ;;  %v1943_v47 = vld [vmem:[#allocation2 + $0x21c] sm:$0xf] }
 0x276   :  { %v6672_v24 = vpop.permute.xlu0 %6671  ;;  %6693 = vrot.lane.b32.xlu1 %v7989_v21, %s8292_s15  ;;  %v1026_v5 = vshrl.u32 %v7724_v25, 16  ;;  %v1182_v43 = vsel %vm8375_vm8, %v1006_v48, %v1181_v20  ;;  %v1029_v44 = vshll.u32 %v7724_v25, 16  ;;  %v6219_v4 = vrot.slane %v6217_v56, 4  ;;  %v1185_v34 = vld [vmem:[#allocation2 + $0x288] sm:$0x1] }
 0x277   :  { %6827 = vst.msk [vmem:[#allocation3 + $0x188] sm:$0xff] %vm6777_vm15, %v6672_v24  ;;  %v3772_v55 = vpop.permute.xlu1 %3771  ;;  %6677 = vrot.lane.b32.xlu0 %v7981_v27, %s8292_s15  ;;  %v1024_v28 = vrot.slane %v1020_v61, 4  ;;  %v1015_v1 = vsel %vm8353_vm7, %v1007_v51, %v1014_v7  ;;  %1183 = vst [vmem:[#allocation2 + $0x280] sm:$0xf] %v1182_v43  ;;  %v1023_v32 = vor.u32 %v1021_v6, %v1020_v61  ;;  %v6223_v8 = vshll.u32 %v4856_v42, 16 }
 0x278   :  { %3931 = vst.msk [vmem:[#allocation3 + $0x168] sm:$0xff] %vm3885_vm13, %v3772_v55  ;;  %v10888_v52 = vrot.slane %v1026_v5, 7  ;;  %v1186_v23 = vsel %vm8324_vm3, %v1016_v46, %v1185_v34  ;;  %v6220_v22 = vor.u32 %v6219_v4, %v10855_v58  ;;  %v6227_v57 = vshrl.u32 %v4856_v42, 16  ;;  %v1944_v25 = vld [vmem:[#allocation2 + $0x220] sm:$0xf] }
 0x279   :  { %1184 = vst.msk [vmem:[#allocation2 + $0x284] sm:$0xf] %vm21_vm0, %v1015_v1  ;;  %1187 = vst [vmem:[#allocation2 + $0x288] sm:$0x1] %v1186_v23  ;;  %v1188_v0 = vld [vmem:[#allocation2 + $0x294] sm:$0xf] }
 0x27a   :  { %v3756_v40 = vpop.permute.xlu0 %3755  ;;  %3803 = vrot.lane.b32.xlu1 %v10841_v11, %s8291_s14  ;;  %v1031_v56 = vor.u32 %v1029_v44, %v10888_v52  ;;  %v10897_v33 = vrot.slane %v6223_v8, 5  ;;  %v6043_v37 = vrot.slane %v6041_v59, 4  ;;  %v1189_v16 = vsel %vm8375_vm8, %v1023_v32, %v1188_v0  ;;  %v10926_v51 = vld [vmem:[#allocation2 + $0x224] sm:$0xf]  ;;  %v254_v44 = vld [vmem:[#allocation2 + $0x29c] sm:$0x1] }
 0x27b   :  { %3923 = vst.msk [vmem:[#allocation3 + $0x128] sm:$0xff] %vm3885_vm13, %v3756_v40  ;;  %3787 = vrot.lane.b32.xlu0 %v7846_v45, %s8291_s14  ;;  %v10905_v17 = vrot.slane %v6220_v22, 4  ;;  %v6229_v11 = vrot.slane %v6227_v57, 4  ;;  %v6233_v58 = vshll.u32 %v4857_v2, 16  ;;  %1190 = vst [vmem:[#allocation2 + $0x294] sm:$0xf] %v1189_v16 }
 0x27c   :  { %v1032_v3 = vsel %vm8353_vm7, %v1024_v28, %v1031_v56  ;;  %v6044_v62 = vor.u32 %v6043_v37, %v10857_v15  ;;  %v6047_v14 = vshll.u32 %v4836_v29, 16  ;;  %v6051_v9 = vshrl.u32 %v4836_v29, 16  ;;  %v3798_v59 = vpop.permute.xlu1 %3797 }
 0x27d   :  { %v1033_v35 = vrot.slane %v10888_v52, 4  ;;  %1191 = vst.msk [vmem:[#allocation2 + $0x298] sm:$0xf] %vm21_vm0, %v1032_v3  ;;  %v6230_v41 = vor.u32 %v6229_v11, %v10897_v33  ;;  %v6057_v38 = vshll.u32 %v4837_v63, 16  ;;  %v3170_v12 = vshrl.u32 %v1943_v47, 16 }
 0x27e   :  { %3944 = vst.msk [vmem:[#allocation3 + $0x1d0] sm:$0xff] %vm3885_vm13, %v3798_v59  ;;  %4536 = vrot.lane.b32.xlu1 %v8250_v54, %s8290_s11  ;;  %v10915_v10 = vrot.slane %v6044_v62, 4  ;;  %v10917_v19 = vrot.slane %v6047_v14, 5  ;;  %v6053_v15 = vrot.slane %v6051_v9, 4  ;;  %v3173_v36 = vshll.u32 %v1943_v47, 16 }
 0x27f   :  { %v1968_v50 = vld [vmem:[#allocation2 + $0x280] sm:$0xf]  ;;  %v6231_v13 = vrot.slane %v6230_v41, 4  ;;  %v6235_v26 = vrot.slane %v6233_v58, 5  ;;  %v10919_v31 = vrot.slane %v6057_v38, 5  ;;  %v3172_v21 = vrot.slane %v3170_v12, 4 }
 0x280   :  { %v1969_v39 = vld [vmem:[#allocation2 + $0x284] sm:$0xf]  ;;  %v3390_v45 = vshrl.u32 %v1968_v50, 16  ;;  %v3393_v60 = vshll.u32 %v1968_v50, 16  ;;  %v6226_v27 = vsel %vm8451_vm11, %v10905_v17, %v10897_v33  ;;  %v6054_v48 = vor.u32 %v6053_v15, %v10917_v19  ;;  %v4521_v42 = vpop.permute.xlu1 %4520  ;;  %v1970_v24 = vld [vmem:[#allocation2 + $0x288] sm:$0xf] }
 0x281   :  { %v3782_v61 = vpop.permute.xlu0 %3781  ;;  %v3399_v7 = vshll.u32 %v1969_v39, 16  ;;  %v3403_v46 = vshrl.u32 %v1969_v39, 16  ;;  %v3175_v20 = vrot.slane %v3173_v36, 5  ;;  %v3179_v6 = vshll.u32 %v1944_v25, 16  ;;  %4680 = vst.msk [vmem:[#allocation3 + $0x168] sm:$0xff] %vm4634_vm14, %v4521_v42  ;;  %v8278_v63 = vld [vmem:[#allocation2 + $0x280] sm:$0xff]  }
 0x282   :  { %3936 = vst.msk [vmem:[#allocation3 + $0x190] sm:$0xff] %vm3885_vm13, %v3782_v61  ;;  %v3392_v5 = vrot.slane %v3390_v45, 4  ;;  %v3395_v55 = vrot.slane %v3393_v60, 5  ;;  %v3409_v43 = vshll.u32 %v1970_v24, 16  ;;  %v6050_v28 = vsel %vm8451_vm11, %v10915_v10, %v10917_v19  ;;  %v4863_v0 = vld [vmem:[#allocation2 + $0x294] sm:$0xf] }
 0x283   :  { %v3401_v4 = vrot.slane %v3399_v7, 5  ;;  %v3405_v29 = vrot.slane %v3403_v46, 4  ;;  %v6236_v1 = vsel %vm8451_vm11, %v6231_v13, %v6235_v26  ;;  %v6055_v34 = vrot.slane %v6054_v48, 4  ;;  %1804 = vst.msk [vmem:[#allocation3 + $0x200] sm:$0xff] %vm1739_vm12, %v8278_v63  ;;  %v1971_v12 = vld [vmem:[#allocation2 + $0x28c] sm:$0xf] }
 0x284   :  { %v3396_v32 = vor.u32 %v3395_v55, %v3392_v5  ;;  %v3411_v2 = vrot.slane %v3409_v43, 5  ;;  %v3413_v8 = vshrl.u32 %v1970_v24, 16  ;;  %v8251_v23 = vld [vmem:[#allocation2 + $0x294] sm:$0xff]   ;;  %v3176_v22 = vor.u32 %v3175_v20, %v3172_v21  ;;  %v1972_v15 = vld [vmem:[#allocation2 + $0x290] sm:$0x1]  ;;  %v8279_v48 = vld [vmem:[#allocation2 + $0x21c] sm:$0xff]  }
 0x285   :  { %v4505_v57 = vpop.permute.xlu0 %4504  ;;  %v3406_v47 = vor.u32 %v3405_v29, %v3401_v4  ;;  %v3181_v40 = vrot.slane %v3179_v6, 5  ;;  %v3183_v54 = vshrl.u32 %v1944_v25, 16  ;;  %v3189_v56 = vshll.u32 %v10926_v51, 16  ;;  %4558 = vrot.lane.b32.xlu1 %v8251_v23, %s8290_s11  ;;  %v4864_v11 = vld [vmem:[#allocation2 + $0x298] sm:$0xf]  ;;  %1794 = vst.msk [vmem:[#allocation3 + $0x1b0] sm:$0xff] %vm1739_vm12, %v8279_v48 }
 0x286   :  { %4672 = vst.msk [vmem:[#allocation3 + $0x128] sm:$0xff] %vm4634_vm14, %v4505_v57  ;;  %v3397_v33 = vrot.slane %v3396_v32, 4  ;;  %v7990_v37 = vcombine.low %v6226_v27, %v6236_v1  ;;  %v6060_v16 = vsel %vm8451_vm11, %v6055_v34, %v10919_v31  ;;  %v3177_v17 = vrot.slane %v3176_v22, 4  ;;  %v1963_v26 = vld [vmem:[#allocation2 + $0x26c] sm:$0xf]  ;;  %v8252_v21 = vld [vmem:[#allocation2 + $0x274] sm:$0xff]  }
 0x287   :  { %v3407_v58 = vrot.slane %v3406_v47, 4  ;;  %v3185_v3 = vrot.slane %v3183_v54, 4  ;;  %v10943_v62 = vrot.slane %v3189_v56, 5  ;;  %v255_v14 = vsel %vm8337_vm6, 0, %v254_v44  ;;  %v6885_v23 = vld [vmem:[#allocation3 + $0x118] sm:$0xff]  ;;  %v6898_v22 = vld [vmem:[#allocation3 + $0x180] sm:$0xff] }
 0x288   :  { %v3402_v9 = vsel %vm8451_vm11, %v3397_v33, %v3401_v4  ;;  %v3182_v59 = vsel %vm8451_vm11, %v3177_v17, %v3181_v40  ;;  %256 = vst [vmem:[#allocation2 + $0x29c] sm:$0x1] %v255_v14  ;;  %v6282_v41 = vshrl.u32 %v4863_v0, 16  ;;  %v6285_v38 = vshll.u32 %v4863_v0, 16  ;;  %v1964_v4 = vld [vmem:[#allocation2 + $0x270] sm:$0xf] }
 0x289   :  { %v3412_v25 = vsel %vm8451_vm11, %v3407_v58, %v3411_v2  ;;  %v3186_v36 = vor.u32 %v3185_v3, %v3181_v40  ;;  %v6291_v50 = vshll.u32 %v4864_v11, 16  ;;  %v6295_v13 = vshrl.u32 %v4864_v11, 16  ;;  %6695 = vrot.lane.b32.xlu1 %v7990_v37, %s8292_s15  ;;  %v4838_v33 = vld [vmem:[#allocation2 + $0x230] sm:$0xf]  ;;  %v10987_v14 = vld [vmem:[#allocation2 + $0x238] sm:$0xf] }
 0x28a   :  { %v7857_v31 = vcombine.low %v3402_v9, %v3412_v25  ;;  %v6284_v39 = vrot.slane %v6282_v41, 4  ;;  %v6287_v45 = vrot.slane %v6285_v38, 5  ;;  %v3415_v60 = vrot.slane %v3413_v8, 4  ;;  %v4547_v27 = vpop.permute.xlu1 %4546  ;;  %v10970_v8 = vld [vmem:[#allocation2 + $0x274] sm:$0xf]  ;;  %v6894_v9 = vld [vmem:[#allocation3 + $0x160] sm:$0xff] }
 0x28b   :  { %v3187_v61 = vrot.slane %v3186_v36, 4  ;;  %v10954_v42 = vrot.slane %v6291_v50, 5  ;;  %v6297_v24 = vrot.slane %v6295_v13, 4  ;;  %v3419_v7 = vshll.u32 %v1971_v12, 16  ;;  %4693 = vst.msk [vmem:[#allocation3 + $0x1d0] sm:$0xff] %vm4634_vm14, %v4547_v27  ;;  %v6907_v38 = vld [vmem:[#allocation3 + $0x1c8] sm:$0xff] }
 0x28c   :  { %3809 = vrot.lane.b32.xlu0 %v7857_v31, %s8291_s14  ;;  %v6288_v46 = vor.u32 %v6287_v45, %v6284_v39  ;;  %v3416_v20 = vor.u32 %v3415_v60, %v3411_v2  ;;  %v3423_v6 = vshrl.u32 %v1971_v12, 16  ;;  %v3429_v5 = vshll.u32 %v1972_v15, 16  ;;  %v10997_v15 = vld [vmem:[%s11545_s1 + $0x8] sm:$0xff]  }
 0x28d   :  { %v3192_v55 = vsel %vm8451_vm11, %v3187_v61, %v10943_v62  ;;  %v6298_v43 = vor.u32 %v6297_v24, %v10954_v42  ;;  %v10963_v44 = vrot.slane %v3419_v7, 5  ;;  %v3346_v29 = vshrl.u32 %v1963_v26, 16  ;;  %v4531_v57 = vpop.permute.xlu0 %4530  ;;  %v8282_v31 = vld [vmem:[#allocation2 + $0x26c] sm:$0xff]   ;;  %8027 = vmatprep.mubr.msk.bf16.mxu0 %vm6952_vm1, %v10997_v15  ;;  %8047 = vmatprep.mubr.msk.bf16.mxu1 %vm6952_vm1, %v10997_v15 }
 0x28e   :  { %v7982_v1 = vcombine.low %v6050_v28, %v6060_v16  ;;  %v7847_v34 = vcombine.low %v3182_v59, %v3192_v55  ;;  %v3417_v32 = vrot.slane %v3416_v20, 4  ;;  %v3425_v2 = vrot.slane %v3423_v6, 4  ;;  %v6664_v63 = vpop.permute.xlu1 %6663  ;;  %4685 = vst.msk [vmem:[#allocation3 + $0x190] sm:$0xff] %vm4634_vm14, %v4531_v57  ;;  %v4839_v16 = vld [vmem:[#allocation2 + $0x234] sm:$0xf]  ;;  %8028 = vmatmul.mubr.msk.bf16.gmra.mrb[4].mxu0 %vm6952_vm1, %v10997_v15  ;;  %8048 = vmatmul.mubr.msk.bf16.gmra.mrb[4].mxu1 %vm6952_vm1, %v10997_v15 }
 0x28f   :  { %v3193_v47 = vshrl.u32 %v10926_v51, 16  ;;  %v1192_v40 = vld [vmem:[#allocation2 + $0x29c] sm:$0x1]  ;;  %v10973_v54 = vrot.slane %v6288_v46, 4  ;;  %v3348_v56 = vrot.slane %v3346_v29, 4  ;;  %v3349_v0 = vshll.u32 %v1963_v26, 16  ;;  %8065 = vmatprep.mubr.msk.bf16.mxu0 %vm6952_vm1, %v10799_v30  ;;  %8085 = vmatprep.mubr.msk.bf16.mxu1 %vm6952_vm1, %v10799_v30 }
 0x290   :  { %6823 = vst.msk [vmem:[#allocation3 + $0x168] sm:$0xff] %vm6777_vm15, %v6664_v63  ;;  %4552 = vrot.lane.b32.xlu0 %v8252_v21, %s8290_s11  ;;  %3789 = vrot.lane.b32.xlu1 %v7847_v34, %s8291_s14  ;;  %v1193_v10 = vsel %vm8324_vm3, %v1033_v35, %v1192_v40  ;;  %v10983_v19 = vrot.slane %v6298_v43, 4  ;;  %v3431_v28 = vrot.slane %v3429_v5, 5  ;;  %v3355_v37 = vshll.u32 %v1964_v4, 16  ;;  %v8281_v26 = vld [vmem:[#allocation2 + $0x288] sm:$0xff]  }
 0x291   :  { %1194 = vst [vmem:[#allocation2 + $0x29c] sm:$0x1] %v1193_v10  ;;  %v3426_v17 = vor.u32 %v3425_v2, %v10963_v44  ;;  %v3351_v11 = vrot.slane %v3349_v0, 5  ;;  %v3359_v58 = vshrl.u32 %v1964_v4, 16  ;;  %v3365_v3 = vshll.u32 %v10970_v8, 16  ;;  %v6648_v12 = vpop.permute.xlu0 %6647  ;;  %1805 = vst.msk [vmem:[#allocation3 + $0x208] sm:$0xff] %vm1739_vm12, %v8281_v26 }
 0x292   :  { %v3422_v52 = vsel %vm8451_vm11, %v3417_v32, %v10963_v44  ;;  %v3357_v35 = vrot.slane %v3355_v37, 5  ;;  %v7065_v59 = vsel %vm6952_vm1, %v6885_v23, 0  ;;  %v7104_v41 = vsel %vm6952_vm1, %v6898_v22, 0  ;;  %6815 = vst.msk [vmem:[#allocation3 + $0x128] sm:$0xff] %vm6777_vm15, %v6648_v12  ;;  %v4866_v5 = vld [vmem:[#allocation2 + $0x2a0] sm:$0xf] }
 0x293   :  { %v3427_v25 = vrot.slane %v3426_v17, 4  ;;  %v3352_v36 = vor.u32 %v3351_v11, %v3348_v56  ;;  %v3361_v50 = vrot.slane %v3359_v58, 4  ;;  %v10999_v13 = vrot.slane %v3365_v3, 5  ;;  %8056 = vmatpush3.bf16.xpose.msra.mxu0 %v7065_v59  ;;  %8070 = vmatpush3.bf16.xpose.msra.mxu1 %v7104_v41  ;;  %1802 = vst.msk [vmem:[#allocation3 + $0x1f0] sm:$0xff] %vm1739_vm12, %v8282_v31  ;;  %v8257_v4 = vld [vmem:[#allocation2 + $0x280] sm:$0xff]  }
 0x294   :  { %6679 = vrot.lane.b32.xlu0 %v7982_v1, %s8292_s15  ;;  %v6062_v21 = vshrl.u32 %v4838_v33, 16  ;;  %v6065_v39 = vshll.u32 %v4838_v33, 16  ;;  %v6071_v45 = vshll.u32 %v4839_v16, 16  ;;  %v6075_v60 = vshrl.u32 %v4839_v16, 16  ;;  %8127 = vmatprep.subr.msk.bf16.mxu0 %vm6952_vm1, %v6894_v9  ;;  %v4867_v1 = vld [vmem:[#allocation2 + $0x2a4] sm:$0x1] }
 0x295   :  { %v3432_v27 = vsel %vm8451_vm11, %v3427_v25, %v3431_v28  ;;  %v3353_v48 = vrot.slane %v3352_v36, 4  ;;  %v3362_v61 = vor.u32 %v3361_v50, %v3357_v35  ;;  %v6081_v24 = vshll.u32 %v10987_v14, 16  ;;  %8132 = vmatprep.subr.msk.bf16.mxu1 %vm6952_vm1, %v6907_v38  ;;  %v4858_v56 = vld [vmem:[#allocation2 + $0x280] sm:$0xf]  ;;  %v4859_v58 = vld [vmem:[#allocation2 + $0x284] sm:$0xf] }
 0x296   :  { %v7858_v7 = vcombine.low %v3422_v52, %v3432_v27  ;;  %v6064_v46 = vrot.slane %v6062_v21, 4  ;;  %v6067_v20 = vrot.slane %v6065_v39, 5  ;;  %v6073_v6 = vrot.slane %v6071_v45, 5  ;;  %v11045_v41 = vld [vmem:[#allocation2 + $0x288] sm:$0xf] }
 0x297   :  { %v3358_v55 = vsel %vm8451_vm11, %v3353_v48, %v3357_v35  ;;  %v3363_v43 = vrot.slane %v3362_v61, 4  ;;  %v3369_v44 = vshrl.u32 %v10970_v8, 16  ;;  %v6077_v29 = vrot.slane %v6075_v60, 4  ;;  %v1966_v45 = vld [vmem:[#allocation2 + $0x278] sm:$0xf] }
 0x298   :  { %v4865_v34 = vld [vmem:[#allocation2 + $0x29c] sm:$0xf]  ;;  %v6294_v32 = vsel %vm8451_vm11, %v10973_v54, %v10954_v42  ;;  %3811 = vrot.lane.b32.xlu1 %v7858_v7, %s8291_s14  ;;  %v6068_v2 = vor.u32 %v6067_v20, %v6064_v46  ;;  %v11028_v23 = vrot.slane %v6081_v24, 5  ;;  %v6085_v8 = vshrl.u32 %v10987_v14, 16 }
 0x299   :  { %v6301_v22 = vshll.u32 %v4865_v34, 16  ;;  %v6305_v57 = vshrl.u32 %v4865_v34, 16  ;;  %v3368_v63 = vsel %vm8451_vm11, %v3363_v43, %v10999_v13  ;;  %v6078_v40 = vor.u32 %v6077_v29, %v6073_v6  ;;  %v1946_v29 = vld [vmem:[#allocation2 + $0x228] sm:$0xf] }
 0x29a   :  { %v7855_v0 = vcombine.low %v3358_v55, %v3368_v63  ;;  %v6069_v42 = vrot.slane %v6068_v2, 4  ;;  %v6311_v54 = vshll.u32 %v4866_v5, 16  ;;  %v6315_v33 = vshrl.u32 %v4866_v5, 16  ;;  %v8284_v63 = vld [vmem:[#allocation2 + $0x224] sm:$0xff]  }
 0x29b   :  { %v6303_v10 = vrot.slane %v6301_v22, 5  ;;  %v6079_v28 = vrot.slane %v6078_v40, 4  ;;  %v6307_v37 = vrot.slane %v6305_v57, 4  ;;  %v6321_v16 = vshll.u32 %v4867_v1, 16  ;;  %v8283_v57 = vld [vmem:[#allocation2 + $0x274] sm:$0xff]   ;;  %1795 = vst.msk [vmem:[#allocation3 + $0x1b8] sm:$0xff] %vm1739_vm12, %v8284_v63 }
 0x29c   :  { %4554 = vrot.lane.b32.xlu1 %v8257_v4, %s8290_s11  ;;  %v6074_v30 = vsel %vm8451_vm11, %v6069_v42, %v6073_v6  ;;  %v6313_v17 = vrot.slane %v6311_v54, 5  ;;  %v6317_v11 = vrot.slane %v6315_v33, 4  ;;  %v6238_v3 = vshrl.u32 %v4858_v56, 16  ;;  %v1967_v6 = vld [vmem:[#allocation2 + $0x27c] sm:$0x1]  ;;  %v8258_v40 = vld [vmem:[#allocation2 + $0x230] sm:$0xff]  }
 0x29d   :  { %v6304_v9 = vsel %vm8451_vm11, %v10983_v19, %v6303_v10  ;;  %v6084_v52 = vsel %vm8451_vm11, %v6079_v28, %v11028_v23  ;;  %v6308_v35 = vor.u32 %v6307_v37, %v6303_v10  ;;  %v6323_v59 = vrot.slane %v6321_v16, 5  ;;  %v1947_v37 = vld [vmem:[#allocation2 + $0x22c] sm:$0x1]  ;;  %1803 = vst.msk [vmem:[#allocation3 + $0x1f8] sm:$0xff] %vm1739_vm12, %v8283_v57  ;;  %v4862_v63 = vld [vmem:[#allocation2 + $0x290] sm:$0x1] }
 0x29e   :  { %v7993_v38 = vcombine.low %v6294_v32, %v6304_v9  ;;  %v7983_v12 = vcombine.low %v6074_v30, %v6084_v52  ;;  %v6318_v25 = vor.u32 %v6317_v11, %v6313_v17  ;;  %v6240_v36 = vrot.slane %v6238_v3, 4  ;;  %v1974_v11 = vld [vmem:[#allocation2 + $0x298] sm:$0xf] }
 0x29f   :  { %v6690_v50 = vpop.permute.xlu1 %6689  ;;  %v6309_v26 = vrot.slane %v6308_v35, 4  ;;  %v6241_v31 = vshll.u32 %v4858_v56, 16  ;;  %v6247_v21 = vshll.u32 %v4859_v58, 16  ;;  %v6251_v39 = vshrl.u32 %v4859_v58, 16  ;;  %v8259_v35 = vld [vmem:[#allocation2 + $0x29c] sm:$0xff]  }
 0x2a0   :  { %6836 = vst.msk [vmem:[#allocation3 + $0x1d0] sm:$0xff] %vm6777_vm15, %v6690_v50  ;;  %v6674_v19 = vpop.permute.xlu0 %6673  ;;  %6701 = vrot.lane.b32.xlu0 %v7993_v38, %s8292_s15  ;;  %6681 = vrot.lane.b32.xlu1 %v7983_v12, %s8292_s15  ;;  %v6319_v60 = vrot.slane %v6318_v25, 4  ;;  %v6257_v27 = vshll.u32 %v11045_v41, 16  ;;  %v6261_v48 = vshrl.u32 %v11045_v41, 16  ;;  %v3371_v61 = vrot.slane %v3369_v44, 4 }
 0x2a1   :  { %6828 = vst.msk [vmem:[#allocation3 + $0x190] sm:$0xff] %vm6777_vm15, %v6674_v19  ;;  %v6314_v24 = vsel %vm8451_vm11, %v6309_v26, %v6313_v17  ;;  %v6243_v7 = vrot.slane %v6241_v31, 5  ;;  %v6249_v46 = vrot.slane %v6247_v21, 5  ;;  %v6253_v20 = vrot.slane %v6251_v39, 4  ;;  %v1973_v17 = vld [vmem:[#allocation2 + $0x294] sm:$0xf] }
 0x2a2   :  { %v6324_v5 = vsel %vm8451_vm11, %v6319_v60, %v6323_v59  ;;  %v11057_v55 = vrot.slane %v6257_v27, 5  ;;  %v3372_v43 = vor.u32 %v3371_v61, %v10999_v13  ;;  %v3375_v4 = vshll.u32 %v1966_v45, 16  ;;  %v11077_v26 = vld [vmem:[#allocation2 + $0x29c] sm:$0xf]  ;;  %v150_v61 = vld [vmem:[#allocation2 + $0x2a8] sm:$0x1] }
 0x2a3   :  { %v3774_v1 = vpop.permute.xlu1 %3773  ;;  %v7994_v44 = vcombine.low %v6314_v24, %v6324_v5  ;;  %v6244_v34 = vor.u32 %v6243_v7, %v6240_v36  ;;  %v6254_v32 = vor.u32 %v6253_v20, %v6249_v46  ;;  %v3379_v2 = vshrl.u32 %v1966_v45, 16  ;;  %v8285_v36 = vld [vmem:[#allocation2 + $0x294] sm:$0xff]   ;;  %v6886_v24 = vld [vmem:[#allocation3 + $0x120] sm:$0xff] }
 0x2a4   :  { %3932 = vst.msk [vmem:[#allocation3 + $0x170] sm:$0xff] %vm3885_vm13, %v3774_v1  ;;  %v3758_v22 = vpop.permute.xlu0 %3757  ;;  %3805 = vrot.lane.b32.xlu0 %v7855_v0, %s8291_s14  ;;  %v3373_v56 = vrot.slane %v3372_v43, 4  ;;  %v3377_v42 = vrot.slane %v3375_v4, 5  ;;  %v3385_v54 = vshll.u32 %v1967_v6, 16  ;;  %v3195_v13 = vrot.slane %v3193_v47, 4 }
 0x2a5   :  { %3924 = vst.msk [vmem:[#allocation3 + $0x130] sm:$0xff] %vm3885_vm13, %v3758_v22  ;;  %6703 = vrot.lane.b32.xlu1 %v7994_v44, %s8292_s15  ;;  %v6245_v33 = vrot.slane %v6244_v34, 4  ;;  %v6255_v10 = vrot.slane %v6254_v32, 4  ;;  %v3381_v28 = vrot.slane %v3379_v2, 4  ;;  %v3199_v16 = vshll.u32 %v1946_v29, 16  ;;  %v6895_v34 = vld [vmem:[#allocation3 + $0x168] sm:$0xff] }
 0x2a6   :  { %v3378_v0 = vsel %vm8451_vm11, %v3373_v56, %v3377_v42  ;;  %v3387_v30 = vrot.slane %v3385_v54, 5  ;;  %v3196_v51 = vor.u32 %v3195_v13, %v10943_v62  ;;  %v3203_v47 = vshrl.u32 %v1946_v29, 16  ;;  %1806 = vst.msk [vmem:[#allocation3 + $0x210] sm:$0xff] %vm1739_vm12, %v8285_v36  ;;  %v4861_v44 = vld [vmem:[#allocation2 + $0x28c] sm:$0xf]  ;;  %v8260_v56 = vld [vmem:[#allocation2 + $0x238] sm:$0xff]  }
 0x2a7   :  { %v6250_v58 = vsel %vm8451_vm11, %v6245_v33, %v6249_v46  ;;  %v6260_v3 = vsel %vm8451_vm11, %v6255_v10, %v11057_v55  ;;  %v3382_v9 = vor.u32 %v3381_v28, %v3377_v42  ;;  %v3201_v52 = vrot.slane %v3199_v16, 5  ;;  %v3800_v62 = vpop.permute.xlu1 %3799  ;;  %v4841_v33 = vld [vmem:[#allocation2 + $0x23c] sm:$0xf] }
 0x2a8   :  { %4538 = vrot.lane.b32.xlu0 %v8258_v40, %s8290_s11  ;;  %v7991_v59 = vcombine.low %v6250_v58, %v6260_v3  ;;  %v3197_v38 = vrot.slane %v3196_v51, 4  ;;  %v3205_v12 = vrot.slane %v3203_v47, 4  ;;  %v3209_v25 = vshll.u32 %v1947_v37, 16  ;;  %3945 = vst.msk [vmem:[#allocation3 + $0x1d8] sm:$0xff] %vm3885_vm13, %v3800_v62  ;;  %v4842_v3 = vld [vmem:[#allocation2 + $0x240] sm:$0x1] }
 0x2a9   :  { %v3383_v50 = vrot.slane %v3382_v9, 4  ;;  %v3434_v31 = vshrl.u32 %v1973_v17, 16  ;;  %v3437_v21 = vshll.u32 %v1973_v17, 16  ;;  %v3443_v39 = vshll.u32 %v1974_v11, 16 }
 0x2aa   :  { %v3202_v45 = vsel %vm8451_vm11, %v3197_v38, %v3201_v52  ;;  %v3206_v19 = vor.u32 %v3205_v12, %v3201_v52  ;;  %v3211_v60 = vrot.slane %v3209_v25, 5  ;;  %v3447_v27 = vshrl.u32 %v1974_v11, 16  ;;  %v3784_v7 = vpop.permute.xlu0 %3783  ;;  %v6899_v52 = vld [vmem:[#allocation3 + $0x188] sm:$0xff] }
 0x2ab   :  { %v3388_v46 = vsel %vm8451_vm11, %v3383_v50, %v3387_v30  ;;  %v3436_v20 = vrot.slane %v3434_v31, 4  ;;  %v3439_v6 = vrot.slane %v3437_v21, 5  ;;  %v3445_v5 = vrot.slane %v3443_v39, 5  ;;  %3937 = vst.msk [vmem:[#allocation3 + $0x198] sm:$0xff] %vm3885_vm13, %v3784_v7  ;;  %v4523_v32 = vpop.permute.xlu1 %4522  ;;  %v4869_v50 = vld [vmem:[#allocation2 + $0x2ac] sm:$0xf] }
 0x2ac   :  { %4560 = vrot.lane.b32.xlu0 %v8259_v35, %s8290_s11  ;;  %v7856_v43 = vcombine.low %v3378_v0, %v3388_v46  ;;  %v3207_v4 = vrot.slane %v3206_v19, 4  ;;  %v3449_v29 = vrot.slane %v3447_v27, 4  ;;  %v3453_v1 = vshll.u32 %v11077_v26, 16  ;;  %4681 = vst.msk [vmem:[#allocation3 + $0x170] sm:$0xff] %vm4634_vm14, %v4523_v32  ;;  %v6908_v31 = vld [vmem:[#allocation3 + $0x1d0] sm:$0xff] }
 0x2ad   :  { %v3440_v2 = vor.u32 %v3439_v6, %v3436_v20  ;;  %v151_v22 = vsel %vm8324_vm3, 0, %v150_v61  ;;  %v7068_v57 = vsel %vm6952_vm1, %v6886_v24, 0  ;;  %v6263_v13 = vrot.slane %v6261_v48, 4  ;;  %v1976_v19 = vld [vmem:[#allocation2 + $0x2a0] sm:$0xf] }
 0x2ae   :  { %3807 = vrot.lane.b32.xlu1 %v7856_v43, %s8291_s14  ;;  %v3212_v40 = vsel %vm8451_vm11, %v3207_v4, %v3211_v60  ;;  %v3450_v42 = vor.u32 %v3449_v29, %v3445_v5  ;;  %v11095_v54 = vrot.slane %v3453_v1, 5  ;;  %152 = vst [vmem:[#allocation2 + $0x2a8] sm:$0x1] %v151_v22  ;;  %8058 = vmatpush3.bf16.xpose.msra.mxu0 %v7068_v57  ;;  %v4507_v10 = vpop.permute.xlu0 %4506  ;;  %v6267_v16 = vshll.u32 %v4861_v44, 16  ;;  %v45_v32 = vld [vmem:[#allocation2 + $0x2b8] sm:$0x1] }
 0x2af   :  { %v7848_v28 = vcombine.low %v3202_v45, %v3212_v40  ;;  %v3441_v37 = vrot.slane %v3440_v2, 4  ;;  %v6271_v0 = vshrl.u32 %v4861_v44, 16  ;;  %8128 = vmatprep.subr.msk.bf16.mxu0 %vm6952_vm1, %v6895_v34  ;;  %4673 = vst.msk [vmem:[#allocation3 + $0x130] sm:$0xff] %vm4634_vm14, %v4507_v10  ;;  %v6264_v51 = vor.u32 %v6263_v13, %v11057_v55  ;;  %v4549_v48 = vpop.permute.xlu1 %4548  ;;  %v1977_v34 = vld [vmem:[#allocation2 + $0x2a4] sm:$0x1]  ;;  %v8264_v2 = vld [vmem:[#allocation2 + $0x288] sm:$0xff]  }
 0x2b0   :  { %6697 = vrot.lane.b32.xlu0 %v7991_v59, %s8292_s15  ;;  %v3451_v30 = vrot.slane %v3450_v42, 4  ;;  %v6277_v47 = vshll.u32 %v4862_v63, 16  ;;  %v6087_v41 = vrot.slane %v6085_v8, 4  ;;  %v6269_v11 = vrot.slane %v6267_v16, 5  ;;  %4694 = vst.msk [vmem:[#allocation3 + $0x1d8] sm:$0xff] %vm4634_vm14, %v4549_v48  ;;  %v8286_v42 = vld [vmem:[#allocation2 + $0x29c] sm:$0xff]  }
 0x2b1   :  { %v3446_v17 = vsel %vm8451_vm11, %v3441_v37, %v3445_v5  ;;  %v6273_v58 = vrot.slane %v6271_v0, 4  ;;  %v6091_v9 = vshll.u32 %v4841_v33, 16  ;;  %v3457_v14 = vshrl.u32 %v11077_v26, 16  ;;  %v257_v59 = vld [vmem:[#allocation2 + $0x2b0] sm:$0x1]  ;;  %1807 = vst.msk [vmem:[#allocation3 + $0x218] sm:$0xff] %vm1739_vm12, %v8286_v42 }
 0x2b2   :  { %4540 = vrot.lane.b32.xlu1 %v8260_v56, %s8290_s11  ;;  %v3456_v55 = vsel %vm8451_vm11, %v3451_v30, %v11095_v54  ;;  %v6265_v8 = vrot.slane %v6264_v51, 4  ;;  %v6088_v35 = vor.u32 %v6087_v41, %v11028_v23  ;;  %v4533_v38 = vpop.permute.xlu0 %4532  ;;  %v6279_v25 = vrot.slane %v6277_v47, 5 }
 0x2b3   :  { %v6274_v12 = vor.u32 %v6273_v58, %v6269_v11  ;;  %v11114_v62 = vrot.slane %v6091_v9, 5  ;;  %v6095_v36 = vshrl.u32 %v4841_v33, 16  ;;  %4686 = vst.msk [vmem:[#allocation3 + $0x198] sm:$0xff] %vm4634_vm14, %v4533_v38  ;;  %v7859_v21 = vcombine.low %v3446_v17, %v3456_v55  ;;  %v6666_v23 = vpop.permute.xlu1 %6665  ;;  %v6900_v55 = vld [vmem:[#allocation3 + $0x190] sm:$0xff] }
 0x2b4   :  { %3791 = vrot.lane.b32.xlu0 %v7848_v28, %s8291_s14  ;;  %v6089_v39 = vrot.slane %v6088_v35, 4  ;;  %v6101_v45 = vshll.u32 %v4842_v3, 16  ;;  %v7107_v26 = vsel %vm6952_vm1, %v6899_v52, 0  ;;  %v6270_v27 = vsel %vm8451_vm11, %v6265_v8, %v6269_v11  ;;  %6824 = vst.msk [vmem:[#allocation3 + $0x170] sm:$0xff] %vm6777_vm15, %v6666_v23  ;;  %v4871_v11 = vld [vmem:[#allocation2 + $0x2b4] sm:$0xf] }
 0x2b5   :  { %v8263_v60 = vld [vmem:[#allocation2 + $0x2a8] sm:$0xff]   ;;  %v6275_v61 = vrot.slane %v6274_v12, 4  ;;  %v6097_v24 = vrot.slane %v6095_v36, 4  ;;  %8072 = vmatpush3.bf16.xpose.msra.mxu1 %v7107_v26  ;;  %v258_v7 = vsel %vm8337_vm6, 0, %v257_v59  ;;  %v6335_v5 = vshll.u32 %v4869_v50, 16 }
 0x2b6   :  { %v6094_v46 = vsel %vm8451_vm11, %v6089_v39, %v11114_v62  ;;  %v6103_v20 = vrot.slane %v6101_v45, 5  ;;  %259 = vst [vmem:[#allocation2 + $0x2b0] sm:$0x1] %v258_v7  ;;  %v4868_v6 = vld [vmem:[#allocation2 + $0x2a8] sm:$0xf]  ;;  %v6339_v43 = vshrl.u32 %v4869_v50, 16  ;;  %8133 = vmatprep.subr.msk.bf16.mxu1 %vm6952_vm1, %v6908_v31  ;;  %v6650_v4 = vpop.permute.xlu0 %6649  ;;  %4562 = vrot.lane.b32.xlu1 %v8263_v60, %s8290_s11 }
 0x2b7   :  { %v6280_v18 = vsel %vm8451_vm11, %v6275_v61, %v6279_v25  ;;  %v6098_v29 = vor.u32 %v6097_v24, %v11114_v62  ;;  %v6326_v1 = vshrl.u32 %v4868_v6, 16  ;;  %v6329_v44 = vshll.u32 %v4868_v6, 16  ;;  %6816 = vst.msk [vmem:[#allocation3 + $0x130] sm:$0xff] %vm6777_vm15, %v6650_v4  ;;  %v6692_v56 = vpop.permute.xlu1 %6691  ;;  %v6887_v52 = vld [vmem:[#allocation3 + $0x128] sm:$0xff] }
 0x2b8   :  { %3813 = vrot.lane.b32.xlu0 %v7859_v21, %s8291_s14  ;;  %v7992_v22 = vcombine.low %v6270_v27, %v6280_v18  ;;  %v11134_v57 = vrot.slane %v6335_v5, 5  ;;  %v6341_v63 = vrot.slane %v6339_v43, 4  ;;  %v3459_v40 = vrot.slane %v3457_v14, 4  ;;  %6837 = vst.msk [vmem:[#allocation3 + $0x1d8] sm:$0xff] %vm6777_vm15, %v6692_v56 }
 0x2b9   :  { %v6099_v13 = vrot.slane %v6098_v29, 4  ;;  %v6328_v33 = vrot.slane %v6326_v1, 4  ;;  %v6331_v10 = vrot.slane %v6329_v44, 5  ;;  %v3463_v28 = vshll.u32 %v1976_v19, 16 }
 0x2ba   :  { %v6342_v37 = vor.u32 %v6341_v63, %v11134_v57  ;;  %v3460_v16 = vor.u32 %v3459_v40, %v11095_v54  ;;  %v3467_v0 = vshrl.u32 %v1976_v19, 16  ;;  %v3473_v30 = vshll.u32 %v1977_v34, 16  ;;  %v6676_v51 = vpop.permute.xlu0 %6675  ;;  %6699 = vrot.lane.b32.xlu1 %v7992_v22, %s8292_s15 }
 0x2bb   :  { %v6104_v47 = vsel %vm8451_vm11, %v6099_v13, %v6103_v20  ;;  %v6332_v41 = vor.u32 %v6331_v10, %v6328_v33  ;;  %v3465_v48 = vrot.slane %v3463_v28, 5  ;;  %v46_v17 = vsel %vm8324_vm3, 0, %v45_v32  ;;  %6829 = vst.msk [vmem:[#allocation3 + $0x198] sm:$0xff] %vm6777_vm15, %v6676_v51  ;;  %v6896_v62 = vld [vmem:[#allocation3 + $0x170] sm:$0xff]  ;;  %v6918_v33 = vld [vmem:[%s11546_s2] sm:$0xff]  ;;  %v6921_v28 = vld [vmem:[%s11546_s2 + $0x18] sm:$0xff] }
 0x2bc   :  { %4556 = vrot.lane.b32.xlu0 %v8264_v2, %s8290_s11  ;;  %v7984_v54 = vcombine.low %v6094_v46, %v6104_v47  ;;  %v6343_v58 = vrot.slane %v6342_v37, 4  ;;  %v3461_v3 = vrot.slane %v3460_v16, 4  ;;  %v3469_v9 = vrot.slane %v3467_v0, 4  ;;  %47 = vst [vmem:[#allocation2 + $0x2b8] sm:$0x1] %v46_v17  ;;  %v6920_v37 = vld [vmem:[%s11546_s2 + $0x10] sm:$0xff] }
 0x2bd   :  { %v4870_v14 = vld [vmem:[#allocation2 + $0x2b0] sm:$0xf]  ;;  %v6333_v8 = vrot.slane %v6332_v41, 4  ;;  %v3475_v35 = vrot.slane %v3473_v30, 5  ;;  %v3776_v25 = vpop.permute.xlu1 %3775  ;;  %v6355_v50 = vshll.u32 %v4871_v11, 16  ;;  %v6359_v31 = vshrl.u32 %v4871_v11, 16 }
 0x2be   :  { %v6345_v59 = vshll.u32 %v4870_v14, 16  ;;  %v6349_v38 = vshrl.u32 %v4870_v14, 16  ;;  %v3466_v49 = vsel %vm8451_vm11, %v3461_v3, %v3465_v48  ;;  %v3470_v12 = vor.u32 %v3469_v9, %v3465_v48  ;;  %3933 = vst.msk [vmem:[#allocation3 + $0x178] sm:$0xff] %vm3885_vm13, %v3776_v25  ;;  %v6888_v20 = vld [vmem:[#allocation3 + $0x130] sm:$0xff]  ;;  %v7532_v47 = vld [vmem:[%s11547_s3] sm:$0xff]  ;;  %v7535_v41 = vld [vmem:[%s11547_s3 + $0x18] sm:$0xff] }
 0x2bf   :  { %v6338_v36 = vsel %vm8451_vm11, %v6333_v8, %v11134_v57  ;;  %v7071_v21 = vsel %vm6952_vm1, %v6887_v52, 0  ;;  %v7110_v19 = vsel %vm6952_vm1, %v6900_v55, 0  ;;  %v6909_v23 = vld [vmem:[#allocation3 + $0x1d8] sm:$0xff]  ;;  %v6357_v60 = vrot.slane %v6355_v50, 5  ;;  %v7533_v16 = vld [vmem:[%s11547_s3 + $0x8] sm:$0xff]  ;;  %v7592_v52 = vld [vmem:[%s11548_s4] sm:$0xff] }
 0x2c0   :  { %6683 = vrot.lane.b32.xlu0 %v7984_v54, %s8292_s15  ;;  %v6347_v39 = vrot.slane %v6345_v59, 5  ;;  %v3471_v45 = vrot.slane %v3470_v12, 4  ;;  %v6351_v26 = vrot.slane %v6349_v38, 4  ;;  %8060 = vmatpush3.bf16.xpose.msra.mxu0 %v7071_v21  ;;  %v6361_v27 = vrot.slane %v6359_v31, 4  ;;  %v8267_v44 = vld [vmem:[#allocation2 + $0x2b0] sm:$0xff]   ;;  %v7593_v3 = vld [vmem:[%s11548_s4 + $0x8] sm:$0xff] }
 0x2c1   :  { %8074 = vmatpush3.bf16.xpose.msra.mxu1 %v7110_v19  ;;  %v3760_v61 = vpop.permute.xlu0 %3759  ;;  %8129 = vmatprep.subr.msk.bf16.mxu0 %vm6952_vm1, %v6896_v62  ;;  %v7074_v32 = vsel %vm6952_vm1, %v6888_v20, 0  ;;  %v7534_v54 = vld [vmem:[%s11547_s3 + $0x10] sm:$0xff]  ;;  %v7595_v55 = vld [vmem:[%s11548_s4 + $0x18] sm:$0xff]  ;;  %v11233_v62 = vld [vmem:[%s11545_s1] sm:$0xff]  }
 0x2c2   :  { %v6348_v24 = vsel %vm8451_vm11, %v6343_v58, %v6347_v39  ;;  %v3476_v7 = vsel %vm8451_vm11, %v3471_v45, %v3475_v35  ;;  %v6352_v46 = vor.u32 %v6351_v26, %v6347_v39  ;;  %3925 = vst.msk [vmem:[#allocation3 + $0x138] sm:$0xff] %vm3885_vm13, %v3760_v61  ;;  %8134 = vmatprep.subr.msk.bf16.mxu1 %vm6952_vm1, %v6909_v23  ;;  %v6901_v18 = vld [vmem:[#allocation3 + $0x198] sm:$0xff] }
 0x2c3   :  { %v7995_v6 = vcombine.low %v6338_v36, %v6348_v24  ;;  %v7860_v5 = vcombine.low %v3466_v49, %v3476_v7  ;;  %v4872_v43 = vld [vmem:[#allocation2 + $0x2b8] sm:$0x1]  ;;  %v6362_v4 = vor.u32 %v6361_v27, %v6357_v60  ;;  %v7113_v63 = vsel %vm6952_vm1, %v6901_v18, 0  ;;  %v7594_v8 = vld [vmem:[%s11548_s4 + $0x10] sm:$0xff] }
 0x2c4   :  { %v6353_v29 = vrot.slane %v6352_v46, 4  ;;  %v6365_v1 = vshll.u32 %v4872_v43, 16 }
 0x2c5   :  { %6705 = vrot.lane.b32.xlu0 %v7995_v6, %s8292_s15  ;;  %3815 = vrot.lane.b32.xlu1 %v7860_v5, %s8291_s14  ;;  %v6363_v34 = vrot.slane %v6362_v4, 4  ;;  %v3802_v57 = vpop.permute.xlu1 %3801 }
 0x2c6   :  { %v6358_v2 = vsel %vm8451_vm11, %v6353_v29, %v6357_v60  ;;  %v6367_v22 = vrot.slane %v6365_v1, 5  ;;  %3946 = vst.msk [vmem:[#allocation3 + $0x1e0] sm:$0xff] %vm3885_vm13, %v3802_v57  ;;  %v11192_v0 = vpop.f32.mrb[0].mxu0 }
 0x2c7   :  { %v11194_v30 = vpop.f32.mrb[1].mxu0 }
 0x2c8   :  { %v6368_v40 = vsel %vm8451_vm11, %v6363_v34, %v6367_v22  ;;  %8062 = vmatpush3.bf16.xpose.msra.mxu0 %v7074_v32  ;;  %v11203_v48 = vpop.f32.mrb[2].mxu0 }
 0x2c9   :  { %4564 = vrot.lane.b32.xlu0 %v8267_v44, %s8290_s11  ;;  %v7996_v56 = vcombine.low %v6358_v2, %v6368_v40  ;;  %8076 = vmatpush3.bf16.xpose.msra.mxu1 %v7113_v63  ;;  %v3786_v42 = vpop.permute.xlu0 %3785  ;;  %v4525_v13 = vpop.permute.xlu1 %4524 }
 0x2ca   :  { %3938 = vst.msk [vmem:[#allocation3 + $0x1a0] sm:$0xff] %vm3885_vm13, %v3786_v42  ;;  %v11210_v58 = vpop.f32.mrb[3].mxu0 }
 0x2cb   :  { %6707 = vrot.lane.b32.xlu1 %v7996_v56, %s8292_s15  ;;  %4682 = vst.msk [vmem:[#allocation3 + $0x178] sm:$0xff] %vm4634_vm14, %v4525_v13 }
 0x2cd   :  { %6924 = vperm.xlu0 %8147, %v6918_v33   ;;  %v4509_v10 = vpop.permute.xlu0 %4508 }
 0x2ce   :  { %4674 = vst.msk [vmem:[#allocation3 + $0x138] sm:$0xff] %vm4634_vm14, %v4509_v10 }
 0x2cf   :  { %6929 = vperm.xlu1 %8148, %v6919_v53  }
 0x2d1   :  { %6939 = vperm.xlu0 %8147, %v6921_v28  }
 0x2d3   :  { %6934 = vperm.xlu1 %8148, %v6920_v37   ;;  %v4551_v51 = vpop.permute.xlu1 %4550 }
 0x2d4   :  { %4695 = vst.msk [vmem:[#allocation3 + $0x1e0] sm:$0xff] %vm4634_vm14, %v4551_v51 }
 0x2d5   :  { %7543 = vperm.xlu0 %8147, %v7533_v16  }
 0x2d7   :  { %7538 = vperm.xlu1 %8148, %v7532_v47   ;;  %v4535_v17 = vpop.permute.xlu0 %4534  ;;  %v6668_v11 = vpop.permute.xlu1 %6667 }
 0x2d8   :  { %4687 = vst.msk [vmem:[#allocation3 + $0x1a0] sm:$0xff] %vm4634_vm14, %v4535_v17 }
 0x2d9   :  { %6825 = vst.msk [vmem:[#allocation3 + $0x178] sm:$0xff] %vm6777_vm15, %v6668_v11  ;;  %7553 = vperm.xlu0 %8147, %v7535_v41  }
 0x2db   :  { %7548 = vperm.xlu1 %8148, %v7534_v54   ;;  %v6652_v9 = vpop.permute.xlu0 %6651 }
 0x2dc   :  { %6817 = vst.msk [vmem:[#allocation3 + $0x138] sm:$0xff] %vm6777_vm15, %v6652_v9 }
 0x2dd   :  { %7603 = vperm.xlu0 %8147, %v7593_v3  }
 0x2df   :  { %7598 = vperm.xlu1 %8148, %v7592_v52  }
 0x2e0   :  { %v6897_v14 = vld [vmem:[#allocation3 + $0x178] sm:$0xff] }
 0x2e1   :  { %8130 = vmatprep.subr.msk.bf16.mxu0 %vm6952_vm1, %v6897_v14  ;;  %7613 = vperm.xlu0 %8147, %v7595_v55  }
 0x2e3   :  { %7608 = vperm.xlu1 %8148, %v7594_v8   ;;  %v6889_v35 = vld [vmem:[#allocation3 + $0x138] sm:$0xff] }
 0x2e4   :  { %v7077_v59 = vsel %vm6952_vm1, %v6889_v35, 0 }
 0x2e5   :  { %8064 = vmatpush3.bf16.xpose.msra.mxu0 %v7077_v59 }
 0x2e8   :  { %v6694_v38 = vpop.permute.xlu1 %6693 }
 0x2e9   :  { %6838 = vst.msk [vmem:[#allocation3 + $0x1e0] sm:$0xff] %vm6777_vm15, %v6694_v38  ;;  %v6678_v49 = vpop.permute.xlu0 %6677 }
 0x2ea   :  { %6830 = vst.msk [vmem:[#allocation3 + $0x1a0] sm:$0xff] %vm6777_vm15, %v6678_v49 }
 0x2ec   :  { %v3804_v12 = vpop.permute.xlu1 %3803  ;;  %8066 = vmatmul.mubr.msk.bf16.vlgmr.msra.gmra.mrb[8].mxu0 %vm6952_vm1, %v11233_v62 }
 0x2ed   :  { %3947 = vst.msk [vmem:[#allocation3 + $0x1e8] sm:$0xff] %vm3885_vm13, %v3804_v12  ;;  %v3788_v25 = vpop.permute.xlu0 %3787  ;;  %8067 = vmatprep.mubr.msk.bf16.mxu0 %vm6952_vm1, %v10997_v15 }
 0x2ee   :  { %3939 = vst.msk [vmem:[#allocation3 + $0x1a8] sm:$0xff] %vm3885_vm13, %v3788_v25 }
 0x2f0   :  { %v4537_v36 = vpop.permute.xlu1 %4536  ;;  %v6910_v50 = vld [vmem:[#allocation3 + $0x1e0] sm:$0xff] }
 0x2f1   :  { %4688 = vst.msk [vmem:[#allocation3 + $0x1a8] sm:$0xff] %vm4634_vm14, %v4537_v36  ;;  %8135 = vmatprep.subr.msk.bf16.mxu1 %vm6952_vm1, %v6910_v50  ;;  %v6902_v31 = vld [vmem:[#allocation3 + $0x1a0] sm:$0xff] }
 0x2f2   :  { %v7116_v21 = vsel %vm6952_vm1, %v6902_v31, 0 }
 0x2f3   :  { %8078 = vmatpush3.bf16.xpose.msra.mxu1 %v7116_v21 }
 0x2f4   :  { %8068 = vmatmul.mubr.msk.bf16.gmra.mrb[12].mxu0 %vm6952_vm1, %v10997_v15 }
 0x2f5   :  { %8103 = vmatprep.mubr.msk.bf16.mxu0 %vm6952_vm1, %v11233_v62 }
 0x2f7   :  { %v4559_v39 = vpop.permute.xlu1 %4558 }
 0x2fb   :  { %v6696_v45 = vpop.permute.xlu1 %6695 }
 0x2fe   :  { %v3810_v26 = vpop.permute.xlu0 %3809 }
 0x2ff   :  { %3950 = vst.msk [vmem:[#allocation3 + $0x200] sm:$0xff] %vm3885_vm13, %v3810_v26 }
 0x300   :  { %4699 = vst.msk [vmem:[#allocation3 + $0x200] sm:$0xff] %vm4634_vm14, %v4559_v39 }
 0x302   :  { %v4553_v19 = vpop.permute.xlu0 %4552  ;;  %v3790_v23 = vpop.permute.xlu1 %3789 }
 0x303   :  { %4696 = vst.msk [vmem:[#allocation3 + $0x1e8] sm:$0xff] %vm4634_vm14, %v4553_v19 }
 0x304   :  { %3940 = vst.msk [vmem:[#allocation3 + $0x1b0] sm:$0xff] %vm3885_vm13, %v3790_v23 }
 0x305   :  { %6839 = vst.msk [vmem:[#allocation3 + $0x1e8] sm:$0xff] %vm6777_vm15, %v6696_v45 }
 0x306   :  { %v6680_v60 = vpop.permute.xlu0 %6679 }
 0x307   :  { %6831 = vst.msk [vmem:[#allocation3 + $0x1a8] sm:$0xff] %vm6777_vm15, %v6680_v60 }
 0x30a   :  { %v3812_v27 = vpop.permute.xlu1 %3811 }
 0x30b   :  { %3951 = vst.msk [vmem:[#allocation3 + $0x208] sm:$0xff] %vm3885_vm13, %v3812_v27 }
 0x30c   :  { %v6911_v61 = vld [vmem:[#allocation3 + $0x1e8] sm:$0xff] }
 0x30d   :  { %8136 = vmatprep.subr.msk.bf16.mxu1 %vm6952_vm1, %v6911_v61 }
 0x30e   :  { %v6903_v24 = vld [vmem:[#allocation3 + $0x1a8] sm:$0xff]  ;;  %v4555_v7 = vpop.permute.xlu1 %4554 }
 0x30f   :  { %v7119_v46 = vsel %vm6952_vm1, %v6903_v24, 0 }
 0x310   :  { %8080 = vmatpush3.bf16.xpose.msra.mxu1 %v7119_v46 }
 0x312   :  { %v6702_v20 = vpop.permute.xlu0 %6701  ;;  %v6682_v6 = vpop.permute.xlu1 %6681 }
 0x313   :  { %6842 = vst.msk [vmem:[#allocation3 + $0x200] sm:$0xff] %vm6777_vm15, %v6702_v20 }
 0x316   :  { %v3806_v5 = vpop.permute.xlu0 %3805 }
 0x317   :  { %3948 = vst.msk [vmem:[#allocation3 + $0x1f0] sm:$0xff] %vm3885_vm13, %v3806_v5  ;;  %v6704_v18 = vpop.permute.xlu1 %6703 }
 0x318   :  { %4697 = vst.msk [vmem:[#allocation3 + $0x1f0] sm:$0xff] %vm4634_vm14, %v4555_v7 }
 0x31a   :  { %v4539_v43 = vpop.permute.xlu0 %4538  ;;  %v6914_v4 = vld [vmem:[#allocation3 + $0x200] sm:$0xff] }
 0x31b   :  { %4689 = vst.msk [vmem:[#allocation3 + $0x1b0] sm:$0xff] %vm4634_vm14, %v4539_v43  ;;  %8139 = vmatprep.subr.msk.bf16.mxu0 %vm6952_vm1, %v6914_v4  ;;  %v7152_v29 = vsel %vm6952_vm1, %v6914_v4, 0 }
 0x31c   :  { %8096 = vmatpush3.bf16.xpose.msra.mxu0 %v7152_v29  ;;  %6832 = vst.msk [vmem:[#allocation3 + $0x1b0] sm:$0xff] %vm6777_vm15, %v6682_v6 }
 0x31e   :  { %v4561_v1 = vpop.permute.xlu0 %4560 }
 0x31f   :  { %4700 = vst.msk [vmem:[#allocation3 + $0x208] sm:$0xff] %vm4634_vm14, %v4561_v1 }
 0x320   :  { %6843 = vst.msk [vmem:[#allocation3 + $0x208] sm:$0xff] %vm6777_vm15, %v6704_v18  ;;  %v3808_v44 = vpop.permute.xlu1 %3807 }
 0x321   :  { %3949 = vst.msk [vmem:[#allocation3 + $0x1f8] sm:$0xff] %vm3885_vm13, %v3808_v44 }
 0x322   :  { %v6698_v34 = vpop.permute.xlu0 %6697 }
 0x323   :  { %6840 = vst.msk [vmem:[#allocation3 + $0x1f0] sm:$0xff] %vm6777_vm15, %v6698_v34  ;;  %v6904_v22 = vld [vmem:[#allocation3 + $0x1b0] sm:$0xff] }
 0x324   :  { %v4541_v32 = vpop.permute.xlu1 %4540  ;;  %v7122_v40 = vsel %vm6952_vm1, %v6904_v22, 0 }
 0x326   :  { %v3792_v2 = vpop.permute.xlu0 %3791 }
 0x327   :  { %3941 = vst.msk [vmem:[#allocation3 + $0x1b8] sm:$0xff] %vm3885_vm13, %v3792_v2  ;;  %v6915_v57 = vld [vmem:[#allocation3 + $0x208] sm:$0xff] }
 0x328   :  { %4690 = vst.msk [vmem:[#allocation3 + $0x1b8] sm:$0xff] %vm4634_vm14, %v4541_v32  ;;  %8140 = vmatprep.subr.msk.bf16.mxu0 %vm6952_vm1, %v6915_v57  ;;  %v7155_v63 = vsel %vm6952_vm1, %v6915_v57, 0  ;;  %v4563_v56 = vpop.permute.xlu1 %4562 }
 0x329   :  { %8098 = vmatpush3.bf16.xpose.msra.mxu0 %v7155_v63 }
 0x32a   :  { %v3814_v42 = vpop.permute.xlu0 %3813  ;;  %v6912_v13 = vld [vmem:[#allocation3 + $0x1f0] sm:$0xff] }
 0x32b   :  { %3952 = vst.msk [vmem:[#allocation3 + $0x210] sm:$0xff] %vm3885_vm13, %v3814_v42  ;;  %8137 = vmatprep.subr.msk.bf16.mxu1 %vm6952_vm1, %v6912_v13 }
 0x32c   :  { %8082 = vmatpush3.bf16.xpose.msra.mxu1 %v7122_v40  ;;  %4701 = vst.msk [vmem:[#allocation3 + $0x210] sm:$0xff] %vm4634_vm14, %v4563_v56  ;;  %v6700_v33 = vpop.permute.xlu1 %6699 }
 0x32e   :  { %v4557_v53 = vpop.permute.xlu0 %4556 }
 0x32f   :  { %4698 = vst.msk [vmem:[#allocation3 + $0x1f8] sm:$0xff] %vm4634_vm14, %v4557_v53 }
 0x330   :  { %6841 = vst.msk [vmem:[#allocation3 + $0x1f8] sm:$0xff] %vm6777_vm15, %v6700_v33 }
 0x332   :  { %v6684_v10 = vpop.permute.xlu0 %6683 }
 0x333   :  { %6833 = vst.msk [vmem:[#allocation3 + $0x1b8] sm:$0xff] %vm6777_vm15, %v6684_v10 }
 0x337   :  { %v6706_v28 = vpop.permute.xlu0 %6705  ;;  %v3816_v37 = vpop.permute.xlu1 %3815  ;;  %v6913_v16 = vld [vmem:[#allocation3 + $0x1f8] sm:$0xff] }
 0x338   :  { %6844 = vst.msk [vmem:[#allocation3 + $0x210] sm:$0xff] %vm6777_vm15, %v6706_v28  ;;  %8138 = vmatprep.subr.msk.bf16.mxu1 %vm6952_vm1, %v6913_v16 }
 0x339   :  { %3953 = vst.msk [vmem:[#allocation3 + $0x218] sm:$0xff] %vm3885_vm13, %v3816_v37  ;;  %v7250_v47 = vpop.f32.mrb[0].mxu1 }
 0x33a   :  { %v6905_v51 = vld [vmem:[#allocation3 + $0x1b8] sm:$0xff]  ;;  %v7252_v11 = vpop.f32.mrb[1].mxu1 }
 0x33b   :  { %v7125_v41 = vsel %vm6952_vm1, %v6905_v51, 0  ;;  %v4565_v17 = vpop.permute.xlu0 %4564  ;;  %v7254_v54 = vpop.f32.mrb[2].mxu1 }
 0x33c   :  { %8084 = vmatpush3.bf16.xpose.msra.mxu1 %v7125_v41  ;;  %4702 = vst.msk [vmem:[#allocation3 + $0x218] sm:$0xff] %vm4634_vm14, %v4565_v17  ;;  %v7256_v9 = vpop.f32.mrb[3].mxu1 }
 0x33d   :  { %v6708_v3 = vpop.permute.xlu1 %6707 }
 0x33e   :  { %6845 = vst.msk [vmem:[#allocation3 + $0x218] sm:$0xff] %vm6777_vm15, %v6708_v3 }
 0x33f   :  { %v6916_v52 = vld [vmem:[#allocation3 + $0x210] sm:$0xff] }
 0x340   :  { %8141 = vmatprep.subr.msk.bf16.mxu0 %vm6952_vm1, %v6916_v52  ;;  %v7158_v55 = vsel %vm6952_vm1, %v6916_v52, 0 }
 0x341   :  { %8100 = vmatpush3.bf16.xpose.msra.mxu0 %v7158_v55 }
 0x343   :  { %8086 = vmatmul.mubr.msk.bf16.vlgmr.msra.gmra.mrb[8].mxu1 %vm6952_vm1, %v11233_v62 }
 0x344   :  { %8087 = vmatprep.mubr.msk.bf16.mxu1 %vm6952_vm1, %v10997_v15 }
 0x345   :  { %v6917_v14 = vld [vmem:[#allocation3 + $0x218] sm:$0xff] }
 0x346   :  { %8142 = vmatprep.subr.msk.bf16.mxu0 %vm6952_vm1, %v6917_v14  ;;  %v7161_v8 = vsel %vm6952_vm1, %v6917_v14, 0 }
 0x349   :  { %8102 = vmatpush3.bf16.xpose.msra.mxu0 %v7161_v8 }
 0x34b   :  { %8088 = vmatmul.mubr.msk.bf16.gmra.mrb[12].mxu1 %vm6952_vm1, %v10997_v15 }
 0x34c   :  { %v11294_v35 = vpop.permute.xlu0 %6924 }
 0x34d   :  { %v7198_v59 = vadd.f32 %v11192_v0, %v11294_v35  ;;  %v7200_v49 = vadd.f32 %v11194_v30, %v11294_v35  ;;  %v7251_v36 = vadd.f32 %v7250_v47, %v11294_v35  ;;  %v7253_v0 = vadd.f32 %v7252_v11, %v11294_v35 }
 0x34e   :  { %v11298_v38 = vpop.permute.xlu1 %6929 }
 0x34f   :  { %v7202_v25 = vadd.f32 %v11203_v48, %v11298_v38  ;;  %v7204_v62 = vadd.f32 %v11210_v58, %v11298_v38  ;;  %v7460_v50 = vmul.f32 0.1, %v7198_v59  ;;  %v7461_v21 = vmul.f32 0.1, %v7200_v49 }
 0x350   :  { %8104 = vmatmul.mubr.msk.bf16.vlgmr.msra.gmra.mrb[16].mxu0 %vm6952_vm1, %v10997_v15  ;;  %v11304_v12 = vpop.permute.xlu0 %6939  ;;  %v7255_v15 = vadd.f32 %v7254_v54, %v11298_v38  ;;  %v7257_v45 = vadd.f32 %v7256_v9, %v11298_v38  ;;  %vm7424_vm3 = vcmp.gt.f32.partialorder %v7198_v59, 0.0  ;;  %vm7425_vm4 = vcmp.gt.f32.partialorder %v7200_v49, 0.0 }
 0x351   :  { %v7469_v30 = vmul.f32 0.1, %v7202_v25  ;;  %v7470_v39 = vmul.f32 0.1, %v7204_v62  ;;  %vm7433_vm0 = vcmp.gt.f32.partialorder %v7202_v25, 0.0  ;;  %vm7434_vm2 = vcmp.gt.f32.partialorder %v7204_v62, 0.0 }
 0x352   :  { %v11312_v31 = vpop.permute.xlu1 %6934  ;;  %v7462_v58 = vmul.f32 0.1, %v7251_v36  ;;  %v7463_v26 = vmul.f32 0.1, %v7253_v0  ;;  %vm7426_vm5 = vcmp.gt.f32.partialorder %v7251_v36, 0.0  ;;  %vm7427_vm6 = vcmp.gt.f32.partialorder %v7253_v0, 0.0 }
 0x353   :  { %vm7435_vm7 = vcmp.gt.f32.partialorder %v7255_v15, 0.0  ;;  %v7471_v19 = vmul.f32 0.1, %v7255_v15  ;;  %v7505_v60 = vsel %vm7433_vm0, %v7202_v25, %v7469_v30  ;;  %v7506_v27 = vsel %vm7434_vm2, %v7204_v62, %v7470_v39 }
 0x354   :  { %v11316_v48 = vpop.permute.xlu0 %7543  ;;  %vm7436_vm8 = vcmp.gt.f32.partialorder %v7257_v45, 0.0  ;;  %v7472_v61 = vmul.f32 0.1, %v7257_v45  ;;  %v7496_v24 = vsel %vm7424_vm3, %v7198_v59, %v7460_v50  ;;  %v7497_v7 = vsel %vm7425_vm4, %v7200_v49, %v7461_v21 }
 0x355   :  { %v7498_v20 = vsel %vm7426_vm5, %v7251_v36, %v7462_v58  ;;  %v7499_v6 = vsel %vm7427_vm6, %v7253_v0, %v7463_v26  ;;  %v7507_v5 = vsel %vm7435_vm7, %v7255_v15, %v7471_v19  ;;  %v7565_v4 = vmul.f32 %v11316_v48, %v7505_v60 }
 0x356   :  { %v11318_v23 = vpop.permute.xlu1 %7538  ;;  %v7508_v43 = vsel %vm7436_vm8, %v7257_v45, %v7472_v61  ;;  %v7566_v18 = vmul.f32 %v11316_v48, %v7506_v27  ;;  %v7567_v29 = vmul.f32 %v11316_v48, %v7507_v5 }
 0x357   :  { %v7568_v1 = vmul.f32 %v11316_v48, %v7508_v43  ;;  %v7556_v34 = vmul.f32 %v11318_v23, %v7496_v24  ;;  %v7557_v32 = vmul.f32 %v11318_v23, %v7497_v7  ;;  %v7558_v2 = vmul.f32 %v11318_v23, %v7498_v20 }
 0x358   :  { %v11320_v46 = vpop.permute.xlu0 %7553  ;;  %v7559_v22 = vmul.f32 %v11318_v23, %v7499_v6 }
 0x35a   :  { %v11326_v44 = vpop.permute.xlu1 %7548 }
 0x35c   :  { %v11332_v57 = vpop.permute.xlu0 %7603 }
 0x35d   :  { %v7625_v63 = vadd.f32 %v11332_v57, %v7565_v4  ;;  %v7626_v40 = vadd.f32 %v11332_v57, %v7566_v18  ;;  %v7627_v56 = vadd.f32 %v11332_v57, %v7567_v29  ;;  %v7628_v42 = vadd.f32 %v11332_v57, %v7568_v1 }
 0x35e   :  { %v11338_v13 = vpop.permute.xlu1 %7598 }
 0x35f   :  { %v7616_v33 = vadd.f32 %v11338_v13, %v7556_v34  ;;  %v7617_v53 = vadd.f32 %v11338_v13, %v7557_v32  ;;  %7662 = vst [vmem:[%s11549_s5 + $0x48] sm:$0xff] %v7625_v63  ;;  %7663 = vst [vmem:[%s11549_s5 + $0x50] sm:$0xff] %v7626_v40  ;;  %v7618_v10 = vadd.f32 %v11338_v13, %v7558_v2 }
 0x360   :  { %v7619_v28 = vadd.f32 %v11338_v13, %v7559_v22  ;;  %7664 = vst [vmem:[%s11549_s5 + $0x58] sm:$0xff] %v7627_v56  ;;  %7665 = vst [vmem:[%s11549_s5 + $0x60] sm:$0xff] %v7628_v42  ;;  %v11378_v45 = vpop.permute.xlu0 %7613 }
 0x361   :  { %7652 = vst [vmem:[%s11549_s5] sm:$0xff] %v7616_v33  ;;  %7653 = vst [vmem:[%s11549_s5 + $0x8] sm:$0xff] %v7617_v53  ;;  %v7207_v37 = vpop.f32.mrb[4].mxu0  ;;  %v7260_v47 = vpop.f32.mrb[4].mxu1 }
 0x362   :  { %7654 = vst [vmem:[%s11549_s5 + $0x10] sm:$0xff] %v7618_v10  ;;  %7655 = vst [vmem:[%s11549_s5 + $0x18] sm:$0xff] %v7619_v28  ;;  %v7208_v16 = vadd.f32 %v7207_v37, %v11312_v31  ;;  %v7209_v51 = vpop.f32.mrb[5].mxu0  ;;  %v7261_v11 = vadd.f32 %v7260_v47, %v11312_v31  ;;  %v7262_v54 = vpop.f32.mrb[5].mxu1 }
 0x363   :  { %v7210_v41 = vadd.f32 %v7209_v51, %v11312_v31  ;;  %v7211_v17 = vpop.f32.mrb[6].mxu0  ;;  %v7263_v55 = vadd.f32 %v7262_v54, %v11312_v31  ;;  %v7264_v14 = vpop.f32.mrb[6].mxu1 }
 0x364   :  { %vm7442_vm9 = vcmp.gt.f32.partialorder %v7208_v16, 0.0  ;;  %v7478_v3 = vmul.f32 0.1, %v7208_v16  ;;  %v7212_v9 = vadd.f32 %v7211_v17, %v11304_v12  ;;  %v7213_v52 = vpop.f32.mrb[7].mxu0  ;;  %vm7444_vm11 = vcmp.gt.f32.partialorder %v7261_v11, 0.0  ;;  %v7266_v49 = vpop.f32.mrb[7].mxu1 }
 0x365   :  { %vm7443_vm10 = vcmp.gt.f32.partialorder %v7210_v41, 0.0  ;;  %v7479_v8 = vmul.f32 0.1, %v7210_v41  ;;  %v7214_v59 = vadd.f32 %v7213_v52, %v11304_v12  ;;  %v11374_v36 = vpop.permute.xlu1 %7608  ;;  %v7480_v0 = vmul.f32 0.1, %v7261_v11 }
 0x366   :  { %v7514_v25 = vsel %vm7442_vm9, %v7208_v16, %v7478_v3  ;;  %vm7451_vm12 = vcmp.gt.f32.partialorder %v7212_v9, 0.0  ;;  %v7487_v62 = vmul.f32 0.1, %v7212_v9  ;;  %vm7445_vm14 = vcmp.gt.f32.partialorder %v7263_v55, 0.0 }
 0x367   :  { %v7574_v50 = vmul.f32 %v11326_v44, %v7514_v25  ;;  %v7515_v21 = vsel %vm7443_vm10, %v7210_v41, %v7479_v8  ;;  %vm7452_vm13 = vcmp.gt.f32.partialorder %v7214_v59, 0.0  ;;  %v7488_v30 = vmul.f32 0.1, %v7214_v59 }
 0x368   :  { %v7575_v39 = vmul.f32 %v11326_v44, %v7515_v21  ;;  %v7523_v15 = vsel %vm7451_vm12, %v7212_v9, %v7487_v62  ;;  %v7516_v58 = vsel %vm7444_vm11, %v7261_v11, %v7480_v0  ;;  %v7481_v7 = vmul.f32 0.1, %v7263_v55 }
 0x369   :  { %v7583_v26 = vmul.f32 %v11320_v46, %v7523_v15  ;;  %v7524_v19 = vsel %vm7452_vm13, %v7214_v59, %v7488_v30  ;;  %v7634_v60 = vadd.f32 %v11374_v36, %v7574_v50  ;;  %v7576_v27 = vmul.f32 %v11326_v44, %v7516_v58 }
 0x36a   :  { %v7584_v61 = vmul.f32 %v11320_v46, %v7524_v19  ;;  %v7635_v24 = vadd.f32 %v11374_v36, %v7575_v39  ;;  %v7265_v20 = vadd.f32 %v7264_v14, %v11304_v12  ;;  %v7267_v43 = vadd.f32 %v7266_v49, %v11304_v12 }
 0x36b   :  { %7671 = vst [vmem:[%s11549_s5 + $0x90] sm:$0xff] %v7634_v60  ;;  %v7643_v6 = vadd.f32 %v11378_v45, %v7583_v26  ;;  %v7636_v5 = vadd.f32 %v11374_v36, %v7576_v27  ;;  %v7517_v18 = vsel %vm7445_vm14, %v7263_v55, %v7481_v7 }
 0x36c   :  { %7672 = vst [vmem:[%s11549_s5 + $0x98] sm:$0xff] %v7635_v24  ;;  %v7644_v4 = vadd.f32 %v11378_v45, %v7584_v61  ;;  %vm7453_vm15 = vcmp.gt.f32.partialorder %v7265_v20, 0.0  ;;  %v7489_v29 = vmul.f32 0.1, %v7265_v20  ;;  %v7577_v1 = vmul.f32 %v11326_v44, %v7517_v18 }
 0x36d   :  { %7680 = vst [vmem:[%s11549_s5 + $0xd8] sm:$0xff] %v7643_v6  ;;  %7673 = vst [vmem:[%s11549_s5 + $0xa0] sm:$0xff] %v7636_v5  ;;  %vm7454_vm1 = vcmp.gt.f32.partialorder %v7267_v43, 0.0  ;;  %v7490_v34 = vmul.f32 0.1, %v7267_v43 }
 0x36e   :  { %7681 = vst [vmem:[%s11549_s5 + $0xe0] sm:$0xff] %v7644_v4  ;;  %v7525_v32 = vsel %vm7453_vm15, %v7265_v20, %v7489_v29  ;;  %v7637_v2 = vadd.f32 %v11374_v36, %v7577_v1 }
 0x36f   :  { %v7585_v22 = vmul.f32 %v11320_v46, %v7525_v32  ;;  %v7526_v63 = vsel %vm7454_vm1, %v7267_v43, %v7490_v34 }
 0x370   :  { %v7586_v40 = vmul.f32 %v11320_v46, %v7526_v63  ;;  %7674 = vst [vmem:[%s11549_s5 + $0xa8] sm:$0xff] %v7637_v2 }
 0x371   :  { %v7645_v56 = vadd.f32 %v11378_v45, %v7585_v22 }
 0x372   :  { %v7646_v42 = vadd.f32 %v11378_v45, %v7586_v40 }
 0x373   :  { %7682 = vst [vmem:[%s11549_s5 + $0xe8] sm:$0xff] %v7645_v56 }
 0x374   :  { %7683 = vst [vmem:[%s11549_s5 + $0xf0] sm:$0xff] %v7646_v42 }
 0x3bf   :  { %v7303_v33 = vpop.f32.mrb[8].mxu0 }
 0x3c0   :  { %v7304_v53 = vadd.f32 %v7303_v33, %v11294_v35  ;;  %v7305_v10 = vpop.f32.mrb[9].mxu0 }
 0x3c1   :  { %v7306_v28 = vadd.f32 %v7305_v10, %v11294_v35  ;;  %v7307_v37 = vpop.f32.mrb[10].mxu0 }
 0x3c2   :  { %vm7428_vm0 = vcmp.gt.f32.partialorder %v7304_v53, 0.0  ;;  %v7464_v16 = vmul.f32 0.1, %v7304_v53  ;;  %v7308_v51 = vadd.f32 %v7307_v37, %v11298_v38  ;;  %v7309_v47 = vpop.f32.mrb[11].mxu0 }
 0x3c3   :  { %vm7429_vm2 = vcmp.gt.f32.partialorder %v7306_v28, 0.0  ;;  %v7465_v41 = vmul.f32 0.1, %v7306_v28  ;;  %v7310_v17 = vadd.f32 %v7309_v47, %v11298_v38 }
 0x3c4   :  { %v7500_v11 = vsel %vm7428_vm0, %v7304_v53, %v7464_v16  ;;  %vm7437_vm3 = vcmp.gt.f32.partialorder %v7308_v51, 0.0  ;;  %v7473_v54 = vmul.f32 0.1, %v7308_v51 }
 0x3c5   :  { %v7560_v3 = vmul.f32 %v11318_v23, %v7500_v11  ;;  %v7501_v9 = vsel %vm7429_vm2, %v7306_v28, %v7465_v41  ;;  %vm7438_vm4 = vcmp.gt.f32.partialorder %v7310_v17, 0.0  ;;  %v7474_v52 = vmul.f32 0.1, %v7310_v17 }
 0x3c6   :  { %v7561_v55 = vmul.f32 %v11318_v23, %v7501_v9  ;;  %v7509_v14 = vsel %vm7437_vm3, %v7308_v51, %v7473_v54 }
 0x3c7   :  { %v7620_v8 = vadd.f32 %v11338_v13, %v7560_v3  ;;  %v7569_v59 = vmul.f32 %v11316_v48, %v7509_v14  ;;  %v7510_v49 = vsel %vm7438_vm4, %v7310_v17, %v7474_v52  ;;  %v7313_v25 = vpop.f32.mrb[12].mxu0  ;;  %vm7660_vm4 = vcmask 523264  }
 0x3c8   :  { %v7621_v62 = vadd.f32 %v11338_v13, %v7561_v55  ;;  %v7570_v0 = vmul.f32 %v11316_v48, %v7510_v49  ;;  %v7314_v50 = vadd.f32 %v7313_v25, %v11312_v31  ;;  %v7315_v21 = vpop.f32.mrb[13].mxu0 }
 0x3c9   :  { %7656 = vst [vmem:[%s11549_s5 + $0x20] sm:$0xff] %v7620_v8  ;;  %v7629_v30 = vadd.f32 %v11332_v57, %v7569_v59  ;;  %v7316_v39 = vadd.f32 %v7315_v21, %v11312_v31  ;;  %v7317_v15 = vpop.f32.mrb[14].mxu0 }
 0x3ca   :  { %7657 = vst [vmem:[%s11549_s5 + $0x28] sm:$0xff] %v7621_v62  ;;  %v7630_v58 = vadd.f32 %v11332_v57, %v7570_v0  ;;  %vm7446_vm5 = vcmp.gt.f32.partialorder %v7314_v50, 0.0  ;;  %v7482_v26 = vmul.f32 0.1, %v7314_v50  ;;  %v7318_v19 = vadd.f32 %v7317_v15, %v11304_v12  ;;  %v7319_v60 = vpop.f32.mrb[15].mxu0 }
 0x3cb   :  { %7666 = vst [vmem:[%s11549_s5 + $0x68] sm:$0xff] %v7629_v30  ;;  %vm7447_vm6 = vcmp.gt.f32.partialorder %v7316_v39, 0.0  ;;  %v7483_v27 = vmul.f32 0.1, %v7316_v39  ;;  %v7320_v61 = vadd.f32 %v7319_v60, %v11304_v12 }
 0x3cc   :  { %7667 = vst [vmem:[%s11549_s5 + $0x70] sm:$0xff] %v7630_v58  ;;  %v7518_v24 = vsel %vm7446_vm5, %v7314_v50, %v7482_v26  ;;  %vm7455_vm7 = vcmp.gt.f32.partialorder %v7318_v19, 0.0  ;;  %v7491_v7 = vmul.f32 0.1, %v7318_v19 }
 0x3cd   :  { %v7578_v20 = vmul.f32 %v11326_v44, %v7518_v24  ;;  %v7519_v6 = vsel %vm7447_vm6, %v7316_v39, %v7483_v27  ;;  %vm7456_vm8 = vcmp.gt.f32.partialorder %v7320_v61, 0.0  ;;  %v7492_v5 = vmul.f32 0.1, %v7320_v61 }
 0x3ce   :  { %v7579_v43 = vmul.f32 %v11326_v44, %v7519_v6  ;;  %v7527_v4 = vsel %vm7455_vm7, %v7318_v19, %v7491_v7 }
 0x3cf   :  { %v7638_v18 = vadd.f32 %v11374_v36, %v7578_v20  ;;  %v7587_v29 = vmul.f32 %v11320_v46, %v7527_v4  ;;  %v7528_v1 = vsel %vm7456_vm8, %v7320_v61, %v7492_v5 }
 0x3d0   :  { %v7639_v34 = vadd.f32 %v11374_v36, %v7579_v43  ;;  %v7588_v32 = vmul.f32 %v11320_v46, %v7528_v1 }
 0x3d1   :  { %7675 = vst [vmem:[%s11549_s5 + $0xb0] sm:$0xff] %v7638_v18  ;;  %v7647_v2 = vadd.f32 %v11378_v45, %v7587_v29 }
 0x3d2   :  { %7676 = vst [vmem:[%s11549_s5 + $0xb8] sm:$0xff] %v7639_v34  ;;  %v7648_v22 = vadd.f32 %v11378_v45, %v7588_v32 }
 0x3d3   :  { %7684 = vst [vmem:[%s11549_s5 + $0xf8] sm:$0xff] %v7647_v2 }
 0x3d4   :  { %7685 = vst [vmem:[%s11549_s5 + $0x100] sm:$0xff] %v7648_v22 }
 0x416   :  { %v7356_v63 = vpop.f32.mrb[8].mxu1 }
 0x417   :  { %v7357_v40 = vadd.f32 %v7356_v63, %v11294_v35  ;;  %v7358_v56 = vpop.f32.mrb[9].mxu1 }
 0x418   :  { %v7359_v42 = vadd.f32 %v7358_v56, %v11294_v35  ;;  %v7360_v33 = vpop.f32.mrb[10].mxu1 }
 0x419   :  { %vm7430_vm9 = vcmp.gt.f32.partialorder %v7357_v40, 0.0  ;;  %v7466_v53 = vmul.f32 0.1, %v7357_v40  ;;  %v7361_v10 = vadd.f32 %v7360_v33, %v11298_v38  ;;  %v7362_v28 = vpop.f32.mrb[11].mxu1 }
 0x41a   :  { %vm7431_vm10 = vcmp.gt.f32.partialorder %v7359_v42, 0.0  ;;  %v7467_v37 = vmul.f32 0.1, %v7359_v42  ;;  %v7363_v16 = vadd.f32 %v7362_v28, %v11298_v38 }
 0x41b   :  { %v7502_v51 = vsel %vm7430_vm9, %v7357_v40, %v7466_v53  ;;  %vm7439_vm11 = vcmp.gt.f32.partialorder %v7361_v10, 0.0  ;;  %v7475_v47 = vmul.f32 0.1, %v7361_v10 }
 0x41c   :  { %v7562_v41 = vmul.f32 %v11318_v23, %v7502_v51  ;;  %v7503_v17 = vsel %vm7431_vm10, %v7359_v42, %v7467_v37  ;;  %vm7440_vm12 = vcmp.gt.f32.partialorder %v7363_v16, 0.0  ;;  %v7476_v11 = vmul.f32 0.1, %v7363_v16 }
 0x41d   :  { %v7563_v54 = vmul.f32 %v11318_v23, %v7503_v17  ;;  %v7511_v3 = vsel %vm7439_vm11, %v7361_v10, %v7475_v47 }
 0x41e   :  { %v7622_v9 = vadd.f32 %v11338_v13, %v7562_v41  ;;  %v7571_v52 = vmul.f32 %v11316_v48, %v7511_v3  ;;  %v7512_v55 = vsel %vm7440_vm12, %v7363_v16, %v7476_v11  ;;  %v7366_v14 = vpop.f32.mrb[12].mxu1 }
 0x41f   :  { %v7623_v8 = vadd.f32 %v11338_v13, %v7563_v54  ;;  %v7572_v59 = vmul.f32 %v11316_v48, %v7512_v55  ;;  %v7367_v49 = vadd.f32 %v7366_v14, %v11312_v31  ;;  %v7368_v25 = vpop.f32.mrb[13].mxu1 }
 0x420   :  { %7658 = vst [vmem:[%s11549_s5 + $0x30] sm:$0xff] %v7622_v9  ;;  %v7631_v62 = vadd.f32 %v11332_v57, %v7571_v52  ;;  %v7369_v0 = vadd.f32 %v7368_v25, %v11312_v31  ;;  %v7370_v50 = vpop.f32.mrb[14].mxu1 }
 0x421   :  { %7659 = vst [vmem:[%s11549_s5 + $0x38] sm:$0xff] %v7623_v8  ;;  %v7632_v21 = vadd.f32 %v11332_v57, %v7572_v59  ;;  %vm7448_vm13 = vcmp.gt.f32.partialorder %v7367_v49, 0.0  ;;  %v7484_v30 = vmul.f32 0.1, %v7367_v49  ;;  %v7371_v39 = vadd.f32 %v7370_v50, %v11304_v12  ;;  %v7372_v15 = vpop.f32.mrb[15].mxu1 }
 0x422   :  { %7668 = vst [vmem:[%s11549_s5 + $0x78] sm:$0xff] %v7631_v62  ;;  %vm7449_vm14 = vcmp.gt.f32.partialorder %v7369_v0, 0.0  ;;  %v7485_v58 = vmul.f32 0.1, %v7369_v0  ;;  %v7373_v26 = vadd.f32 %v7372_v15, %v11304_v12 }
 0x423   :  { %7669 = vst [vmem:[%s11549_s5 + $0x80] sm:$0xff] %v7632_v21  ;;  %v7520_v19 = vsel %vm7448_vm13, %v7367_v49, %v7484_v30  ;;  %vm7457_vm15 = vcmp.gt.f32.partialorder %v7371_v39, 0.0  ;;  %v7493_v60 = vmul.f32 0.1, %v7371_v39  ;;  %v8105_v27 = vpop.f32.mrb[16].mxu0 }
 0x424   :  { %v7580_v61 = vmul.f32 %v11326_v44, %v7520_v19  ;;  %v7521_v24 = vsel %vm7449_vm14, %v7369_v0, %v7485_v58  ;;  %vm7458_vm1 = vcmp.gt.f32.partialorder %v7373_v26, 0.0  ;;  %v7494_v7 = vmul.f32 0.1, %v7373_v26  ;;  %v7409_v20 = vpop.f32.mrb[17].mxu0 }
 0x425   :  { %v7581_v6 = vmul.f32 %v11326_v44, %v7521_v24  ;;  %v7529_v5 = vsel %vm7457_vm15, %v7371_v39, %v7493_v60  ;;  %v7418_v43 = vadd.f32 %v8105_v27, %v11312_v31  ;;  %v7410_v4 = vadd.f32 %v7409_v20, %v11294_v35  ;;  %v8106_v18 = vpop.f32.mrb[18].mxu0 }
 0x426   :  { %v7640_v29 = vadd.f32 %v11374_v36, %v7580_v61  ;;  %v7589_v1 = vmul.f32 %v11320_v46, %v7529_v5  ;;  %v7530_v34 = vsel %vm7458_vm1, %v7373_v26, %v7494_v7  ;;  %v7421_v32 = vadd.f32 %v8106_v18, %v11304_v12  ;;  %v7412_v2 = vpop.f32.mrb[19].mxu0 }
 0x427   :  { %v7641_v22 = vadd.f32 %v11374_v36, %v7581_v6  ;;  %v7590_v63 = vmul.f32 %v11320_v46, %v7530_v34  ;;  %vm7450_vm0 = vcmp.gt.f32.partialorder %v7418_v43, 0.0  ;;  %v7486_v40 = vmul.f32 0.1, %v7418_v43 }
 0x428   :  { %7677 = vst [vmem:[%s11549_s5 + $0xc0] sm:$0xff] %v7640_v29  ;;  %v7649_v35 = vadd.f32 %v11378_v45, %v7589_v1  ;;  %vm7432_vm2 = vcmp.gt.f32.partialorder %v7410_v4, 0.0  ;;  %v7468_v31 = vmul.f32 0.1, %v7410_v4  ;;  %vm7459_vm3 = vcmp.gt.f32.partialorder %v7421_v32, 0.0 }
 0x429   :  { %7678 = vst [vmem:[%s11549_s5 + $0xc8] sm:$0xff] %v7641_v22  ;;  %v7650_v12 = vadd.f32 %v11378_v45, %v7590_v63  ;;  %v7522_v56 = vsel %vm7450_vm0, %v7418_v43, %v7486_v40  ;;  %v7495_v42 = vmul.f32 0.1, %v7421_v32  ;;  %v7413_v33 = vadd.f32 %v7412_v2, %v11298_v38 }
 0x42a   :  { %7686 = vst [vmem:[%s11549_s5 + $0x108] sm:$0xff] %v7649_v35  ;;  %v7582_v53 = vmul.f32 %v11326_v44, %v7522_v56  ;;  %v7504_v10 = vsel %vm7432_vm2, %v7410_v4, %v7468_v31 }
 0x42b   :  { %7687 = vst [vmem:[%s11549_s5 + $0x110] sm:$0xff] %v7650_v12  ;;  %v7564_v28 = vmul.f32 %v11318_v23, %v7504_v10  ;;  %v7531_v37 = vsel %vm7459_vm3, %v7421_v32, %v7495_v42  ;;  %vm7441_vm5 = vcmp.gt.f32.partialorder %v7413_v33, 0.0  ;;  %v7477_v16 = vmul.f32 0.1, %v7413_v33 }
 0x42c   :  { %v7642_v51 = vadd.f32 %v11374_v36, %v7582_v53  ;;  %v7591_v38 = vmul.f32 %v11320_v46, %v7531_v37 }
 0x42d   :  { %v7624_v47 = vadd.f32 %v11338_v13, %v7564_v28  ;;  %v7513_v41 = vsel %vm7441_vm5, %v7413_v33, %v7477_v16 }
 0x42e   :  { %7679 = vst.msk [vmem:[%s11549_s5 + $0xd0] sm:$0xff] %vm7660_vm4, %v7642_v51  ;;  %v7651_v44 = vadd.f32 %v11378_v45, %v7591_v38  ;;  %v7573_v17 = vmul.f32 %v11316_v48, %v7513_v41 }
 0x42f   :  { %7661 = vst.msk [vmem:[%s11549_s5 + $0x40] sm:$0xff] %vm7660_vm4, %v7624_v47 }
 0x430   :  { %7688 = vst.msk [vmem:[%s11549_s5 + $0x118] sm:$0xff] %vm7660_vm4, %v7651_v44  ;;  %v7633_v23 = vadd.f32 %v11332_v57, %v7573_v17 }
 0x432   :  { %7670 = vst.msk [vmem:[%s11549_s5 + $0x88] sm:$0xff] %vm7660_vm4, %v7633_v23 }

</bundles_post_ra>
